<compile_context>
chip_gen: v7x
topology: tpu7x:2x2x1
jax: 0.10.0
libtpu: 0.0.40
codegen_flags: <defaults>
</compile_context>

<pallas_src>
import math

import jax
import jax.numpy as jnp
import numpy as np
from jax import lax
from jax.experimental import pallas as pl
from jax.experimental.pallas import tpu as pltpu

EPS = 1e-5            # nn.InstanceNorm2d default eps
NEG_SLOPE = 0.2       # nn.LeakyReLU(0.2)
INV_SQRT2 = 1.0 / math.sqrt(2.0)


# ---------------------------------------------------------------------------
# In-kernel helpers
# ---------------------------------------------------------------------------
def _lrelu(v):
    return jnp.where(v > 0, v, NEG_SLOPE * v)


def _instance_norm(v, g, b):
    # v: (H*W, C); per-channel biased stats over the spatial axis, affine=True.
    mean = jnp.mean(v, axis=0, keepdims=True)
    cen = v - mean
    var = jnp.mean(cen * cen, axis=0, keepdims=True)
    return cen * lax.rsqrt(var + EPS) * g + b


def _conv3x3_same(pad_ref, col_ref, v_flat, w_ref, b_ref, hh, ww):
    """3x3 SAME conv of a (hh*ww, c) activation as ONE im2col MXU matmul.

    pad_ref: VMEM scratch (hh+2, ww+2, c) -- zero-padded copy of the input.
    col_ref: VMEM scratch (hh*ww, 9*c)    -- im2col matrix.
    w_ref  : (9*c, cout) weights (3x3 HWIO flattened over the taps).
    b_ref  : (1, cout) bias.
    """
    c = v_flat.shape[-1]

    # Re-zero only the 1-pixel border each step (no program_id==0 init, so this
    # stays correct under "parallel" grid sharding across TensorCores).
    zrow = jnp.zeros((1, ww + 2, c), jnp.float32)
    pad_ref[pl.ds(0, 1), :, :] = zrow
    pad_ref[pl.ds(hh + 1, 1), :, :] = zrow
    zcol = jnp.zeros((hh + 2, 1, c), jnp.float32)
    pad_ref[:, pl.ds(0, 1), :] = zcol
    pad_ref[:, pl.ds(ww + 1, 1), :] = zcol

    # Interior <- activation.
    if ww % 8 == 0:
        pad_ref[pl.ds(1, hh), pl.ds(1, ww), :] = v_flat.reshape(hh, ww, c)
    else:
        # Small-resolution path (ww < 8): keep reshapes trivially layout-friendly.
        for h in range(hh):
            row = v_flat[h * ww:(h + 1) * ww, :]
            pad_ref[pl.ds(1 + h, 1), pl.ds(1, ww), :] = row.reshape(1, ww, c)

    # im2col: the 9 shifted windows placed side by side on the lane axis.
    for k in range(9):
        dy, dx = divmod(k, 3)
        if ww % 8 == 0:
            win = pad_ref[pl.ds(dy, hh), pl.ds(dx, ww), :]
            col_ref[:, pl.ds(k * c, c)] = win.reshape(hh * ww, c)
        else:
            for h in range(hh):
                win = pad_ref[pl.ds(dy + h, 1), pl.ds(dx, ww), :]
                col_ref[pl.ds(h * ww, ww), pl.ds(k * c, c)] = win.reshape(ww, c)

    # ONE matmul for the whole conv (K = 9*c) instead of 9 K=c matmuls.
    y = jnp.dot(col_ref[...], w_ref[...], preferred_element_type=jnp.float32)
    return y + b_ref[...]


# ---------------------------------------------------------------------------
# Kernel factories
# ---------------------------------------------------------------------------
def _make_stem_kernel(H, W):
    def kernel(x_ref, w_ref, b_ref, o_ref, pad_ref, col_ref):
        y = _conv3x3_same(pad_ref, col_ref, x_ref[0], w_ref, b_ref, H, W)
        o_ref[0] = y.astype(o_ref.dtype)
    return kernel


def _make_resblock_kernel(H, W, has_resampler):
    H2, W2 = H // 2, W // 2

    def body(x_ref, pool_ref, w1_ref, b1_ref, g1_ref, be1_ref,
             w2_ref, b2_ref, g2_ref, be2_ref, wr_ref, o_ref,
             pad1, col1, pad2, col2):
        xf = x_ref[0]                         # (H*W, cin) spatial-flat, channels on lanes
        pool = pool_ref[...]                  # (H2*W2, H*W) constant 2x2 avg-pool matrix

        # Shortcut: out1 = avg_pool(resampler(x)).  The spatial-only avg-pool and the
        # channel-only bias-free 1x1 conv commute exactly, so pool first (cheaper) and
        # skip the matmul entirely when the resampler is Identity (dim_in == dim_out).
        sc = jnp.dot(pool, xf, preferred_element_type=jnp.float32)
        if wr_ref is not None:
            sc = jnp.dot(sc, wr_ref[...], preferred_element_type=jnp.float32)

        # Main branch: norm1 -> lrelu -> conv1 -> avgpool -> norm2 -> lrelu -> conv2.
        h1 = _lrelu(_instance_norm(xf, g1_ref[...], be1_ref[...]))
        y1 = _conv3x3_same(pad1, col1, h1, w1_ref, b1_ref, H, W)
        y1 = jnp.dot(pool, y1, preferred_element_type=jnp.float32)
        h2 = _lrelu(_instance_norm(y1, g2_ref[...], be2_ref[...]))
        y2 = _conv3x3_same(pad2, col2, h2, w2_ref, b2_ref, H2, W2)

        o_ref[0] = ((sc + y2) * INV_SQRT2).astype(o_ref.dtype)

    if has_resampler:
        def kernel(x_ref, pool_ref, w1, b1, g1, be1, w2, b2, g2, be2, wr,
                   o_ref, pad1, col1, pad2, col2):
            body(x_ref, pool_ref, w1, b1, g1, be1, w2, b2, g2, be2, wr,
                 o_ref, pad1, col1, pad2, col2)
    else:
        def kernel(x_ref, pool_ref, w1, b1, g1, be1, w2, b2, g2, be2,
                   o_ref, pad1, col1, pad2, col2):
            body(x_ref, pool_ref, w1, b1, g1, be1, w2, b2, g2, be2, None,
                 o_ref, pad1, col1, pad2, col2)
    return kernel


def _head_kernel(h_ref, w4_ref, b4_ref, wl_ref, bl_ref, y_ref, o_ref):
    # h_ref: (N, 16*C) lane-dense slab -- whole batch in one invocation.
    h = _lrelu(h_ref[...])
    t = jnp.dot(h, w4_ref[...], preferred_element_type=jnp.float32) + b4_ref[...]
    t = _lrelu(t)
    logits = jnp.dot(t, wl_ref[...], preferred_element_type=jnp.float32) + bl_ref[...]
    # out[n] = logits[n, y[n]]
    idx = lax.broadcasted_iota(jnp.int32, logits.shape, 1)
    sel = jnp.where(idx == y_ref[...], logits, 0.0)
    o_ref[...] = jnp.sum(sel, axis=1, keepdims=True)


# ---------------------------------------------------------------------------
# Stage wrappers (pallas_call plumbing)
# ---------------------------------------------------------------------------
def _make_pool_matrix(H, W):
    # 2x2 average pooling (stride 2) as a constant (H*W/4, H*W) matrix, built as the
    # Kronecker product of the 1-D pooling operators (host-side, trace-time only).
    def pool_1d(n):
        a = np.zeros((n // 2, n), np.float32)
        r = np.arange(n // 2)
        a[r, 2 * r] = 0.5
        a[r, 2 * r + 1] = 0.5
        return a
    return jnp.asarray(np.kron(pool_1d(H), pool_1d(W)))


def _stem_apply(x_flat, w, b, H, W):
    N, HW, cin = x_flat.shape
    cout = w.shape[-1]
    return pl.pallas_call(
        _make_stem_kernel(H, W),
        out_shape=jax.ShapeDtypeStruct((N, HW, cout), jnp.float32),
        grid_spec=pltpu.PrefetchScalarGridSpec(
            num_scalar_prefetch=0,
            grid=(N,),
            in_specs=[
                pl.BlockSpec((1, HW, cin), lambda n: (n, 0, 0)),
                pl.BlockSpec((9 * cin, cout), lambda n: (0, 0)),
                pl.BlockSpec((1, cout), lambda n: (0, 0)),
            ],
            out_specs=pl.BlockSpec((1, HW, cout), lambda n: (n, 0, 0)),
            scratch_shapes=[
                pltpu.VMEM((H + 2, W + 2, cin), jnp.float32),
                pltpu.VMEM((HW, 9 * cin), jnp.float32),
            ]),
        compiler_params=pltpu.CompilerParams(
            dimension_semantics=("parallel",)),
    )(x_flat, w.reshape(9 * cin, cout), b.reshape(1, cout))


def _resblock_apply(x_flat, blk, H, W):
    N, HW, cin = x_flat.shape
    cout = blk['w2'].shape[-1]
    H2, W2 = H // 2, W // 2
    HW2 = H2 * W2
    has_res = blk['wr'] is not None

    inputs = [
        x_flat,
        _make_pool_matrix(H, W),
        blk['w1'].reshape(9 * cin, cin),
        blk['b1'].reshape(1, cin),
        blk['g1'].reshape(1, cin),
        blk['be1'].reshape(1, cin),
        blk['w2'].reshape(9 * cin, cout),
        blk['b2'].reshape(1, cout),
        blk['g2'].reshape(1, cin),
        blk['be2'].reshape(1, cin),
    ]
    in_specs = [
        pl.BlockSpec((1, HW, cin), lambda n: (n, 0, 0)),
        pl.BlockSpec((HW2, HW), lambda n: (0, 0)),
        pl.BlockSpec((9 * cin, cin), lambda n: (0, 0)),
        pl.BlockSpec((1, cin), lambda n: (0, 0)),
        pl.BlockSpec((1, cin), lambda n: (0, 0)),
        pl.BlockSpec((1, cin), lambda n: (0, 0)),
        pl.BlockSpec((9 * cin, cout), lambda n: (0, 0)),
        pl.BlockSpec((1, cout), lambda n: (0, 0)),
        pl.BlockSpec((1, cin), lambda n: (0, 0)),
        pl.BlockSpec((1, cin), lambda n: (0, 0)),
    ]
    if has_res:
        inputs.append(blk['wr'])
        in_specs.append(pl.BlockSpec((cin, cout), lambda n: (0, 0)))

    return pl.pallas_call(
        _make_resblock_kernel(H, W, has_res),
        out_shape=jax.ShapeDtypeStruct((N, HW2, cout), jnp.float32),
        grid_spec=pltpu.PrefetchScalarGridSpec(
            num_scalar_prefetch=0,
            grid=(N,),
            in_specs=in_specs,
            out_specs=pl.BlockSpec((1, HW2, cout), lambda n: (n, 0, 0)),
            scratch_shapes=[
                pltpu.VMEM((H + 2, W + 2, cin), jnp.float32),     # conv1 padded input
                pltpu.VMEM((HW, 9 * cin), jnp.float32),           # conv1 im2col
                pltpu.VMEM((H2 + 2, W2 + 2, cin), jnp.float32),   # conv2 padded input
                pltpu.VMEM((HW2, 9 * cin), jnp.float32),          # conv2 im2col
            ]),
        compiler_params=pltpu.CompilerParams(
            dimension_semantics=("parallel",)),
    )(*inputs)


def _head_apply(h_flat, head, y):
    N = h_flat.shape[0]
    C = head['w4'].shape[-1]
    D = head['wl'].shape[-1]
    out = pl.pallas_call(
        _head_kernel,
        out_shape=jax.ShapeDtypeStruct((N, 1), jnp.float32),
    )(h_flat,
      head['w4'].reshape(-1, C),
      head['b4'].reshape(1, C),
      head['wl'],
      head['bl'].reshape(1, D),
      y.astype(jnp.int32).reshape(N, 1))
    return out[:, 0]


def discriminator_forward(x_nchw, y, params):
    """x: (N, 3, H, W) float32 NCHW; y: (N,) int domain labels -> (N,) float32."""
    N, cin0, H, W = x_nchw.shape
    x = jnp.transpose(x_nchw, (0, 2, 3, 1)).reshape(N, H * W, cin0)   # NHWC, spatial-flat
    h = _stem_apply(x, params['stem']['w'], params['stem']['b'], H, W)
    curH, curW = H, W
    for blk in params['blocks']:
        h = _resblock_apply(h, blk, curH, curW)
        curH //= 2
        curW //= 2
    # After log2(img)-2 downsamples the feature map is 4x4; the 4x4 VALID conv and the
    # 1x1 conv reduce to two matmuls on a lane-dense (N, 16*C) slab.
    assert curH == 4 and curW == 4
    C = h.shape[-1]
    hf = h.reshape(N, curH * curW * C)
    return _head_apply(hf, params['head'], y)


# ---------------------------------------------------------------------------
# Parameters (HWIO conv weights + per-channel vectors), matching the PyTorch graph
# ---------------------------------------------------------------------------
def init_discriminator_params(key, img_size, num_domains, max_conv_dim, base_dim=None):
    # PyTorch uses dim_in = 2**14 // img_size; `base_dim` lets the self-test override
    # that starting width while keeping the exact architecture / layer graph.
    dim_in = (2 ** 14) // img_size if base_dim is None else base_dim
    repeat_num = int(math.log2(img_size)) - 2
    assert repeat_num > 0

    keys = iter(jax.random.split(key, 9 * repeat_num + 8))

    def w_init(shape, fan_in):
        return jax.random.normal(next(keys), shape, jnp.float32) / math.sqrt(fan_in)

    def v_init(shape, scale=0.1):
        return scale * jax.random.normal(next(keys), shape, jnp.float32)

    params = {'stem': {'w': w_init((3, 3, 3, dim_in), 9 * 3),
                       'b': v_init((dim_in,))}}

    blocks = []
    d = dim_in
    for _ in range(repeat_num):
        d_out = min(d * 2, max_conv_dim)
        blk = {
            'w1': w_init((3, 3, d, d), 9 * d),
            'b1': v_init((d,)),
            'g1': 1.0 + v_init((d,)),
            'be1': v_init((d,)),
            'w2': w_init((3, 3, d, d_out), 9 * d),
            'b2': v_init((d_out,)),
            'g2': 1.0 + v_init((d,)),
            'be2': v_init((d,)),
            'wr': w_init((d, d_out), d) if d != d_out else None,
        }
        blocks.append(blk)
        d = d_out
    params['blocks'] = blocks

    params['head'] = {
        'w4': w_init((4, 4, d, d), 16 * d),
        'b4': v_init((d,)),
        'wl': w_init((d, num_domains), d),
        'bl': v_init((num_domains,)),
    }
    return params


# ---------------------------------------------------------------------------
# Pure-JAX reference (same math as the PyTorch module) for a correctness check
# ---------------------------------------------------------------------------
def _reference_forward(x_nchw, y, params):
    x = jnp.transpose(x_nchw, (0, 2, 3, 1))

    def conv(v, w, b=None, padding='SAME'):
        o = lax.conv_general_dilated(
            v, w, window_strides=(1, 1), padding=padding,
            dimension_numbers=('NHWC', 'HWIO', 'NHWC'))
        if b is not None:
            o = o + b.reshape(1, 1, 1, -1)
        return o

    def inorm(v, g, b):
        m = jnp.mean(v, axis=(1, 2), keepdims=True)
        c = v - m
        var = jnp.mean(c * c, axis=(1, 2), keepdims=True)
        return c * lax.rsqrt(var + EPS) * g.reshape(1, 1, 1, -1) + b.reshape(1, 1, 1, -1)

    def lrelu(v):
        return jnp.where(v > 0, v, NEG_SLOPE * v)

    def pool2(v):
        n, h, w, c = v.shape
        return v.reshape(n, h // 2, 2, w // 2, 2, c).mean(axis=(2, 4))

    h = conv(x, params['stem']['w'], params['stem']['b'])
    for blk in params['blocks']:
        sc = h if blk['wr'] is None else jnp.einsum('nhwc,cd->nhwd', h, blk['wr'])
        sc = pool2(sc)
        t = conv(lrelu(inorm(h, blk['g1'], blk['be1'])), blk['w1'], blk['b1'])
        t = pool2(t)
        t = conv(lrelu(inorm(t, blk['g2'], blk['be2'])), blk['w2'], blk['b2'])
        h = (sc + t) * INV_SQRT2
    h = lrelu(h)
    h = conv(h, params['head']['w4'], params['head']['b4'], padding='VALID')
    h = lrelu(h)
    logits = jnp.einsum('nhwc,cd->nhwd', h, params['head']['wl']) \
        + params['head']['bl'].reshape(1, 1, 1, -1)
    logits = logits.reshape(logits.shape[0], -1)
    return logits[jnp.arange(logits.shape[0]), y]


if __name__ == "__main__":
    # Small, architecture-faithful config: img_size=16 -> 2 ResBlocks (16->8->4 spatial),
    # then the 4x4 VALID conv + 1x1 conv head and the per-sample domain gather.
    # base_dim=8 overrides the PyTorch default width (2**14 // 16 = 1024) so the
    # self-test stays small; max_conv_dim=16 also exercises the identity-shortcut block.
    IMG_SIZE = 16
    BATCH = 2
    NUM_DOMAINS = 2
    MAX_CONV_DIM = 16
    BASE_DIM = 8

    key = jax.random.PRNGKey(0)
    kp, kx, ky = jax.random.split(key, 3)
    params = init_discriminator_params(kp, IMG_SIZE, NUM_DOMAINS, MAX_CONV_DIM,
                                       base_dim=BASE_DIM)
    x = jax.random.normal(kx, (BATCH, 3, IMG_SIZE, IMG_SIZE), jnp.float32)
    y = jax.random.randint(ky, (BATCH,), 0, NUM_DOMAINS)

    fwd = jax.jit(discriminator_forward)
    out = jax.block_until_ready(fwd(x, y, params))

    ref = jax.block_until_ready(_reference_forward(x, y, params))
    assert out.shape == (BATCH,)
    assert jnp.allclose(out, ref, atol=1e-2, rtol=1e-2), (out, ref)
    print("KERNEL_OK")
</pallas_src>

<mosaic_0001>
module attributes {stable_mosaic.version = 11 : i64} {
  func.func @kernel(%arg0: i32, %arg1: memref<1x256x3xf32, #tpu.memory_space<vmem>>, %arg2: memref<27x8xf32, #tpu.memory_space<vmem>>, %arg3: memref<1x8xf32, #tpu.memory_space<vmem>>, %arg4: memref<1x256x8xf32, #tpu.memory_space<vmem>>, %arg5: memref<18x18x3xf32, #tpu.memory_space<vmem>>, %arg6: memref<256x27xf32, #tpu.memory_space<vmem>>) attributes {dimension_semantics = [#tpu.dimension_semantics<parallel>], iteration_bounds = array<i64: 2>, scalar_prefetch = 0 : i64, scratch_operands = 2 : i64, tpu.core_type = #tpu.core_type<tc>, window_params = [{transform_indices = @transform_0, window_bounds = array<i64: 1, 256, 3>}, {pipeline_mode = #tpu.pipeline_mode<synchronous>, transform_indices = @transform_1, window_bounds = array<i64: 27, 8>}, {pipeline_mode = #tpu.pipeline_mode<synchronous>, transform_indices = @transform_2, window_bounds = array<i64: 1, 8>}, {transform_indices = @transform_3, window_bounds = array<i64: 1, 256, 8>}]} {
    %c0 = arith.constant 0 : index
    %c0_0 = arith.constant 0 : index
    %c0_1 = arith.constant 0 : index
    %0 = vector.load %arg1[%c0, %c0_0, %c0_1] : memref<1x256x3xf32, #tpu.memory_space<vmem>>, vector<1x256x3xf32>
    %1 = vector.shape_cast %0 : vector<1x256x3xf32> to vector<256x3xf32>
    %cst = arith.constant 0.000000e+00 : f32
    %2 = vector.broadcast %cst : f32 to vector<1x18x3xf32>
    %c0_2 = arith.constant 0 : index
    %c0_3 = arith.constant 0 : index
    %c0_4 = arith.constant 0 : index
    %3 = vector.load %arg5[%c0_2, %c0_3, %c0_4] : memref<18x18x3xf32, #tpu.memory_space<vmem>>, vector<1x18x3xf32>
    tpu.vector_store %arg5[%c0_2, %c0_3, %c0_4], %2 {strides = array<i32>} : memref<18x18x3xf32, #tpu.memory_space<vmem>>, vector<1x18x3xf32>,
    %c17 = arith.constant 17 : index
    %c0_5 = arith.constant 0 : index
    %c0_6 = arith.constant 0 : index
    %4 = vector.load %arg5[%c17, %c0_5, %c0_6] : memref<18x18x3xf32, #tpu.memory_space<vmem>>, vector<1x18x3xf32>
    tpu.vector_store %arg5[%c17, %c0_5, %c0_6], %2 {strides = array<i32>} : memref<18x18x3xf32, #tpu.memory_space<vmem>>, vector<1x18x3xf32>,
    %cst_7 = arith.constant 0.000000e+00 : f32
    %5 = vector.broadcast %cst_7 : f32 to vector<18x1x3xf32>
    %c0_8 = arith.constant 0 : index
    %c0_9 = arith.constant 0 : index
    %c0_10 = arith.constant 0 : index
    %6 = vector.load %arg5[%c0_8, %c0_9, %c0_10] : memref<18x18x3xf32, #tpu.memory_space<vmem>>, vector<18x1x3xf32>
    tpu.vector_store %arg5[%c0_8, %c0_9, %c0_10], %5 {strides = array<i32>} : memref<18x18x3xf32, #tpu.memory_space<vmem>>, vector<18x1x3xf32>,
    %c0_11 = arith.constant 0 : index
    %c17_12 = arith.constant 17 : index
    %c0_13 = arith.constant 0 : index
    %7 = vector.load %arg5[%c0_11, %c17_12, %c0_13] : memref<18x18x3xf32, #tpu.memory_space<vmem>>, vector<18x1x3xf32>
    tpu.vector_store %arg5[%c0_11, %c17_12, %c0_13], %5 {strides = array<i32>} : memref<18x18x3xf32, #tpu.memory_space<vmem>>, vector<18x1x3xf32>,
    %8 = vector.shape_cast %1 : vector<256x3xf32> to vector<16x16x3xf32>
    %c1 = arith.constant 1 : index
    %c1_14 = arith.constant 1 : index
    %c0_15 = arith.constant 0 : index
    %9 = vector.load %arg5[%c1, %c1_14, %c0_15] : memref<18x18x3xf32, #tpu.memory_space<vmem>>, vector<16x16x3xf32>
    tpu.vector_store %arg5[%c1, %c1_14, %c0_15], %8 {strides = array<i32>} : memref<18x18x3xf32, #tpu.memory_space<vmem>>, vector<16x16x3xf32>,
    %c0_16 = arith.constant 0 : index
    %c0_17 = arith.constant 0 : index
    %c0_18 = arith.constant 0 : index
    %10 = vector.load %arg5[%c0_16, %c0_17, %c0_18] : memref<18x18x3xf32, #tpu.memory_space<vmem>>, vector<16x16x3xf32>
    %11 = vector.shape_cast %10 : vector<16x16x3xf32> to vector<256x3xf32>
    %c0_19 = arith.constant 0 : index
    %c0_20 = arith.constant 0 : index
    %12 = vector.load %arg6[%c0_19, %c0_20] : memref<256x27xf32, #tpu.memory_space<vmem>>, vector<256x3xf32>
    tpu.vector_store %arg6[%c0_19, %c0_20], %11 {strides = array<i32>} : memref<256x27xf32, #tpu.memory_space<vmem>>, vector<256x3xf32>,
    %c0_21 = arith.constant 0 : index
    %c1_22 = arith.constant 1 : index
    %c0_23 = arith.constant 0 : index
    %13 = vector.load %arg5[%c0_21, %c1_22, %c0_23] : memref<18x18x3xf32, #tpu.memory_space<vmem>>, vector<16x16x3xf32>
    %14 = vector.shape_cast %13 : vector<16x16x3xf32> to vector<256x3xf32>
    %c0_24 = arith.constant 0 : index
    %c3 = arith.constant 3 : index
    %15 = vector.load %arg6[%c0_24, %c3] : memref<256x27xf32, #tpu.memory_space<vmem>>, vector<256x3xf32>
    tpu.vector_store %arg6[%c0_24, %c3], %14 {strides = array<i32>} : memref<256x27xf32, #tpu.memory_space<vmem>>, vector<256x3xf32>,
    %c0_25 = arith.constant 0 : index
    %c2 = arith.constant 2 : index
    %c0_26 = arith.constant 0 : index
    %16 = vector.load %arg5[%c0_25, %c2, %c0_26] : memref<18x18x3xf32, #tpu.memory_space<vmem>>, vector<16x16x3xf32>
    %17 = vector.shape_cast %16 : vector<16x16x3xf32> to vector<256x3xf32>
    %c0_27 = arith.constant 0 : index
    %c6 = arith.constant 6 : index
    %18 = vector.load %arg6[%c0_27, %c6] : memref<256x27xf32, #tpu.memory_space<vmem>>, vector<256x3xf32>
    tpu.vector_store %arg6[%c0_27, %c6], %17 {strides = array<i32>} : memref<256x27xf32, #tpu.memory_space<vmem>>, vector<256x3xf32>,
    %c1_28 = arith.constant 1 : index
    %c0_29 = arith.constant 0 : index
    %c0_30 = arith.constant 0 : index
    %19 = vector.load %arg5[%c1_28, %c0_29, %c0_30] : memref<18x18x3xf32, #tpu.memory_space<vmem>>, vector<16x16x3xf32>
    %20 = vector.shape_cast %19 : vector<16x16x3xf32> to vector<256x3xf32>
    %c0_31 = arith.constant 0 : index
    %c9 = arith.constant 9 : index
    %21 = vector.load %arg6[%c0_31, %c9] : memref<256x27xf32, #tpu.memory_space<vmem>>, vector<256x3xf32>
    tpu.vector_store %arg6[%c0_31, %c9], %20 {strides = array<i32>} : memref<256x27xf32, #tpu.memory_space<vmem>>, vector<256x3xf32>,
    %c1_32 = arith.constant 1 : index
    %c1_33 = arith.constant 1 : index
    %c0_34 = arith.constant 0 : index
    %22 = vector.load %arg5[%c1_32, %c1_33, %c0_34] : memref<18x18x3xf32, #tpu.memory_space<vmem>>, vector<16x16x3xf32>
    %23 = vector.shape_cast %22 : vector<16x16x3xf32> to vector<256x3xf32>
    %c0_35 = arith.constant 0 : index
    %c12 = arith.constant 12 : index
    %24 = vector.load %arg6[%c0_35, %c12] : memref<256x27xf32, #tpu.memory_space<vmem>>, vector<256x3xf32>
    tpu.vector_store %arg6[%c0_35, %c12], %23 {strides = array<i32>} : memref<256x27xf32, #tpu.memory_space<vmem>>, vector<256x3xf32>,
    %c1_36 = arith.constant 1 : index
    %c2_37 = arith.constant 2 : index
    %c0_38 = arith.constant 0 : index
    %25 = vector.load %arg5[%c1_36, %c2_37, %c0_38] : memref<18x18x3xf32, #tpu.memory_space<vmem>>, vector<16x16x3xf32>
    %26 = vector.shape_cast %25 : vector<16x16x3xf32> to vector<256x3xf32>
    %c0_39 = arith.constant 0 : index
    %c15 = arith.constant 15 : index
    %27 = vector.load %arg6[%c0_39, %c15] : memref<256x27xf32, #tpu.memory_space<vmem>>, vector<256x3xf32>
    tpu.vector_store %arg6[%c0_39, %c15], %26 {strides = array<i32>} : memref<256x27xf32, #tpu.memory_space<vmem>>, vector<256x3xf32>,
    %c2_40 = arith.constant 2 : index
    %c0_41 = arith.constant 0 : index
    %c0_42 = arith.constant 0 : index
    %28 = vector.load %arg5[%c2_40, %c0_41, %c0_42] : memref<18x18x3xf32, #tpu.memory_space<vmem>>, vector<16x16x3xf32>
    %29 = vector.shape_cast %28 : vector<16x16x3xf32> to vector<256x3xf32>
    %c0_43 = arith.constant 0 : index
    %c18 = arith.constant 18 : index
    %30 = vector.load %arg6[%c0_43, %c18] : memref<256x27xf32, #tpu.memory_space<vmem>>, vector<256x3xf32>
    tpu.vector_store %arg6[%c0_43, %c18], %29 {strides = array<i32>} : memref<256x27xf32, #tpu.memory_space<vmem>>, vector<256x3xf32>,
    %c2_44 = arith.constant 2 : index
    %c1_45 = arith.constant 1 : index
    %c0_46 = arith.constant 0 : index
    %31 = vector.load %arg5[%c2_44, %c1_45, %c0_46] : memref<18x18x3xf32, #tpu.memory_space<vmem>>, vector<16x16x3xf32>
    %32 = vector.shape_cast %31 : vector<16x16x3xf32> to vector<256x3xf32>
    %c0_47 = arith.constant 0 : index
    %c21 = arith.constant 21 : index
    %33 = vector.load %arg6[%c0_47, %c21] : memref<256x27xf32, #tpu.memory_space<vmem>>, vector<256x3xf32>
    tpu.vector_store %arg6[%c0_47, %c21], %32 {strides = array<i32>} : memref<256x27xf32, #tpu.memory_space<vmem>>, vector<256x3xf32>,
    %c2_48 = arith.constant 2 : index
    %c2_49 = arith.constant 2 : index
    %c0_50 = arith.constant 0 : index
    %34 = vector.load %arg5[%c2_48, %c2_49, %c0_50] : memref<18x18x3xf32, #tpu.memory_space<vmem>>, vector<16x16x3xf32>
    %35 = vector.shape_cast %34 : vector<16x16x3xf32> to vector<256x3xf32>
    %c0_51 = arith.constant 0 : index
    %c24 = arith.constant 24 : index
    %36 = vector.load %arg6[%c0_51, %c24] : memref<256x27xf32, #tpu.memory_space<vmem>>, vector<256x3xf32>
    tpu.vector_store %arg6[%c0_51, %c24], %35 {strides = array<i32>} : memref<256x27xf32, #tpu.memory_space<vmem>>, vector<256x3xf32>,
    %c0_52 = arith.constant 0 : index
    %c0_53 = arith.constant 0 : index
    %37 = vector.load %arg6[%c0_52, %c0_53] : memref<256x27xf32, #tpu.memory_space<vmem>>, vector<256x27xf32>
    %c0_54 = arith.constant 0 : index
    %c0_55 = arith.constant 0 : index
    %38 = vector.load %arg2[%c0_54, %c0_55] : memref<27x8xf32, #tpu.memory_space<vmem>>, vector<27x8xf32>
    %cst_56 = arith.constant dense<0.000000e+00> : vector<256x8xf32>
    %39 = tpu.matmul %37, %38, %cst_56 {dimension_numbers = #tpu.dot_dimension_numbers<[1], [0], [0], [1], [0, 0, 1, 1], [], []>} : vector<256x27xf32>, vector<27x8xf32>, vector<256x8xf32> -> vector<256x8xf32>
    %c0_57 = arith.constant 0 : index
    %c0_58 = arith.constant 0 : index
    %40 = vector.load %arg3[%c0_57, %c0_58] : memref<1x8xf32, #tpu.memory_space<vmem>>, vector<1x8xf32>
    %41 = vector.broadcast %40 : vector<1x8xf32> to vector<256x8xf32>
    %42 = arith.addf %39, %41 : vector<256x8xf32>
    %c0_59 = arith.constant 0 : index
    %c0_60 = arith.constant 0 : index
    %c0_61 = arith.constant 0 : index
    %43 = vector.load %arg4[%c0_59, %c0_60, %c0_61] : memref<1x256x8xf32, #tpu.memory_space<vmem>>, vector<1x256x8xf32>
    %44 = vector.shape_cast %43 : vector<1x256x8xf32> to vector<256x8xf32>
    %45 = vector.shape_cast %42 : vector<256x8xf32> to vector<1x256x8xf32>
    tpu.vector_store %arg4[%c0_59, %c0_60, %c0_61], %45 {strides = array<i32>} : memref<1x256x8xf32, #tpu.memory_space<vmem>>, vector<1x256x8xf32>,
    return
  }
  func.func @transform_0(%arg0: i32) -> (i32, i32, i32) {
    %c0_i32 = arith.constant 0 : i32
    %c0_i32_0 = arith.constant 0 : i32
    %c0_i32_1 = arith.constant 0 : i32
    return %arg0, %c0_i32, %c0_i32_0 : i32, i32, i32
  }
  func.func @transform_1(%arg0: i32) -> (i32, i32) {
    %c0_i32 = arith.constant 0 : i32
    %c0_i32_0 = arith.constant 0 : i32
    %c0_i32_1 = arith.constant 0 : i32
    return %c0_i32, %c0_i32_0 : i32, i32
  }
  func.func @transform_2(%arg0: i32) -> (i32, i32) {
    %c0_i32 = arith.constant 0 : i32
    %c0_i32_0 = arith.constant 0 : i32
    %c0_i32_1 = arith.constant 0 : i32
    return %c0_i32, %c0_i32_0 : i32, i32
  }
  func.func @transform_3(%arg0: i32) -> (i32, i32, i32) {
    %c0_i32 = arith.constant 0 : i32
    %c0_i32_0 = arith.constant 0 : i32
    %c0_i32_1 = arith.constant 0 : i32
    return %arg0, %c0_i32, %c0_i32_0 : i32, i32, i32
  }
}

module attributes {stable_mosaic.version = 11 : i64} {
  func.func @kernel(%arg0: i32, %arg1: memref<1x256x8xf32, #tpu.memory_space<vmem>>, %arg2: memref<64x256xf32, #tpu.memory_space<vmem>>, %arg3: memref<72x8xf32, #tpu.memory_space<vmem>>, %arg4: memref<1x8xf32, #tpu.memory_space<vmem>>, %arg5: memref<1x8xf32, #tpu.memory_space<vmem>>, %arg6: memref<1x8xf32, #tpu.memory_space<vmem>>, %arg7: memref<72x16xf32, #tpu.memory_space<vmem>>, %arg8: memref<1x16xf32, #tpu.memory_space<vmem>>, %arg9: memref<1x8xf32, #tpu.memory_space<vmem>>, %arg10: memref<1x8xf32, #tpu.memory_space<vmem>>, %arg11: memref<8x16xf32, #tpu.memory_space<vmem>>, %arg12: memref<1x64x16xf32, #tpu.memory_space<vmem>>, %arg13: memref<18x18x8xf32, #tpu.memory_space<vmem>>, %arg14: memref<256x72xf32, #tpu.memory_space<vmem>>, %arg15: memref<10x10x8xf32, #tpu.memory_space<vmem>>, %arg16: memref<64x72xf32, #tpu.memory_space<vmem>>) attributes {dimension_semantics = [#tpu.dimension_semantics<parallel>], iteration_bounds = array<i64: 2>, scalar_prefetch = 0 : i64, scratch_operands = 4 : i64, tpu.core_type = #tpu.core_type<tc>, window_params = [{transform_indices = @transform_0, window_bounds = array<i64: 1, 256, 8>}, {pipeline_mode = #tpu.pipeline_mode<synchronous>, transform_indices = @transform_1, window_bounds = array<i64: 64, 256>}, {pipeline_mode = #tpu.pipeline_mode<synchronous>, transform_indices = @transform_2, window_bounds = array<i64: 72, 8>}, {pipeline_mode = #tpu.pipeline_mode<synchronous>, transform_indices = @transform_3, window_bounds = array<i64: 1, 8>}, {pipeline_mode = #tpu.pipeline_mode<synchronous>, transform_indices = @transform_4, window_bounds = array<i64: 1, 8>}, {pipeline_mode = #tpu.pipeline_mode<synchronous>, transform_indices = @transform_5, window_bounds = array<i64: 1, 8>}, {pipeline_mode = #tpu.pipeline_mode<synchronous>, transform_indices = @transform_6, window_bounds = array<i64: 72, 16>}, {pipeline_mode = #tpu.pipeline_mode<synchronous>, transform_indices = @transform_7, window_bounds = array<i64: 1, 16>}, {pipeline_mode = #tpu.pipeline_mode<synchronous>, transform_indices = @transform_8, window_bounds = array<i64: 1, 8>}, {pipeline_mode = #tpu.pipeline_mode<synchronous>, transform_indices = @transform_9, window_bounds = array<i64: 1, 8>}, {pipeline_mode = #tpu.pipeline_mode<synchronous>, transform_indices = @transform_10, window_bounds = array<i64: 8, 16>}, {transform_indices = @transform_11, window_bounds = array<i64: 1, 64, 16>}]} {
    %c0 = arith.constant 0 : index
    %c0_0 = arith.constant 0 : index
    %c0_1 = arith.constant 0 : index
    %0 = vector.load %arg1[%c0, %c0_0, %c0_1] : memref<1x256x8xf32, #tpu.memory_space<vmem>>, vector<1x256x8xf32>
    %1 = vector.shape_cast %0 : vector<1x256x8xf32> to vector<256x8xf32>
    %c0_2 = arith.constant 0 : index
    %c0_3 = arith.constant 0 : index
    %2 = vector.load %arg2[%c0_2, %c0_3] : memref<64x256xf32, #tpu.memory_space<vmem>>, vector<64x256xf32>
    %cst = arith.constant dense<0.000000e+00> : vector<64x8xf32>
    %3 = tpu.matmul %2, %1, %cst {dimension_numbers = #tpu.dot_dimension_numbers<[1], [0], [0], [1], [0, 0, 1, 1], [], []>} : vector<64x256xf32>, vector<256x8xf32>, vector<64x8xf32> -> vector<64x8xf32>
    %c0_4 = arith.constant 0 : index
    %c0_5 = arith.constant 0 : index
    %4 = vector.load %arg11[%c0_4, %c0_5] : memref<8x16xf32, #tpu.memory_space<vmem>>, vector<8x16xf32>
    %cst_6 = arith.constant dense<0.000000e+00> : vector<64x16xf32>
    %5 = tpu.matmul %3, %4, %cst_6 {dimension_numbers = #tpu.dot_dimension_numbers<[1], [0], [0], [1], [0, 0, 1, 1], [], []>} : vector<64x8xf32>, vector<8x16xf32>, vector<64x16xf32> -> vector<64x16xf32>
    %c0_7 = arith.constant 0 : index
    %c0_8 = arith.constant 0 : index
    %6 = vector.load %arg5[%c0_7, %c0_8] : memref<1x8xf32, #tpu.memory_space<vmem>>, vector<1x8xf32>
    %c0_9 = arith.constant 0 : index
    %c0_10 = arith.constant 0 : index
    %7 = vector.load %arg6[%c0_9, %c0_10] : memref<1x8xf32, #tpu.memory_space<vmem>>, vector<1x8xf32>
    %cst_11 = arith.constant dense<0.000000e+00> : vector<8xf32>
    %8 = vector.multi_reduction <add>, %1, %cst_11 [0] : vector<256x8xf32> to vector<8xf32>
    %9 = vector.shape_cast %8 : vector<8xf32> to vector<1x8xf32>
    %cst_12 = arith.constant 2.560000e+02 : f32
    %10 = vector.broadcast %cst_12 : f32 to vector<1x8xf32>
    %11 = arith.divf %9, %10 : vector<1x8xf32>
    %12 = vector.broadcast %11 : vector<1x8xf32> to vector<256x8xf32>
    %13 = arith.subf %1, %12 : vector<256x8xf32>
    %14 = arith.mulf %13, %13 : vector<256x8xf32>
    %cst_13 = arith.constant dense<0.000000e+00> : vector<8xf32>
    %15 = vector.multi_reduction <add>, %14, %cst_13 [0] : vector<256x8xf32> to vector<8xf32>
    %16 = vector.shape_cast %15 : vector<8xf32> to vector<1x8xf32>
    %cst_14 = arith.constant 2.560000e+02 : f32
    %17 = vector.broadcast %cst_14 : f32 to vector<1x8xf32>
    %18 = arith.divf %16, %17 : vector<1x8xf32>
    %cst_15 = arith.constant 9.99999974E-6 : f32
    %19 = vector.broadcast %cst_15 : f32 to vector<1x8xf32>
    %20 = arith.addf %18, %19 : vector<1x8xf32>
    %21 = math.rsqrt %20 : vector<1x8xf32>
    %22 = vector.broadcast %21 : vector<1x8xf32> to vector<256x8xf32>
    %23 = arith.mulf %13, %22 : vector<256x8xf32>
    %24 = vector.broadcast %6 : vector<1x8xf32> to vector<256x8xf32>
    %25 = arith.mulf %23, %24 : vector<256x8xf32>
    %26 = vector.broadcast %7 : vector<1x8xf32> to vector<256x8xf32>
    %27 = arith.addf %25, %26 : vector<256x8xf32>
    %cst_16 = arith.constant 0.000000e+00 : f32
    %28 = vector.broadcast %cst_16 : f32 to vector<256x8xf32>
    %29 = arith.cmpf ogt, %27, %28 : vector<256x8xf32>
    %cst_17 = arith.constant 2.000000e-01 : f32
    %30 = vector.broadcast %cst_17 : f32 to vector<256x8xf32>
    %31 = arith.mulf %30, %27 : vector<256x8xf32>
    %32 = arith.select %29, %27, %31 : vector<256x8xi1>, vector<256x8xf32>
    %cst_18 = arith.constant 0.000000e+00 : f32
    %33 = vector.broadcast %cst_18 : f32 to vector<1x18x8xf32>
    %c0_19 = arith.constant 0 : index
    %c0_20 = arith.constant 0 : index
    %c0_21 = arith.constant 0 : index
    %34 = vector.load %arg13[%c0_19, %c0_20, %c0_21] : memref<18x18x8xf32, #tpu.memory_space<vmem>>, vector<1x18x8xf32>
    tpu.vector_store %arg13[%c0_19, %c0_20, %c0_21], %33 {strides = array<i32>} : memref<18x18x8xf32, #tpu.memory_space<vmem>>, vector<1x18x8xf32>,
    %c17 = arith.constant 17 : index
    %c0_22 = arith.constant 0 : index
    %c0_23 = arith.constant 0 : index
    %35 = vector.load %arg13[%c17, %c0_22, %c0_23] : memref<18x18x8xf32, #tpu.memory_space<vmem>>, vector<1x18x8xf32>
    tpu.vector_store %arg13[%c17, %c0_22, %c0_23], %33 {strides = array<i32>} : memref<18x18x8xf32, #tpu.memory_space<vmem>>, vector<1x18x8xf32>,
    %cst_24 = arith.constant 0.000000e+00 : f32
    %36 = vector.broadcast %cst_24 : f32 to vector<18x1x8xf32>
    %c0_25 = arith.constant 0 : index
    %c0_26 = arith.constant 0 : index
    %c0_27 = arith.constant 0 : index
    %37 = vector.load %arg13[%c0_25, %c0_26, %c0_27] : memref<18x18x8xf32, #tpu.memory_space<vmem>>, vector<18x1x8xf32>
    tpu.vector_store %arg13[%c0_25, %c0_26, %c0_27], %36 {strides = array<i32>} : memref<18x18x8xf32, #tpu.memory_space<vmem>>, vector<18x1x8xf32>,
    %c0_28 = arith.constant 0 : index
    %c17_29 = arith.constant 17 : index
    %c0_30 = arith.constant 0 : index
    %38 = vector.load %arg13[%c0_28, %c17_29, %c0_30] : memref<18x18x8xf32, #tpu.memory_space<vmem>>, vector<18x1x8xf32>
    tpu.vector_store %arg13[%c0_28, %c17_29, %c0_30], %36 {strides = array<i32>} : memref<18x18x8xf32, #tpu.memory_space<vmem>>, vector<18x1x8xf32>,
    %39 = vector.shape_cast %32 : vector<256x8xf32> to vector<16x16x8xf32>
    %c1 = arith.constant 1 : index
    %c1_31 = arith.constant 1 : index
    %c0_32 = arith.constant 0 : index
    %40 = vector.load %arg13[%c1, %c1_31, %c0_32] : memref<18x18x8xf32, #tpu.memory_space<vmem>>, vector<16x16x8xf32>
    tpu.vector_store %arg13[%c1, %c1_31, %c0_32], %39 {strides = array<i32>} : memref<18x18x8xf32, #tpu.memory_space<vmem>>, vector<16x16x8xf32>,
    %c0_33 = arith.constant 0 : index
    %c0_34 = arith.constant 0 : index
    %c0_35 = arith.constant 0 : index
    %41 = vector.load %arg13[%c0_33, %c0_34, %c0_35] : memref<18x18x8xf32, #tpu.memory_space<vmem>>, vector<16x16x8xf32>
    %42 = vector.shape_cast %41 : vector<16x16x8xf32> to vector<256x8xf32>
    %c0_36 = arith.constant 0 : index
    %c0_37 = arith.constant 0 : index
    %43 = vector.load %arg14[%c0_36, %c0_37] : memref<256x72xf32, #tpu.memory_space<vmem>>, vector<256x8xf32>
    tpu.vector_store %arg14[%c0_36, %c0_37], %42 {strides = array<i32>} : memref<256x72xf32, #tpu.memory_space<vmem>>, vector<256x8xf32>,
    %c0_38 = arith.constant 0 : index
    %c1_39 = arith.constant 1 : index
    %c0_40 = arith.constant 0 : index
    %44 = vector.load %arg13[%c0_38, %c1_39, %c0_40] : memref<18x18x8xf32, #tpu.memory_space<vmem>>, vector<16x16x8xf32>
    %45 = vector.shape_cast %44 : vector<16x16x8xf32> to vector<256x8xf32>
    %c0_41 = arith.constant 0 : index
    %c8 = arith.constant 8 : index
    %46 = vector.load %arg14[%c0_41, %c8] : memref<256x72xf32, #tpu.memory_space<vmem>>, vector<256x8xf32>
    tpu.vector_store %arg14[%c0_41, %c8], %45 {strides = array<i32>} : memref<256x72xf32, #tpu.memory_space<vmem>>, vector<256x8xf32>,
    %c0_42 = arith.constant 0 : index
    %c2 = arith.constant 2 : index
    %c0_43 = arith.constant 0 : index
    %47 = vector.load %arg13[%c0_42, %c2, %c0_43] : memref<18x18x8xf32, #tpu.memory_space<vmem>>, vector<16x16x8xf32>
    %48 = vector.shape_cast %47 : vector<16x16x8xf32> to vector<256x8xf32>
    %c0_44 = arith.constant 0 : index
    %c16 = arith.constant 16 : index
    %49 = vector.load %arg14[%c0_44, %c16] : memref<256x72xf32, #tpu.memory_space<vmem>>, vector<256x8xf32>
    tpu.vector_store %arg14[%c0_44, %c16], %48 {strides = array<i32>} : memref<256x72xf32, #tpu.memory_space<vmem>>, vector<256x8xf32>,
    %c1_45 = arith.constant 1 : index
    %c0_46 = arith.constant 0 : index
    %c0_47 = arith.constant 0 : index
    %50 = vector.load %arg13[%c1_45, %c0_46, %c0_47] : memref<18x18x8xf32, #tpu.memory_space<vmem>>, vector<16x16x8xf32>
    %51 = vector.shape_cast %50 : vector<16x16x8xf32> to vector<256x8xf32>
    %c0_48 = arith.constant 0 : index
    %c24 = arith.constant 24 : index
    %52 = vector.load %arg14[%c0_48, %c24] : memref<256x72xf32, #tpu.memory_space<vmem>>, vector<256x8xf32>
    tpu.vector_store %arg14[%c0_48, %c24], %51 {strides = array<i32>} : memref<256x72xf32, #tpu.memory_space<vmem>>, vector<256x8xf32>,
    %c1_49 = arith.constant 1 : index
    %c1_50 = arith.constant 1 : index
    %c0_51 = arith.constant 0 : index
    %53 = vector.load %arg13[%c1_49, %c1_50, %c0_51] : memref<18x18x8xf32, #tpu.memory_space<vmem>>, vector<16x16x8xf32>
    %54 = vector.shape_cast %53 : vector<16x16x8xf32> to vector<256x8xf32>
    %c0_52 = arith.constant 0 : index
    %c32 = arith.constant 32 : index
    %55 = vector.load %arg14[%c0_52, %c32] : memref<256x72xf32, #tpu.memory_space<vmem>>, vector<256x8xf32>
    tpu.vector_store %arg14[%c0_52, %c32], %54 {strides = array<i32>} : memref<256x72xf32, #tpu.memory_space<vmem>>, vector<256x8xf32>,
    %c1_53 = arith.constant 1 : index
    %c2_54 = arith.constant 2 : index
    %c0_55 = arith.constant 0 : index
    %56 = vector.load %arg13[%c1_53, %c2_54, %c0_55] : memref<18x18x8xf32, #tpu.memory_space<vmem>>, vector<16x16x8xf32>
    %57 = vector.shape_cast %56 : vector<16x16x8xf32> to vector<256x8xf32>
    %c0_56 = arith.constant 0 : index
    %c40 = arith.constant 40 : index
    %58 = vector.load %arg14[%c0_56, %c40] : memref<256x72xf32, #tpu.memory_space<vmem>>, vector<256x8xf32>
    tpu.vector_store %arg14[%c0_56, %c40], %57 {strides = array<i32>} : memref<256x72xf32, #tpu.memory_space<vmem>>, vector<256x8xf32>,
    %c2_57 = arith.constant 2 : index
    %c0_58 = arith.constant 0 : index
    %c0_59 = arith.constant 0 : index
    %59 = vector.load %arg13[%c2_57, %c0_58, %c0_59] : memref<18x18x8xf32, #tpu.memory_space<vmem>>, vector<16x16x8xf32>
    %60 = vector.shape_cast %59 : vector<16x16x8xf32> to vector<256x8xf32>
    %c0_60 = arith.constant 0 : index
    %c48 = arith.constant 48 : index
    %61 = vector.load %arg14[%c0_60, %c48] : memref<256x72xf32, #tpu.memory_space<vmem>>, vector<256x8xf32>
    tpu.vector_store %arg14[%c0_60, %c48], %60 {strides = array<i32>} : memref<256x72xf32, #tpu.memory_space<vmem>>, vector<256x8xf32>,
    %c2_61 = arith.constant 2 : index
    %c1_62 = arith.constant 1 : index
    %c0_63 = arith.constant 0 : index
    %62 = vector.load %arg13[%c2_61, %c1_62, %c0_63] : memref<18x18x8xf32, #tpu.memory_space<vmem>>, vector<16x16x8xf32>
    %63 = vector.shape_cast %62 : vector<16x16x8xf32> to vector<256x8xf32>
    %c0_64 = arith.constant 0 : index
    %c56 = arith.constant 56 : index
    %64 = vector.load %arg14[%c0_64, %c56] : memref<256x72xf32, #tpu.memory_space<vmem>>, vector<256x8xf32>
    tpu.vector_store %arg14[%c0_64, %c56], %63 {strides = array<i32>} : memref<256x72xf32, #tpu.memory_space<vmem>>, vector<256x8xf32>,
    %c2_65 = arith.constant 2 : index
    %c2_66 = arith.constant 2 : index
    %c0_67 = arith.constant 0 : index
    %65 = vector.load %arg13[%c2_65, %c2_66, %c0_67] : memref<18x18x8xf32, #tpu.memory_space<vmem>>, vector<16x16x8xf32>
    %66 = vector.shape_cast %65 : vector<16x16x8xf32> to vector<256x8xf32>
    %c0_68 = arith.constant 0 : index
    %c64 = arith.constant 64 : index
    %67 = vector.load %arg14[%c0_68, %c64] : memref<256x72xf32, #tpu.memory_space<vmem>>, vector<256x8xf32>
    tpu.vector_store %arg14[%c0_68, %c64], %66 {strides = array<i32>} : memref<256x72xf32, #tpu.memory_space<vmem>>, vector<256x8xf32>,
    %c0_69 = arith.constant 0 : index
    %c0_70 = arith.constant 0 : index
    %68 = vector.load %arg14[%c0_69, %c0_70] : memref<256x72xf32, #tpu.memory_space<vmem>>, vector<256x72xf32>
    %c0_71 = arith.constant 0 : index
    %c0_72 = arith.constant 0 : index
    %69 = vector.load %arg3[%c0_71, %c0_72] : memref<72x8xf32, #tpu.memory_space<vmem>>, vector<72x8xf32>
    %cst_73 = arith.constant dense<0.000000e+00> : vector<256x8xf32>
    %70 = tpu.matmul %68, %69, %cst_73 {dimension_numbers = #tpu.dot_dimension_numbers<[1], [0], [0], [1], [0, 0, 1, 1], [], []>} : vector<256x72xf32>, vector<72x8xf32>, vector<256x8xf32> -> vector<256x8xf32>
    %c0_74 = arith.constant 0 : index
    %c0_75 = arith.constant 0 : index
    %71 = vector.load %arg4[%c0_74, %c0_75] : memref<1x8xf32, #tpu.memory_space<vmem>>, vector<1x8xf32>
    %72 = vector.broadcast %71 : vector<1x8xf32> to vector<256x8xf32>
    %73 = arith.addf %70, %72 : vector<256x8xf32>
    %cst_76 = arith.constant dense<0.000000e+00> : vector<64x8xf32>
    %74 = tpu.matmul %2, %73, %cst_76 {dimension_numbers = #tpu.dot_dimension_numbers<[1], [0], [0], [1], [0, 0, 1, 1], [], []>} : vector<64x256xf32>, vector<256x8xf32>, vector<64x8xf32> -> vector<64x8xf32>
    %c0_77 = arith.constant 0 : index
    %c0_78 = arith.constant 0 : index
    %75 = vector.load %arg9[%c0_77, %c0_78] : memref<1x8xf32, #tpu.memory_space<vmem>>, vector<1x8xf32>
    %c0_79 = arith.constant 0 : index
    %c0_80 = arith.constant 0 : index
    %76 = vector.load %arg10[%c0_79, %c0_80] : memref<1x8xf32, #tpu.memory_space<vmem>>, vector<1x8xf32>
    %cst_81 = arith.constant dense<0.000000e+00> : vector<8xf32>
    %77 = vector.multi_reduction <add>, %74, %cst_81 [0] : vector<64x8xf32> to vector<8xf32>
    %78 = vector.shape_cast %77 : vector<8xf32> to vector<1x8xf32>
    %cst_82 = arith.constant 6.400000e+01 : f32
    %79 = vector.broadcast %cst_82 : f32 to vector<1x8xf32>
    %80 = arith.divf %78, %79 : vector<1x8xf32>
    %81 = vector.broadcast %80 : vector<1x8xf32> to vector<64x8xf32>
    %82 = arith.subf %74, %81 : vector<64x8xf32>
    %83 = arith.mulf %82, %82 : vector<64x8xf32>
    %cst_83 = arith.constant dense<0.000000e+00> : vector<8xf32>
    %84 = vector.multi_reduction <add>, %83, %cst_83 [0] : vector<64x8xf32> to vector<8xf32>
    %85 = vector.shape_cast %84 : vector<8xf32> to vector<1x8xf32>
    %cst_84 = arith.constant 6.400000e+01 : f32
    %86 = vector.broadcast %cst_84 : f32 to vector<1x8xf32>
    %87 = arith.divf %85, %86 : vector<1x8xf32>
    %cst_85 = arith.constant 9.99999974E-6 : f32
    %88 = vector.broadcast %cst_85 : f32 to vector<1x8xf32>
    %89 = arith.addf %87, %88 : vector<1x8xf32>
    %90 = math.rsqrt %89 : vector<1x8xf32>
    %91 = vector.broadcast %90 : vector<1x8xf32> to vector<64x8xf32>
    %92 = arith.mulf %82, %91 : vector<64x8xf32>
    %93 = vector.broadcast %75 : vector<1x8xf32> to vector<64x8xf32>
    %94 = arith.mulf %92, %93 : vector<64x8xf32>
    %95 = vector.broadcast %76 : vector<1x8xf32> to vector<64x8xf32>
    %96 = arith.addf %94, %95 : vector<64x8xf32>
    %cst_86 = arith.constant 0.000000e+00 : f32
    %97 = vector.broadcast %cst_86 : f32 to vector<64x8xf32>
    %98 = arith.cmpf ogt, %96, %97 : vector<64x8xf32>
    %cst_87 = arith.constant 2.000000e-01 : f32
    %99 = vector.broadcast %cst_87 : f32 to vector<64x8xf32>
    %100 = arith.mulf %99, %96 : vector<64x8xf32>
    %101 = arith.select %98, %96, %100 : vector<64x8xi1>, vector<64x8xf32>
    %cst_88 = arith.constant 0.000000e+00 : f32
    %102 = vector.broadcast %cst_88 : f32 to vector<1x10x8xf32>
    %c0_89 = arith.constant 0 : index
    %c0_90 = arith.constant 0 : index
    %c0_91 = arith.constant 0 : index
    %103 = vector.load %arg15[%c0_89, %c0_90, %c0_91] : memref<10x10x8xf32, #tpu.memory_space<vmem>>, vector<1x10x8xf32>
    tpu.vector_store %arg15[%c0_89, %c0_90, %c0_91], %102 {strides = array<i32>} : memref<10x10x8xf32, #tpu.memory_space<vmem>>, vector<1x10x8xf32>,
    %c9 = arith.constant 9 : index
    %c0_92 = arith.constant 0 : index
    %c0_93 = arith.constant 0 : index
    %104 = vector.load %arg15[%c9, %c0_92, %c0_93] : memref<10x10x8xf32, #tpu.memory_space<vmem>>, vector<1x10x8xf32>
    tpu.vector_store %arg15[%c9, %c0_92, %c0_93], %102 {strides = array<i32>} : memref<10x10x8xf32, #tpu.memory_space<vmem>>, vector<1x10x8xf32>,
    %cst_94 = arith.constant 0.000000e+00 : f32
    %105 = vector.broadcast %cst_94 : f32 to vector<10x1x8xf32>
    %c0_95 = arith.constant 0 : index
    %c0_96 = arith.constant 0 : index
    %c0_97 = arith.constant 0 : index
    %106 = vector.load %arg15[%c0_95, %c0_96, %c0_97] : memref<10x10x8xf32, #tpu.memory_space<vmem>>, vector<10x1x8xf32>
    tpu.vector_store %arg15[%c0_95, %c0_96, %c0_97], %105 {strides = array<i32>} : memref<10x10x8xf32, #tpu.memory_space<vmem>>, vector<10x1x8xf32>,
    %c0_98 = arith.constant 0 : index
    %c9_99 = arith.constant 9 : index
    %c0_100 = arith.constant 0 : index
    %107 = vector.load %arg15[%c0_98, %c9_99, %c0_100] : memref<10x10x8xf32, #tpu.memory_space<vmem>>, vector<10x1x8xf32>
    tpu.vector_store %arg15[%c0_98, %c9_99, %c0_100], %105 {strides = array<i32>} : memref<10x10x8xf32, #tpu.memory_space<vmem>>, vector<10x1x8xf32>,
    %108 = vector.shape_cast %101 : vector<64x8xf32> to vector<8x8x8xf32>
    %c1_101 = arith.constant 1 : index
    %c1_102 = arith.constant 1 : index
    %c0_103 = arith.constant 0 : index
    %109 = vector.load %arg15[%c1_101, %c1_102, %c0_103] : memref<10x10x8xf32, #tpu.memory_space<vmem>>, vector<8x8x8xf32>
    tpu.vector_store %arg15[%c1_101, %c1_102, %c0_103], %108 {strides = array<i32>} : memref<10x10x8xf32, #tpu.memory_space<vmem>>, vector<8x8x8xf32>,
    %c0_104 = arith.constant 0 : index
    %c0_105 = arith.constant 0 : index
    %c0_106 = arith.constant 0 : index
    %110 = vector.load %arg15[%c0_104, %c0_105, %c0_106] : memref<10x10x8xf32, #tpu.memory_space<vmem>>, vector<8x8x8xf32>
    %111 = vector.shape_cast %110 : vector<8x8x8xf32> to vector<64x8xf32>
    %c0_107 = arith.constant 0 : index
    %c0_108 = arith.constant 0 : index
    %112 = vector.load %arg16[%c0_107, %c0_108] : memref<64x72xf32, #tpu.memory_space<vmem>>, vector<64x8xf32>
    tpu.vector_store %arg16[%c0_107, %c0_108], %111 {strides = array<i32>} : memref<64x72xf32, #tpu.memory_space<vmem>>, vector<64x8xf32>,
    %c0_109 = arith.constant 0 : index
    %c1_110 = arith.constant 1 : index
    %c0_111 = arith.constant 0 : index
    %113 = vector.load %arg15[%c0_109, %c1_110, %c0_111] : memref<10x10x8xf32, #tpu.memory_space<vmem>>, vector<8x8x8xf32>
    %114 = vector.shape_cast %113 : vector<8x8x8xf32> to vector<64x8xf32>
    %c0_112 = arith.constant 0 : index
    %c8_113 = arith.constant 8 : index
    %115 = vector.load %arg16[%c0_112, %c8_113] : memref<64x72xf32, #tpu.memory_space<vmem>>, vector<64x8xf32>
    tpu.vector_store %arg16[%c0_112, %c8_113], %114 {strides = array<i32>} : memref<64x72xf32, #tpu.memory_space<vmem>>, vector<64x8xf32>,
    %c0_114 = arith.constant 0 : index
    %c2_115 = arith.constant 2 : index
    %c0_116 = arith.constant 0 : index
    %116 = vector.load %arg15[%c0_114, %c2_115, %c0_116] : memref<10x10x8xf32, #tpu.memory_space<vmem>>, vector<8x8x8xf32>
    %117 = vector.shape_cast %116 : vector<8x8x8xf32> to vector<64x8xf32>
    %c0_117 = arith.constant 0 : index
    %c16_118 = arith.constant 16 : index
    %118 = vector.load %arg16[%c0_117, %c16_118] : memref<64x72xf32, #tpu.memory_space<vmem>>, vector<64x8xf32>
    tpu.vector_store %arg16[%c0_117, %c16_118], %117 {strides = array<i32>} : memref<64x72xf32, #tpu.memory_space<vmem>>, vector<64x8xf32>,
    %c1_119 = arith.constant 1 : index
    %c0_120 = arith.constant 0 : index
    %c0_121 = arith.constant 0 : index
    %119 = vector.load %arg15[%c1_119, %c0_120, %c0_121] : memref<10x10x8xf32, #tpu.memory_space<vmem>>, vector<8x8x8xf32>
    %120 = vector.shape_cast %119 : vector<8x8x8xf32> to vector<64x8xf32>
    %c0_122 = arith.constant 0 : index
    %c24_123 = arith.constant 24 : index
    %121 = vector.load %arg16[%c0_122, %c24_123] : memref<64x72xf32, #tpu.memory_space<vmem>>, vector<64x8xf32>
    tpu.vector_store %arg16[%c0_122, %c24_123], %120 {strides = array<i32>} : memref<64x72xf32, #tpu.memory_space<vmem>>, vector<64x8xf32>,
    %c1_124 = arith.constant 1 : index
    %c1_125 = arith.constant 1 : index
    %c0_126 = arith.constant 0 : index
    %122 = vector.load %arg15[%c1_124, %c1_125, %c0_126] : memref<10x10x8xf32, #tpu.memory_space<vmem>>, vector<8x8x8xf32>
    %123 = vector.shape_cast %122 : vector<8x8x8xf32> to vector<64x8xf32>
    %c0_127 = arith.constant 0 : index
    %c32_128 = arith.constant 32 : index
    %124 = vector.load %arg16[%c0_127, %c32_128] : memref<64x72xf32, #tpu.memory_space<vmem>>, vector<64x8xf32>
    tpu.vector_store %arg16[%c0_127, %c32_128], %123 {strides = array<i32>} : memref<64x72xf32, #tpu.memory_space<vmem>>, vector<64x8xf32>,
    %c1_129 = arith.constant 1 : index
    %c2_130 = arith.constant 2 : index
    %c0_131 = arith.constant 0 : index
    %125 = vector.load %arg15[%c1_129, %c2_130, %c0_131] : memref<10x10x8xf32, #tpu.memory_space<vmem>>, vector<8x8x8xf32>
    %126 = vector.shape_cast %125 : vector<8x8x8xf32> to vector<64x8xf32>
    %c0_132 = arith.constant 0 : index
    %c40_133 = arith.constant 40 : index
    %127 = vector.load %arg16[%c0_132, %c40_133] : memref<64x72xf32, #tpu.memory_space<vmem>>, vector<64x8xf32>
    tpu.vector_store %arg16[%c0_132, %c40_133], %126 {strides = array<i32>} : memref<64x72xf32, #tpu.memory_space<vmem>>, vector<64x8xf32>,
    %c2_134 = arith.constant 2 : index
    %c0_135 = arith.constant 0 : index
    %c0_136 = arith.constant 0 : index
    %128 = vector.load %arg15[%c2_134, %c0_135, %c0_136] : memref<10x10x8xf32, #tpu.memory_space<vmem>>, vector<8x8x8xf32>
    %129 = vector.shape_cast %128 : vector<8x8x8xf32> to vector<64x8xf32>
    %c0_137 = arith.constant 0 : index
    %c48_138 = arith.constant 48 : index
    %130 = vector.load %arg16[%c0_137, %c48_138] : memref<64x72xf32, #tpu.memory_space<vmem>>, vector<64x8xf32>
    tpu.vector_store %arg16[%c0_137, %c48_138], %129 {strides = array<i32>} : memref<64x72xf32, #tpu.memory_space<vmem>>, vector<64x8xf32>,
    %c2_139 = arith.constant 2 : index
    %c1_140 = arith.constant 1 : index
    %c0_141 = arith.constant 0 : index
    %131 = vector.load %arg15[%c2_139, %c1_140, %c0_141] : memref<10x10x8xf32, #tpu.memory_space<vmem>>, vector<8x8x8xf32>
    %132 = vector.shape_cast %131 : vector<8x8x8xf32> to vector<64x8xf32>
    %c0_142 = arith.constant 0 : index
    %c56_143 = arith.constant 56 : index
    %133 = vector.load %arg16[%c0_142, %c56_143] : memref<64x72xf32, #tpu.memory_space<vmem>>, vector<64x8xf32>
    tpu.vector_store %arg16[%c0_142, %c56_143], %132 {strides = array<i32>} : memref<64x72xf32, #tpu.memory_space<vmem>>, vector<64x8xf32>,
    %c2_144 = arith.constant 2 : index
    %c2_145 = arith.constant 2 : index
    %c0_146 = arith.constant 0 : index
    %134 = vector.load %arg15[%c2_144, %c2_145, %c0_146] : memref<10x10x8xf32, #tpu.memory_space<vmem>>, vector<8x8x8xf32>
    %135 = vector.shape_cast %134 : vector<8x8x8xf32> to vector<64x8xf32>
    %c0_147 = arith.constant 0 : index
    %c64_148 = arith.constant 64 : index
    %136 = vector.load %arg16[%c0_147, %c64_148] : memref<64x72xf32, #tpu.memory_space<vmem>>, vector<64x8xf32>
    tpu.vector_store %arg16[%c0_147, %c64_148], %135 {strides = array<i32>} : memref<64x72xf32, #tpu.memory_space<vmem>>, vector<64x8xf32>,
    %c0_149 = arith.constant 0 : index
    %c0_150 = arith.constant 0 : index
    %137 = vector.load %arg16[%c0_149, %c0_150] : memref<64x72xf32, #tpu.memory_space<vmem>>, vector<64x72xf32>
    %c0_151 = arith.constant 0 : index
    %c0_152 = arith.constant 0 : index
    %138 = vector.load %arg7[%c0_151, %c0_152] : memref<72x16xf32, #tpu.memory_space<vmem>>, vector<72x16xf32>
    %cst_153 = arith.constant dense<0.000000e+00> : vector<64x16xf32>
    %139 = tpu.matmul %137, %138, %cst_153 {dimension_numbers = #tpu.dot_dimension_numbers<[1], [0], [0], [1], [0, 0, 1, 1], [], []>} : vector<64x72xf32>, vector<72x16xf32>, vector<64x16xf32> -> vector<64x16xf32>
    %c0_154 = arith.constant 0 : index
    %c0_155 = arith.constant 0 : index
    %140 = vector.load %arg8[%c0_154, %c0_155] : memref<1x16xf32, #tpu.memory_space<vmem>>, vector<1x16xf32>
    %141 = vector.broadcast %140 : vector<1x16xf32> to vector<64x16xf32>
    %142 = arith.addf %139, %141 : vector<64x16xf32>
    %143 = arith.addf %5, %142 : vector<64x16xf32>
    %cst_156 = arith.constant 0.707106769 : f32
    %144 = vector.broadcast %cst_156 : f32 to vector<64x16xf32>
    %145 = arith.mulf %143, %144 : vector<64x16xf32>
    %c0_157 = arith.constant 0 : index
    %c0_158 = arith.constant 0 : index
    %c0_159 = arith.constant 0 : index
    %146 = vector.load %arg12[%c0_157, %c0_158, %c0_159] : memref<1x64x16xf32, #tpu.memory_space<vmem>>, vector<1x64x16xf32>
    %147 = vector.shape_cast %146 : vector<1x64x16xf32> to vector<64x16xf32>
    %148 = vector.shape_cast %145 : vector<64x16xf32> to vector<1x64x16xf32>
    tpu.vector_store %arg12[%c0_157, %c0_158, %c0_159], %148 {strides = array<i32>} : memref<1x64x16xf32, #tpu.memory_space<vmem>>, vector<1x64x16xf32>,
    return
  }
  func.func @transform_0(%arg0: i32) -> (i32, i32, i32) {
    %c0_i32 = arith.constant 0 : i32
    %c0_i32_0 = arith.constant 0 : i32
    %c0_i32_1 = arith.constant 0 : i32
    return %arg0, %c0_i32, %c0_i32_0 : i32, i32, i32
  }
  func.func @transform_1(%arg0: i32) -> (i32, i32) {
    %c0_i32 = arith.constant 0 : i32
    %c0_i32_0 = arith.constant 0 : i32
    %c0_i32_1 = arith.constant 0 : i32
    return %c0_i32, %c0_i32_0 : i32, i32
  }
  func.func @transform_2(%arg0: i32) -> (i32, i32) {
    %c0_i32 = arith.constant 0 : i32
    %c0_i32_0 = arith.constant 0 : i32
    %c0_i32_1 = arith.constant 0 : i32
    return %c0_i32, %c0_i32_0 : i32, i32
  }
  func.func @transform_3(%arg0: i32) -> (i32, i32) {
    %c0_i32 = arith.constant 0 : i32
    %c0_i32_0 = arith.constant 0 : i32
    %c0_i32_1 = arith.constant 0 : i32
    return %c0_i32, %c0_i32_0 : i32, i32
  }
  func.func @transform_4(%arg0: i32) -> (i32, i32) {
    %c0_i32 = arith.constant 0 : i32
    %c0_i32_0 = arith.constant 0 : i32
    %c0_i32_1 = arith.constant 0 : i32
    return %c0_i32, %c0_i32_0 : i32, i32
  }
  func.func @transform_5(%arg0: i32) -> (i32, i32) {
    %c0_i32 = arith.constant 0 : i32
    %c0_i32_0 = arith.constant 0 : i32
    %c0_i32_1 = arith.constant 0 : i32
    return %c0_i32, %c0_i32_0 : i32, i32
  }
  func.func @transform_6(%arg0: i32) -> (i32, i32) {
    %c0_i32 = arith.constant 0 : i32
    %c0_i32_0 = arith.constant 0 : i32
    %c0_i32_1 = arith.constant 0 : i32
    return %c0_i32, %c0_i32_0 : i32, i32
  }
  func.func @transform_7(%arg0: i32) -> (i32, i32) {
    %c0_i32 = arith.constant 0 : i32
    %c0_i32_0 = arith.constant 0 : i32
    %c0_i32_1 = arith.constant 0 : i32
    return %c0_i32, %c0_i32_0 : i32, i32
  }
  func.func @transform_8(%arg0: i32) -> (i32, i32) {
    %c0_i32 = arith.constant 0 : i32
    %c0_i32_0 = arith.constant 0 : i32
    %c0_i32_1 = arith.constant 0 : i32
    return %c0_i32, %c0_i32_0 : i32, i32
  }
  func.func @transform_9(%arg0: i32) -> (i32, i32) {
    %c0_i32 = arith.constant 0 : i32
    %c0_i32_0 = arith.constant 0 : i32
    %c0_i32_1 = arith.constant 0 : i32
    return %c0_i32, %c0_i32_0 : i32, i32
  }
  func.func @transform_10(%arg0: i32) -> (i32, i32) {
    %c0_i32 = arith.constant 0 : i32
    %c0_i32_0 = arith.constant 0 : i32
    %c0_i32_1 = arith.constant 0 : i32
    return %c0_i32, %c0_i32_0 : i32, i32
  }
  func.func @transform_11(%arg0: i32) -> (i32, i32, i32) {
    %c0_i32 = arith.constant 0 : i32
    %c0_i32_0 = arith.constant 0 : i32
    %c0_i32_1 = arith.constant 0 : i32
    return %arg0, %c0_i32, %c0_i32_0 : i32, i32, i32
  }
}

module attributes {stable_mosaic.version = 11 : i64} {
  func.func @kernel(%arg0: i32, %arg1: memref<1x64x16xf32, #tpu.memory_space<vmem>>, %arg2: memref<16x64xf32, #tpu.memory_space<vmem>>, %arg3: memref<144x16xf32, #tpu.memory_space<vmem>>, %arg4: memref<1x16xf32, #tpu.memory_space<vmem>>, %arg5: memref<1x16xf32, #tpu.memory_space<vmem>>, %arg6: memref<1x16xf32, #tpu.memory_space<vmem>>, %arg7: memref<144x16xf32, #tpu.memory_space<vmem>>, %arg8: memref<1x16xf32, #tpu.memory_space<vmem>>, %arg9: memref<1x16xf32, #tpu.memory_space<vmem>>, %arg10: memref<1x16xf32, #tpu.memory_space<vmem>>, %arg11: memref<1x16x16xf32, #tpu.memory_space<vmem>>, %arg12: memref<10x10x16xf32, #tpu.memory_space<vmem>>, %arg13: memref<64x144xf32, #tpu.memory_space<vmem>>, %arg14: memref<6x6x16xf32, #tpu.memory_space<vmem>>, %arg15: memref<16x144xf32, #tpu.memory_space<vmem>>) attributes {dimension_semantics = [#tpu.dimension_semantics<parallel>], iteration_bounds = array<i64: 2>, scalar_prefetch = 0 : i64, scratch_operands = 4 : i64, tpu.core_type = #tpu.core_type<tc>, window_params = [{transform_indices = @transform_0, window_bounds = array<i64: 1, 64, 16>}, {pipeline_mode = #tpu.pipeline_mode<synchronous>, transform_indices = @transform_1, window_bounds = array<i64: 16, 64>}, {pipeline_mode = #tpu.pipeline_mode<synchronous>, transform_indices = @transform_2, window_bounds = array<i64: 144, 16>}, {pipeline_mode = #tpu.pipeline_mode<synchronous>, transform_indices = @transform_3, window_bounds = array<i64: 1, 16>}, {pipeline_mode = #tpu.pipeline_mode<synchronous>, transform_indices = @transform_4, window_bounds = array<i64: 1, 16>}, {pipeline_mode = #tpu.pipeline_mode<synchronous>, transform_indices = @transform_5, window_bounds = array<i64: 1, 16>}, {pipeline_mode = #tpu.pipeline_mode<synchronous>, transform_indices = @transform_6, window_bounds = array<i64: 144, 16>}, {pipeline_mode = #tpu.pipeline_mode<synchronous>, transform_indices = @transform_7, window_bounds = array<i64: 1, 16>}, {pipeline_mode = #tpu.pipeline_mode<synchronous>, transform_indices = @transform_8, window_bounds = array<i64: 1, 16>}, {pipeline_mode = #tpu.pipeline_mode<synchronous>, transform_indices = @transform_9, window_bounds = array<i64: 1, 16>}, {transform_indices = @transform_10, window_bounds = array<i64: 1, 16, 16>}]} {
    %c0 = arith.constant 0 : index
    %c0_0 = arith.constant 0 : index
    %c0_1 = arith.constant 0 : index
    %0 = vector.load %arg1[%c0, %c0_0, %c0_1] : memref<1x64x16xf32, #tpu.memory_space<vmem>>, vector<1x64x16xf32>
    %1 = vector.shape_cast %0 : vector<1x64x16xf32> to vector<64x16xf32>
    %c0_2 = arith.constant 0 : index
    %c0_3 = arith.constant 0 : index
    %2 = vector.load %arg2[%c0_2, %c0_3] : memref<16x64xf32, #tpu.memory_space<vmem>>, vector<16x64xf32>
    %cst = arith.constant dense<0.000000e+00> : vector<16x16xf32>
    %3 = tpu.matmul %2, %1, %cst {dimension_numbers = #tpu.dot_dimension_numbers<[1], [0], [0], [1], [0, 0, 1, 1], [], []>} : vector<16x64xf32>, vector<64x16xf32>, vector<16x16xf32> -> vector<16x16xf32>
    %c0_4 = arith.constant 0 : index
    %c0_5 = arith.constant 0 : index
    %4 = vector.load %arg5[%c0_4, %c0_5] : memref<1x16xf32, #tpu.memory_space<vmem>>, vector<1x16xf32>
    %c0_6 = arith.constant 0 : index
    %c0_7 = arith.constant 0 : index
    %5 = vector.load %arg6[%c0_6, %c0_7] : memref<1x16xf32, #tpu.memory_space<vmem>>, vector<1x16xf32>
    %cst_8 = arith.constant dense<0.000000e+00> : vector<16xf32>
    %6 = vector.multi_reduction <add>, %1, %cst_8 [0] : vector<64x16xf32> to vector<16xf32>
    %7 = vector.shape_cast %6 : vector<16xf32> to vector<1x16xf32>
    %cst_9 = arith.constant 6.400000e+01 : f32
    %8 = vector.broadcast %cst_9 : f32 to vector<1x16xf32>
    %9 = arith.divf %7, %8 : vector<1x16xf32>
    %10 = vector.broadcast %9 : vector<1x16xf32> to vector<64x16xf32>
    %11 = arith.subf %1, %10 : vector<64x16xf32>
    %12 = arith.mulf %11, %11 : vector<64x16xf32>
    %cst_10 = arith.constant dense<0.000000e+00> : vector<16xf32>
    %13 = vector.multi_reduction <add>, %12, %cst_10 [0] : vector<64x16xf32> to vector<16xf32>
    %14 = vector.shape_cast %13 : vector<16xf32> to vector<1x16xf32>
    %cst_11 = arith.constant 6.400000e+01 : f32
    %15 = vector.broadcast %cst_11 : f32 to vector<1x16xf32>
    %16 = arith.divf %14, %15 : vector<1x16xf32>
    %cst_12 = arith.constant 9.99999974E-6 : f32
    %17 = vector.broadcast %cst_12 : f32 to vector<1x16xf32>
    %18 = arith.addf %16, %17 : vector<1x16xf32>
    %19 = math.rsqrt %18 : vector<1x16xf32>
    %20 = vector.broadcast %19 : vector<1x16xf32> to vector<64x16xf32>
    %21 = arith.mulf %11, %20 : vector<64x16xf32>
    %22 = vector.broadcast %4 : vector<1x16xf32> to vector<64x16xf32>
    %23 = arith.mulf %21, %22 : vector<64x16xf32>
    %24 = vector.broadcast %5 : vector<1x16xf32> to vector<64x16xf32>
    %25 = arith.addf %23, %24 : vector<64x16xf32>
    %cst_13 = arith.constant 0.000000e+00 : f32
    %26 = vector.broadcast %cst_13 : f32 to vector<64x16xf32>
    %27 = arith.cmpf ogt, %25, %26 : vector<64x16xf32>
    %cst_14 = arith.constant 2.000000e-01 : f32
    %28 = vector.broadcast %cst_14 : f32 to vector<64x16xf32>
    %29 = arith.mulf %28, %25 : vector<64x16xf32>
    %30 = arith.select %27, %25, %29 : vector<64x16xi1>, vector<64x16xf32>
    %cst_15 = arith.constant 0.000000e+00 : f32
    %31 = vector.broadcast %cst_15 : f32 to vector<1x10x16xf32>
    %c0_16 = arith.constant 0 : index
    %c0_17 = arith.constant 0 : index
    %c0_18 = arith.constant 0 : index
    %32 = vector.load %arg12[%c0_16, %c0_17, %c0_18] : memref<10x10x16xf32, #tpu.memory_space<vmem>>, vector<1x10x16xf32>
    tpu.vector_store %arg12[%c0_16, %c0_17, %c0_18], %31 {strides = array<i32>} : memref<10x10x16xf32, #tpu.memory_space<vmem>>, vector<1x10x16xf32>,
    %c9 = arith.constant 9 : index
    %c0_19 = arith.constant 0 : index
    %c0_20 = arith.constant 0 : index
    %33 = vector.load %arg12[%c9, %c0_19, %c0_20] : memref<10x10x16xf32, #tpu.memory_space<vmem>>, vector<1x10x16xf32>
    tpu.vector_store %arg12[%c9, %c0_19, %c0_20], %31 {strides = array<i32>} : memref<10x10x16xf32, #tpu.memory_space<vmem>>, vector<1x10x16xf32>,
    %cst_21 = arith.constant 0.000000e+00 : f32
    %34 = vector.broadcast %cst_21 : f32 to vector<10x1x16xf32>
    %c0_22 = arith.constant 0 : index
    %c0_23 = arith.constant 0 : index
    %c0_24 = arith.constant 0 : index
    %35 = vector.load %arg12[%c0_22, %c0_23, %c0_24] : memref<10x10x16xf32, #tpu.memory_space<vmem>>, vector<10x1x16xf32>
    tpu.vector_store %arg12[%c0_22, %c0_23, %c0_24], %34 {strides = array<i32>} : memref<10x10x16xf32, #tpu.memory_space<vmem>>, vector<10x1x16xf32>,
    %c0_25 = arith.constant 0 : index
    %c9_26 = arith.constant 9 : index
    %c0_27 = arith.constant 0 : index
    %36 = vector.load %arg12[%c0_25, %c9_26, %c0_27] : memref<10x10x16xf32, #tpu.memory_space<vmem>>, vector<10x1x16xf32>
    tpu.vector_store %arg12[%c0_25, %c9_26, %c0_27], %34 {strides = array<i32>} : memref<10x10x16xf32, #tpu.memory_space<vmem>>, vector<10x1x16xf32>,
    %37 = vector.shape_cast %30 : vector<64x16xf32> to vector<8x8x16xf32>
    %c1 = arith.constant 1 : index
    %c1_28 = arith.constant 1 : index
    %c0_29 = arith.constant 0 : index
    %38 = vector.load %arg12[%c1, %c1_28, %c0_29] : memref<10x10x16xf32, #tpu.memory_space<vmem>>, vector<8x8x16xf32>
    tpu.vector_store %arg12[%c1, %c1_28, %c0_29], %37 {strides = array<i32>} : memref<10x10x16xf32, #tpu.memory_space<vmem>>, vector<8x8x16xf32>,
    %c0_30 = arith.constant 0 : index
    %c0_31 = arith.constant 0 : index
    %c0_32 = arith.constant 0 : index
    %39 = vector.load %arg12[%c0_30, %c0_31, %c0_32] : memref<10x10x16xf32, #tpu.memory_space<vmem>>, vector<8x8x16xf32>
    %40 = vector.shape_cast %39 : vector<8x8x16xf32> to vector<64x16xf32>
    %c0_33 = arith.constant 0 : index
    %c0_34 = arith.constant 0 : index
    %41 = vector.load %arg13[%c0_33, %c0_34] : memref<64x144xf32, #tpu.memory_space<vmem>>, vector<64x16xf32>
    tpu.vector_store %arg13[%c0_33, %c0_34], %40 {strides = array<i32>} : memref<64x144xf32, #tpu.memory_space<vmem>>, vector<64x16xf32>,
    %c0_35 = arith.constant 0 : index
    %c1_36 = arith.constant 1 : index
    %c0_37 = arith.constant 0 : index
    %42 = vector.load %arg12[%c0_35, %c1_36, %c0_37] : memref<10x10x16xf32, #tpu.memory_space<vmem>>, vector<8x8x16xf32>
    %43 = vector.shape_cast %42 : vector<8x8x16xf32> to vector<64x16xf32>
    %c0_38 = arith.constant 0 : index
    %c16 = arith.constant 16 : index
    %44 = vector.load %arg13[%c0_38, %c16] : memref<64x144xf32, #tpu.memory_space<vmem>>, vector<64x16xf32>
    tpu.vector_store %arg13[%c0_38, %c16], %43 {strides = array<i32>} : memref<64x144xf32, #tpu.memory_space<vmem>>, vector<64x16xf32>,
    %c0_39 = arith.constant 0 : index
    %c2 = arith.constant 2 : index
    %c0_40 = arith.constant 0 : index
    %45 = vector.load %arg12[%c0_39, %c2, %c0_40] : memref<10x10x16xf32, #tpu.memory_space<vmem>>, vector<8x8x16xf32>
    %46 = vector.shape_cast %45 : vector<8x8x16xf32> to vector<64x16xf32>
    %c0_41 = arith.constant 0 : index
    %c32 = arith.constant 32 : index
    %47 = vector.load %arg13[%c0_41, %c32] : memref<64x144xf32, #tpu.memory_space<vmem>>, vector<64x16xf32>
    tpu.vector_store %arg13[%c0_41, %c32], %46 {strides = array<i32>} : memref<64x144xf32, #tpu.memory_space<vmem>>, vector<64x16xf32>,
    %c1_42 = arith.constant 1 : index
    %c0_43 = arith.constant 0 : index
    %c0_44 = arith.constant 0 : index
    %48 = vector.load %arg12[%c1_42, %c0_43, %c0_44] : memref<10x10x16xf32, #tpu.memory_space<vmem>>, vector<8x8x16xf32>
    %49 = vector.shape_cast %48 : vector<8x8x16xf32> to vector<64x16xf32>
    %c0_45 = arith.constant 0 : index
    %c48 = arith.constant 48 : index
    %50 = vector.load %arg13[%c0_45, %c48] : memref<64x144xf32, #tpu.memory_space<vmem>>, vector<64x16xf32>
    tpu.vector_store %arg13[%c0_45, %c48], %49 {strides = array<i32>} : memref<64x144xf32, #tpu.memory_space<vmem>>, vector<64x16xf32>,
    %c1_46 = arith.constant 1 : index
    %c1_47 = arith.constant 1 : index
    %c0_48 = arith.constant 0 : index
    %51 = vector.load %arg12[%c1_46, %c1_47, %c0_48] : memref<10x10x16xf32, #tpu.memory_space<vmem>>, vector<8x8x16xf32>
    %52 = vector.shape_cast %51 : vector<8x8x16xf32> to vector<64x16xf32>
    %c0_49 = arith.constant 0 : index
    %c64 = arith.constant 64 : index
    %53 = vector.load %arg13[%c0_49, %c64] : memref<64x144xf32, #tpu.memory_space<vmem>>, vector<64x16xf32>
    tpu.vector_store %arg13[%c0_49, %c64], %52 {strides = array<i32>} : memref<64x144xf32, #tpu.memory_space<vmem>>, vector<64x16xf32>,
    %c1_50 = arith.constant 1 : index
    %c2_51 = arith.constant 2 : index
    %c0_52 = arith.constant 0 : index
    %54 = vector.load %arg12[%c1_50, %c2_51, %c0_52] : memref<10x10x16xf32, #tpu.memory_space<vmem>>, vector<8x8x16xf32>
    %55 = vector.shape_cast %54 : vector<8x8x16xf32> to vector<64x16xf32>
    %c0_53 = arith.constant 0 : index
    %c80 = arith.constant 80 : index
    %56 = vector.load %arg13[%c0_53, %c80] : memref<64x144xf32, #tpu.memory_space<vmem>>, vector<64x16xf32>
    tpu.vector_store %arg13[%c0_53, %c80], %55 {strides = array<i32>} : memref<64x144xf32, #tpu.memory_space<vmem>>, vector<64x16xf32>,
    %c2_54 = arith.constant 2 : index
    %c0_55 = arith.constant 0 : index
    %c0_56 = arith.constant 0 : index
    %57 = vector.load %arg12[%c2_54, %c0_55, %c0_56] : memref<10x10x16xf32, #tpu.memory_space<vmem>>, vector<8x8x16xf32>
    %58 = vector.shape_cast %57 : vector<8x8x16xf32> to vector<64x16xf32>
    %c0_57 = arith.constant 0 : index
    %c96 = arith.constant 96 : index
    %59 = vector.load %arg13[%c0_57, %c96] : memref<64x144xf32, #tpu.memory_space<vmem>>, vector<64x16xf32>
    tpu.vector_store %arg13[%c0_57, %c96], %58 {strides = array<i32>} : memref<64x144xf32, #tpu.memory_space<vmem>>, vector<64x16xf32>,
    %c2_58 = arith.constant 2 : index
    %c1_59 = arith.constant 1 : index
    %c0_60 = arith.constant 0 : index
    %60 = vector.load %arg12[%c2_58, %c1_59, %c0_60] : memref<10x10x16xf32, #tpu.memory_space<vmem>>, vector<8x8x16xf32>
    %61 = vector.shape_cast %60 : vector<8x8x16xf32> to vector<64x16xf32>
    %c0_61 = arith.constant 0 : index
    %c112 = arith.constant 112 : index
    %62 = vector.load %arg13[%c0_61, %c112] : memref<64x144xf32, #tpu.memory_space<vmem>>, vector<64x16xf32>
    tpu.vector_store %arg13[%c0_61, %c112], %61 {strides = array<i32>} : memref<64x144xf32, #tpu.memory_space<vmem>>, vector<64x16xf32>,
    %c2_62 = arith.constant 2 : index
    %c2_63 = arith.constant 2 : index
    %c0_64 = arith.constant 0 : index
    %63 = vector.load %arg12[%c2_62, %c2_63, %c0_64] : memref<10x10x16xf32, #tpu.memory_space<vmem>>, vector<8x8x16xf32>
    %64 = vector.shape_cast %63 : vector<8x8x16xf32> to vector<64x16xf32>
    %c0_65 = arith.constant 0 : index
    %c128 = arith.constant 128 : index
    %65 = vector.load %arg13[%c0_65, %c128] : memref<64x144xf32, #tpu.memory_space<vmem>>, vector<64x16xf32>
    tpu.vector_store %arg13[%c0_65, %c128], %64 {strides = array<i32>} : memref<64x144xf32, #tpu.memory_space<vmem>>, vector<64x16xf32>,
    %c0_66 = arith.constant 0 : index
    %c0_67 = arith.constant 0 : index
    %66 = vector.load %arg13[%c0_66, %c0_67] : memref<64x144xf32, #tpu.memory_space<vmem>>, vector<64x144xf32>
    %c0_68 = arith.constant 0 : index
    %c0_69 = arith.constant 0 : index
    %67 = vector.load %arg3[%c0_68, %c0_69] : memref<144x16xf32, #tpu.memory_space<vmem>>, vector<144x16xf32>
    %cst_70 = arith.constant dense<0.000000e+00> : vector<64x16xf32>
    %68 = tpu.matmul %66, %67, %cst_70 {dimension_numbers = #tpu.dot_dimension_numbers<[1], [0], [0], [1], [0, 0, 1, 1], [], []>} : vector<64x144xf32>, vector<144x16xf32>, vector<64x16xf32> -> vector<64x16xf32>
    %c0_71 = arith.constant 0 : index
    %c0_72 = arith.constant 0 : index
    %69 = vector.load %arg4[%c0_71, %c0_72] : memref<1x16xf32, #tpu.memory_space<vmem>>, vector<1x16xf32>
    %70 = vector.broadcast %69 : vector<1x16xf32> to vector<64x16xf32>
    %71 = arith.addf %68, %70 : vector<64x16xf32>
    %cst_73 = arith.constant dense<0.000000e+00> : vector<16x16xf32>
    %72 = tpu.matmul %2, %71, %cst_73 {dimension_numbers = #tpu.dot_dimension_numbers<[1], [0], [0], [1], [0, 0, 1, 1], [], []>} : vector<16x64xf32>, vector<64x16xf32>, vector<16x16xf32> -> vector<16x16xf32>
    %c0_74 = arith.constant 0 : index
    %c0_75 = arith.constant 0 : index
    %73 = vector.load %arg9[%c0_74, %c0_75] : memref<1x16xf32, #tpu.memory_space<vmem>>, vector<1x16xf32>
    %c0_76 = arith.constant 0 : index
    %c0_77 = arith.constant 0 : index
    %74 = vector.load %arg10[%c0_76, %c0_77] : memref<1x16xf32, #tpu.memory_space<vmem>>, vector<1x16xf32>
    %cst_78 = arith.constant dense<0.000000e+00> : vector<16xf32>
    %75 = vector.multi_reduction <add>, %72, %cst_78 [0] : vector<16x16xf32> to vector<16xf32>
    %76 = vector.shape_cast %75 : vector<16xf32> to vector<1x16xf32>
    %cst_79 = arith.constant 1.600000e+01 : f32
    %77 = vector.broadcast %cst_79 : f32 to vector<1x16xf32>
    %78 = arith.divf %76, %77 : vector<1x16xf32>
    %79 = vector.broadcast %78 : vector<1x16xf32> to vector<16x16xf32>
    %80 = arith.subf %72, %79 : vector<16x16xf32>
    %81 = arith.mulf %80, %80 : vector<16x16xf32>
    %cst_80 = arith.constant dense<0.000000e+00> : vector<16xf32>
    %82 = vector.multi_reduction <add>, %81, %cst_80 [0] : vector<16x16xf32> to vector<16xf32>
    %83 = vector.shape_cast %82 : vector<16xf32> to vector<1x16xf32>
    %cst_81 = arith.constant 1.600000e+01 : f32
    %84 = vector.broadcast %cst_81 : f32 to vector<1x16xf32>
    %85 = arith.divf %83, %84 : vector<1x16xf32>
    %cst_82 = arith.constant 9.99999974E-6 : f32
    %86 = vector.broadcast %cst_82 : f32 to vector<1x16xf32>
    %87 = arith.addf %85, %86 : vector<1x16xf32>
    %88 = math.rsqrt %87 : vector<1x16xf32>
    %89 = vector.broadcast %88 : vector<1x16xf32> to vector<16x16xf32>
    %90 = arith.mulf %80, %89 : vector<16x16xf32>
    %91 = vector.broadcast %73 : vector<1x16xf32> to vector<16x16xf32>
    %92 = arith.mulf %90, %91 : vector<16x16xf32>
    %93 = vector.broadcast %74 : vector<1x16xf32> to vector<16x16xf32>
    %94 = arith.addf %92, %93 : vector<16x16xf32>
    %cst_83 = arith.constant 0.000000e+00 : f32
    %95 = vector.broadcast %cst_83 : f32 to vector<16x16xf32>
    %96 = arith.cmpf ogt, %94, %95 : vector<16x16xf32>
    %cst_84 = arith.constant 2.000000e-01 : f32
    %97 = vector.broadcast %cst_84 : f32 to vector<16x16xf32>
    %98 = arith.mulf %97, %94 : vector<16x16xf32>
    %99 = arith.select %96, %94, %98 : vector<16x16xi1>, vector<16x16xf32>
    %cst_85 = arith.constant 0.000000e+00 : f32
    %100 = vector.broadcast %cst_85 : f32 to vector<1x6x16xf32>
    %c0_86 = arith.constant 0 : index
    %c0_87 = arith.constant 0 : index
    %c0_88 = arith.constant 0 : index
    %101 = vector.load %arg14[%c0_86, %c0_87, %c0_88] : memref<6x6x16xf32, #tpu.memory_space<vmem>>, vector<1x6x16xf32>
    tpu.vector_store %arg14[%c0_86, %c0_87, %c0_88], %100 {strides = array<i32>} : memref<6x6x16xf32, #tpu.memory_space<vmem>>, vector<1x6x16xf32>,
    %c5 = arith.constant 5 : index
    %c0_89 = arith.constant 0 : index
    %c0_90 = arith.constant 0 : index
    %102 = vector.load %arg14[%c5, %c0_89, %c0_90] : memref<6x6x16xf32, #tpu.memory_space<vmem>>, vector<1x6x16xf32>
    tpu.vector_store %arg14[%c5, %c0_89, %c0_90], %100 {strides = array<i32>} : memref<6x6x16xf32, #tpu.memory_space<vmem>>, vector<1x6x16xf32>,
    %cst_91 = arith.constant 0.000000e+00 : f32
    %103 = vector.broadcast %cst_91 : f32 to vector<6x1x16xf32>
    %c0_92 = arith.constant 0 : index
    %c0_93 = arith.constant 0 : index
    %c0_94 = arith.constant 0 : index
    %104 = vector.load %arg14[%c0_92, %c0_93, %c0_94] : memref<6x6x16xf32, #tpu.memory_space<vmem>>, vector<6x1x16xf32>
    tpu.vector_store %arg14[%c0_92, %c0_93, %c0_94], %103 {strides = array<i32>} : memref<6x6x16xf32, #tpu.memory_space<vmem>>, vector<6x1x16xf32>,
    %c0_95 = arith.constant 0 : index
    %c5_96 = arith.constant 5 : index
    %c0_97 = arith.constant 0 : index
    %105 = vector.load %arg14[%c0_95, %c5_96, %c0_97] : memref<6x6x16xf32, #tpu.memory_space<vmem>>, vector<6x1x16xf32>
    tpu.vector_store %arg14[%c0_95, %c5_96, %c0_97], %103 {strides = array<i32>} : memref<6x6x16xf32, #tpu.memory_space<vmem>>, vector<6x1x16xf32>,
    %106 = vector.extract_strided_slice %99 {offsets = [0, 0], sizes = [4, 16], strides = [1, 1]} : vector<16x16xf32> to vector<4x16xf32>
    %107 = vector.shape_cast %106 : vector<4x16xf32> to vector<1x4x16xf32>
    %c1_98 = arith.constant 1 : index
    %c1_99 = arith.constant 1 : index
    %c0_100 = arith.constant 0 : index
    %108 = vector.load %arg14[%c1_98, %c1_99, %c0_100] : memref<6x6x16xf32, #tpu.memory_space<vmem>>, vector<1x4x16xf32>
    tpu.vector_store %arg14[%c1_98, %c1_99, %c0_100], %107 {strides = array<i32>} : memref<6x6x16xf32, #tpu.memory_space<vmem>>, vector<1x4x16xf32>,
    %109 = vector.extract_strided_slice %99 {offsets = [4, 0], sizes = [4, 16], strides = [1, 1]} : vector<16x16xf32> to vector<4x16xf32>
    %110 = vector.shape_cast %109 : vector<4x16xf32> to vector<1x4x16xf32>
    %c2_101 = arith.constant 2 : index
    %c1_102 = arith.constant 1 : index
    %c0_103 = arith.constant 0 : index
    %111 = vector.load %arg14[%c2_101, %c1_102, %c0_103] : memref<6x6x16xf32, #tpu.memory_space<vmem>>, vector<1x4x16xf32>
    tpu.vector_store %arg14[%c2_101, %c1_102, %c0_103], %110 {strides = array<i32>} : memref<6x6x16xf32, #tpu.memory_space<vmem>>, vector<1x4x16xf32>,
    %112 = vector.extract_strided_slice %99 {offsets = [8, 0], sizes = [4, 16], strides = [1, 1]} : vector<16x16xf32> to vector<4x16xf32>
    %113 = vector.shape_cast %112 : vector<4x16xf32> to vector<1x4x16xf32>
    %c3 = arith.constant 3 : index
    %c1_104 = arith.constant 1 : index
    %c0_105 = arith.constant 0 : index
    %114 = vector.load %arg14[%c3, %c1_104, %c0_105] : memref<6x6x16xf32, #tpu.memory_space<vmem>>, vector<1x4x16xf32>
    tpu.vector_store %arg14[%c3, %c1_104, %c0_105], %113 {strides = array<i32>} : memref<6x6x16xf32, #tpu.memory_space<vmem>>, vector<1x4x16xf32>,
    %115 = vector.extract_strided_slice %99 {offsets = [12, 0], sizes = [4, 16], strides = [1, 1]} : vector<16x16xf32> to vector<4x16xf32>
    %116 = vector.shape_cast %115 : vector<4x16xf32> to vector<1x4x16xf32>
    %c4 = arith.constant 4 : index
    %c1_106 = arith.constant 1 : index
    %c0_107 = arith.constant 0 : index
    %117 = vector.load %arg14[%c4, %c1_106, %c0_107] : memref<6x6x16xf32, #tpu.memory_space<vmem>>, vector<1x4x16xf32>
    tpu.vector_store %arg14[%c4, %c1_106, %c0_107], %116 {strides = array<i32>} : memref<6x6x16xf32, #tpu.memory_space<vmem>>, vector<1x4x16xf32>,
    %c0_108 = arith.constant 0 : index
    %c0_109 = arith.constant 0 : index
    %c0_110 = arith.constant 0 : index
    %118 = vector.load %arg14[%c0_108, %c0_109, %c0_110] : memref<6x6x16xf32, #tpu.memory_space<vmem>>, vector<1x4x16xf32>
    %119 = vector.shape_cast %118 : vector<1x4x16xf32> to vector<4x16xf32>
    %c0_111 = arith.constant 0 : index
    %c0_112 = arith.constant 0 : index
    %120 = vector.load %arg15[%c0_111, %c0_112] : memref<16x144xf32, #tpu.memory_space<vmem>>, vector<4x16xf32>
    tpu.vector_store %arg15[%c0_111, %c0_112], %119 {strides = array<i32>} : memref<16x144xf32, #tpu.memory_space<vmem>>, vector<4x16xf32>,
    %c1_113 = arith.constant 1 : index
    %c0_114 = arith.constant 0 : index
    %c0_115 = arith.constant 0 : index
    %121 = vector.load %arg14[%c1_113, %c0_114, %c0_115] : memref<6x6x16xf32, #tpu.memory_space<vmem>>, vector<1x4x16xf32>
    %122 = vector.shape_cast %121 : vector<1x4x16xf32> to vector<4x16xf32>
    %c4_116 = arith.constant 4 : index
    %c0_117 = arith.constant 0 : index
    %123 = vector.load %arg15[%c4_116, %c0_117] : memref<16x144xf32, #tpu.memory_space<vmem>>, vector<4x16xf32>
    tpu.vector_store %arg15[%c4_116, %c0_117], %122 {strides = array<i32>} : memref<16x144xf32, #tpu.memory_space<vmem>>, vector<4x16xf32>,
    %c2_118 = arith.constant 2 : index
    %c0_119 = arith.constant 0 : index
    %c0_120 = arith.constant 0 : index
    %124 = vector.load %arg14[%c2_118, %c0_119, %c0_120] : memref<6x6x16xf32, #tpu.memory_space<vmem>>, vector<1x4x16xf32>
    %125 = vector.shape_cast %124 : vector<1x4x16xf32> to vector<4x16xf32>
    %c8 = arith.constant 8 : index
    %c0_121 = arith.constant 0 : index
    %126 = vector.load %arg15[%c8, %c0_121] : memref<16x144xf32, #tpu.memory_space<vmem>>, vector<4x16xf32>
    tpu.vector_store %arg15[%c8, %c0_121], %125 {strides = array<i32>} : memref<16x144xf32, #tpu.memory_space<vmem>>, vector<4x16xf32>,
    %c3_122 = arith.constant 3 : index
    %c0_123 = arith.constant 0 : index
    %c0_124 = arith.constant 0 : index
    %127 = vector.load %arg14[%c3_122, %c0_123, %c0_124] : memref<6x6x16xf32, #tpu.memory_space<vmem>>, vector<1x4x16xf32>
    %128 = vector.shape_cast %127 : vector<1x4x16xf32> to vector<4x16xf32>
    %c12 = arith.constant 12 : index
    %c0_125 = arith.constant 0 : index
    %129 = vector.load %arg15[%c12, %c0_125] : memref<16x144xf32, #tpu.memory_space<vmem>>, vector<4x16xf32>
    tpu.vector_store %arg15[%c12, %c0_125], %128 {strides = array<i32>} : memref<16x144xf32, #tpu.memory_space<vmem>>, vector<4x16xf32>,
    %c0_126 = arith.constant 0 : index
    %c1_127 = arith.constant 1 : index
    %c0_128 = arith.constant 0 : index
    %130 = vector.load %arg14[%c0_126, %c1_127, %c0_128] : memref<6x6x16xf32, #tpu.memory_space<vmem>>, vector<1x4x16xf32>
    %131 = vector.shape_cast %130 : vector<1x4x16xf32> to vector<4x16xf32>
    %c0_129 = arith.constant 0 : index
    %c16_130 = arith.constant 16 : index
    %132 = vector.load %arg15[%c0_129, %c16_130] : memref<16x144xf32, #tpu.memory_space<vmem>>, vector<4x16xf32>
    tpu.vector_store %arg15[%c0_129, %c16_130], %131 {strides = array<i32>} : memref<16x144xf32, #tpu.memory_space<vmem>>, vector<4x16xf32>,
    %c1_131 = arith.constant 1 : index
    %c1_132 = arith.constant 1 : index
    %c0_133 = arith.constant 0 : index
    %133 = vector.load %arg14[%c1_131, %c1_132, %c0_133] : memref<6x6x16xf32, #tpu.memory_space<vmem>>, vector<1x4x16xf32>
    %134 = vector.shape_cast %133 : vector<1x4x16xf32> to vector<4x16xf32>
    %c4_134 = arith.constant 4 : index
    %c16_135 = arith.constant 16 : index
    %135 = vector.load %arg15[%c4_134, %c16_135] : memref<16x144xf32, #tpu.memory_space<vmem>>, vector<4x16xf32>
    tpu.vector_store %arg15[%c4_134, %c16_135], %134 {strides = array<i32>} : memref<16x144xf32, #tpu.memory_space<vmem>>, vector<4x16xf32>,
    %c2_136 = arith.constant 2 : index
    %c1_137 = arith.constant 1 : index
    %c0_138 = arith.constant 0 : index
    %136 = vector.load %arg14[%c2_136, %c1_137, %c0_138] : memref<6x6x16xf32, #tpu.memory_space<vmem>>, vector<1x4x16xf32>
    %137 = vector.shape_cast %136 : vector<1x4x16xf32> to vector<4x16xf32>
    %c8_139 = arith.constant 8 : index
    %c16_140 = arith.constant 16 : index
    %138 = vector.load %arg15[%c8_139, %c16_140] : memref<16x144xf32, #tpu.memory_space<vmem>>, vector<4x16xf32>
    tpu.vector_store %arg15[%c8_139, %c16_140], %137 {strides = array<i32>} : memref<16x144xf32, #tpu.memory_space<vmem>>, vector<4x16xf32>,
    %c3_141 = arith.constant 3 : index
    %c1_142 = arith.constant 1 : index
    %c0_143 = arith.constant 0 : index
    %139 = vector.load %arg14[%c3_141, %c1_142, %c0_143] : memref<6x6x16xf32, #tpu.memory_space<vmem>>, vector<1x4x16xf32>
    %140 = vector.shape_cast %139 : vector<1x4x16xf32> to vector<4x16xf32>
    %c12_144 = arith.constant 12 : index
    %c16_145 = arith.constant 16 : index
    %141 = vector.load %arg15[%c12_144, %c16_145] : memref<16x144xf32, #tpu.memory_space<vmem>>, vector<4x16xf32>
    tpu.vector_store %arg15[%c12_144, %c16_145], %140 {strides = array<i32>} : memref<16x144xf32, #tpu.memory_space<vmem>>, vector<4x16xf32>,
    %c0_146 = arith.constant 0 : index
    %c2_147 = arith.constant 2 : index
    %c0_148 = arith.constant 0 : index
    %142 = vector.load %arg14[%c0_146, %c2_147, %c0_148] : memref<6x6x16xf32, #tpu.memory_space<vmem>>, vector<1x4x16xf32>
    %143 = vector.shape_cast %142 : vector<1x4x16xf32> to vector<4x16xf32>
    %c0_149 = arith.constant 0 : index
    %c32_150 = arith.constant 32 : index
    %144 = vector.load %arg15[%c0_149, %c32_150] : memref<16x144xf32, #tpu.memory_space<vmem>>, vector<4x16xf32>
    tpu.vector_store %arg15[%c0_149, %c32_150], %143 {strides = array<i32>} : memref<16x144xf32, #tpu.memory_space<vmem>>, vector<4x16xf32>,
    %c1_151 = arith.constant 1 : index
    %c2_152 = arith.constant 2 : index
    %c0_153 = arith.constant 0 : index
    %145 = vector.load %arg14[%c1_151, %c2_152, %c0_153] : memref<6x6x16xf32, #tpu.memory_space<vmem>>, vector<1x4x16xf32>
    %146 = vector.shape_cast %145 : vector<1x4x16xf32> to vector<4x16xf32>
    %c4_154 = arith.constant 4 : index
    %c32_155 = arith.constant 32 : index
    %147 = vector.load %arg15[%c4_154, %c32_155] : memref<16x144xf32, #tpu.memory_space<vmem>>, vector<4x16xf32>
    tpu.vector_store %arg15[%c4_154, %c32_155], %146 {strides = array<i32>} : memref<16x144xf32, #tpu.memory_space<vmem>>, vector<4x16xf32>,
    %c2_156 = arith.constant 2 : index
    %c2_157 = arith.constant 2 : index
    %c0_158 = arith.constant 0 : index
    %148 = vector.load %arg14[%c2_156, %c2_157, %c0_158] : memref<6x6x16xf32, #tpu.memory_space<vmem>>, vector<1x4x16xf32>
    %149 = vector.shape_cast %148 : vector<1x4x16xf32> to vector<4x16xf32>
    %c8_159 = arith.constant 8 : index
    %c32_160 = arith.constant 32 : index
    %150 = vector.load %arg15[%c8_159, %c32_160] : memref<16x144xf32, #tpu.memory_space<vmem>>, vector<4x16xf32>
    tpu.vector_store %arg15[%c8_159, %c32_160], %149 {strides = array<i32>} : memref<16x144xf32, #tpu.memory_space<vmem>>, vector<4x16xf32>,
    %c3_161 = arith.constant 3 : index
    %c2_162 = arith.constant 2 : index
    %c0_163 = arith.constant 0 : index
    %151 = vector.load %arg14[%c3_161, %c2_162, %c0_163] : memref<6x6x16xf32, #tpu.memory_space<vmem>>, vector<1x4x16xf32>
    %152 = vector.shape_cast %151 : vector<1x4x16xf32> to vector<4x16xf32>
    %c12_164 = arith.constant 12 : index
    %c32_165 = arith.constant 32 : index
    %153 = vector.load %arg15[%c12_164, %c32_165] : memref<16x144xf32, #tpu.memory_space<vmem>>, vector<4x16xf32>
    tpu.vector_store %arg15[%c12_164, %c32_165], %152 {strides = array<i32>} : memref<16x144xf32, #tpu.memory_space<vmem>>, vector<4x16xf32>,
    %c1_166 = arith.constant 1 : index
    %c0_167 = arith.constant 0 : index
    %c0_168 = arith.constant 0 : index
    %154 = vector.load %arg14[%c1_166, %c0_167, %c0_168] : memref<6x6x16xf32, #tpu.memory_space<vmem>>, vector<1x4x16xf32>
    %155 = vector.shape_cast %154 : vector<1x4x16xf32> to vector<4x16xf32>
    %c0_169 = arith.constant 0 : index
    %c48_170 = arith.constant 48 : index
    %156 = vector.load %arg15[%c0_169, %c48_170] : memref<16x144xf32, #tpu.memory_space<vmem>>, vector<4x16xf32>
    tpu.vector_store %arg15[%c0_169, %c48_170], %155 {strides = array<i32>} : memref<16x144xf32, #tpu.memory_space<vmem>>, vector<4x16xf32>,
    %c2_171 = arith.constant 2 : index
    %c0_172 = arith.constant 0 : index
    %c0_173 = arith.constant 0 : index
    %157 = vector.load %arg14[%c2_171, %c0_172, %c0_173] : memref<6x6x16xf32, #tpu.memory_space<vmem>>, vector<1x4x16xf32>
    %158 = vector.shape_cast %157 : vector<1x4x16xf32> to vector<4x16xf32>
    %c4_174 = arith.constant 4 : index
    %c48_175 = arith.constant 48 : index
    %159 = vector.load %arg15[%c4_174, %c48_175] : memref<16x144xf32, #tpu.memory_space<vmem>>, vector<4x16xf32>
    tpu.vector_store %arg15[%c4_174, %c48_175], %158 {strides = array<i32>} : memref<16x144xf32, #tpu.memory_space<vmem>>, vector<4x16xf32>,
    %c3_176 = arith.constant 3 : index
    %c0_177 = arith.constant 0 : index
    %c0_178 = arith.constant 0 : index
    %160 = vector.load %arg14[%c3_176, %c0_177, %c0_178] : memref<6x6x16xf32, #tpu.memory_space<vmem>>, vector<1x4x16xf32>
    %161 = vector.shape_cast %160 : vector<1x4x16xf32> to vector<4x16xf32>
    %c8_179 = arith.constant 8 : index
    %c48_180 = arith.constant 48 : index
    %162 = vector.load %arg15[%c8_179, %c48_180] : memref<16x144xf32, #tpu.memory_space<vmem>>, vector<4x16xf32>
    tpu.vector_store %arg15[%c8_179, %c48_180], %161 {strides = array<i32>} : memref<16x144xf32, #tpu.memory_space<vmem>>, vector<4x16xf32>,
    %c4_181 = arith.constant 4 : index
    %c0_182 = arith.constant 0 : index
    %c0_183 = arith.constant 0 : index
    %163 = vector.load %arg14[%c4_181, %c0_182, %c0_183] : memref<6x6x16xf32, #tpu.memory_space<vmem>>, vector<1x4x16xf32>
    %164 = vector.shape_cast %163 : vector<1x4x16xf32> to vector<4x16xf32>
    %c12_184 = arith.constant 12 : index
    %c48_185 = arith.constant 48 : index
    %165 = vector.load %arg15[%c12_184, %c48_185] : memref<16x144xf32, #tpu.memory_space<vmem>>, vector<4x16xf32>
    tpu.vector_store %arg15[%c12_184, %c48_185], %164 {strides = array<i32>} : memref<16x144xf32, #tpu.memory_space<vmem>>, vector<4x16xf32>,
    %c1_186 = arith.constant 1 : index
    %c1_187 = arith.constant 1 : index
    %c0_188 = arith.constant 0 : index
    %166 = vector.load %arg14[%c1_186, %c1_187, %c0_188] : memref<6x6x16xf32, #tpu.memory_space<vmem>>, vector<1x4x16xf32>
    %167 = vector.shape_cast %166 : vector<1x4x16xf32> to vector<4x16xf32>
    %c0_189 = arith.constant 0 : index
    %c64_190 = arith.constant 64 : index
    %168 = vector.load %arg15[%c0_189, %c64_190] : memref<16x144xf32, #tpu.memory_space<vmem>>, vector<4x16xf32>
    tpu.vector_store %arg15[%c0_189, %c64_190], %167 {strides = array<i32>} : memref<16x144xf32, #tpu.memory_space<vmem>>, vector<4x16xf32>,
    %c2_191 = arith.constant 2 : index
    %c1_192 = arith.constant 1 : index
    %c0_193 = arith.constant 0 : index
    %169 = vector.load %arg14[%c2_191, %c1_192, %c0_193] : memref<6x6x16xf32, #tpu.memory_space<vmem>>, vector<1x4x16xf32>
    %170 = vector.shape_cast %169 : vector<1x4x16xf32> to vector<4x16xf32>
    %c4_194 = arith.constant 4 : index
    %c64_195 = arith.constant 64 : index
    %171 = vector.load %arg15[%c4_194, %c64_195] : memref<16x144xf32, #tpu.memory_space<vmem>>, vector<4x16xf32>
    tpu.vector_store %arg15[%c4_194, %c64_195], %170 {strides = array<i32>} : memref<16x144xf32, #tpu.memory_space<vmem>>, vector<4x16xf32>,
    %c3_196 = arith.constant 3 : index
    %c1_197 = arith.constant 1 : index
    %c0_198 = arith.constant 0 : index
    %172 = vector.load %arg14[%c3_196, %c1_197, %c0_198] : memref<6x6x16xf32, #tpu.memory_space<vmem>>, vector<1x4x16xf32>
    %173 = vector.shape_cast %172 : vector<1x4x16xf32> to vector<4x16xf32>
    %c8_199 = arith.constant 8 : index
    %c64_200 = arith.constant 64 : index
    %174 = vector.load %arg15[%c8_199, %c64_200] : memref<16x144xf32, #tpu.memory_space<vmem>>, vector<4x16xf32>
    tpu.vector_store %arg15[%c8_199, %c64_200], %173 {strides = array<i32>} : memref<16x144xf32, #tpu.memory_space<vmem>>, vector<4x16xf32>,
    %c4_201 = arith.constant 4 : index
    %c1_202 = arith.constant 1 : index
    %c0_203 = arith.constant 0 : index
    %175 = vector.load %arg14[%c4_201, %c1_202, %c0_203] : memref<6x6x16xf32, #tpu.memory_space<vmem>>, vector<1x4x16xf32>
    %176 = vector.shape_cast %175 : vector<1x4x16xf32> to vector<4x16xf32>
    %c12_204 = arith.constant 12 : index
    %c64_205 = arith.constant 64 : index
    %177 = vector.load %arg15[%c12_204, %c64_205] : memref<16x144xf32, #tpu.memory_space<vmem>>, vector<4x16xf32>
    tpu.vector_store %arg15[%c12_204, %c64_205], %176 {strides = array<i32>} : memref<16x144xf32, #tpu.memory_space<vmem>>, vector<4x16xf32>,
    %c1_206 = arith.constant 1 : index
    %c2_207 = arith.constant 2 : index
    %c0_208 = arith.constant 0 : index
    %178 = vector.load %arg14[%c1_206, %c2_207, %c0_208] : memref<6x6x16xf32, #tpu.memory_space<vmem>>, vector<1x4x16xf32>
    %179 = vector.shape_cast %178 : vector<1x4x16xf32> to vector<4x16xf32>
    %c0_209 = arith.constant 0 : index
    %c80_210 = arith.constant 80 : index
    %180 = vector.load %arg15[%c0_209, %c80_210] : memref<16x144xf32, #tpu.memory_space<vmem>>, vector<4x16xf32>
    tpu.vector_store %arg15[%c0_209, %c80_210], %179 {strides = array<i32>} : memref<16x144xf32, #tpu.memory_space<vmem>>, vector<4x16xf32>,
    %c2_211 = arith.constant 2 : index
    %c2_212 = arith.constant 2 : index
    %c0_213 = arith.constant 0 : index
    %181 = vector.load %arg14[%c2_211, %c2_212, %c0_213] : memref<6x6x16xf32, #tpu.memory_space<vmem>>, vector<1x4x16xf32>
    %182 = vector.shape_cast %181 : vector<1x4x16xf32> to vector<4x16xf32>
    %c4_214 = arith.constant 4 : index
    %c80_215 = arith.constant 80 : index
    %183 = vector.load %arg15[%c4_214, %c80_215] : memref<16x144xf32, #tpu.memory_space<vmem>>, vector<4x16xf32>
    tpu.vector_store %arg15[%c4_214, %c80_215], %182 {strides = array<i32>} : memref<16x144xf32, #tpu.memory_space<vmem>>, vector<4x16xf32>,
    %c3_216 = arith.constant 3 : index
    %c2_217 = arith.constant 2 : index
    %c0_218 = arith.constant 0 : index
    %184 = vector.load %arg14[%c3_216, %c2_217, %c0_218] : memref<6x6x16xf32, #tpu.memory_space<vmem>>, vector<1x4x16xf32>
    %185 = vector.shape_cast %184 : vector<1x4x16xf32> to vector<4x16xf32>
    %c8_219 = arith.constant 8 : index
    %c80_220 = arith.constant 80 : index
    %186 = vector.load %arg15[%c8_219, %c80_220] : memref<16x144xf32, #tpu.memory_space<vmem>>, vector<4x16xf32>
    tpu.vector_store %arg15[%c8_219, %c80_220], %185 {strides = array<i32>} : memref<16x144xf32, #tpu.memory_space<vmem>>, vector<4x16xf32>,
    %c4_221 = arith.constant 4 : index
    %c2_222 = arith.constant 2 : index
    %c0_223 = arith.constant 0 : index
    %187 = vector.load %arg14[%c4_221, %c2_222, %c0_223] : memref<6x6x16xf32, #tpu.memory_space<vmem>>, vector<1x4x16xf32>
    %188 = vector.shape_cast %187 : vector<1x4x16xf32> to vector<4x16xf32>
    %c12_224 = arith.constant 12 : index
    %c80_225 = arith.constant 80 : index
    %189 = vector.load %arg15[%c12_224, %c80_225] : memref<16x144xf32, #tpu.memory_space<vmem>>, vector<4x16xf32>
    tpu.vector_store %arg15[%c12_224, %c80_225], %188 {strides = array<i32>} : memref<16x144xf32, #tpu.memory_space<vmem>>, vector<4x16xf32>,
    %c2_226 = arith.constant 2 : index
    %c0_227 = arith.constant 0 : index
    %c0_228 = arith.constant 0 : index
    %190 = vector.load %arg14[%c2_226, %c0_227, %c0_228] : memref<6x6x16xf32, #tpu.memory_space<vmem>>, vector<1x4x16xf32>
    %191 = vector.shape_cast %190 : vector<1x4x16xf32> to vector<4x16xf32>
    %c0_229 = arith.constant 0 : index
    %c96_230 = arith.constant 96 : index
    %192 = vector.load %arg15[%c0_229, %c96_230] : memref<16x144xf32, #tpu.memory_space<vmem>>, vector<4x16xf32>
    tpu.vector_store %arg15[%c0_229, %c96_230], %191 {strides = array<i32>} : memref<16x144xf32, #tpu.memory_space<vmem>>, vector<4x16xf32>,
    %c3_231 = arith.constant 3 : index
    %c0_232 = arith.constant 0 : index
    %c0_233 = arith.constant 0 : index
    %193 = vector.load %arg14[%c3_231, %c0_232, %c0_233] : memref<6x6x16xf32, #tpu.memory_space<vmem>>, vector<1x4x16xf32>
    %194 = vector.shape_cast %193 : vector<1x4x16xf32> to vector<4x16xf32>
    %c4_234 = arith.constant 4 : index
    %c96_235 = arith.constant 96 : index
    %195 = vector.load %arg15[%c4_234, %c96_235] : memref<16x144xf32, #tpu.memory_space<vmem>>, vector<4x16xf32>
    tpu.vector_store %arg15[%c4_234, %c96_235], %194 {strides = array<i32>} : memref<16x144xf32, #tpu.memory_space<vmem>>, vector<4x16xf32>,
    %c4_236 = arith.constant 4 : index
    %c0_237 = arith.constant 0 : index
    %c0_238 = arith.constant 0 : index
    %196 = vector.load %arg14[%c4_236, %c0_237, %c0_238] : memref<6x6x16xf32, #tpu.memory_space<vmem>>, vector<1x4x16xf32>
    %197 = vector.shape_cast %196 : vector<1x4x16xf32> to vector<4x16xf32>
    %c8_239 = arith.constant 8 : index
    %c96_240 = arith.constant 96 : index
    %198 = vector.load %arg15[%c8_239, %c96_240] : memref<16x144xf32, #tpu.memory_space<vmem>>, vector<4x16xf32>
    tpu.vector_store %arg15[%c8_239, %c96_240], %197 {strides = array<i32>} : memref<16x144xf32, #tpu.memory_space<vmem>>, vector<4x16xf32>,
    %c5_241 = arith.constant 5 : index
    %c0_242 = arith.constant 0 : index
    %c0_243 = arith.constant 0 : index
    %199 = vector.load %arg14[%c5_241, %c0_242, %c0_243] : memref<6x6x16xf32, #tpu.memory_space<vmem>>, vector<1x4x16xf32>
    %200 = vector.shape_cast %199 : vector<1x4x16xf32> to vector<4x16xf32>
    %c12_244 = arith.constant 12 : index
    %c96_245 = arith.constant 96 : index
    %201 = vector.load %arg15[%c12_244, %c96_245] : memref<16x144xf32, #tpu.memory_space<vmem>>, vector<4x16xf32>
    tpu.vector_store %arg15[%c12_244, %c96_245], %200 {strides = array<i32>} : memref<16x144xf32, #tpu.memory_space<vmem>>, vector<4x16xf32>,
    %c2_246 = arith.constant 2 : index
    %c1_247 = arith.constant 1 : index
    %c0_248 = arith.constant 0 : index
    %202 = vector.load %arg14[%c2_246, %c1_247, %c0_248] : memref<6x6x16xf32, #tpu.memory_space<vmem>>, vector<1x4x16xf32>
    %203 = vector.shape_cast %202 : vector<1x4x16xf32> to vector<4x16xf32>
    %c0_249 = arith.constant 0 : index
    %c112_250 = arith.constant 112 : index
    %204 = vector.load %arg15[%c0_249, %c112_250] : memref<16x144xf32, #tpu.memory_space<vmem>>, vector<4x16xf32>
    tpu.vector_store %arg15[%c0_249, %c112_250], %203 {strides = array<i32>} : memref<16x144xf32, #tpu.memory_space<vmem>>, vector<4x16xf32>,
    %c3_251 = arith.constant 3 : index
    %c1_252 = arith.constant 1 : index
    %c0_253 = arith.constant 0 : index
    %205 = vector.load %arg14[%c3_251, %c1_252, %c0_253] : memref<6x6x16xf32, #tpu.memory_space<vmem>>, vector<1x4x16xf32>
    %206 = vector.shape_cast %205 : vector<1x4x16xf32> to vector<4x16xf32>
    %c4_254 = arith.constant 4 : index
    %c112_255 = arith.constant 112 : index
    %207 = vector.load %arg15[%c4_254, %c112_255] : memref<16x144xf32, #tpu.memory_space<vmem>>, vector<4x16xf32>
    tpu.vector_store %arg15[%c4_254, %c112_255], %206 {strides = array<i32>} : memref<16x144xf32, #tpu.memory_space<vmem>>, vector<4x16xf32>,
    %c4_256 = arith.constant 4 : index
    %c1_257 = arith.constant 1 : index
    %c0_258 = arith.constant 0 : index
    %208 = vector.load %arg14[%c4_256, %c1_257, %c0_258] : memref<6x6x16xf32, #tpu.memory_space<vmem>>, vector<1x4x16xf32>
    %209 = vector.shape_cast %208 : vector<1x4x16xf32> to vector<4x16xf32>
    %c8_259 = arith.constant 8 : index
    %c112_260 = arith.constant 112 : index
    %210 = vector.load %arg15[%c8_259, %c112_260] : memref<16x144xf32, #tpu.memory_space<vmem>>, vector<4x16xf32>
    tpu.vector_store %arg15[%c8_259, %c112_260], %209 {strides = array<i32>} : memref<16x144xf32, #tpu.memory_space<vmem>>, vector<4x16xf32>,
    %c5_261 = arith.constant 5 : index
    %c1_262 = arith.constant 1 : index
    %c0_263 = arith.constant 0 : index
    %211 = vector.load %arg14[%c5_261, %c1_262, %c0_263] : memref<6x6x16xf32, #tpu.memory_space<vmem>>, vector<1x4x16xf32>
    %212 = vector.shape_cast %211 : vector<1x4x16xf32> to vector<4x16xf32>
    %c12_264 = arith.constant 12 : index
    %c112_265 = arith.constant 112 : index
    %213 = vector.load %arg15[%c12_264, %c112_265] : memref<16x144xf32, #tpu.memory_space<vmem>>, vector<4x16xf32>
    tpu.vector_store %arg15[%c12_264, %c112_265], %212 {strides = array<i32>} : memref<16x144xf32, #tpu.memory_space<vmem>>, vector<4x16xf32>,
    %c2_266 = arith.constant 2 : index
    %c2_267 = arith.constant 2 : index
    %c0_268 = arith.constant 0 : index
    %214 = vector.load %arg14[%c2_266, %c2_267, %c0_268] : memref<6x6x16xf32, #tpu.memory_space<vmem>>, vector<1x4x16xf32>
    %215 = vector.shape_cast %214 : vector<1x4x16xf32> to vector<4x16xf32>
    %c0_269 = arith.constant 0 : index
    %c128_270 = arith.constant 128 : index
    %216 = vector.load %arg15[%c0_269, %c128_270] : memref<16x144xf32, #tpu.memory_space<vmem>>, vector<4x16xf32>
    tpu.vector_store %arg15[%c0_269, %c128_270], %215 {strides = array<i32>} : memref<16x144xf32, #tpu.memory_space<vmem>>, vector<4x16xf32>,
    %c3_271 = arith.constant 3 : index
    %c2_272 = arith.constant 2 : index
    %c0_273 = arith.constant 0 : index
    %217 = vector.load %arg14[%c3_271, %c2_272, %c0_273] : memref<6x6x16xf32, #tpu.memory_space<vmem>>, vector<1x4x16xf32>
    %218 = vector.shape_cast %217 : vector<1x4x16xf32> to vector<4x16xf32>
    %c4_274 = arith.constant 4 : index
    %c128_275 = arith.constant 128 : index
    %219 = vector.load %arg15[%c4_274, %c128_275] : memref<16x144xf32, #tpu.memory_space<vmem>>, vector<4x16xf32>
    tpu.vector_store %arg15[%c4_274, %c128_275], %218 {strides = array<i32>} : memref<16x144xf32, #tpu.memory_space<vmem>>, vector<4x16xf32>,
    %c4_276 = arith.constant 4 : index
    %c2_277 = arith.constant 2 : index
    %c0_278 = arith.constant 0 : index
    %220 = vector.load %arg14[%c4_276, %c2_277, %c0_278] : memref<6x6x16xf32, #tpu.memory_space<vmem>>, vector<1x4x16xf32>
    %221 = vector.shape_cast %220 : vector<1x4x16xf32> to vector<4x16xf32>
    %c8_279 = arith.constant 8 : index
    %c128_280 = arith.constant 128 : index
    %222 = vector.load %arg15[%c8_279, %c128_280] : memref<16x144xf32, #tpu.memory_space<vmem>>, vector<4x16xf32>
    tpu.vector_store %arg15[%c8_279, %c128_280], %221 {strides = array<i32>} : memref<16x144xf32, #tpu.memory_space<vmem>>, vector<4x16xf32>,
    %c5_281 = arith.constant 5 : index
    %c2_282 = arith.constant 2 : index
    %c0_283 = arith.constant 0 : index
    %223 = vector.load %arg14[%c5_281, %c2_282, %c0_283] : memref<6x6x16xf32, #tpu.memory_space<vmem>>, vector<1x4x16xf32>
    %224 = vector.shape_cast %223 : vector<1x4x16xf32> to vector<4x16xf32>
    %c12_284 = arith.constant 12 : index
    %c128_285 = arith.constant 128 : index
    %225 = vector.load %arg15[%c12_284, %c128_285] : memref<16x144xf32, #tpu.memory_space<vmem>>, vector<4x16xf32>
    tpu.vector_store %arg15[%c12_284, %c128_285], %224 {strides = array<i32>} : memref<16x144xf32, #tpu.memory_space<vmem>>, vector<4x16xf32>,
    %c0_286 = arith.constant 0 : index
    %c0_287 = arith.constant 0 : index
    %226 = vector.load %arg15[%c0_286, %c0_287] : memref<16x144xf32, #tpu.memory_space<vmem>>, vector<16x144xf32>
    %c0_288 = arith.constant 0 : index
    %c0_289 = arith.constant 0 : index
    %227 = vector.load %arg7[%c0_288, %c0_289] : memref<144x16xf32, #tpu.memory_space<vmem>>, vector<144x16xf32>
    %cst_290 = arith.constant dense<0.000000e+00> : vector<16x16xf32>
    %228 = tpu.matmul %226, %227, %cst_290 {dimension_numbers = #tpu.dot_dimension_numbers<[1], [0], [0], [1], [0, 0, 1, 1], [], []>} : vector<16x144xf32>, vector<144x16xf32>, vector<16x16xf32> -> vector<16x16xf32>
    %c0_291 = arith.constant 0 : index
    %c0_292 = arith.constant 0 : index
    %229 = vector.load %arg8[%c0_291, %c0_292] : memref<1x16xf32, #tpu.memory_space<vmem>>, vector<1x16xf32>
    %230 = vector.broadcast %229 : vector<1x16xf32> to vector<16x16xf32>
    %231 = arith.addf %228, %230 : vector<16x16xf32>
    %232 = arith.addf %3, %231 : vector<16x16xf32>
    %cst_293 = arith.constant 0.707106769 : f32
    %233 = vector.broadcast %cst_293 : f32 to vector<16x16xf32>
    %234 = arith.mulf %232, %233 : vector<16x16xf32>
    %c0_294 = arith.constant 0 : index
    %c0_295 = arith.constant 0 : index
    %c0_296 = arith.constant 0 : index
    %235 = vector.load %arg11[%c0_294, %c0_295, %c0_296] : memref<1x16x16xf32, #tpu.memory_space<vmem>>, vector<1x16x16xf32>
    %236 = vector.shape_cast %235 : vector<1x16x16xf32> to vector<16x16xf32>
    %237 = vector.shape_cast %234 : vector<16x16xf32> to vector<1x16x16xf32>
    tpu.vector_store %arg11[%c0_294, %c0_295, %c0_296], %237 {strides = array<i32>} : memref<1x16x16xf32, #tpu.memory_space<vmem>>, vector<1x16x16xf32>,
    return
  }
  func.func @transform_0(%arg0: i32) -> (i32, i32, i32) {
    %c0_i32 = arith.constant 0 : i32
    %c0_i32_0 = arith.constant 0 : i32
    %c0_i32_1 = arith.constant 0 : i32
    return %arg0, %c0_i32, %c0_i32_0 : i32, i32, i32
  }
  func.func @transform_1(%arg0: i32) -> (i32, i32) {
    %c0_i32 = arith.constant 0 : i32
    %c0_i32_0 = arith.constant 0 : i32
    %c0_i32_1 = arith.constant 0 : i32
    return %c0_i32, %c0_i32_0 : i32, i32
  }
  func.func @transform_2(%arg0: i32) -> (i32, i32) {
    %c0_i32 = arith.constant 0 : i32
    %c0_i32_0 = arith.constant 0 : i32
    %c0_i32_1 = arith.constant 0 : i32
    return %c0_i32, %c0_i32_0 : i32, i32
  }
  func.func @transform_3(%arg0: i32) -> (i32, i32) {
    %c0_i32 = arith.constant 0 : i32
    %c0_i32_0 = arith.constant 0 : i32
    %c0_i32_1 = arith.constant 0 : i32
    return %c0_i32, %c0_i32_0 : i32, i32
  }
  func.func @transform_4(%arg0: i32) -> (i32, i32) {
    %c0_i32 = arith.constant 0 : i32
    %c0_i32_0 = arith.constant 0 : i32
    %c0_i32_1 = arith.constant 0 : i32
    return %c0_i32, %c0_i32_0 : i32, i32
  }
  func.func @transform_5(%arg0: i32) -> (i32, i32) {
    %c0_i32 = arith.constant 0 : i32
    %c0_i32_0 = arith.constant 0 : i32
    %c0_i32_1 = arith.constant 0 : i32
    return %c0_i32, %c0_i32_0 : i32, i32
  }
  func.func @transform_6(%arg0: i32) -> (i32, i32) {
    %c0_i32 = arith.constant 0 : i32
    %c0_i32_0 = arith.constant 0 : i32
    %c0_i32_1 = arith.constant 0 : i32
    return %c0_i32, %c0_i32_0 : i32, i32
  }
  func.func @transform_7(%arg0: i32) -> (i32, i32) {
    %c0_i32 = arith.constant 0 : i32
    %c0_i32_0 = arith.constant 0 : i32
    %c0_i32_1 = arith.constant 0 : i32
    return %c0_i32, %c0_i32_0 : i32, i32
  }
  func.func @transform_8(%arg0: i32) -> (i32, i32) {
    %c0_i32 = arith.constant 0 : i32
    %c0_i32_0 = arith.constant 0 : i32
    %c0_i32_1 = arith.constant 0 : i32
    return %c0_i32, %c0_i32_0 : i32, i32
  }
  func.func @transform_9(%arg0: i32) -> (i32, i32) {
    %c0_i32 = arith.constant 0 : i32
    %c0_i32_0 = arith.constant 0 : i32
    %c0_i32_1 = arith.constant 0 : i32
    return %c0_i32, %c0_i32_0 : i32, i32
  }
  func.func @transform_10(%arg0: i32) -> (i32, i32, i32) {
    %c0_i32 = arith.constant 0 : i32
    %c0_i32_0 = arith.constant 0 : i32
    %c0_i32_1 = arith.constant 0 : i32
    return %arg0, %c0_i32, %c0_i32_0 : i32, i32, i32
  }
}

module attributes {stable_mosaic.version = 11 : i64} {
  func.func @_head_kernel(%arg0: memref<2x256xf32, #tpu.memory_space<vmem>>, %arg1: memref<256x16xf32, #tpu.memory_space<vmem>>, %arg2: memref<1x16xf32, #tpu.memory_space<vmem>>, %arg3: memref<16x2xf32, #tpu.memory_space<vmem>>, %arg4: memref<1x2xf32, #tpu.memory_space<vmem>>, %arg5: memref<2x1xi32, #tpu.memory_space<vmem>>, %arg6: memref<2x1xf32, #tpu.memory_space<vmem>>) attributes {dimension_semantics = [], scalar_prefetch = 0 : i64, scratch_operands = 0 : i64, tpu.core_type = #tpu.core_type<tc>} {
    %c0 = arith.constant 0 : index
    %c0_0 = arith.constant 0 : index
    %0 = vector.load %arg0[%c0, %c0_0] : memref<2x256xf32, #tpu.memory_space<vmem>>, vector<2x256xf32>
    %cst = arith.constant 0.000000e+00 : f32
    %1 = vector.broadcast %cst : f32 to vector<2x256xf32>
    %2 = arith.cmpf ogt, %0, %1 : vector<2x256xf32>
    %cst_1 = arith.constant 2.000000e-01 : f32
    %3 = vector.broadcast %cst_1 : f32 to vector<2x256xf32>
    %4 = arith.mulf %3, %0 : vector<2x256xf32>
    %5 = arith.select %2, %0, %4 : vector<2x256xi1>, vector<2x256xf32>
    %c0_2 = arith.constant 0 : index
    %c0_3 = arith.constant 0 : index
    %6 = vector.load %arg1[%c0_2, %c0_3] : memref<256x16xf32, #tpu.memory_space<vmem>>, vector<256x16xf32>
    %cst_4 = arith.constant dense<0.000000e+00> : vector<2x16xf32>
    %7 = tpu.matmul %5, %6, %cst_4 {dimension_numbers = #tpu.dot_dimension_numbers<[1], [0], [0], [1], [0, 0, 1, 1], [], []>} : vector<2x256xf32>, vector<256x16xf32>, vector<2x16xf32> -> vector<2x16xf32>
    %c0_5 = arith.constant 0 : index
    %c0_6 = arith.constant 0 : index
    %8 = vector.load %arg2[%c0_5, %c0_6] : memref<1x16xf32, #tpu.memory_space<vmem>>, vector<1x16xf32>
    %9 = vector.broadcast %8 : vector<1x16xf32> to vector<2x16xf32>
    %10 = arith.addf %7, %9 : vector<2x16xf32>
    %cst_7 = arith.constant 0.000000e+00 : f32
    %11 = vector.broadcast %cst_7 : f32 to vector<2x16xf32>
    %12 = arith.cmpf ogt, %10, %11 : vector<2x16xf32>
    %cst_8 = arith.constant 2.000000e-01 : f32
    %13 = vector.broadcast %cst_8 : f32 to vector<2x16xf32>
    %14 = arith.mulf %13, %10 : vector<2x16xf32>
    %15 = arith.select %12, %10, %14 : vector<2x16xi1>, vector<2x16xf32>
    %c0_9 = arith.constant 0 : index
    %c0_10 = arith.constant 0 : index
    %16 = vector.load %arg3[%c0_9, %c0_10] : memref<16x2xf32, #tpu.memory_space<vmem>>, vector<16x2xf32>
    %cst_11 = arith.constant dense<0.000000e+00> : vector<2x2xf32>
    %17 = tpu.matmul %15, %16, %cst_11 {dimension_numbers = #tpu.dot_dimension_numbers<[1], [0], [0], [1], [0, 0, 1, 1], [], []>} : vector<2x16xf32>, vector<16x2xf32>, vector<2x2xf32> -> vector<2x2xf32>
    %c0_12 = arith.constant 0 : index
    %c0_13 = arith.constant 0 : index
    %18 = vector.load %arg4[%c0_12, %c0_13] : memref<1x2xf32, #tpu.memory_space<vmem>>, vector<1x2xf32>
    %19 = vector.broadcast %18 : vector<1x2xf32> to vector<2x2xf32>
    %20 = arith.addf %17, %19 : vector<2x2xf32>
    %21 = tpu.iota {dimensions = array<i32: 1>} : vector<2x2xi32>
    %c0_14 = arith.constant 0 : index
    %c0_15 = arith.constant 0 : index
    %22 = vector.load %arg5[%c0_14, %c0_15] : memref<2x1xi32, #tpu.memory_space<vmem>>, vector<2x1xi32>
    %23 = vector.broadcast %22 : vector<2x1xi32> to vector<2x2xi32>
    %24 = arith.cmpi eq, %21, %23 : vector<2x2xi32>
    %cst_16 = arith.constant 0.000000e+00 : f32
    %25 = vector.broadcast %cst_16 : f32 to vector<2x2xf32>
    %26 = arith.select %24, %20, %25 : vector<2x2xi1>, vector<2x2xf32>
    %cst_17 = arith.constant dense<0.000000e+00> : vector<2xf32>
    %27 = vector.multi_reduction <add>, %26, %cst_17 [1] : vector<2x2xf32> to vector<2xf32>
    %28 = vector.shape_cast %27 : vector<2xf32> to vector<2x1xf32>
    %c0_18 = arith.constant 0 : index
    %c0_19 = arith.constant 0 : index
    %29 = vector.load %arg6[%c0_18, %c0_19] : memref<2x1xf32, #tpu.memory_space<vmem>>, vector<2x1xf32>
    tpu.vector_store %arg6[%c0_18, %c0_19], %28 {strides = array<i32>} : memref<2x1xf32, #tpu.memory_space<vmem>>, vector<2x1xf32>,
    return
  }
}

</mosaic_0001>

<bundles_post_ra>
// kernel: discriminator_forward.7
= control target key start
LH: loop header
LB: loop body
LE: loop exit
PB: predicated region body
PF: predicated region fallthrough
CT: control target
= control target key end

     0   :  { %v340_v12 = vmov 1983009808   ;;  %v70_v14 = vlaneseq  ;;  %v341_v62 = vmov 0.0|0.0   ;;  %vm342_vm1 = vmmov 0   ;;  %s499_s1 = inlined_call_operand.vmem [shape: f32[256,16], index: 1, kind: input, shape index: {}]   ;;  %s500_s0 = inlined_call_operand.vmem [shape: f32[2,256], index: 0, kind: input, shape index: {}]   ;;  %s501_s3 = inlined_call_operand.vmem [shape: f32[16,2], index: 3, kind: input, shape index: {}]   ;;  %s502_s5 = inlined_call_operand.vmem [shape: s32[2,1], index: 5, kind: input, shape index: {}]   ;;  %s503_s2 = inlined_call_operand.vmem [shape: f32[1,16], index: 2, kind: input, shape index: {}]   ;;  %s504_s4 = inlined_call_operand.vmem [shape: f32[1,2], index: 4, kind: input, shape index: {}]   ;;  %s505_s6 = inlined_call_operand.vmem [shape: f32[2,1], index: 6, kind: output, shape index: {}]  }
   0x1   :  { %v43_v0 = vld [vmem:[%s499_s1 + $0x80] sm:$0xff]  ;;  %v44_v1 = vld [vmem:[%s499_s1 + $0x88] sm:$0xff]  ;;  %v45_v5 = vld [vmem:[%s499_s1 + $0x90] sm:$0xff]  ;;  %v68_v13 = vunpack.c.l.s4 %v340_v12  ;;  %331 = vmatprep.subr.bf16.mxu1 %v341_v62  ;;  %v343_v63 = vmov 0.0   ;;  %vm159_vm3 = vcmask 130048   ;;  %vm241_vm5 = vcmask 9216  }
   0x2   :  { %v27_v2 = vld [vmem:[%s499_s1] sm:$0xff]  ;;  %v299_v3 = vpack.c.bf16 %v44_v1, %v43_v0  ;;  %v28_v4 = vld [vmem:[%s499_s1 + $0x8] sm:$0xff]  ;;  %v46_v6 = vld [vmem:[%s499_s1 + $0x98] sm:$0xff]  ;;  %v71_v23 = vshrl.u32 %v70_v14, 7  ;;  %296 = vmatprep.mubr.msk.f32.mxu1 %vm342_vm1, %v343_v63  ;;  %v344_v0 = vmov 0   ;;  %vm245_vm6 = vcmask 1024  }
   0x3   :  { %v301_v7 = vpack.c.bf16 %v28_v4, %v27_v2  ;;  %v303_v8 = vpack.c.bf16 %v46_v6, %v45_v5  ;;  %v29_v9 = vld [vmem:[%s499_s1 + $0x10] sm:$0xff]  ;;  %v30_v10 = vld [vmem:[%s499_s1 + $0x18] sm:$0xff]  ;;  %v47_v11 = vld [vmem:[%s499_s1 + $0xa0] sm:$0xff]  ;;  %v69_v22 = vunpack.c.0.s8 %v68_v13  ;;  %339 = vset.pattern.permute.xlu0 %v344_v0 }
   0x4   :  { %300 = vmatprep.subr.bf16.mxu0 %v299_v3  ;;  %v48_v15 = vld [vmem:[%s499_s1 + $0xa8] sm:$0xff]  ;;  %v305_v16 = vpack.c.bf16 %v30_v10, %v29_v9  ;;  %v31_v18 = vld [vmem:[%s499_s1 + $0x20] sm:$0xff]  ;;  %v49_v20 = vld [vmem:[%s499_s1 + $0xb0] sm:$0xff]  ;;  %v234_v9 = vand.u32 127, %v70_v14 }
   0x5   :  { %302 = vmatpush3.bf16.msra.mxu0 %v301_v7  ;;  %v307_v17 = vpack.c.bf16 %v48_v15, %v47_v11  ;;  %v32_v19 = vld [vmem:[%s499_s1 + $0x28] sm:$0xff]  ;;  %v50_v21 = vld [vmem:[%s499_s1 + $0xb8] sm:$0xff]  ;;  %v33_v26 = vld [vmem:[%s499_s1 + $0x30] sm:$0xff]  ;;  %v72_v31 = vsub.s32 %v69_v22, %v71_v23 }
   0x6   :  { %304 = vmatprep.subr.bf16.mxu0 %v303_v8  ;;  %v309_v24 = vpack.c.bf16 %v32_v19, %v31_v18  ;;  %v311_v25 = vpack.c.bf16 %v50_v21, %v49_v20  ;;  %v34_v27 = vld [vmem:[%s499_s1 + $0x38] sm:$0xff]  ;;  %v51_v28 = vld [vmem:[%s499_s1 + $0xc0] sm:$0xff]  ;;  %v52_v29 = vld [vmem:[%s499_s1 + $0xc8] sm:$0xff] }
   0x7   :  { %v23_v30 = vld [vmem:[%s500_s0] sm:$0xf]  ;;  %v313_v33 = vpack.c.bf16 %v34_v27, %v33_v26  ;;  %v315_v34 = vpack.c.bf16 %v52_v29, %v51_v28  ;;  %v36_v36 = vld [vmem:[%s499_s1 + $0x48] sm:$0xff]  ;;  %v53_v38 = vld [vmem:[%s499_s1 + $0xd0] sm:$0xff] }
   0x8   :  { %vm24_vm0 = vcmp.gt.f32.partialorder %v23_v30, 0.0  ;;  %v25_v32 = vmul.f32 0.2, %v23_v30  ;;  %v35_v35 = vld [vmem:[%s499_s1 + $0x40] sm:$0xff]  ;;  %v54_v39 = vld [vmem:[%s499_s1 + $0xd8] sm:$0xff]  ;;  %v37_v44 = vld [vmem:[%s499_s1 + $0x50] sm:$0xff] }
   0x9   :  { %306 = vmatpush3.bf16.msra.mxu0 %v305_v16  ;;  %v317_v41 = vpack.c.bf16 %v36_v36, %v35_v35  ;;  %v319_v43 = vpack.c.bf16 %v54_v39, %v53_v38  ;;  %v38_v45 = vld [vmem:[%s499_s1 + $0x58] sm:$0xff]  ;;  %v55_v46 = vld [vmem:[%s499_s1 + $0xe0] sm:$0xff]  ;;  %v56_v47 = vld [vmem:[%s499_s1 + $0xe8] sm:$0xff] }
   0xa   :  { %308 = vmatprep.subr.bf16.mxu0 %v307_v17  ;;  %v26_v37 = vsel %vm24_vm0, %v23_v30, %v25_v32  ;;  %v321_v48 = vpack.c.bf16 %v38_v45, %v37_v44  ;;  %v323_v49 = vpack.c.bf16 %v56_v47, %v55_v46  ;;  %v39_v50 = vld [vmem:[%s499_s1 + $0x60] sm:$0xff]  ;;  %v40_v51 = vld [vmem:[%s499_s1 + $0x68] sm:$0xff]  ;;  %v57_v52 = vld [vmem:[%s499_s1 + $0xf0] sm:$0xff] }
   0xb   :  { %v73_v40 = vrot.slane %v26_v37, %v72_v31  ;;  %v58_v53 = vld [vmem:[%s499_s1 + $0xf8] sm:$0xff]  ;;  %v325_v54 = vpack.c.bf16 %v40_v51, %v39_v50  ;;  %v41_v56 = vld [vmem:[%s499_s1 + $0x70] sm:$0xff]  ;;  %v150_v59 = vld [vmem:[%s501_s3] sm:$0xff] }
   0xc   :  { %v327_v55 = vpack.c.bf16 %v58_v53, %v57_v52  ;;  %v42_v57 = vld [vmem:[%s499_s1 + $0x78] sm:$0xff]  ;;  %v151_v60 = vld [vmem:[%s501_s3 + $0x8] sm:$0xff]  ;;  %v235_v1 = vld [vmem:[%s502_s5] sm:$0x3] }
   0xd   :  { %310 = vmatpush3.bf16.msra.mxu0 %v309_v24  ;;  %v74_v42 = vcombine.high %v73_v40, %v73_v40  ;;  %v329_v58 = vpack.c.bf16 %v42_v57, %v41_v56  ;;  %v332_v61 = vpack.c.bf16 %v151_v60, %v150_v59  ;;  %237 = vperm.xlu0 %339, %v235_v1   ;;  %v251_v3 = vld [vmem:[%s503_s2] ss:$0 sm:$0xff] }
   0xe   :  { %312 = vmatprep.subr.bf16.mxu0 %v311_v25  ;;  %v252_v11 = vld [vmem:[%s504_s4] ss:$0 sm:$0xff] }
   0xf   :  { %141 = vmatprep.mubr.f32.mxu0 %v74_v42  ;;  %333 = vmatpush3.bf16.msra.mxu1 %v332_v61 }
  0x11   :  { %314 = vmatpush3.bf16.msra.mxu0 %v313_v33 }
  0x12   :  { %316 = vmatprep.subr.bf16.mxu0 %v315_v34 }
  0x15   :  { %318 = vmatpush3.bf16.msra.mxu0 %v317_v41 }
  0x16   :  { %320 = vmatprep.subr.bf16.mxu0 %v319_v43 }
  0x19   :  { %322 = vmatpush3.bf16.msra.mxu0 %v321_v48 }
  0x1a   :  { %324 = vmatprep.subr.bf16.mxu0 %v323_v49 }
  0x1d   :  { %326 = vmatpush3.bf16.msra.mxu0 %v325_v54 }
  0x1e   :  { %328 = vmatprep.subr.bf16.mxu0 %v327_v55 }
  0x21   :  { %330 = vmatpush3.bf16.msra.mxu0 %v329_v58 }
  0x24   :  { %142 = vmatmul.mubr.f32.vlgmr.msra.gmra.mrb[0].mxu0 %v73_v40 }
  0x8c   :  { %v238_v10 = vpop.permute.xlu0 %237 }
  0x8d   :  { %vm239_vm4 = vcmp.eq.s32.totalorder %v234_v9, %v238_v10 }
  0xf7   :  { %v286_v2 = vpop.f32.mrb[0].mxu0 }
  0xf8   :  { %v287_v4 = vpop.f32.mrb[1].mxu0 }
  0xf9   :  { %v288_v5 = vadd.f32 %v287_v4, %v286_v2 }
  0xfb   :  { %v144_v6 = vadd.f32 %v288_v5, %v251_v3 }
  0xfd   :  { %v148_v7 = vmul.f32 0.2, %v144_v6  ;;  %vm147_vm2 = vcmp.gt.f32.partialorder %v144_v6, 0.0 }
  0xff   :  { %v149_v8 = vsel %vm147_vm2, %v144_v6, %v148_v7 }
 0x100   :  { %297 = vmatmul.mubr.msk.f32.vlgmr.msra.gmra.mrb[0].mxu1 %vm159_vm3, %v149_v8 }
 0x1d3   :  { %v229_v12 = vpop.f32.mrb[0].mxu1 }
 0x1d4   :  { %v230_v13 = vadd.f32 %v252_v11, %v229_v12  ;;  %v298_v15 = vpop.f32.mrb[1].mxu1 }
 0x1d6   :  { %v240_v16 = vsel %vm239_vm4, %v230_v13, 0.0 }
 0x1d7   :  { %v242_v17 = vsel %vm241_vm5, %v240_v16, 0.0 }
 0x1d8   :  { %243 = vadd.xlane.f32.xlu0 %v242_v17 }
 0x265   :  { %v244_v18 = vpop.xlane.xlu0 %243 }
 0x266   :  { %246 = vst.msk [vmem:[%s505_s6] sm:$0x3] %vm245_vm6, %v244_v18 }

// kernel: discriminator_forward.4
= control target key start
LH: loop header
LB: loop body
LE: loop exit
PB: predicated region body
PF: predicated region fallthrough
CT: control target
= control target key end

     0   :  { %s2557_s12 = smov 0   ;;  %s3644_s0 = inlined_call_operand.vmem [shape: f32[2,256,3], index: 0, kind: input, shape index: {}]   ;;  %s3645_s1 = inlined_call_operand.vmem [shape: f32[27,8], index: 1, kind: input, shape index: {}]   ;;  %s3646_s2 = inlined_call_operand.vmem [shape: f32[1,8], index: 2, kind: input, shape index: {}]   ;;  %s3647_s3 = inlined_call_operand.vmem [shape: f32[2,256,8], index: 3, kind: output, shape index: {}]  }
   0x1 LB: > { %s2348_s13 = sadd.s32 4294967295, %s2525_s12   ;;  %p2352_p0 = scmp.ge.s32.totalorder %s2525_s12, 1  ;;  %s2525_s12 = sphi %s2557_s12, %s13_s12  }
   0x2   : > { %p137_p1 = scmp.lt.s32.totalorder %s2525_s12, 3 }
   0x4   : > { %p138_p2 = pnand %p2352_p0, %p137_p1 }
   0x5   : > { %vm203_vm0 = vcmask (!%p138_p2), 23552   ;;  %vm212_vm1 = vcmask (!%p138_p2), 16384   ;;  %p2567_p3 = scmp.lt.s32.totalorder (!%p138_p2), %s2348_s13, 1  ;;  %vm206_vm2 = vcmask (!%p138_p2), 17408   ;;  %v2527_v0 = vmov (!%p138_p2), 0.0   ;;  %s2528_s19 = smov (!%p138_p2), 3  }
   0x6   : > { %141 = sbr.rel (%p138_p2) target bundleno = 882 (0x372), region = 32  ;;  %204 = vst.msk [vmem:[#allocation2] sm:$0xff] (!%p138_p2), %vm203_vm0, %v2527_v0  ;;  %205 = vst.msk [vmem:[#allocation2 + $0x8] sm:$0xff] (!%p138_p2), %vm203_vm0, %v2527_v0  ;;  %s2529_s20 = smov (!%p138_p2), 6   ;;  %vm506_vm3 = vcmask (!%p138_p2), 48152   ;;  %vm699_vm4 = vcmask (!%p138_p2), 72752  }
   0x7   : > { %209 = vst.msk [vmem:[#allocation2 + $0x198] sm:$0xff] (!%p138_p2), %vm203_vm0, %v2527_v0  ;;  %210 = vst.msk [vmem:[#allocation2 + $0x1a0] sm:$0xff] (!%p138_p2), %vm203_vm0, %v2527_v0  ;;  %s2530_s21 = smov (!%p138_p2), 9   ;;  %s2531_s22 = smov (!%p138_p2), 12   ;;  %vm2031_vm5 = vcmask (!%p138_p2), 1042432   ;;  %vm2536_vm6 = vmmov (!%p138_p2), 1  }
   0x8   : > { %214 = vst.msk [vmem:[#allocation2 + $0x18] sm:$0x1] (!%p138_p2), %vm212_vm1, %v2527_v0  ;;  %215 = vst.msk [vmem:[#allocation2 + $0x30] sm:$0x1] (!%p138_p2), %vm212_vm1, %v2527_v0  ;;  %s2532_s23 = smov (!%p138_p2), 15   ;;  %s2533_s24 = smov (!%p138_p2), 18  }
   0x9   : > { %216 = vst.msk [vmem:[#allocation2 + $0x48] sm:$0x1] (!%p138_p2), %vm212_vm1, %v2527_v0  ;;  %217 = vst.msk [vmem:[#allocation2 + $0x60] sm:$0x1] (!%p138_p2), %vm212_vm1, %v2527_v0  ;;  %s2534_s25 = smov (!%p138_p2), 21   ;;  %s2535_s26 = smov (!%p138_p2), 24  }
   0xa   : > { %218 = vst.msk [vmem:[#allocation2 + $0x78] sm:$0x1] (!%p138_p2), %vm212_vm1, %v2527_v0  ;;  %219 = vst.msk [vmem:[#allocation2 + $0x90] sm:$0x1] (!%p138_p2), %vm212_vm1, %v2527_v0  ;;  %vm892_vm8 = vcmask (!%p138_p2), 97352   ;;  %vm1085_vm9 = vcmask (!%p138_p2), 121952  }
   0xb   : > { %220 = vst.msk [vmem:[#allocation2 + $0xa8] sm:$0x1] (!%p138_p2), %vm212_vm1, %v2527_v0  ;;  %221 = vst.msk [vmem:[#allocation2 + $0xc0] sm:$0x1] (!%p138_p2), %vm212_vm1, %v2527_v0  ;;  %vm1278_vm10 = vcmask (!%p138_p2), 146552   ;;  %vm1472_vm11 = vcmask (!%p138_p2), 171152  }
   0xc   : > { %222 = vst.msk [vmem:[#allocation2 + $0xd8] sm:$0x1] (!%p138_p2), %vm212_vm1, %v2527_v0  ;;  %223 = vst.msk [vmem:[#allocation2 + $0xf0] sm:$0x1] (!%p138_p2), %vm212_vm1, %v2527_v0  ;;  %vm1665_vm12 = vcmask (!%p138_p2), 195752   ;;  %vm1858_vm13 = vcmask (!%p138_p2), 220352  }
   0xd   : > { %224 = vst.msk [vmem:[#allocation2 + $0x108] sm:$0x1] %vm212_vm1, %v2527_v0  ;;  %225 = vst.msk [vmem:[#allocation2 + $0x120] sm:$0x1] %vm212_vm1, %v2527_v0  ;;  %s3650_s13 = smov (!%p2567_p3, %s2348_s13), 1  ;;  %v346_v7 = vld [vmem:[#allocation2 + $0x1] sm:$0xff] }
   0xe   : > { %226 = vst.msk [vmem:[#allocation2 + $0x138] sm:$0x1] %vm212_vm1, %v2527_v0  ;;  %227 = vst.msk [vmem:[#allocation2 + $0x150] sm:$0x1] %vm212_vm1, %v2527_v0  ;;  %s2393_s15 = sshll.u32 %s3650_s13, 8  ;;  %410 = vrot.lane.b32.xlu0 %v346_v7, %s2528_s19  ;;  %v283_v48 = vld [vmem:[#allocation2 + $0x8] sm:$0xff] }
   0xf   : > { %228 = vst.msk [vmem:[#allocation2 + $0x168] sm:$0x1] %vm212_vm1, %v2527_v0  ;;  %229 = vst.msk [vmem:[#allocation2 + $0x180] sm:$0x1] %vm212_vm1, %v2527_v0  ;;  %s2625_s18 = scalar_lea.vmem %s3644_s0, %s2393_s15  ;;  %vm1934_vm14 = vcmask 220160   ;;  %s3508_s14 = scalar_lea.vmem %s3647_s3, %s2393_s15  ;;  %vm2260_vm15 = vcmask 64512  }
  0x10   : > { %232 = vst.msk [vmem:[#allocation2 + $0x29] sm:$0x1] %vm212_vm1, %v2527_v0  ;;  %233 = vst.msk [vmem:[#allocation2 + $0x41] sm:$0x1] %vm212_vm1, %v2527_v0  ;;  %v171_v1 = vld [vmem:[%s2625_s18] sm:$0xff]  ;;  %v172_v2 = vld [vmem:[%s2625_s18 + $0x8] sm:$0xff] }
  0x11   : > { %234 = vst.msk [vmem:[#allocation2 + $0x59] sm:$0x1] %vm212_vm1, %v2527_v0  ;;  %235 = vst.msk [vmem:[#allocation2 + $0x71] sm:$0x1] %vm212_vm1, %v2527_v0  ;;  %v173_v3 = vld [vmem:[%s2625_s18 + $0x10] sm:$0xff]  ;;  %v174_v4 = vld [vmem:[%s2625_s18 + $0x18] sm:$0xff] }
  0x12   : > { %236 = vst.msk [vmem:[#allocation2 + $0x89] sm:$0x1] %vm212_vm1, %v2527_v0  ;;  %237 = vst.msk [vmem:[#allocation2 + $0xa1] sm:$0x1] %vm212_vm1, %v2527_v0  ;;  %v175_v5 = vld [vmem:[%s2625_s18 + $0x20] sm:$0xff]  ;;  %v176_v6 = vld [vmem:[%s2625_s18 + $0x28] sm:$0xff] }
  0x13   : > { %238 = vst.msk [vmem:[#allocation2 + $0xb9] sm:$0x1] %vm212_vm1, %v2527_v0  ;;  %239 = vst.msk [vmem:[#allocation2 + $0xd1] sm:$0x1] %vm212_vm1, %v2527_v0  ;;  %v177_v9 = vld [vmem:[%s2625_s18 + $0x30] sm:$0xff]  ;;  %v178_v10 = vld [vmem:[%s2625_s18 + $0x38] sm:$0xff] }
  0x14   : > { %240 = vst.msk [vmem:[#allocation2 + $0xe9] sm:$0x1] %vm212_vm1, %v2527_v0  ;;  %241 = vst.msk [vmem:[#allocation2 + $0x101] sm:$0x1] %vm212_vm1, %v2527_v0  ;;  %v179_v11 = vld [vmem:[%s2625_s18 + $0x40] sm:$0xff]  ;;  %v180_v12 = vld [vmem:[%s2625_s18 + $0x48] sm:$0xff] }
  0x15   : > { %242 = vst.msk [vmem:[#allocation2 + $0x119] sm:$0x1] %vm212_vm1, %v2527_v0  ;;  %243 = vst.msk [vmem:[#allocation2 + $0x131] sm:$0x1] %vm212_vm1, %v2527_v0  ;;  %v181_v13 = vld [vmem:[%s2625_s18 + $0x50] sm:$0xff]  ;;  %v182_v14 = vld [vmem:[%s2625_s18 + $0x58] sm:$0xff] }
  0x16   : > { %244 = vst.msk [vmem:[#allocation2 + $0x149] sm:$0x1] %vm212_vm1, %v2527_v0  ;;  %245 = vst.msk [vmem:[#allocation2 + $0x161] sm:$0x1] %vm212_vm1, %v2527_v0  ;;  %v183_v15 = vld [vmem:[%s2625_s18 + $0x60] sm:$0xff]  ;;  %v184_v16 = vld [vmem:[%s2625_s18 + $0x68] sm:$0xff] }
  0x17   : > { %246 = vst.msk [vmem:[#allocation2 + $0x179] sm:$0x1] %vm212_vm1, %v2527_v0  ;;  %247 = vst.msk [vmem:[#allocation2 + $0x191] sm:$0x1] %vm212_vm1, %v2527_v0  ;;  %v185_v17 = vld [vmem:[%s2625_s18 + $0x70] sm:$0xff]  ;;  %v186_v18 = vld [vmem:[%s2625_s18 + $0x78] sm:$0xff] }
  0x18   : > { %207 = vst.msk [vmem:[#allocation2 + $0x10] sm:$0x3] %vm206_vm2, %v2527_v0  ;;  %211 = vst.msk [vmem:[#allocation2 + $0x1a8] sm:$0x3] %vm206_vm2, %v2527_v0  ;;  %v187_v19 = vld [vmem:[%s2625_s18 + $0x80] sm:$0xff]  ;;  %v188_v20 = vld [vmem:[%s2625_s18 + $0x88] sm:$0xff] }
  0x19   : > { %213 = vst.msk [vmem:[#allocation2] sm:$0x1] %vm212_vm1, %v2527_v0  ;;  %230 = vst.msk [vmem:[#allocation2 + $0x198] sm:$0x1] %vm212_vm1, %v2527_v0  ;;  %v189_v21 = vld [vmem:[%s2625_s18 + $0x90] sm:$0xff]  ;;  %v190_v22 = vld [vmem:[%s2625_s18 + $0x98] sm:$0xff] }
  0x1a   : > { %231 = vst.msk [vmem:[#allocation2 + $0x11] sm:$0x1] %vm212_vm1, %v2527_v0  ;;  %248 = vst.msk [vmem:[#allocation2 + $0x1a9] sm:$0x1] %vm212_vm1, %v2527_v0  ;;  %v191_v23 = vld [vmem:[%s2625_s18 + $0xa0] sm:$0xff]  ;;  %v192_v24 = vld [vmem:[%s2625_s18 + $0xa8] sm:$0xff] }
  0x1b   : > { %250 = vst.msk [vmem:[#allocation2 + $0x19] sm:$0xff] %vm203_vm0, %v171_v1  ;;  %251 = vst.msk [vmem:[#allocation2 + $0x21] sm:$0xff] %vm203_vm0, %v172_v2  ;;  %v193_v28 = vld [vmem:[%s2625_s18 + $0xb0] sm:$0xff]  ;;  %v194_v29 = vld [vmem:[%s2625_s18 + $0xb8] sm:$0xff] }
  0x1c   : > { %252 = vst.msk [vmem:[#allocation2 + $0x31] sm:$0xff] %vm203_vm0, %v173_v3  ;;  %253 = vst.msk [vmem:[#allocation2 + $0x39] sm:$0xff] %vm203_vm0, %v174_v4  ;;  %v195_v33 = vld [vmem:[%s2625_s18 + $0xc0] sm:$0xff]  ;;  %v196_v34 = vld [vmem:[%s2625_s18 + $0xc8] sm:$0xff] }
  0x1d   : > { %254 = vst.msk [vmem:[#allocation2 + $0x49] sm:$0xff] %vm203_vm0, %v175_v5  ;;  %255 = vst.msk [vmem:[#allocation2 + $0x51] sm:$0xff] %vm203_vm0, %v176_v6  ;;  %v197_v35 = vld [vmem:[%s2625_s18 + $0xd0] sm:$0xff]  ;;  %v198_v36 = vld [vmem:[%s2625_s18 + $0xd8] sm:$0xff] }
  0x1e   : > { %256 = vst.msk [vmem:[#allocation2 + $0x61] sm:$0xff] %vm203_vm0, %v177_v9  ;;  %257 = vst.msk [vmem:[#allocation2 + $0x69] sm:$0xff] %vm203_vm0, %v178_v10  ;;  %v199_v37 = vld [vmem:[%s2625_s18 + $0xe0] sm:$0xff]  ;;  %v200_v38 = vld [vmem:[%s2625_s18 + $0xe8] sm:$0xff] }
  0x1f   : > { %v347_v8 = vld [vmem:[#allocation2 + $0x9] sm:$0xff]  ;;  %258 = vst.msk [vmem:[#allocation2 + $0x79] sm:$0xff] %vm203_vm0, %v179_v11  ;;  %259 = vst.msk [vmem:[#allocation2 + $0x81] sm:$0xff] %vm203_vm0, %v180_v12 }
  0x20   : > { %260 = vst.msk [vmem:[#allocation2 + $0x91] sm:$0xff] %vm203_vm0, %v181_v13  ;;  %261 = vst.msk [vmem:[#allocation2 + $0x99] sm:$0xff] %vm203_vm0, %v182_v14  ;;  %412 = vrot.lane.b32.xlu0 %v347_v8, %s2528_s19  ;;  %v282_v45 = vld [vmem:[#allocation2] sm:$0xff] }
  0x21   : > { %262 = vst.msk [vmem:[#allocation2 + $0xa9] sm:$0xff] %vm203_vm0, %v183_v15  ;;  %263 = vst.msk [vmem:[#allocation2 + $0xb1] sm:$0xff] %vm203_vm0, %v184_v16 }
  0x22   : > { %264 = vst.msk [vmem:[#allocation2 + $0xc1] sm:$0xff] %vm203_vm0, %v185_v17  ;;  %265 = vst.msk [vmem:[#allocation2 + $0xc9] sm:$0xff] %vm203_vm0, %v186_v18  ;;  %v2670_v25 = vld [vmem:[#allocation2 + $0x19] sm:$0xff]  ;;  %v2679_v27 = vld [vmem:[#allocation2 + $0x21] sm:$0xff] }
  0x23   : > { %266 = vst.msk [vmem:[#allocation2 + $0xd9] sm:$0xff] %vm203_vm0, %v187_v19  ;;  %267 = vst.msk [vmem:[#allocation2 + $0xe1] sm:$0xff] %vm203_vm0, %v188_v20  ;;  %v2672_v26 = vld [vmem:[#allocation2 + $0x31] sm:$0xff]  ;;  %414 = vrot.lane.b32.xlu1 %v2670_v25, %s2528_s19  ;;  %v2689_v31 = vld [vmem:[#allocation2 + $0x39] sm:$0xff] }
  0x24   : > { %268 = vst.msk [vmem:[#allocation2 + $0xf1] sm:$0xff] %vm203_vm0, %v189_v21  ;;  %269 = vst.msk [vmem:[#allocation2 + $0xf9] sm:$0xff] %vm203_vm0, %v190_v22  ;;  %418 = vrot.lane.b32.xlu0 %v2672_v26, %s2528_s19  ;;  %v352_v30 = vld [vmem:[#allocation2 + $0x49] sm:$0xff]  ;;  %v353_v39 = vld [vmem:[#allocation2 + $0x51] sm:$0xff] }
  0x25   : > { %270 = vst.msk [vmem:[#allocation2 + $0x109] sm:$0xff] %vm203_vm0, %v191_v23  ;;  %271 = vst.msk [vmem:[#allocation2 + $0x111] sm:$0xff] %vm203_vm0, %v192_v24  ;;  %v354_v32 = vld [vmem:[#allocation2 + $0x61] sm:$0xff]  ;;  %v355_v41 = vld [vmem:[#allocation2 + $0x69] sm:$0xff] }
  0x26   : > { %272 = vst.msk [vmem:[#allocation2 + $0x121] sm:$0xff] %vm203_vm0, %v193_v28  ;;  %273 = vst.msk [vmem:[#allocation2 + $0x129] sm:$0xff] %vm203_vm0, %v194_v29  ;;  %v356_v40 = vld [vmem:[#allocation2 + $0x79] sm:$0xff]  ;;  %v357_v43 = vld [vmem:[#allocation2 + $0x81] sm:$0xff] }
  0x27   : > { %416 = vrot.lane.b32.xlu1 %v2679_v27, %s2528_s19  ;;  %274 = vst.msk [vmem:[#allocation2 + $0x139] sm:$0xff] %vm203_vm0, %v195_v33  ;;  %275 = vst.msk [vmem:[#allocation2 + $0x141] sm:$0xff] %vm203_vm0, %v196_v34  ;;  %v358_v42 = vld [vmem:[#allocation2 + $0x91] sm:$0xff]  ;;  %v359_v47 = vld [vmem:[#allocation2 + $0x99] sm:$0xff] }
  0x28   : > { %422 = vrot.lane.b32.xlu0 %v352_v30, %s2528_s19  ;;  %276 = vst.msk [vmem:[#allocation2 + $0x151] sm:$0xff] %vm203_vm0, %v197_v35  ;;  %277 = vst.msk [vmem:[#allocation2 + $0x159] sm:$0xff] %vm203_vm0, %v198_v36  ;;  %v360_v44 = vld [vmem:[#allocation2 + $0xa9] sm:$0xff]  ;;  %v2712_v46 = vld [vmem:[#allocation2 + $0x18] sm:$0xff] }
  0x29   : > { %278 = vst.msk [vmem:[#allocation2 + $0x169] sm:$0xff] %vm203_vm0, %v199_v37  ;;  %279 = vst.msk [vmem:[#allocation2 + $0x171] sm:$0xff] %vm203_vm0, %v200_v38  ;;  %v2719_v49 = vld [vmem:[#allocation2 + $0x20] sm:$0xff]  ;;  %v2723_v51 = vld [vmem:[#allocation2 + $0x30] sm:$0xff] }
  0x2a   : > { %314 = vst.msk [vmem:[#allocation3] sm:$0xff] %vm203_vm0, %v282_v45  ;;  %316 = vst.msk [vmem:[#allocation3 + $0x10] sm:$0xff] %vm203_vm0, %v2712_v46  ;;  %v362_v50 = vld [vmem:[#allocation2 + $0xc1] sm:$0xff]  ;;  %v2725_v52 = vld [vmem:[#allocation2 + $0x38] sm:$0xff] }
  0x2b   : > { %420 = vrot.lane.b32.xlu1 %v2689_v31, %s2528_s19  ;;  %315 = vst.msk [vmem:[#allocation3 + $0x8] sm:$0xff] %vm203_vm0, %v283_v48  ;;  %317 = vst.msk [vmem:[#allocation3 + $0x18] sm:$0xff] %vm203_vm0, %v2719_v49  ;;  %v361_v53 = vld [vmem:[#allocation2 + $0xb1] sm:$0xff]  ;;  %v2732_v54 = vld [vmem:[#allocation2 + $0x48] sm:$0xff] }
  0x2c   : > { %426 = vrot.lane.b32.xlu0 %v354_v32, %s2528_s19  ;;  %318 = vst.msk [vmem:[#allocation3 + $0x20] sm:$0xff] %vm203_vm0, %v2723_v51  ;;  %319 = vst.msk [vmem:[#allocation3 + $0x28] sm:$0xff] %vm203_vm0, %v2725_v52  ;;  %v2734_v55 = vld [vmem:[#allocation2 + $0x50] sm:$0xff]  ;;  %v2736_v56 = vld [vmem:[#allocation2 + $0xd9] sm:$0xff] }
  0x2d   : > { %320 = vst.msk [vmem:[#allocation3 + $0x30] sm:$0xff] %vm203_vm0, %v2732_v54  ;;  %321 = vst.msk [vmem:[#allocation3 + $0x38] sm:$0xff] %vm203_vm0, %v2734_v55  ;;  %v2742_v57 = vld [vmem:[#allocation2 + $0x60] sm:$0xff]  ;;  %v2744_v58 = vld [vmem:[#allocation2 + $0x68] sm:$0xff] }
  0x2e   : > { %v2746_v59 = vld [vmem:[#allocation2 + $0x78] sm:$0xff]  ;;  %322 = vst.msk [vmem:[#allocation3 + $0x40] sm:$0xff] %vm203_vm0, %v2742_v57  ;;  %323 = vst.msk [vmem:[#allocation3 + $0x48] sm:$0xff] %vm203_vm0, %v2744_v58  ;;  %v2755_v60 = vld [vmem:[#allocation2 + $0x80] sm:$0xff] }
  0x2f   : > { %424 = vrot.lane.b32.xlu1 %v353_v39, %s2528_s19  ;;  %324 = vst.msk [vmem:[#allocation3 + $0x50] sm:$0xff] %vm203_vm0, %v2746_v59  ;;  %v2757_v61 = vld [vmem:[#allocation2 + $0x90] sm:$0xff]  ;;  %v2759_v62 = vld [vmem:[#allocation2 + $0x98] sm:$0xff]  ;;  %325 = vst.msk [vmem:[#allocation3 + $0x58] sm:$0xff] %vm203_vm0, %v2755_v60 }
  0x30   : > { %430 = vrot.lane.b32.xlu0 %v356_v40, %s2528_s19  ;;  %v363_v63 = vld [vmem:[#allocation2 + $0xc9] sm:$0xff]  ;;  %326 = vst.msk [vmem:[#allocation3 + $0x60] sm:$0xff] %vm203_vm0, %v2757_v61  ;;  %327 = vst.msk [vmem:[#allocation3 + $0x68] sm:$0xff] %vm203_vm0, %v2759_v62  ;;  %v2771_v2 = vld [vmem:[#allocation2 + $0xc0] sm:$0xff] }
  0x31   : > { %v2767_v0 = vld [vmem:[#allocation2 + $0xa8] sm:$0xff]  ;;  %v2769_v1 = vld [vmem:[#allocation2 + $0xb0] sm:$0xff]  ;;  %330 = vst.msk [vmem:[#allocation3 + $0x80] sm:$0xff] %vm203_vm0, %v2771_v2  ;;  %v2782_v4 = vld [vmem:[#allocation2 + $0xd8] sm:$0xff] }
  0x32   : > { %328 = vst.msk [vmem:[#allocation3 + $0x70] sm:$0xff] %vm203_vm0, %v2767_v0  ;;  %329 = vst.msk [vmem:[#allocation3 + $0x78] sm:$0xff] %vm203_vm0, %v2769_v1  ;;  %v2780_v3 = vld [vmem:[#allocation2 + $0xc8] sm:$0xff]  ;;  %v2784_v5 = vld [vmem:[#allocation2 + $0xe0] sm:$0xff] }
  0x33   : > { %428 = vrot.lane.b32.xlu1 %v355_v41, %s2528_s19  ;;  %331 = vst.msk [vmem:[#allocation3 + $0x88] sm:$0xff] %vm203_vm0, %v2780_v3  ;;  %332 = vst.msk [vmem:[#allocation3 + $0x90] sm:$0xff] %vm203_vm0, %v2782_v4  ;;  %v2792_v6 = vld [vmem:[#allocation2 + $0xf0] sm:$0xff]  ;;  %v2794_v7 = vld [vmem:[#allocation2 + $0xf8] sm:$0xff] }
  0x34   : > { %434 = vrot.lane.b32.xlu0 %v358_v42, %s2528_s19  ;;  %333 = vst.msk [vmem:[#allocation3 + $0x98] sm:$0xff] %vm203_vm0, %v2784_v5  ;;  %v2796_v8 = vld [vmem:[#allocation2 + $0x108] sm:$0xff]  ;;  %334 = vst.msk [vmem:[#allocation3 + $0xa0] sm:$0xff] %vm203_vm0, %v2792_v6  ;;  %v2806_v9 = vld [vmem:[#allocation2 + $0x110] sm:$0xff] }
  0x35   : > { %335 = vst.msk [vmem:[#allocation3 + $0xa8] sm:$0xff] %vm203_vm0, %v2794_v7  ;;  %336 = vst.msk [vmem:[#allocation3 + $0xb0] sm:$0xff] %vm203_vm0, %v2796_v8  ;;  %v2808_v10 = vld [vmem:[#allocation2 + $0xf1] sm:$0xff]  ;;  %v2813_v11 = vld [vmem:[#allocation2 + $0x120] sm:$0xff] }
  0x36   : > { %337 = vst.msk [vmem:[#allocation3 + $0xb8] sm:$0xff] %vm203_vm0, %v2806_v9  ;;  %v2815_v12 = vld [vmem:[#allocation2 + $0x128] sm:$0xff]  ;;  %338 = vst.msk [vmem:[#allocation3 + $0xc0] sm:$0xff] %vm203_vm0, %v2813_v11  ;;  %v2829_v15 = vld [vmem:[#allocation2 + $0x138] sm:$0xff] }
  0x37   : > { %432 = vrot.lane.b32.xlu1 %v357_v43, %s2528_s19  ;;  %v2817_v13 = vld [vmem:[#allocation2 + $0xe1] sm:$0xff]  ;;  %339 = vst.msk [vmem:[#allocation3 + $0xc8] sm:$0xff] %vm203_vm0, %v2815_v12  ;;  %v2825_v14 = vld [vmem:[#allocation2 + $0x109] sm:$0xff]  ;;  %v2833_v17 = vld [vmem:[#allocation2 + $0xf9] sm:$0xff] }
  0x38   : > { %438 = vrot.lane.b32.xlu0 %v360_v44, %s2528_s19  ;;  %v2831_v16 = vld [vmem:[#allocation2 + $0x140] sm:$0xff]  ;;  %340 = vst.msk [vmem:[#allocation3 + $0xd0] sm:$0xff] %vm203_vm0, %v2829_v15  ;;  %v2843_v19 = vld [vmem:[#allocation2 + $0x150] sm:$0xff]  ;;  %v2845_v20 = vld [vmem:[#allocation2 + $0x158] sm:$0xff] }
  0x39   : > { %341 = vst.msk [vmem:[#allocation3 + $0xd8] sm:$0xff] %vm203_vm0, %v2831_v16  ;;  %v370_v18 = vld [vmem:[#allocation2 + $0x121] sm:$0xff]  ;;  %v2847_v21 = vld [vmem:[#allocation2 + $0x111] sm:$0xff]  ;;  %342 = vst.msk [vmem:[#allocation3 + $0xe0] sm:$0xff] %vm203_vm0, %v2843_v19 }
  0x3a   : > { %343 = vst.msk [vmem:[#allocation3 + $0xe8] sm:$0xff] %vm203_vm0, %v2845_v20  ;;  %v372_v22 = vld [vmem:[#allocation2 + $0x139] sm:$0xff]  ;;  %v2856_v23 = vld [vmem:[#allocation2 + $0x168] sm:$0xff]  ;;  %v2858_v24 = vld [vmem:[#allocation2 + $0x170] sm:$0xff] }
  0x3b   : > { %436 = vrot.lane.b32.xlu1 %v359_v47, %s2528_s19  ;;  %v371_v28 = vld [vmem:[#allocation2 + $0x129] sm:$0xff]  ;;  %344 = vst.msk [vmem:[#allocation3 + $0xf0] sm:$0xff] %vm203_vm0, %v2856_v23  ;;  %345 = vst.msk [vmem:[#allocation3 + $0xf8] sm:$0xff] %vm203_vm0, %v2858_v24  ;;  %v374_v29 = vld [vmem:[#allocation2 + $0x151] sm:$0xff] }
  0x3c   : > { %442 = vrot.lane.b32.xlu0 %v362_v50, %s2528_s19  ;;  %v373_v30 = vld [vmem:[#allocation2 + $0x141] sm:$0xff]  ;;  %v201_v32 = vld [vmem:[%s2625_s18 + $0xf0] sm:$0xff]  ;;  %v202_v34 = vld [vmem:[%s2625_s18 + $0xf8] sm:$0xff] }
  0x3d   : > { %v376_v33 = vld [vmem:[#allocation2 + $0x169] sm:$0xff]  ;;  %280 = vst.msk [vmem:[#allocation2 + $0x181] sm:$0xff] %vm203_vm0, %v201_v32  ;;  %281 = vst.msk [vmem:[#allocation2 + $0x189] sm:$0xff] %vm203_vm0, %v202_v34  ;;  %v375_v35 = vld [vmem:[#allocation2 + $0x159] sm:$0xff] }
  0x3e   : > { %v539_v36 = vld [vmem:[#allocation2 + $0x2] sm:$0xff]  ;;  %v377_v37 = vld [vmem:[#allocation2 + $0x171] sm:$0xff]  ;;  %v2875_v38 = vld [vmem:[#allocation2 + $0x1a] sm:$0xff] }
  0x3f   : > { %440 = vrot.lane.b32.xlu1 %v361_v53, %s2528_s19  ;;  %v540_v39 = vld [vmem:[#allocation2 + $0xa] sm:$0xff]  ;;  %v2880_v40 = vld [vmem:[#allocation2 + $0x32] sm:$0xff]  ;;  %v2883_v41 = vld [vmem:[#allocation2 + $0x22] sm:$0xff] }
  0x40   : > { %446 = vrot.lane.b32.xlu0 %v2736_v56, %s2528_s19  ;;  %v2887_v42 = vld [vmem:[#allocation2 + $0x4a] sm:$0xff]  ;;  %v2891_v43 = vld [vmem:[#allocation2 + $0x3a] sm:$0xff]  ;;  %v2895_v44 = vld [vmem:[#allocation2 + $0x62] sm:$0xff] }
  0x41   : > { %v2899_v45 = vld [vmem:[#allocation2 + $0x52] sm:$0xff]  ;;  %v549_v47 = vld [vmem:[#allocation2 + $0x7a] sm:$0xff]  ;;  %v548_v48 = vld [vmem:[#allocation2 + $0x6a] sm:$0xff] }
  0x42   : > { %v551_v50 = vld [vmem:[#allocation2 + $0x92] sm:$0xff]  ;;  %v550_v53 = vld [vmem:[#allocation2 + $0x82] sm:$0xff]  ;;  %v2924_v34 = vld [vmem:[#allocation2 + $0x10a] sm:$0xff] }
  0x43   : > { %444 = vrot.lane.b32.xlu1 %v363_v63, %s2528_s19  ;;  %v553_v63 = vld [vmem:[#allocation2 + $0xaa] sm:$0xff]  ;;  %v2917_v32 = vld [vmem:[#allocation2 + $0xf2] sm:$0xff]  ;;  %vm2492_vm7 = vmpackc.low %vm2031_vm5, %vm2536_vm6 }
  0x44   : > { %450 = vrot.lane.b32.xlu0 %v2808_v10, %s2528_s19 }
  0x47   : > { %448 = vrot.lane.b32.xlu1 %v2817_v13, %s2528_s19 }
  0x48   : > { %454 = vrot.lane.b32.xlu0 %v2825_v14, %s2528_s19 }
  0x4b   : > { %452 = vrot.lane.b32.xlu1 %v2833_v17, %s2528_s19 }
  0x4c   : > { %458 = vrot.lane.b32.xlu0 %v370_v18, %s2528_s19  ;;  %v552_v18 = vld [vmem:[#allocation2 + $0x9a] sm:$0xff] }
  0x4f   : > { %456 = vrot.lane.b32.xlu1 %v2847_v21, %s2528_s19 }
  0x50   : > { %462 = vrot.lane.b32.xlu0 %v372_v22, %s2528_s19  ;;  %v555_v22 = vld [vmem:[#allocation2 + $0xc2] sm:$0xff] }
  0x53   : > { %460 = vrot.lane.b32.xlu1 %v371_v28, %s2528_s19  ;;  %v554_v28 = vld [vmem:[#allocation2 + $0xb2] sm:$0xff] }
  0x54   : > { %466 = vrot.lane.b32.xlu0 %v374_v29, %s2528_s19  ;;  %v2912_v29 = vld [vmem:[#allocation2 + $0xda] sm:$0xff] }
  0x57   : > { %464 = vrot.lane.b32.xlu1 %v373_v30, %s2528_s19  ;;  %v556_v30 = vld [vmem:[#allocation2 + $0xca] sm:$0xff] }
  0x58   : > { %470 = vrot.lane.b32.xlu0 %v376_v33, %s2528_s19  ;;  %v2920_v33 = vld [vmem:[#allocation2 + $0xe2] sm:$0xff] }
  0x5b   : > { %468 = vrot.lane.b32.xlu1 %v375_v35, %s2528_s19  ;;  %v2928_v35 = vld [vmem:[#allocation2 + $0xfa] sm:$0xff] }
  0x5c   : > { %603 = vrot.lane.b32.xlu0 %v539_v36, %s2529_s20  ;;  %v2932_v36 = vld [vmem:[#allocation2 + $0x122] sm:$0xff] }
  0x5f   : > { %472 = vrot.lane.b32.xlu1 %v377_v37, %s2528_s19  ;;  %v2936_v37 = vld [vmem:[#allocation2 + $0x112] sm:$0xff] }
  0x60   : > { %607 = vrot.lane.b32.xlu0 %v2875_v38, %s2529_s20 }
  0x63   : > { %605 = vrot.lane.b32.xlu1 %v540_v39, %s2529_s20  ;;  %v565_v39 = vld [vmem:[#allocation2 + $0x13a] sm:$0xff] }
  0x64   : > { %611 = vrot.lane.b32.xlu0 %v2880_v40, %s2529_s20 }
  0x67   : > { %609 = vrot.lane.b32.xlu1 %v2883_v41, %s2529_s20 }
  0x68   : > { %615 = vrot.lane.b32.xlu0 %v2887_v42, %s2529_s20 }
  0x6b   : > { %613 = vrot.lane.b32.xlu1 %v2891_v43, %s2529_s20 }
  0x6c   : > { %619 = vrot.lane.b32.xlu0 %v2895_v44, %s2529_s20 }
  0x6f   : > { %617 = vrot.lane.b32.xlu1 %v2899_v45, %s2529_s20 }
  0x70   : > { %623 = vrot.lane.b32.xlu0 %v549_v47, %s2529_s20 }
  0x73   : > { %621 = vrot.lane.b32.xlu1 %v548_v48, %s2529_s20  ;;  %v2942_v48 = vld [vmem:[#allocation2 + $0x12a] sm:$0xff] }
  0x74   : > { %627 = vrot.lane.b32.xlu0 %v551_v50, %s2529_s20  ;;  %v567_v50 = vld [vmem:[#allocation2 + $0x152] sm:$0xff] }
  0x77   : > { %625 = vrot.lane.b32.xlu1 %v550_v53, %s2529_s20 }
  0x78   : > { %631 = vrot.lane.b32.xlu0 %v553_v63, %s2529_s20  ;;  %v566_v63 = vld [vmem:[#allocation2 + $0x142] sm:$0xff] }
  0x7b   : > { %629 = vrot.lane.b32.xlu1 %v552_v18, %s2529_s20 }
  0x7c   : > { %635 = vrot.lane.b32.xlu0 %v555_v22, %s2529_s20  ;;  %v569_v22 = vld [vmem:[#allocation2 + $0x16a] sm:$0xff] }
  0x7f   : > { %633 = vrot.lane.b32.xlu1 %v554_v28, %s2529_s20 }
  0x80   : > { %639 = vrot.lane.b32.xlu0 %v2912_v29, %s2529_s20  ;;  %v411_v47 = vpop.permute.xlu0 %410 }
  0x81   : > { %507 = vst.msk [vmem:[#allocation3] sm:$0xff] %vm506_vm3, %v411_v47 }
  0x83   : > { %637 = vrot.lane.b32.xlu1 %v556_v30, %s2529_s20  ;;  %v568_v30 = vld [vmem:[#allocation2 + $0x15a] sm:$0xff] }
  0x84   : > { %643 = vrot.lane.b32.xlu0 %v2917_v32, %s2529_s20 }
  0x87   : > { %641 = vrot.lane.b32.xlu1 %v2920_v33, %s2529_s20 }
  0x88   : > { %647 = vrot.lane.b32.xlu0 %v2924_v34, %s2529_s20 }
  0x8b   : > { %645 = vrot.lane.b32.xlu1 %v2928_v35, %s2529_s20 }
  0x8c   : > { %651 = vrot.lane.b32.xlu0 %v2932_v36, %s2529_s20 }
  0x8f   : > { %649 = vrot.lane.b32.xlu1 %v2936_v37, %s2529_s20 }
  0x90   : > { %655 = vrot.lane.b32.xlu0 %v565_v39, %s2529_s20 }
  0x92   : > { %v413_v53 = vpop.permute.xlu0 %412 }
  0x93   : > { %653 = vrot.lane.b32.xlu1 %v2942_v48, %s2529_s20  ;;  %508 = vst.msk [vmem:[#allocation3 + $0x8] sm:$0xff] %vm506_vm3, %v413_v53  ;;  %v570_v53 = vld [vmem:[#allocation2 + $0x172] sm:$0xff] }
  0x94   : > { %659 = vrot.lane.b32.xlu0 %v567_v50, %s2529_s20 }
  0x95   : > { %v415_v18 = vpop.permute.xlu1 %414 }
  0x96   : > { %509 = vst.msk [vmem:[#allocation3 + $0x10] sm:$0xff] %vm506_vm3, %v415_v18  ;;  %v419_v28 = vpop.permute.xlu0 %418 }
  0x97   : > { %657 = vrot.lane.b32.xlu1 %v566_v63, %s2529_s20  ;;  %511 = vst.msk [vmem:[#allocation3 + $0x20] sm:$0xff] %vm506_vm3, %v419_v28 }
  0x98   : > { %663 = vrot.lane.b32.xlu0 %v569_v22, %s2529_s20 }
  0x99   : > { %v417_v39 = vpop.permute.xlu1 %416 }
  0x9a   : > { %510 = vst.msk [vmem:[#allocation3 + $0x18] sm:$0xff] %vm506_vm3, %v417_v39  ;;  %v423_v47 = vpop.permute.xlu0 %422 }
  0x9b   : > { %661 = vrot.lane.b32.xlu1 %v568_v30, %s2529_s20  ;;  %513 = vst.msk [vmem:[#allocation3 + $0x30] sm:$0xff] %vm506_vm3, %v423_v47 }
  0x9c   : > { %796 = vrot.lane.b32.xlu0 %v2712_v46, %s2530_s21 }
  0x9d   : > { %v421_v50 = vpop.permute.xlu1 %420 }
  0x9e   : > { %512 = vst.msk [vmem:[#allocation3 + $0x28] sm:$0xff] %vm506_vm3, %v421_v50  ;;  %v427_v63 = vpop.permute.xlu0 %426 }
  0x9f   : > { %665 = vrot.lane.b32.xlu1 %v570_v53, %s2529_s20  ;;  %515 = vst.msk [vmem:[#allocation3 + $0x40] sm:$0xff] %vm506_vm3, %v427_v63 }
  0xa0   : > { %800 = vrot.lane.b32.xlu0 %v2723_v51, %s2530_s21 }
  0xa1   : > { %v425_v18 = vpop.permute.xlu1 %424 }
  0xa2   : > { %514 = vst.msk [vmem:[#allocation3 + $0x38] sm:$0xff] %vm506_vm3, %v425_v18  ;;  %v431_v22 = vpop.permute.xlu0 %430 }
  0xa3   : > { %798 = vrot.lane.b32.xlu1 %v2719_v49, %s2530_s21  ;;  %517 = vst.msk [vmem:[#allocation3 + $0x50] sm:$0xff] %vm506_vm3, %v431_v22 }
  0xa4   : > { %804 = vrot.lane.b32.xlu0 %v2732_v54, %s2530_s21 }
  0xa5   : > { %v429_v46 = vpop.permute.xlu1 %428 }
  0xa6   : > { %516 = vst.msk [vmem:[#allocation3 + $0x48] sm:$0xff] %vm506_vm3, %v429_v46  ;;  %v435_v28 = vpop.permute.xlu0 %434 }
  0xa7   : > { %802 = vrot.lane.b32.xlu1 %v2725_v52, %s2530_s21  ;;  %519 = vst.msk [vmem:[#allocation3 + $0x60] sm:$0xff] %vm506_vm3, %v435_v28 }
  0xa8   : > { %808 = vrot.lane.b32.xlu0 %v2742_v57, %s2530_s21 }
  0xa9   : > { %v433_v30 = vpop.permute.xlu1 %432 }
  0xaa   : > { %518 = vst.msk [vmem:[#allocation3 + $0x58] sm:$0xff] %vm506_vm3, %v433_v30  ;;  %v439_v49 = vpop.permute.xlu0 %438 }
  0xab   : > { %806 = vrot.lane.b32.xlu1 %v2734_v55, %s2530_s21  ;;  %521 = vst.msk [vmem:[#allocation3 + $0x70] sm:$0xff] %vm506_vm3, %v439_v49 }
  0xac   : > { %812 = vrot.lane.b32.xlu0 %v2746_v59, %s2530_s21 }
  0xad   : > { %v437_v39 = vpop.permute.xlu1 %436 }
  0xae   : > { %520 = vst.msk [vmem:[#allocation3 + $0x68] sm:$0xff] %vm506_vm3, %v437_v39  ;;  %v443_v47 = vpop.permute.xlu0 %442 }
  0xaf   : > { %810 = vrot.lane.b32.xlu1 %v2744_v58, %s2530_s21  ;;  %523 = vst.msk [vmem:[#allocation3 + $0x80] sm:$0xff] %vm506_vm3, %v443_v47 }
  0xb0   : > { %816 = vrot.lane.b32.xlu0 %v2757_v61, %s2530_s21 }
  0xb1   : > { %v441_v53 = vpop.permute.xlu1 %440 }
  0xb2   : > { %522 = vst.msk [vmem:[#allocation3 + $0x78] sm:$0xff] %vm506_vm3, %v441_v53  ;;  %v447_v50 = vpop.permute.xlu0 %446  ;;  %v762_v53 = vld [vmem:[#allocation2 + $0x180] sm:$0xff] }
  0xb3   : > { %814 = vrot.lane.b32.xlu1 %v2755_v60, %s2530_s21  ;;  %525 = vst.msk [vmem:[#allocation3 + $0x90] sm:$0xff] %vm506_vm3, %v447_v50 }
  0xb4   : > { %820 = vrot.lane.b32.xlu0 %v2767_v0, %s2530_s21 }
  0xb5   : > { %v445_v63 = vpop.permute.xlu1 %444 }
  0xb6   : > { %524 = vst.msk [vmem:[#allocation3 + $0x88] sm:$0xff] %vm506_vm3, %v445_v63  ;;  %v451_v18 = vpop.permute.xlu0 %450 }
  0xb7   : > { %818 = vrot.lane.b32.xlu1 %v2759_v62, %s2530_s21  ;;  %527 = vst.msk [vmem:[#allocation3 + $0xa0] sm:$0xff] %vm506_vm3, %v451_v18 }
  0xb8   : > { %824 = vrot.lane.b32.xlu0 %v2771_v2, %s2530_s21 }
  0xb9   : > { %v449_v61 = vpop.permute.xlu1 %448 }
  0xba   : > { %526 = vst.msk [vmem:[#allocation3 + $0x98] sm:$0xff] %vm506_vm3, %v449_v61  ;;  %v455_v22 = vpop.permute.xlu0 %454  ;;  %v763_v61 = vld [vmem:[#allocation2 + $0x188] sm:$0xff] }
  0xbb   : > { %822 = vrot.lane.b32.xlu1 %v2769_v1, %s2530_s21  ;;  %529 = vst.msk [vmem:[#allocation3 + $0xb0] sm:$0xff] %vm506_vm3, %v455_v22 }
  0xbc   : > { %828 = vrot.lane.b32.xlu0 %v2782_v4, %s2530_s21 }
  0xbd   : > { %v453_v0 = vpop.permute.xlu1 %452 }
  0xbe   : > { %528 = vst.msk [vmem:[#allocation3 + $0xa8] sm:$0xff] %vm506_vm3, %v453_v0  ;;  %v459_v62 = vpop.permute.xlu0 %458 }
  0xbf   : > { %826 = vrot.lane.b32.xlu1 %v2780_v3, %s2530_s21  ;;  %531 = vst.msk [vmem:[#allocation3 + $0xc0] sm:$0xff] %vm506_vm3, %v459_v62 }
  0xc0   : > { %832 = vrot.lane.b32.xlu0 %v2792_v6, %s2530_s21 }
  0xc1   : > { %v457_v2 = vpop.permute.xlu1 %456 }
  0xc2   : > { %530 = vst.msk [vmem:[#allocation3 + $0xb8] sm:$0xff] %vm506_vm3, %v457_v2  ;;  %v463_v1 = vpop.permute.xlu0 %462 }
  0xc3   : > { %830 = vrot.lane.b32.xlu1 %v2784_v5, %s2530_s21  ;;  %533 = vst.msk [vmem:[#allocation3 + $0xd0] sm:$0xff] %vm506_vm3, %v463_v1 }
  0xc4   : > { %836 = vrot.lane.b32.xlu0 %v2796_v8, %s2530_s21 }
  0xc5   : > { %v461_v4 = vpop.permute.xlu1 %460 }
  0xc6   : > { %532 = vst.msk [vmem:[#allocation3 + $0xc8] sm:$0xff] %vm506_vm3, %v461_v4  ;;  %v467_v3 = vpop.permute.xlu0 %466  ;;  %v1924_v4 = vld [vmem:[%s3645_s1 + $0x8] sm:$0xff] }
  0xc7   : > { %834 = vrot.lane.b32.xlu1 %v2794_v7, %s2530_s21  ;;  %535 = vst.msk [vmem:[#allocation3 + $0xe0] sm:$0xff] %vm506_vm3, %v467_v3 }
  0xc8   : > { %840 = vrot.lane.b32.xlu0 %v2813_v11, %s2530_s21 }
  0xc9   : > { %v465_v46 = vpop.permute.xlu1 %464 }
  0xca   : > { %534 = vst.msk [vmem:[#allocation3 + $0xd8] sm:$0xff] %vm506_vm3, %v465_v46  ;;  %v471_v5 = vpop.permute.xlu0 %470 }
  0xcb   : > { %838 = vrot.lane.b32.xlu1 %v2806_v9, %s2530_s21  ;;  %537 = vst.msk [vmem:[#allocation3 + $0xf0] sm:$0xff] %vm506_vm3, %v471_v5  ;;  %v1925_v5 = vld [vmem:[%s3645_s1 + $0x10] sm:$0xff] }
  0xcc   : > { %844 = vrot.lane.b32.xlu0 %v2829_v15, %s2530_s21 }
  0xcd   : > { %v469_v28 = vpop.permute.xlu1 %468 }
  0xce   : > { %536 = vst.msk [vmem:[#allocation3 + $0xe8] sm:$0xff] %vm506_vm3, %v469_v28  ;;  %v604_v30 = vpop.permute.xlu0 %603  ;;  %v1926_v28 = vld [vmem:[%s3645_s1 + $0x18] sm:$0x7] }
  0xcf   : > { %842 = vrot.lane.b32.xlu1 %v2815_v12, %s2530_s21  ;;  %700 = vst.msk [vmem:[#allocation3] sm:$0xff] %vm699_vm4, %v604_v30 }
  0xd0   : > { %848 = vrot.lane.b32.xlu0 %v2843_v19, %s2530_s21 }
  0xd1   : > { %v473_v49 = vpop.permute.xlu1 %472 }
  0xd2   : > { %538 = vst.msk [vmem:[#allocation3 + $0xf8] sm:$0xff] %vm506_vm3, %v473_v49  ;;  %v608_v39 = vpop.permute.xlu0 %607 }
  0xd3   : > { %846 = vrot.lane.b32.xlu1 %v2831_v16, %s2530_s21  ;;  %702 = vst.msk [vmem:[#allocation3 + $0x10] sm:$0xff] %vm699_vm4, %v608_v39 }
  0xd4   : > { %852 = vrot.lane.b32.xlu0 %v2856_v23, %s2530_s21 }
  0xd5   : > { %v606_v47 = vpop.permute.xlu1 %605 }
  0xd6   : > { %701 = vst.msk [vmem:[#allocation3 + $0x8] sm:$0xff] %vm699_vm4, %v606_v47  ;;  %v612_v50 = vpop.permute.xlu0 %611 }
  0xd7   : > { %850 = vrot.lane.b32.xlu1 %v2845_v20, %s2530_s21  ;;  %704 = vst.msk [vmem:[#allocation3 + $0x20] sm:$0xff] %vm699_vm4, %v612_v50 }
  0xd8   : > { %856 = vrot.lane.b32.xlu0 %v762_v53, %s2530_s21 }
  0xd9   : > { %v610_v63 = vpop.permute.xlu1 %609 }
  0xda   : > { %703 = vst.msk [vmem:[#allocation3 + $0x18] sm:$0xff] %vm699_vm4, %v610_v63  ;;  %v616_v18 = vpop.permute.xlu0 %615  ;;  %v1507_v63 = vld [vmem:[#allocation2 + $0x49] sm:$0xff] }
  0xdb   : > { %854 = vrot.lane.b32.xlu1 %v2858_v24, %s2530_s21  ;;  %706 = vst.msk [vmem:[#allocation3 + $0x30] sm:$0xff] %vm699_vm4, %v616_v18 }
  0xdc   : > { %989 = vrot.lane.b32.xlu0 %v2670_v25, %s2531_s22 }
  0xdd   : > { %v614_v23 = vpop.permute.xlu1 %613 }
  0xde   : > { %705 = vst.msk [vmem:[#allocation3 + $0x28] sm:$0xff] %vm699_vm4, %v614_v23  ;;  %v620_v22 = vpop.permute.xlu0 %619 }
  0xdf   : > { %858 = vrot.lane.b32.xlu1 %v763_v61, %s2530_s21  ;;  %708 = vst.msk [vmem:[#allocation3 + $0x40] sm:$0xff] %vm699_vm4, %v620_v22 }
  0xe0   : > { %993 = vrot.lane.b32.xlu0 %v2672_v26, %s2531_s22 }
  0xe1   : > { %v618_v0 = vpop.permute.xlu1 %617 }
  0xe2   : > { %707 = vst.msk [vmem:[#allocation3 + $0x38] sm:$0xff] %vm699_vm4, %v618_v0  ;;  %v624_v24 = vpop.permute.xlu0 %623 }
  0xe3   : > { %991 = vrot.lane.b32.xlu1 %v2679_v27, %s2531_s22  ;;  %710 = vst.msk [vmem:[#allocation3 + $0x50] sm:$0xff] %vm699_vm4, %v624_v24 }
  0xe4   : > { %1023 = vrot.lane.b32.xlu0 %v2817_v13, %s2531_s22 }
  0xe5   : > { %v622_v25 = vpop.permute.xlu1 %621 }
  0xe6   : > { %709 = vst.msk [vmem:[#allocation3 + $0x48] sm:$0xff] %vm699_vm4, %v622_v25  ;;  %v628_v62 = vpop.permute.xlu0 %627 }
  0xe7   : > { %1021 = vrot.lane.b32.xlu1 %v2736_v56, %s2531_s22  ;;  %712 = vst.msk [vmem:[#allocation3 + $0x60] sm:$0xff] %vm699_vm4, %v628_v62 }
  0xe8   : > { %1214 = vrot.lane.b32.xlu0 %v2912_v29, %s2532_s23 }
  0xe9   : > { %v626_v2 = vpop.permute.xlu1 %625 }
  0xea   : > { %711 = vst.msk [vmem:[#allocation3 + $0x58] sm:$0xff] %vm699_vm4, %v626_v2  ;;  %v632_v27 = vpop.permute.xlu0 %631 }
  0xeb   : > { %1182 = vrot.lane.b32.xlu1 %v2875_v38, %s2532_s23  ;;  %714 = vst.msk [vmem:[#allocation3 + $0x70] sm:$0xff] %vm699_vm4, %v632_v27 }
  0xec   : > { %1216 = vrot.lane.b32.xlu0 %v2920_v33, %s2532_s23 }
  0xed   : > { %v630_v13 = vpop.permute.xlu1 %629 }
  0xee   : > { %713 = vst.msk [vmem:[#allocation3 + $0x68] sm:$0xff] %vm699_vm4, %v630_v13  ;;  %v636_v56 = vpop.permute.xlu0 %635 }
  0xef   : > { %1184 = vrot.lane.b32.xlu1 %v2883_v41, %s2532_s23  ;;  %716 = vst.msk [vmem:[#allocation3 + $0x80] sm:$0xff] %vm699_vm4, %v636_v56  ;;  %v1509_v56 = vld [vmem:[#allocation2 + $0x61] sm:$0xff] }
  0xf0   : > { %1408 = vrot.lane.b32.xlu0 %v2792_v6, %s2533_s24 }
  0xf1   : > { %v634_v29 = vpop.permute.xlu1 %633 }
  0xf2   : > { %715 = vst.msk [vmem:[#allocation3 + $0x78] sm:$0xff] %vm699_vm4, %v634_v29  ;;  %v640_v38 = vpop.permute.xlu0 %639 }
  0xf3   : > { %1376 = vrot.lane.b32.xlu1 %v2723_v51, %s2533_s24  ;;  %718 = vst.msk [vmem:[#allocation3 + $0x90] sm:$0xff] %vm699_vm4, %v640_v38  ;;  %v1525_v38 = vld [vmem:[#allocation2 + $0x121] sm:$0xff] }
  0xf4   : > { %1410 = vrot.lane.b32.xlu0 %v2794_v7, %s2533_s24 }
  0xf5   : > { %v638_v33 = vpop.permute.xlu1 %637 }
  0xf6   : > { %717 = vst.msk [vmem:[#allocation3 + $0x88] sm:$0xff] %vm699_vm4, %v638_v33  ;;  %v644_v41 = vpop.permute.xlu0 %643 }
  0xf7   : > { %1378 = vrot.lane.b32.xlu1 %v2725_v52, %s2533_s24  ;;  %720 = vst.msk [vmem:[#allocation3 + $0xa0] sm:$0xff] %vm699_vm4, %v644_v41 }
  0xf8   : > { %1601 = vrot.lane.b32.xlu0 %v2808_v10, %s2534_s25 }
  0xf9   : > { %v642_v6 = vpop.permute.xlu1 %641 }
  0xfa   : > { %719 = vst.msk [vmem:[#allocation3 + $0x98] sm:$0xff] %vm699_vm4, %v642_v6  ;;  %v648_v51 = vpop.permute.xlu0 %647  ;;  %v1526_v6 = vld [vmem:[#allocation2 + $0x129] sm:$0xff] }
  0xfb   : > { %1569 = vrot.lane.b32.xlu1 %v2672_v26, %s2534_s25  ;;  %722 = vst.msk [vmem:[#allocation3 + $0xb0] sm:$0xff] %vm699_vm4, %v648_v51  ;;  %v1923_v26 = vld [vmem:[%s3645_s1] sm:$0xff] }
  0xfc   : > { %1571 = vrot.lane.b32.xlu0 %v2689_v31, %s2534_s25  ;;  %v2487_v3 = vpack.c.bf16 %v1924_v4, %v1923_v26  ;;  %v1703_v4 = vld [vmem:[#allocation2 + $0x6a] sm:$0xff] }
  0xfd   : > { %v646_v7 = vpop.permute.xlu1 %645 }
  0xfe   : > { %721 = vst.msk [vmem:[#allocation3 + $0xa8] sm:$0xff] %vm699_vm4, %v646_v7  ;;  %v652_v52 = vpop.permute.xlu0 %651  ;;  %2488 = vmatprep.subr.bf16.mxu0 %v2487_v3  ;;  %2497 = vmatprep.subr.bf16.mxu1 %v2487_v3 }
  0xff   : > { %1025 = vrot.lane.b32.xlu1 %v2808_v10, %s2531_s22  ;;  %724 = vst.msk [vmem:[#allocation3 + $0xc0] sm:$0xff] %vm699_vm4, %v652_v52  ;;  %2490 = vmatpush3.bf16.msra.mxu0 %v2487_v3 }
 0x100   : > { %1762 = vrot.lane.b32.xlu0 %v2880_v40, %s2535_s26  ;;  %2499 = vmatpush3.bf16.msra.mxu1 %v2487_v3 }
 0x101   : > { %v650_v1 = vpop.permute.xlu1 %649 }
 0x102   : > { %723 = vst.msk [vmem:[#allocation3 + $0xb8] sm:$0xff] %vm699_vm4, %v650_v1  ;;  %v656_v10 = vpop.permute.xlu0 %655  ;;  %v1124_v1 = vld [vmem:[#allocation2 + $0x62] sm:$0xff] }
 0x103   : > { %1603 = vrot.lane.b32.xlu1 %v2833_v17, %s2534_s25  ;;  %726 = vst.msk [vmem:[#allocation3 + $0xd0] sm:$0xff] %vm699_vm4, %v656_v10 }
 0x104   : > { %995 = vrot.lane.b32.xlu0 %v2689_v31, %s2531_s22  ;;  %v2491_v31 = vpack.c.bf16 %v1926_v28, %v1925_v5 }
 0x105   : > { %v654_v46 = vpop.permute.xlu1 %653 }
 0x106   : > { %725 = vst.msk [vmem:[#allocation3 + $0xc8] sm:$0xff] %vm699_vm4, %v654_v46  ;;  %v660_v30 = vpop.permute.xlu0 %659  ;;  %2493 = vmatprep.subr.msk.bf16.mxu0 %vm2492_vm7, %v2491_v31  ;;  %2498 = vmatprep.subr.msk.bf16.mxu1 %vm2492_vm7, %v2491_v31 }
 0x107   : > { %1794 = vrot.lane.b32.xlu1 %v2917_v32, %s2535_s26  ;;  %728 = vst.msk [vmem:[#allocation3 + $0xe0] sm:$0xff] %vm699_vm4, %v660_v30  ;;  %2496 = vmatpush3.bf16.msk.msra.mxu0 %vm2492_vm7, %v2491_v31 }
 0x108   : > { %1186 = vrot.lane.b32.xlu0 %v2880_v40, %s2532_s23  ;;  %2500 = vmatpush3.bf16.msk.msra.mxu1 %vm2492_vm7, %v2491_v31 }
 0x109   : > { %v658_v49 = vpop.permute.xlu1 %657 }
 0x10a   : > { %727 = vst.msk [vmem:[#allocation3 + $0xd8] sm:$0xff] %vm699_vm4, %v658_v49  ;;  %v664_v39 = vpop.permute.xlu0 %663  ;;  %v1511_v49 = vld [vmem:[#allocation2 + $0x79] sm:$0xff] }
 0x10b   : > { %1027 = vrot.lane.b32.xlu1 %v2833_v17, %s2531_s22  ;;  %730 = vst.msk [vmem:[#allocation3 + $0xf0] sm:$0xff] %vm699_vm4, %v664_v39 }
 0x10c   : > { %1764 = vrot.lane.b32.xlu0 %v2891_v43, %s2535_s26 }
 0x10d   : > { %v662_v47 = vpop.permute.xlu1 %661 }
 0x10e   : > { %729 = vst.msk [vmem:[#allocation3 + $0xe8] sm:$0xff] %vm699_vm4, %v662_v47  ;;  %v797_v40 = vpop.permute.xlu0 %796 }
 0x10f   : > { %1218 = vrot.lane.b32.xlu1 %v2917_v32, %s2532_s23  ;;  %893 = vst.msk [vmem:[#allocation3] sm:$0xff] %vm892_vm8, %v797_v40 }
 0x110   : > { %1188 = vrot.lane.b32.xlu0 %v2891_v43, %s2532_s23 }
 0x111   : > { %v666_v53 = vpop.permute.xlu1 %665 }
 0x112   : > { %731 = vst.msk [vmem:[#allocation3 + $0xf8] sm:$0xff] %vm699_vm4, %v666_v53  ;;  %v801_v17 = vpop.permute.xlu0 %800 }
 0x113   : > { %1796 = vrot.lane.b32.xlu1 %v2928_v35, %s2535_s26  ;;  %895 = vst.msk [vmem:[#allocation3 + $0x10] sm:$0xff] %vm892_vm8, %v801_v17 }
 0x114   : > { %1380 = vrot.lane.b32.xlu0 %v2732_v54, %s2533_s24 }
 0x115   : > { %v799_v50 = vpop.permute.xlu1 %798 }
 0x116   : > { %894 = vst.msk [vmem:[#allocation3 + $0x8] sm:$0xff] %vm892_vm8, %v799_v50  ;;  %v805_v32 = vpop.permute.xlu0 %804  ;;  %v1528_v50 = vld [vmem:[#allocation2 + $0x141] sm:$0xff] }
 0x117   : > { %1220 = vrot.lane.b32.xlu1 %v2928_v35, %s2532_s23  ;;  %897 = vst.msk [vmem:[#allocation3 + $0x20] sm:$0xff] %vm892_vm8, %v805_v32 }
 0x118   : > { %1382 = vrot.lane.b32.xlu0 %v2734_v55, %s2533_s24 }
 0x119   : > { %v803_v43 = vpop.permute.xlu1 %802 }
 0x11a   : > { %896 = vst.msk [vmem:[#allocation3 + $0x18] sm:$0xff] %vm892_vm8, %v803_v43  ;;  %v809_v18 = vpop.permute.xlu0 %808 }
 0x11b   : > { %1412 = vrot.lane.b32.xlu1 %v2796_v8, %s2533_s24  ;;  %899 = vst.msk [vmem:[#allocation3 + $0x30] sm:$0xff] %vm892_vm8, %v809_v18  ;;  %v1508_v8 = vld [vmem:[#allocation2 + $0x51] sm:$0xff]  ;;  %v1720_v18 = vld [vmem:[#allocation2 + $0x13a] sm:$0xff] }
 0x11c   : > { %1573 = vrot.lane.b32.xlu0 %v1507_v63, %s2534_s25 }
 0x11d   : > { %v807_v54 = vpop.permute.xlu1 %806 }
 0x11e   : > { %898 = vst.msk [vmem:[#allocation3 + $0x28] sm:$0xff] %vm892_vm8, %v807_v54  ;;  %v813_v35 = vpop.permute.xlu0 %812 }
 0x11f   : > { %1414 = vrot.lane.b32.xlu1 %v2806_v9, %s2533_s24  ;;  %901 = vst.msk [vmem:[#allocation3 + $0x40] sm:$0xff] %vm892_vm8, %v813_v35 }
 0x120   : > { %997 = vrot.lane.b32.xlu0 %v1507_v63, %s2531_s22 }
 0x121   : > { %v811_v55 = vpop.permute.xlu1 %810 }
 0x122   : > { %900 = vst.msk [vmem:[#allocation3 + $0x38] sm:$0xff] %vm892_vm8, %v811_v55  ;;  %v817_v61 = vpop.permute.xlu0 %816 }
 0x123   : > { %1605 = vrot.lane.b32.xlu1 %v2825_v14, %s2534_s25  ;;  %903 = vst.msk [vmem:[#allocation3 + $0x50] sm:$0xff] %vm892_vm8, %v817_v61  ;;  %v1705_v61 = vld [vmem:[#allocation2 + $0x82] sm:$0xff] }
 0x124   : > { %1575 = vrot.lane.b32.xlu0 %v1508_v8, %s2534_s25 }
 0x125   : > { %v815_v23 = vpop.permute.xlu1 %814 }
 0x126   : > { %902 = vst.msk [vmem:[#allocation3 + $0x48] sm:$0xff] %vm892_vm8, %v815_v23  ;;  %v821_v9 = vpop.permute.xlu0 %820 }
 0x127   : > { %1029 = vrot.lane.b32.xlu1 %v2825_v14, %s2531_s22  ;;  %905 = vst.msk [vmem:[#allocation3 + $0x60] sm:$0xff] %vm892_vm8, %v821_v9 }
 0x128   : > { %1766 = vrot.lane.b32.xlu0 %v2887_v42, %s2535_s26 }
 0x129   : > { %v819_v22 = vpop.permute.xlu1 %818 }
 0x12a   : > { %904 = vst.msk [vmem:[#allocation3 + $0x58] sm:$0xff] %vm892_vm8, %v819_v22  ;;  %v825_v0 = vpop.permute.xlu0 %824 }
 0x12b   : > { %1607 = vrot.lane.b32.xlu1 %v2847_v21, %s2534_s25  ;;  %907 = vst.msk [vmem:[#allocation3 + $0x70] sm:$0xff] %vm892_vm8, %v825_v0 }
 0x12c   : > { %999 = vrot.lane.b32.xlu0 %v1508_v8, %s2531_s22 }
 0x12d   : > { %v823_v24 = vpop.permute.xlu1 %822 }
 0x12e   : > { %906 = vst.msk [vmem:[#allocation3 + $0x68] sm:$0xff] %vm892_vm8, %v823_v24  ;;  %v829_v14 = vpop.permute.xlu0 %828  ;;  %v1721_v24 = vld [vmem:[#allocation2 + $0x142] sm:$0xff] }
 0x12f   : > { %1798 = vrot.lane.b32.xlu1 %v2924_v34, %s2535_s26  ;;  %909 = vst.msk [vmem:[#allocation3 + $0x80] sm:$0xff] %vm892_vm8, %v829_v14 }
 0x130   : > { %1190 = vrot.lane.b32.xlu0 %v2887_v42, %s2532_s23 }
 0x131   : > { %v827_v25 = vpop.permute.xlu1 %826 }
 0x132   : > { %908 = vst.msk [vmem:[#allocation3 + $0x78] sm:$0xff] %vm892_vm8, %v827_v25  ;;  %v833_v62 = vpop.permute.xlu0 %832  ;;  %v1320_v25 = vld [vmem:[#allocation2 + $0x90] sm:$0xff] }
 0x133   : > { %1031 = vrot.lane.b32.xlu1 %v2847_v21, %s2531_s22  ;;  %911 = vst.msk [vmem:[#allocation3 + $0x90] sm:$0xff] %vm892_vm8, %v833_v62 }
 0x134   : > { %1768 = vrot.lane.b32.xlu0 %v2899_v45, %s2535_s26 }
 0x135   : > { %v831_v2 = vpop.permute.xlu1 %830 }
 0x136   : > { %910 = vst.msk [vmem:[#allocation3 + $0x88] sm:$0xff] %vm892_vm8, %v831_v2  ;;  %v837_v27 = vpop.permute.xlu0 %836 }
 0x137   : > { %1222 = vrot.lane.b32.xlu1 %v2924_v34, %s2532_s23  ;;  %913 = vst.msk [vmem:[#allocation3 + $0xa0] sm:$0xff] %vm892_vm8, %v837_v27 }
 0x138   : > { %1192 = vrot.lane.b32.xlu0 %v2899_v45, %s2532_s23 }
 0x139   : > { %v835_v42 = vpop.permute.xlu1 %834 }
 0x13a   : > { %912 = vst.msk [vmem:[#allocation3 + $0x98] sm:$0xff] %vm892_vm8, %v835_v42  ;;  %v841_v21 = vpop.permute.xlu0 %840  ;;  %v1321_v42 = vld [vmem:[#allocation2 + $0x98] sm:$0xff] }
 0x13b   : > { %1800 = vrot.lane.b32.xlu1 %v2936_v37, %s2535_s26  ;;  %915 = vst.msk [vmem:[#allocation3 + $0xb0] sm:$0xff] %vm892_vm8, %v841_v21 }
 0x13c   : > { %1384 = vrot.lane.b32.xlu0 %v2742_v57, %s2533_s24 }
 0x13d   : > { %v839_v13 = vpop.permute.xlu1 %838 }
 0x13e   : > { %914 = vst.msk [vmem:[#allocation3 + $0xa8] sm:$0xff] %vm892_vm8, %v839_v13  ;;  %v845_v34 = vpop.permute.xlu0 %844 }
 0x13f   : > { %1224 = vrot.lane.b32.xlu1 %v2936_v37, %s2532_s23  ;;  %917 = vst.msk [vmem:[#allocation3 + $0xc0] sm:$0xff] %vm892_vm8, %v845_v34  ;;  %v1513_v34 = vld [vmem:[#allocation2 + $0x91] sm:$0xff] }
 0x140   : > { %1386 = vrot.lane.b32.xlu0 %v2744_v58, %s2533_s24 }
 0x141   : > { %v843_v45 = vpop.permute.xlu1 %842 }
 0x142   : > { %916 = vst.msk [vmem:[#allocation3 + $0xb8] sm:$0xff] %vm892_vm8, %v843_v45  ;;  %v849_v29 = vpop.permute.xlu0 %848 }
 0x143   : > { %1416 = vrot.lane.b32.xlu1 %v2813_v11, %s2533_s24  ;;  %919 = vst.msk [vmem:[#allocation3 + $0xd0] sm:$0xff] %vm892_vm8, %v849_v29  ;;  %v1510_v11 = vld [vmem:[#allocation2 + $0x69] sm:$0xff] }
 0x144   : > { %1577 = vrot.lane.b32.xlu0 %v1509_v56, %s2534_s25 }
 0x145   : > { %v847_v57 = vpop.permute.xlu1 %846 }
 0x146   : > { %918 = vst.msk [vmem:[#allocation3 + $0xc8] sm:$0xff] %vm892_vm8, %v847_v57  ;;  %v853_v37 = vpop.permute.xlu0 %852  ;;  %v1529_v57 = vld [vmem:[#allocation2 + $0x151] sm:$0xff] }
 0x147   : > { %1418 = vrot.lane.b32.xlu1 %v2815_v12, %s2533_s24  ;;  %921 = vst.msk [vmem:[#allocation3 + $0xe0] sm:$0xff] %vm892_vm8, %v853_v37 }
 0x148   : > { %1001 = vrot.lane.b32.xlu0 %v1509_v56, %s2531_s22 }
 0x149   : > { %v851_v58 = vpop.permute.xlu1 %850 }
 0x14a   : > { %920 = vst.msk [vmem:[#allocation3 + $0xd8] sm:$0xff] %vm892_vm8, %v851_v58  ;;  %v857_v33 = vpop.permute.xlu0 %856 }
 0x14b   : > { %1609 = vrot.lane.b32.xlu1 %v1525_v38, %s2534_s25  ;;  %923 = vst.msk [vmem:[#allocation3 + $0xf0] sm:$0xff] %vm892_vm8, %v857_v33  ;;  %v1530_v33 = vld [vmem:[#allocation2 + $0x159] sm:$0xff] }
 0x14c   : > { %1579 = vrot.lane.b32.xlu0 %v1510_v11, %s2534_s25 }
 0x14d   : > { %v855_v41 = vpop.permute.xlu1 %854 }
 0x14e   : > { %922 = vst.msk [vmem:[#allocation3 + $0xe8] sm:$0xff] %vm892_vm8, %v855_v41  ;;  %v990_v12 = vpop.permute.xlu0 %989 }
 0x14f   : > { %1033 = vrot.lane.b32.xlu1 %v1525_v38, %s2531_s22  ;;  %1086 = vst.msk [vmem:[#allocation3] sm:$0xff] %vm1085_vm9, %v990_v12 }
 0x150   : > { %1770 = vrot.lane.b32.xlu0 %v2895_v44, %s2535_s26 }
 0x151   : > { %v859_v51 = vpop.permute.xlu1 %858 }
 0x152   : > { %924 = vst.msk [vmem:[#allocation3 + $0xf8] sm:$0xff] %vm892_vm8, %v859_v51  ;;  %v994_v7 = vpop.permute.xlu0 %993  ;;  %v1722_v51 = vld [vmem:[#allocation2 + $0x152] sm:$0xff] }
 0x153   : > { %1611 = vrot.lane.b32.xlu1 %v1526_v6, %s2534_s25  ;;  %1088 = vst.msk [vmem:[#allocation3 + $0x10] sm:$0xff] %vm1085_vm9, %v994_v7 }
 0x154   : > { %1003 = vrot.lane.b32.xlu0 %v1510_v11, %s2531_s22 }
 0x155   : > { %v992_v52 = vpop.permute.xlu1 %991 }
 0x156   : > { %1087 = vst.msk [vmem:[#allocation3 + $0x8] sm:$0xff] %vm1085_vm9, %v992_v52  ;;  %v1024_v26 = vpop.permute.xlu0 %1023 }
 0x157   : > { %1802 = vrot.lane.b32.xlu1 %v2932_v36, %s2535_s26  ;;  %1103 = vst.msk [vmem:[#allocation3 + $0x88] sm:$0xff] %vm1085_vm9, %v1024_v26 }
 0x158   : > { %1194 = vrot.lane.b32.xlu0 %v1124_v1, %s2532_s23 }
 0x159   : > { %v1022_v44 = vpop.permute.xlu1 %1021 }
 0x15a   : > { %1102 = vst.msk [vmem:[#allocation3 + $0x80] sm:$0xff] %vm1085_vm9, %v1022_v44  ;;  %v1215_v10 = vpop.permute.xlu0 %1214  ;;  %v1707_v44 = vld [vmem:[#allocation2 + $0x9a] sm:$0xff] }
 0x15b   : > { %1035 = vrot.lane.b32.xlu1 %v1526_v6, %s2531_s22  ;;  %1295 = vst.msk [vmem:[#allocation3 + $0x80] sm:$0xff] %vm1278_vm10, %v1215_v10 }
 0x15c   : > { %1772 = vrot.lane.b32.xlu0 %v1703_v4, %s2535_s26 }
 0x15d   : > { %v1183_v3 = vpop.permute.xlu1 %1182 }
 0x15e   : > { %1279 = vst.msk [vmem:[#allocation3] sm:$0xff] %vm1278_vm10, %v1183_v3  ;;  %v1217_v46 = vpop.permute.xlu0 %1216 }
 0x15f   : > { %1226 = vrot.lane.b32.xlu1 %v2932_v36, %s2532_s23  ;;  %1296 = vst.msk [vmem:[#allocation3 + $0x88] sm:$0xff] %vm1278_vm10, %v1217_v46 }
 0x160   : > { %1196 = vrot.lane.b32.xlu0 %v1703_v4, %s2532_s23 }
 0x161   : > { %v1185_v5 = vpop.permute.xlu1 %1184 }
 0x162   : > { %1280 = vst.msk [vmem:[#allocation3 + $0x8] sm:$0xff] %vm1278_vm10, %v1185_v5  ;;  %v1409_v28 = vpop.permute.xlu0 %1408  ;;  %v1723_v5 = vld [vmem:[#allocation2 + $0x15a] sm:$0xff] }
 0x163   : > { %1804 = vrot.lane.b32.xlu1 %v2942_v48, %s2535_s26  ;;  %1489 = vst.msk [vmem:[#allocation3 + $0x80] sm:$0xff] %vm1472_vm11, %v1409_v28 }
 0x164   : > { %1388 = vrot.lane.b32.xlu0 %v2746_v59, %s2533_s24 }
 0x165   : > { %v1377_v30 = vpop.permute.xlu1 %1376 }
 0x166   : > { %1473 = vst.msk [vmem:[#allocation3] sm:$0xff] %vm1472_vm11, %v1377_v30  ;;  %v1411_v36 = vpop.permute.xlu0 %1410  ;;  %v1322_v30 = vld [vmem:[#allocation2 + $0xa8] sm:$0xff] }
 0x167   : > { %1228 = vrot.lane.b32.xlu1 %v2942_v48, %s2532_s23  ;;  %1490 = vst.msk [vmem:[#allocation3 + $0x88] sm:$0xff] %vm1472_vm11, %v1411_v36 }
 0x168   : > { %1390 = vrot.lane.b32.xlu0 %v2755_v60, %s2533_s24  ;;  %v1527_v60 = vld [vmem:[#allocation2 + $0x139] sm:$0xff] }
 0x169   : > { %v1379_v31 = vpop.permute.xlu1 %1378 }
 0x16a   : > { %1474 = vst.msk [vmem:[#allocation3 + $0x8] sm:$0xff] %vm1472_vm11, %v1379_v31  ;;  %v1602_v59 = vpop.permute.xlu0 %1601 }
 0x16b   : > { %1420 = vrot.lane.b32.xlu1 %v2829_v15, %s2533_s24  ;;  %1682 = vst.msk [vmem:[#allocation3 + $0x80] sm:$0xff] %vm1665_vm12, %v1602_v59  ;;  %v1512_v15 = vld [vmem:[#allocation2 + $0x81] sm:$0xff]  ;;  %v1323_v59 = vld [vmem:[#allocation2 + $0xb0] sm:$0xff] }
 0x16c   : > { %1581 = vrot.lane.b32.xlu0 %v1511_v49, %s2534_s25 }
 0x16d   : > { %v1570_v39 = vpop.permute.xlu1 %1569 }
 0x16e   : > { %1666 = vst.msk [vmem:[#allocation3] sm:$0xff] %vm1665_vm12, %v1570_v39  ;;  %v1572_v48 = vpop.permute.xlu0 %1571 }
 0x16f   : > { %1422 = vrot.lane.b32.xlu1 %v2831_v16, %s2533_s24  ;;  %1667 = vst.msk [vmem:[#allocation3 + $0x8] sm:$0xff] %vm1665_vm12, %v1572_v48  ;;  %v1704_v16 = vld [vmem:[#allocation2 + $0x7a] sm:$0xff]  ;;  %v1338_v48 = vld [vmem:[#allocation2 + $0x168] sm:$0xff] }
 0x170   : > { %1005 = vrot.lane.b32.xlu0 %v1511_v49, %s2531_s22 }
 0x171   : > { %v1026_v47 = vpop.permute.xlu1 %1025 }
 0x172   : > { %1104 = vst.msk [vmem:[#allocation3 + $0x90] sm:$0xff] %vm1085_vm9, %v1026_v47  ;;  %v1763_v40 = vpop.permute.xlu0 %1762  ;;  %v1515_v47 = vld [vmem:[#allocation2 + $0xa9] sm:$0xff] }
 0x173   : > { %1613 = vrot.lane.b32.xlu1 %v1527_v60, %s2534_s25  ;;  %1859 = vst.msk [vmem:[#allocation3] sm:$0xff] %vm1858_vm13, %v1763_v40  ;;  %v1339_v40 = vld [vmem:[#allocation2 + $0x170] sm:$0xff] }
 0x174   : > { %1583 = vrot.lane.b32.xlu0 %v1512_v15, %s2534_s25 }
 0x175   : > { %v1604_v53 = vpop.permute.xlu1 %1603 }
 0x176   : > { %1683 = vst.msk [vmem:[#allocation3 + $0x88] sm:$0xff] %vm1665_vm12, %v1604_v53  ;;  %v996_v17 = vpop.permute.xlu0 %995 }
 0x177   : > { %1037 = vrot.lane.b32.xlu1 %v1527_v60, %s2531_s22  ;;  %1089 = vst.msk [vmem:[#allocation3 + $0x18] sm:$0xff] %vm1085_vm9, %v996_v17  ;;  %v1531_v17 = vld [vmem:[#allocation2 + $0x169] sm:$0xff] }
 0x178   : > { %1774 = vrot.lane.b32.xlu0 %v1704_v16, %s2535_s26 }
 0x179   : > { %v1795_v32 = vpop.permute.xlu1 %1794 }
 0x17a   : > { %1875 = vst.msk [vmem:[#allocation3 + $0x80] sm:$0xff] %vm1858_vm13, %v1795_v32  ;;  %v1187_v43 = vpop.permute.xlu0 %1186  ;;  %v1891_v63 = vld [vmem:[#allocation3] sm:$0xff] }
 0x17b   : > { %1615 = vrot.lane.b32.xlu1 %v1528_v50, %s2534_s25  ;;  %1281 = vst.msk [vmem:[#allocation3 + $0x10] sm:$0xff] %vm1278_vm10, %v1187_v43  ;;  %2439 = vmatprep.mubr.msk.f32.mxu0 %vm1934_vm14, %v1891_v63  ;;  %v1516_v32 = vld [vmem:[#allocation2 + $0xb1] sm:$0xff] }
 0x17c   : > { %1007 = vrot.lane.b32.xlu0 %v1512_v15, %s2531_s22 }
 0x17d   : > { %v1028_v54 = vpop.permute.xlu1 %1027 }
 0x17e   : > { %1105 = vst.msk [vmem:[#allocation3 + $0x98] sm:$0xff] %vm1085_vm9, %v1028_v54  ;;  %v1765_v35 = vpop.permute.xlu0 %1764 }
 0x17f   : > { %1806 = vrot.lane.b32.xlu1 %v1720_v18, %s2535_s26  ;;  %1860 = vst.msk [vmem:[#allocation3 + $0x8] sm:$0xff] %vm1858_vm13, %v1765_v35  ;;  %v1532_v35 = vld [vmem:[#allocation2 + $0x171] sm:$0xff] }
 0x180   : > { %1198 = vrot.lane.b32.xlu0 %v1704_v16, %s2532_s23 }
 0x181   : > { %v1219_v55 = vpop.permute.xlu1 %1218  ;;  %v1907_v8 = vld [vmem:[#allocation3 + $0x80] sm:$0xff] }
 0x182   : > { %1297 = vst.msk [vmem:[#allocation3 + $0x90] sm:$0xff] %vm1278_vm10, %v1219_v55  ;;  %2463 = vmatprep.mubr.msk.f32.mxu1 %vm1934_vm14, %v1907_v8  ;;  %v1189_v23 = vpop.permute.xlu0 %1188 }
 0x183   : > { %1039 = vrot.lane.b32.xlu1 %v1528_v50, %s2531_s22  ;;  %1282 = vst.msk [vmem:[#allocation3 + $0x18] sm:$0xff] %vm1278_vm10, %v1189_v23  ;;  %v1724_v23 = vld [vmem:[#allocation2 + $0x16a] sm:$0xff] }
 0x184   : > { %1776 = vrot.lane.b32.xlu0 %v1705_v61, %s2535_s26 }
 0x185   : > { %v1797_v9 = vpop.permute.xlu1 %1796 }
 0x186   : > { %1876 = vst.msk [vmem:[#allocation3 + $0x88] sm:$0xff] %vm1858_vm13, %v1797_v9  ;;  %v1381_v22 = vpop.permute.xlu0 %1380  ;;  %v1892_v0 = vld [vmem:[#allocation3 + $0x8] sm:$0xff] }
 0x187   : > { %1230 = vrot.lane.b32.xlu1 %v1720_v18, %s2532_s23  ;;  %1475 = vst.msk [vmem:[#allocation3 + $0x10] sm:$0xff] %vm1472_vm11, %v1381_v22  ;;  %2440 = vmatmul.mubr.msk.f32.vlgmr.msra.gmra.mrb[0].mxu0 %vm1934_vm14, %v1892_v0  ;;  %v1708_v18 = vld [vmem:[#allocation2 + $0xaa] sm:$0xff] }
 0x188   : > { %1200 = vrot.lane.b32.xlu0 %v1705_v61, %s2532_s23 }
 0x189   : > { %v1221_v14 = vpop.permute.xlu1 %1220 }
 0x18a   : > { %1298 = vst.msk [vmem:[#allocation3 + $0x98] sm:$0xff] %vm1278_vm10, %v1221_v14  ;;  %v1383_v62 = vpop.permute.xlu0 %1382  ;;  %v1709_v14 = vld [vmem:[#allocation2 + $0xb2] sm:$0xff] }
 0x18b   : > { %1808 = vrot.lane.b32.xlu1 %v1721_v24, %s2535_s26  ;;  %1476 = vst.msk [vmem:[#allocation3 + $0x18] sm:$0xff] %vm1472_vm11, %v1383_v62 }
 0x18c   : > { %1392 = vrot.lane.b32.xlu0 %v1320_v25, %s2533_s24 }
 0x18d   : > { %v1413_v2 = vpop.permute.xlu1 %1412  ;;  %v1908_v27 = vld [vmem:[#allocation3 + $0x88] sm:$0xff] }
 0x18e   : > { %1491 = vst.msk [vmem:[#allocation3 + $0x90] sm:$0xff] %vm1472_vm11, %v1413_v2  ;;  %2464 = vmatmul.mubr.msk.f32.vlgmr.msra.gmra.mrb[0].mxu1 %vm1934_vm14, %v1908_v27  ;;  %v1574_v21 = vpop.permute.xlu0 %1573 }
 0x18f   : > { %1232 = vrot.lane.b32.xlu1 %v1721_v24, %s2532_s23  ;;  %1668 = vst.msk [vmem:[#allocation3 + $0x10] sm:$0xff] %vm1665_vm12, %v1574_v21 }
 0x190   : > { %1394 = vrot.lane.b32.xlu0 %v1321_v42, %s2533_s24  ;;  %v1725_v42 = vld [vmem:[#allocation2 + $0x172] sm:$0xff] }
 0x191   : > { %v1415_v13 = vpop.permute.xlu1 %1414 }
 0x192   : > { %1492 = vst.msk [vmem:[#allocation3 + $0x98] sm:$0xff] %vm1472_vm11, %v1415_v13  ;;  %v998_v45 = vpop.permute.xlu0 %997  ;;  %v1324_v13 = vld [vmem:[#allocation2 + $0xc0] sm:$0xff] }
 0x193   : > { %1424 = vrot.lane.b32.xlu1 %v2843_v19, %s2533_s24  ;;  %1090 = vst.msk [vmem:[#allocation3 + $0x20] sm:$0xff] %vm1085_vm9, %v998_v45  ;;  %v1514_v19 = vld [vmem:[#allocation2 + $0x99] sm:$0xff] }
 0x194   : > { %1585 = vrot.lane.b32.xlu0 %v1513_v34, %s2534_s25 }
 0x195   : > { %v1606_v56 = vpop.permute.xlu1 %1605 }
 0x196   : > { %1684 = vst.msk [vmem:[#allocation3 + $0x90] sm:$0xff] %vm1665_vm12, %v1606_v56  ;;  %v1576_v29 = vpop.permute.xlu0 %1575 }
 0x197   : > { %1426 = vrot.lane.b32.xlu1 %v2845_v20, %s2533_s24  ;;  %1669 = vst.msk [vmem:[#allocation3 + $0x18] sm:$0xff] %vm1665_vm12, %v1576_v29  ;;  %v1706_v20 = vld [vmem:[#allocation2 + $0x92] sm:$0xff]  ;;  %v1325_v29 = vld [vmem:[#allocation2 + $0xc8] sm:$0xff] }
 0x198   : > { %1009 = vrot.lane.b32.xlu0 %v1513_v34, %s2531_s22 }
 0x199   : > { %v1030_v37 = vpop.permute.xlu1 %1029 }
 0x19a   : > { %1106 = vst.msk [vmem:[#allocation3 + $0xa0] sm:$0xff] %vm1085_vm9, %v1030_v37  ;;  %v1767_v38 = vpop.permute.xlu0 %1766  ;;  %v1340_v37 = vld [vmem:[#allocation2 + $0x180] sm:$0xff] }
 0x19b   : > { %1617 = vrot.lane.b32.xlu1 %v1529_v57, %s2534_s25  ;;  %1861 = vst.msk [vmem:[#allocation3 + $0x10] sm:$0xff] %vm1858_vm13, %v1767_v38  ;;  %v1517_v38 = vld [vmem:[#allocation2 + $0xc1] sm:$0xff] }
 0x19c   : > { %1587 = vrot.lane.b32.xlu0 %v1514_v19, %s2534_s25 }
 0x19d   : > { %v1608_v58 = vpop.permute.xlu1 %1607 }
 0x19e   : > { %1685 = vst.msk [vmem:[#allocation3 + $0x98] sm:$0xff] %vm1665_vm12, %v1608_v58  ;;  %v1000_v11 = vpop.permute.xlu0 %999 }
 0x19f   : > { %1041 = vrot.lane.b32.xlu1 %v1529_v57, %s2531_s22  ;;  %1091 = vst.msk [vmem:[#allocation3 + $0x28] sm:$0xff] %vm1085_vm9, %v1000_v11 }
 0x1a0   : > { %1778 = vrot.lane.b32.xlu0 %v1706_v20, %s2535_s26 }
 0x1a1   : > { %v1799_v41 = vpop.permute.xlu1 %1798 }
 0x1a2   : > { %1877 = vst.msk [vmem:[#allocation3 + $0x90] sm:$0xff] %vm1858_vm13, %v1799_v41  ;;  %v1191_v12 = vpop.permute.xlu0 %1190  ;;  %v1893_v6 = vld [vmem:[#allocation3 + $0x10] sm:$0xff] }
 0x1a3   : > { %1619 = vrot.lane.b32.xlu1 %v1530_v33, %s2534_s25  ;;  %1283 = vst.msk [vmem:[#allocation3 + $0x20] sm:$0xff] %vm1278_vm10, %v1191_v12  ;;  %2442 = vmatprep.mubr.msk.f32.mxu0 %vm1934_vm14, %v1893_v6  ;;  %v1533_v41 = vld [vmem:[#allocation2 + $0x181] sm:$0xff]  ;;  %v1518_v6 = vld [vmem:[#allocation2 + $0xc9] sm:$0xff] }
 0x1a4   : > { %1011 = vrot.lane.b32.xlu0 %v1514_v19, %s2531_s22 }
 0x1a5   : > { %v1032_v7 = vpop.permute.xlu1 %1031 }
 0x1a6   : > { %1107 = vst.msk [vmem:[#allocation3 + $0xa8] sm:$0xff] %vm1085_vm9, %v1032_v7  ;;  %v1769_v52 = vpop.permute.xlu0 %1768 }
 0x1a7   : > { %1810 = vrot.lane.b32.xlu1 %v1722_v51, %s2535_s26  ;;  %1862 = vst.msk [vmem:[#allocation3 + $0x18] sm:$0xff] %vm1858_vm13, %v1769_v52  ;;  %v1710_v52 = vld [vmem:[#allocation2 + $0xc2] sm:$0xff] }
 0x1a8   : > { %1202 = vrot.lane.b32.xlu0 %v1706_v20, %s2532_s23  ;;  %v1341_v20 = vld [vmem:[#allocation2 + $0x188] sm:$0xff] }
 0x1a9   : > { %v1223_v1 = vpop.permute.xlu1 %1222  ;;  %v1909_v26 = vld [vmem:[#allocation3 + $0x90] sm:$0xff] }
 0x1aa   : > { %1299 = vst.msk [vmem:[#allocation3 + $0xa0] sm:$0xff] %vm1278_vm10, %v1223_v1  ;;  %2466 = vmatprep.mubr.msk.f32.mxu1 %vm1934_vm14, %v1909_v26  ;;  %v1193_v4 = vpop.permute.xlu0 %1192  ;;  %v1534_v26 = vld [vmem:[#allocation2 + $0x189] sm:$0xff] }
 0x1ab   : > { %1043 = vrot.lane.b32.xlu1 %v1530_v33, %s2531_s22  ;;  %1284 = vst.msk [vmem:[#allocation3 + $0x28] sm:$0xff] %vm1278_vm10, %v1193_v4 }
 0x1ac   : > { %1780 = vrot.lane.b32.xlu0 %v1707_v44, %s2535_s26 }
 0x1ad   : > { %v1801_v10 = vpop.permute.xlu1 %1800 }
 0x1ae   : > { %1878 = vst.msk [vmem:[#allocation3 + $0x98] sm:$0xff] %vm1858_vm13, %v1801_v10  ;;  %v1385_v3 = vpop.permute.xlu0 %1384  ;;  %v1894_v46 = vld [vmem:[#allocation3 + $0x18] sm:$0xff] }
 0x1af   : > { %1234 = vrot.lane.b32.xlu1 %v1722_v51, %s2532_s23  ;;  %1477 = vst.msk [vmem:[#allocation3 + $0x20] sm:$0xff] %vm1472_vm11, %v1385_v3  ;;  %2443 = vmatmul.mubr.msk.f32.gmra.mrb[2].mxu0 %vm1934_vm14, %v1894_v46  ;;  %v1726_v3 = vld [vmem:[#allocation2 + $0x182] sm:$0xff] }
 0x1b0   : > { %1204 = vrot.lane.b32.xlu0 %v1707_v44, %s2532_s23 }
 0x1b1   : > { %v1225_v28 = vpop.permute.xlu1 %1224 }
 0x1b2   : > { %1300 = vst.msk [vmem:[#allocation3 + $0xa8] sm:$0xff] %vm1278_vm10, %v1225_v28  ;;  %v1387_v36 = vpop.permute.xlu0 %1386 }
 0x1b3   : > { %1812 = vrot.lane.b32.xlu1 %v1723_v5, %s2535_s26  ;;  %1478 = vst.msk [vmem:[#allocation3 + $0x28] sm:$0xff] %vm1472_vm11, %v1387_v36  ;;  %v1711_v36 = vld [vmem:[#allocation2 + $0xca] sm:$0xff] }
 0x1b4   : > { %1396 = vrot.lane.b32.xlu0 %v1322_v30, %s2533_s24 }
 0x1b5   : > { %v1417_v31 = vpop.permute.xlu1 %1416  ;;  %v1910_v49 = vld [vmem:[#allocation3 + $0x98] sm:$0xff] }
 0x1b6   : > { %1493 = vst.msk [vmem:[#allocation3 + $0xa0] sm:$0xff] %vm1472_vm11, %v1417_v31  ;;  %2467 = vmatmul.mubr.msk.f32.gmra.mrb[2].mxu1 %vm1934_vm14, %v1910_v49  ;;  %v1578_v39 = vpop.permute.xlu0 %1577 }
 0x1b7   : > { %1236 = vrot.lane.b32.xlu1 %v1723_v5, %s2532_s23  ;;  %1670 = vst.msk [vmem:[#allocation3 + $0x20] sm:$0xff] %vm1665_vm12, %v1578_v39 }
 0x1b8   : > { %1398 = vrot.lane.b32.xlu0 %v1323_v59, %s2533_s24 }
 0x1b9   : > { %v1419_v60 = vpop.permute.xlu1 %1418 }
 0x1ba   : > { %1494 = vst.msk [vmem:[#allocation3 + $0xa8] sm:$0xff] %vm1472_vm11, %v1419_v60  ;;  %v1002_v15 = vpop.permute.xlu0 %1001 }
 0x1bb   : > { %1428 = vrot.lane.b32.xlu1 %v1338_v48, %s2533_s24  ;;  %1092 = vst.msk [vmem:[#allocation3 + $0x30] sm:$0xff] %vm1085_vm9, %v1002_v15  ;;  %v1727_v48 = vld [vmem:[#allocation2 + $0x18a] sm:$0xff] }
 0x1bc   : > { %1589 = vrot.lane.b32.xlu0 %v1515_v47, %s2534_s25 }
 0x1bd   : > { %v1610_v53 = vpop.permute.xlu1 %1609 }
 0x1be   : > { %1686 = vst.msk [vmem:[#allocation3 + $0xa0] sm:$0xff] %vm1665_vm12, %v1610_v53  ;;  %v1580_v16 = vpop.permute.xlu0 %1579 }
 0x1bf   : > { %1430 = vrot.lane.b32.xlu1 %v1339_v40, %s2533_s24  ;;  %1671 = vst.msk [vmem:[#allocation3 + $0x28] sm:$0xff] %vm1665_vm12, %v1580_v16  ;;  %v1327_v16 = vld [vmem:[#allocation2 + $0xe0] sm:$0xff] }
 0x1c0   : > { %1013 = vrot.lane.b32.xlu0 %v1515_v47, %s2531_s22  ;;  %v1326_v47 = vld [vmem:[#allocation2 + $0xd8] sm:$0xff] }
 0x1c1   : > { %v1034_v50 = vpop.permute.xlu1 %1033 }
 0x1c2   : > { %1108 = vst.msk [vmem:[#allocation3 + $0xb0] sm:$0xff] %vm1085_vm9, %v1034_v50  ;;  %v1771_v43 = vpop.permute.xlu0 %1770  ;;  %v1342_v50 = vld [vmem:[#allocation2 + $0x198] sm:$0xff] }
 0x1c3   : > { %1621 = vrot.lane.b32.xlu1 %v1531_v17, %s2534_s25  ;;  %1863 = vst.msk [vmem:[#allocation3 + $0x20] sm:$0xff] %vm1858_vm13, %v1771_v43  ;;  %v1519_v43 = vld [vmem:[#allocation2 + $0xd9] sm:$0xff] }
 0x1c4   : > { %1591 = vrot.lane.b32.xlu0 %v1516_v32, %s2534_s25 }
 0x1c5   : > { %v1612_v63 = vpop.permute.xlu1 %1611 }
 0x1c6   : > { %1687 = vst.msk [vmem:[#allocation3 + $0xa8] sm:$0xff] %vm1665_vm12, %v1612_v63  ;;  %v1004_v54 = vpop.permute.xlu0 %1003 }
 0x1c7   : > { %1045 = vrot.lane.b32.xlu1 %v1531_v17, %s2531_s22  ;;  %1093 = vst.msk [vmem:[#allocation3 + $0x38] sm:$0xff] %vm1085_vm9, %v1004_v54 }
 0x1c8   : > { %1782 = vrot.lane.b32.xlu0 %v1708_v18, %s2535_s26 }
 0x1c9   : > { %v1803_v55 = vpop.permute.xlu1 %1802 }
 0x1ca   : > { %1879 = vst.msk [vmem:[#allocation3 + $0xa0] sm:$0xff] %vm1858_vm13, %v1803_v55  ;;  %v1195_v8 = vpop.permute.xlu0 %1194  ;;  %v1895_v61 = vld [vmem:[#allocation3 + $0x20] sm:$0xff] }
 0x1cb   : > { %1623 = vrot.lane.b32.xlu1 %v1532_v35, %s2534_s25  ;;  %1285 = vst.msk [vmem:[#allocation3 + $0x30] sm:$0xff] %vm1278_vm10, %v1195_v8  ;;  %2445 = vmatprep.mubr.msk.f32.mxu0 %vm1934_vm14, %v1895_v61  ;;  %v1535_v8 = vld [vmem:[#allocation2 + $0x199] sm:$0xff] }
 0x1cc   : > { %1015 = vrot.lane.b32.xlu0 %v1516_v32, %s2531_s22 }
 0x1cd   : > { %v1036_v9 = vpop.permute.xlu1 %1035 }
 0x1ce   : > { %1109 = vst.msk [vmem:[#allocation3 + $0xb8] sm:$0xff] %vm1085_vm9, %v1036_v9  ;;  %v1773_v22 = vpop.permute.xlu0 %1772 }
 0x1cf   : > { %1814 = vrot.lane.b32.xlu1 %v1724_v23, %s2535_s26  ;;  %1864 = vst.msk [vmem:[#allocation3 + $0x28] sm:$0xff] %vm1858_vm13, %v1773_v22  ;;  %v1536_v22 = vld [vmem:[#allocation2 + $0x1a1] sm:$0xff] }
 0x1d0   : > { %1206 = vrot.lane.b32.xlu0 %v1708_v18, %s2532_s23  ;;  %v1343_v18 = vld [vmem:[#allocation2 + $0x1a0] sm:$0xff] }
 0x1d1   : > { %v1227_v0 = vpop.permute.xlu1 %1226  ;;  %v1911_v24 = vld [vmem:[#allocation3 + $0xa0] sm:$0xff] }
 0x1d2   : > { %1301 = vst.msk [vmem:[#allocation3 + $0xb0] sm:$0xff] %vm1278_vm10, %v1227_v0  ;;  %2469 = vmatprep.mubr.msk.f32.mxu1 %vm1934_vm14, %v1911_v24  ;;  %v1197_v25 = vpop.permute.xlu0 %1196  ;;  %v1713_v24 = vld [vmem:[#allocation2 + $0xe2] sm:$0xff] }
 0x1d3   : > { %1047 = vrot.lane.b32.xlu1 %v1532_v35, %s2531_s22  ;;  %1286 = vst.msk [vmem:[#allocation3 + $0x38] sm:$0xff] %vm1278_vm10, %v1197_v25  ;;  %v1520_v35 = vld [vmem:[#allocation2 + $0xe1] sm:$0xff] }
 0x1d4   : > { %1784 = vrot.lane.b32.xlu0 %v1709_v14, %s2535_s26  ;;  %v1728_v25 = vld [vmem:[#allocation2 + $0x19a] sm:$0xff] }
 0x1d5   : > { %v1805_v62 = vpop.permute.xlu1 %1804 }
 0x1d6   : > { %1880 = vst.msk [vmem:[#allocation3 + $0xa8] sm:$0xff] %vm1858_vm13, %v1805_v62  ;;  %v1389_v2 = vpop.permute.xlu0 %1388  ;;  %v1896_v27 = vld [vmem:[#allocation3 + $0x28] sm:$0xff] }
 0x1d7   : > { %1238 = vrot.lane.b32.xlu1 %v1724_v23, %s2532_s23  ;;  %1479 = vst.msk [vmem:[#allocation3 + $0x30] sm:$0xff] %vm1472_vm11, %v1389_v2  ;;  %2446 = vmatmul.mubr.msk.f32.gmra.mrb[4].mxu0 %vm1934_vm14, %v1896_v27  ;;  %v1712_v23 = vld [vmem:[#allocation2 + $0xda] sm:$0xff] }
 0x1d8   : > { %1208 = vrot.lane.b32.xlu0 %v1709_v14, %s2532_s23 }
 0x1d9   : > { %v1229_v21 = vpop.permute.xlu1 %1228 }
 0x1da   : > { %1302 = vst.msk [vmem:[#allocation3 + $0xb8] sm:$0xff] %vm1278_vm10, %v1229_v21  ;;  %v1391_v34 = vpop.permute.xlu0 %1390 }
 0x1db   : > { %1816 = vrot.lane.b32.xlu1 %v1725_v42, %s2535_s26  ;;  %1480 = vst.msk [vmem:[#allocation3 + $0x38] sm:$0xff] %vm1472_vm11, %v1391_v34 }
 0x1dc   : > { %1400 = vrot.lane.b32.xlu0 %v1324_v13, %s2533_s24 }
 0x1dd   : > { %v1421_v45 = vpop.permute.xlu1 %1420  ;;  %v1912_v56 = vld [vmem:[#allocation3 + $0xa8] sm:$0xff] }
 0x1de   : > { %1495 = vst.msk [vmem:[#allocation3 + $0xb0] sm:$0xff] %vm1472_vm11, %v1421_v45  ;;  %2470 = vmatmul.mubr.msk.f32.gmra.mrb[4].mxu1 %vm1934_vm14, %v1912_v56  ;;  %v1582_v57 = vpop.permute.xlu0 %1581 }
 0x1df   : > { %1240 = vrot.lane.b32.xlu1 %v1725_v42, %s2532_s23  ;;  %1672 = vst.msk [vmem:[#allocation3 + $0x30] sm:$0xff] %vm1665_vm12, %v1582_v57  ;;  %v1729_v42 = vld [vmem:[#allocation2 + $0x1a2] sm:$0xff] }
 0x1e0   : > { %1402 = vrot.lane.b32.xlu0 %v1325_v29, %s2533_s24 }
 0x1e1   : > { %v1423_v19 = vpop.permute.xlu1 %1422 }
 0x1e2   : > { %1496 = vst.msk [vmem:[#allocation3 + $0xb8] sm:$0xff] %vm1472_vm11, %v1423_v19  ;;  %v1006_v58 = vpop.permute.xlu0 %1005 }
 0x1e3   : > { %1432 = vrot.lane.b32.xlu1 %v1340_v37, %s2533_s24  ;;  %1094 = vst.msk [vmem:[#allocation3 + $0x40] sm:$0xff] %vm1085_vm9, %v1006_v58 }
 0x1e4   : > { %1593 = vrot.lane.b32.xlu0 %v1517_v38, %s2534_s25 }
 0x1e5   : > { %v1614_v11 = vpop.permute.xlu1 %1613 }
 0x1e6   : > { %1688 = vst.msk [vmem:[#allocation3 + $0xb0] sm:$0xff] %vm1665_vm12, %v1614_v11  ;;  %v1584_v33 = vpop.permute.xlu0 %1583 }
 0x1e7   : > { %1434 = vrot.lane.b32.xlu1 %v1341_v20, %s2533_s24  ;;  %1673 = vst.msk [vmem:[#allocation3 + $0x38] sm:$0xff] %vm1665_vm12, %v1584_v33 }
 0x1e8   : > { %1017 = vrot.lane.b32.xlu0 %v1517_v38, %s2531_s22 }
 0x1e9   : > { %v1038_v12 = vpop.permute.xlu1 %1037 }
 0x1ea   : > { %1110 = vst.msk [vmem:[#allocation3 + $0xc0] sm:$0xff] %vm1085_vm9, %v1038_v12  ;;  %v1775_v51 = vpop.permute.xlu0 %1774 }
 0x1eb   : > { %1625 = vrot.lane.b32.xlu1 %v1533_v41, %s2534_s25  ;;  %1865 = vst.msk [vmem:[#allocation3 + $0x30] sm:$0xff] %vm1858_vm13, %v1775_v51 }
 0x1ec   : > { %1595 = vrot.lane.b32.xlu0 %v1518_v6, %s2534_s25 }
 0x1ed   : > { %v1616_v7 = vpop.permute.xlu1 %1615 }
 0x1ee   : > { %1689 = vst.msk [vmem:[#allocation3 + $0xb8] sm:$0xff] %vm1665_vm12, %v1616_v7  ;;  %v1008_v1 = vpop.permute.xlu0 %1007 }
 0x1ef   : > { %1049 = vrot.lane.b32.xlu1 %v1533_v41, %s2531_s22  ;;  %1095 = vst.msk [vmem:[#allocation3 + $0x48] sm:$0xff] %vm1085_vm9, %v1008_v1 }
 0x1f0   : > { %1786 = vrot.lane.b32.xlu0 %v1710_v52, %s2535_s26 }
 0x1f1   : > { %v1807_v44 = vpop.permute.xlu1 %1806 }
 0x1f2   : > { %1881 = vst.msk [vmem:[#allocation3 + $0xb0] sm:$0xff] %vm1858_vm13, %v1807_v44  ;;  %v1199_v4 = vpop.permute.xlu0 %1198  ;;  %v1897_v10 = vld [vmem:[#allocation3 + $0x30] sm:$0xff] }
 0x1f3   : > { %1627 = vrot.lane.b32.xlu1 %v1534_v26, %s2534_s25  ;;  %1287 = vst.msk [vmem:[#allocation3 + $0x40] sm:$0xff] %vm1278_vm10, %v1199_v4  ;;  %2448 = vmatprep.mubr.msk.f32.mxu0 %vm1934_vm14, %v1897_v10 }
 0x1f4   : > { %1019 = vrot.lane.b32.xlu0 %v1518_v6, %s2531_s22 }
 0x1f5   : > { %v1040_v46 = vpop.permute.xlu1 %1039 }
 0x1f6   : > { %1111 = vst.msk [vmem:[#allocation3 + $0xc8] sm:$0xff] %vm1085_vm9, %v1040_v46  ;;  %v1777_v5 = vpop.permute.xlu0 %1776 }
 0x1f7   : > { %1818 = vrot.lane.b32.xlu1 %v1726_v3, %s2535_s26  ;;  %1866 = vst.msk [vmem:[#allocation3 + $0x38] sm:$0xff] %vm1858_vm13, %v1777_v5 }
 0x1f8   : > { %1210 = vrot.lane.b32.xlu0 %v1710_v52, %s2532_s23 }
 0x1f9   : > { %v1231_v28 = vpop.permute.xlu1 %1230  ;;  %v1913_v30 = vld [vmem:[#allocation3 + $0xb0] sm:$0xff] }
 0x1fa   : > { %1303 = vst.msk [vmem:[#allocation3 + $0xc0] sm:$0xff] %vm1278_vm10, %v1231_v28  ;;  %2472 = vmatprep.mubr.msk.f32.mxu1 %vm1934_vm14, %v1913_v30  ;;  %v1201_v31 = vpop.permute.xlu0 %1200 }
 0x1fb   : > { %1051 = vrot.lane.b32.xlu1 %v1534_v26, %s2531_s22  ;;  %1288 = vst.msk [vmem:[#allocation3 + $0x48] sm:$0xff] %vm1278_vm10, %v1201_v31 }
 0x1fc   : > { %1788 = vrot.lane.b32.xlu0 %v1711_v36, %s2535_s26 }
 0x1fd   : > { %v1809_v49 = vpop.permute.xlu1 %1808 }
 0x1fe   : > { %1882 = vst.msk [vmem:[#allocation3 + $0xb8] sm:$0xff] %vm1858_vm13, %v1809_v49  ;;  %v1393_v59 = vpop.permute.xlu0 %1392  ;;  %v1898_v39 = vld [vmem:[#allocation3 + $0x38] sm:$0xff] }
 0x1ff   : > { %1242 = vrot.lane.b32.xlu1 %v1726_v3, %s2532_s23  ;;  %1481 = vst.msk [vmem:[#allocation3 + $0x40] sm:$0xff] %vm1472_vm11, %v1393_v59  ;;  %2449 = vmatmul.mubr.msk.f32.gmra.mrb[6].mxu0 %vm1934_vm14, %v1898_v39 }
 0x200   : > { %1212 = vrot.lane.b32.xlu0 %v1711_v36, %s2532_s23 }
 0x201   : > { %v1233_v60 = vpop.permute.xlu1 %1232 }
 0x202   : > { %1304 = vst.msk [vmem:[#allocation3 + $0xc8] sm:$0xff] %vm1278_vm10, %v1233_v60  ;;  %v1395_v15 = vpop.permute.xlu0 %1394 }
 0x203   : > { %1820 = vrot.lane.b32.xlu1 %v1727_v48, %s2535_s26  ;;  %1482 = vst.msk [vmem:[#allocation3 + $0x48] sm:$0xff] %vm1472_vm11, %v1395_v15  ;;  %v3500_v15 = vld [vmem:[%s3646_s2] ss:$0 sm:$0xff] }
 0x204   : > { %1404 = vrot.lane.b32.xlu0 %v1326_v47, %s2533_s24 }
 0x205   : > { %v1425_v40 = vpop.permute.xlu1 %1424  ;;  %v1914_v53 = vld [vmem:[#allocation3 + $0xb8] sm:$0xff] }
 0x206   : > { %1497 = vst.msk [vmem:[#allocation3 + $0xc0] sm:$0xff] %vm1472_vm11, %v1425_v40  ;;  %2473 = vmatmul.mubr.msk.f32.gmra.mrb[6].mxu1 %vm1934_vm14, %v1914_v53  ;;  %v1586_v17 = vpop.permute.xlu0 %1585 }
 0x207   : > { %1244 = vrot.lane.b32.xlu1 %v1727_v48, %s2532_s23  ;;  %1674 = vst.msk [vmem:[#allocation3 + $0x40] sm:$0xff] %vm1665_vm12, %v1586_v17 }
 0x208   : > { %1406 = vrot.lane.b32.xlu0 %v1327_v16, %s2533_s24 }
 0x209   : > { %v1427_v32 = vpop.permute.xlu1 %1426 }
 0x20a   : > { %1498 = vst.msk [vmem:[#allocation3 + $0xc8] sm:$0xff] %vm1472_vm11, %v1427_v32  ;;  %v1010_v63 = vpop.permute.xlu0 %1009 }
 0x20b   : > { %1436 = vrot.lane.b32.xlu1 %v1342_v50, %s2533_s24  ;;  %1096 = vst.msk [vmem:[#allocation3 + $0x50] sm:$0xff] %vm1085_vm9, %v1010_v63 }
 0x20c   : > { %1597 = vrot.lane.b32.xlu0 %v1519_v43, %s2534_s25 }
 0x20d   : > { %v1618_v54 = vpop.permute.xlu1 %1617 }
 0x20e   : > { %1690 = vst.msk [vmem:[#allocation3 + $0xc0] sm:$0xff] %vm1665_vm12, %v1618_v54  ;;  %v1588_v55 = vpop.permute.xlu0 %1587 }
 0x20f   : > { %1438 = vrot.lane.b32.xlu1 %v1343_v18, %s2533_s24  ;;  %1675 = vst.msk [vmem:[#allocation3 + $0x48] sm:$0xff] %vm1665_vm12, %v1588_v55 }
 0x210   : > { %1599 = vrot.lane.b32.xlu0 %v1520_v35, %s2534_s25 }
 0x211   : > { %v1042_v61 = vpop.permute.xlu1 %1041 }
 0x212   : > { %1112 = vst.msk [vmem:[#allocation3 + $0xd0] sm:$0xff] %vm1085_vm9, %v1042_v61  ;;  %v1779_v9 = vpop.permute.xlu0 %1778 }
 0x213   : > { %1629 = vrot.lane.b32.xlu1 %v1535_v8, %s2534_s25  ;;  %1867 = vst.msk [vmem:[#allocation3 + $0x40] sm:$0xff] %vm1858_vm13, %v1779_v9 }
 0x214   : > { %1790 = vrot.lane.b32.xlu0 %v1712_v23, %s2535_s26 }
 0x215   : > { %v1620_v0 = vpop.permute.xlu1 %1619 }
 0x216   : > { %1691 = vst.msk [vmem:[#allocation3 + $0xc8] sm:$0xff] %vm1665_vm12, %v1620_v0  ;;  %v1012_v14 = vpop.permute.xlu0 %1011 }
 0x217   : > { %1631 = vrot.lane.b32.xlu1 %v1536_v22, %s2534_s25  ;;  %1097 = vst.msk [vmem:[#allocation3 + $0x58] sm:$0xff] %vm1085_vm9, %v1012_v14 }
 0x218   : > { %1792 = vrot.lane.b32.xlu0 %v1713_v24, %s2535_s26 }
 0x219   : > { %v1811_v62 = vpop.permute.xlu1 %1810 }
 0x21a   : > { %1883 = vst.msk [vmem:[#allocation3 + $0xc0] sm:$0xff] %vm1858_vm13, %v1811_v62  ;;  %v1203_v2 = vpop.permute.xlu0 %1202  ;;  %v1899_v27 = vld [vmem:[#allocation3 + $0x40] sm:$0xff] }
 0x21b   : > { %1822 = vrot.lane.b32.xlu1 %v1728_v25, %s2535_s26  ;;  %1289 = vst.msk [vmem:[#allocation3 + $0x50] sm:$0xff] %vm1278_vm10, %v1203_v2  ;;  %2451 = vmatprep.mubr.msk.f32.mxu0 %vm1934_vm14, %v1899_v27 }
 0x21d   : > { %v1044_v21 = vpop.permute.xlu1 %1043 }
 0x21e   : > { %1113 = vst.msk [vmem:[#allocation3 + $0xd8] sm:$0xff] %vm1085_vm9, %v1044_v21  ;;  %v1781_v13 = vpop.permute.xlu0 %1780 }
 0x21f   : > { %1824 = vrot.lane.b32.xlu1 %v1729_v42, %s2535_s26  ;;  %1868 = vst.msk [vmem:[#allocation3 + $0x48] sm:$0xff] %vm1858_vm13, %v1781_v13 }
 0x221   : > { %v1235_v34 = vpop.permute.xlu1 %1234  ;;  %v1915_v45 = vld [vmem:[#allocation3 + $0xc0] sm:$0xff] }
 0x222   : > { %1305 = vst.msk [vmem:[#allocation3 + $0xd0] sm:$0xff] %vm1278_vm10, %v1235_v34  ;;  %2475 = vmatprep.mubr.msk.f32.mxu1 %vm1934_vm14, %v1915_v45  ;;  %v1205_v56 = vpop.permute.xlu0 %1204 }
 0x223   : > { %1290 = vst.msk [vmem:[#allocation3 + $0x58] sm:$0xff] %vm1278_vm10, %v1205_v56 }
 0x225   : > { %v1813_v29 = vpop.permute.xlu1 %1812 }
 0x226   : > { %1884 = vst.msk [vmem:[#allocation3 + $0xc8] sm:$0xff] %vm1858_vm13, %v1813_v29  ;;  %v1397_v57 = vpop.permute.xlu0 %1396  ;;  %v1900_v37 = vld [vmem:[#allocation3 + $0x48] sm:$0xff] }
 0x227   : > { %1483 = vst.msk [vmem:[#allocation3 + $0x50] sm:$0xff] %vm1472_vm11, %v1397_v57  ;;  %2452 = vmatmul.mubr.msk.f32.gmra.mrb[8].mxu0 %vm1934_vm14, %v1900_v37 }
 0x229   : > { %v1237_v19 = vpop.permute.xlu1 %1236 }
 0x22a   : > { %1306 = vst.msk [vmem:[#allocation3 + $0xd8] sm:$0xff] %vm1278_vm10, %v1237_v19  ;;  %v1399_v38 = vpop.permute.xlu0 %1398 }
 0x22b   : > { %1484 = vst.msk [vmem:[#allocation3 + $0x58] sm:$0xff] %vm1472_vm11, %v1399_v38 }
 0x22d   : > { %v1429_v58 = vpop.permute.xlu1 %1428  ;;  %v1916_v20 = vld [vmem:[#allocation3 + $0xc8] sm:$0xff] }
 0x22e   : > { %1499 = vst.msk [vmem:[#allocation3 + $0xd0] sm:$0xff] %vm1472_vm11, %v1429_v58  ;;  %2476 = vmatmul.mubr.msk.f32.gmra.mrb[8].mxu1 %vm1934_vm14, %v1916_v20  ;;  %v1590_v11 = vpop.permute.xlu0 %1589 }
 0x22f   : > { %1676 = vst.msk [vmem:[#allocation3 + $0x50] sm:$0xff] %vm1665_vm12, %v1590_v11 }
 0x231   : > { %v1431_v33 = vpop.permute.xlu1 %1430 }
 0x232   : > { %1500 = vst.msk [vmem:[#allocation3 + $0xd8] sm:$0xff] %vm1472_vm11, %v1431_v33  ;;  %v1014_v41 = vpop.permute.xlu0 %1013 }
 0x233   : > { %1098 = vst.msk [vmem:[#allocation3 + $0x60] sm:$0xff] %vm1085_vm9, %v1014_v41 }
 0x235   : > { %v1622_v12 = vpop.permute.xlu1 %1621 }
 0x236   : > { %1692 = vst.msk [vmem:[#allocation3 + $0xd0] sm:$0xff] %vm1665_vm12, %v1622_v12  ;;  %v1592_v6 = vpop.permute.xlu0 %1591 }
 0x237   : > { %1677 = vst.msk [vmem:[#allocation3 + $0x58] sm:$0xff] %vm1665_vm12, %v1592_v6 }
 0x239   : > { %v1046_v51 = vpop.permute.xlu1 %1045 }
 0x23a   : > { %1114 = vst.msk [vmem:[#allocation3 + $0xe0] sm:$0xff] %vm1085_vm9, %v1046_v51  ;;  %v1783_v7 = vpop.permute.xlu0 %1782 }
 0x23b   : > { %1869 = vst.msk [vmem:[#allocation3 + $0x50] sm:$0xff] %vm1858_vm13, %v1783_v7 }
 0x23d   : > { %v1624_v52 = vpop.permute.xlu1 %1623 }
 0x23e   : > { %1693 = vst.msk [vmem:[#allocation3 + $0xd8] sm:$0xff] %vm1665_vm12, %v1624_v52  ;;  %v1016_v1 = vpop.permute.xlu0 %1015 }
 0x23f   : > { %1099 = vst.msk [vmem:[#allocation3 + $0x68] sm:$0xff] %vm1085_vm9, %v1016_v1 }
 0x241   : > { %v1815_v26 = vpop.permute.xlu1 %1814 }
 0x242   : > { %1885 = vst.msk [vmem:[#allocation3 + $0xd0] sm:$0xff] %vm1858_vm13, %v1815_v26  ;;  %v1207_v44 = vpop.permute.xlu0 %1206  ;;  %v1901_v4 = vld [vmem:[#allocation3 + $0x50] sm:$0xff] }
 0x243   : > { %1291 = vst.msk [vmem:[#allocation3 + $0x60] sm:$0xff] %vm1278_vm10, %v1207_v44  ;;  %2454 = vmatprep.mubr.msk.f32.mxu0 %vm1934_vm14, %v1901_v4 }
 0x245   : > { %v1048_v10 = vpop.permute.xlu1 %1047 }
 0x246   : > { %1115 = vst.msk [vmem:[#allocation3 + $0xe8] sm:$0xff] %vm1085_vm9, %v1048_v10  ;;  %v1785_v3 = vpop.permute.xlu0 %1784 }
 0x247   : > { %1870 = vst.msk [vmem:[#allocation3 + $0x58] sm:$0xff] %vm1858_vm13, %v1785_v3 }
 0x249   : > { %v1239_v46 = vpop.permute.xlu1 %1238  ;;  %v1917_v5 = vld [vmem:[#allocation3 + $0xd0] sm:$0xff] }
 0x24a   : > { %1307 = vst.msk [vmem:[#allocation3 + $0xe0] sm:$0xff] %vm1278_vm10, %v1239_v46  ;;  %2478 = vmatprep.mubr.msk.f32.mxu1 %vm1934_vm14, %v1917_v5  ;;  %v1209_v28 = vpop.permute.xlu0 %1208 }
 0x24b   : > { %1292 = vst.msk [vmem:[#allocation3 + $0x68] sm:$0xff] %vm1278_vm10, %v1209_v28 }
 0x24d   : > { %v1817_v30 = vpop.permute.xlu1 %1816 }
 0x24e   : > { %1886 = vst.msk [vmem:[#allocation3 + $0xd8] sm:$0xff] %vm1858_vm13, %v1817_v30  ;;  %v1401_v36 = vpop.permute.xlu0 %1400  ;;  %v1902_v31 = vld [vmem:[#allocation3 + $0x58] sm:$0xff] }
 0x24f   : > { %1485 = vst.msk [vmem:[#allocation3 + $0x60] sm:$0xff] %vm1472_vm11, %v1401_v36  ;;  %2455 = vmatmul.mubr.msk.f32.gmra.mrb[10].mxu0 %vm1934_vm14, %v1902_v31 }
 0x251   : > { %v1241_v49 = vpop.permute.xlu1 %1240 }
 0x252   : > { %1308 = vst.msk [vmem:[#allocation3 + $0xe8] sm:$0xff] %vm1278_vm10, %v1241_v49  ;;  %v1403_v59 = vpop.permute.xlu0 %1402 }
 0x253   : > { %1486 = vst.msk [vmem:[#allocation3 + $0x68] sm:$0xff] %vm1472_vm11, %v1403_v59 }
 0x255   : > { %v1433_v39 = vpop.permute.xlu1 %1432  ;;  %v1918_v48 = vld [vmem:[#allocation3 + $0xd8] sm:$0xff] }
 0x256   : > { %1501 = vst.msk [vmem:[#allocation3 + $0xe0] sm:$0xff] %vm1472_vm11, %v1433_v39  ;;  %2479 = vmatmul.mubr.msk.f32.gmra.mrb[10].mxu1 %vm1934_vm14, %v1918_v48  ;;  %v1594_v60 = vpop.permute.xlu0 %1593 }
 0x257   : > { %1678 = vst.msk [vmem:[#allocation3 + $0x60] sm:$0xff] %vm1665_vm12, %v1594_v60 }
 0x259   : > { %v1435_v47 = vpop.permute.xlu1 %1434 }
 0x25a   : > { %1502 = vst.msk [vmem:[#allocation3 + $0xe8] sm:$0xff] %vm1472_vm11, %v1435_v47  ;;  %v1018_v40 = vpop.permute.xlu0 %1017  ;;  %v2441_v53 = vpop.f32.mrb[0].mxu0 }
 0x25b   : > { %1100 = vst.msk [vmem:[#allocation3 + $0x70] sm:$0xff] %vm1085_vm9, %v1018_v40  ;;  %v2107_v16 = vadd.f32 %v2441_v53, %v3500_v15  ;;  %v2101_v17 = vpop.f32.mrb[1].mxu0 }
 0x25c   : > { %v2102_v32 = vadd.f32 %v3500_v15, %v2101_v17 }
 0x25d   : > { %v1626_v50 = vpop.permute.xlu1 %1625  ;;  %2262 = vst.msk [vmem:[%s3508_s14 + $0x8] sm:$0xff] %vm2260_vm15, %v2107_v16 }
 0x25e   : > { %1694 = vst.msk [vmem:[#allocation3 + $0xe0] sm:$0xff] %vm1665_vm12, %v1626_v50  ;;  %v1596_v43 = vpop.permute.xlu0 %1595 }
 0x25f   : > { %2261 = vst.msk [vmem:[%s3508_s14] sm:$0xff] %vm2260_vm15, %v2102_v32 }
 0x260   : > { %1679 = vst.msk [vmem:[#allocation3 + $0x68] sm:$0xff] %vm1665_vm12, %v1596_v43 }
 0x261   : > { %v2465_v63 = vpop.f32.mrb[0].mxu1  ;;  %v1050_v18 = vpop.permute.xlu1 %1049 }
 0x262   : > { %v2187_v54 = vadd.f32 %v2465_v63, %v3500_v15  ;;  %1116 = vst.msk [vmem:[#allocation3 + $0xf0] sm:$0xff] %vm1085_vm9, %v1050_v18  ;;  %v2181_v35 = vpop.f32.mrb[1].mxu1  ;;  %v1787_v8 = vpop.permute.xlu0 %1786 }
 0x263   : > { %v2182_v55 = vadd.f32 %v3500_v15, %v2181_v35  ;;  %1871 = vst.msk [vmem:[#allocation3 + $0x60] sm:$0xff] %vm1858_vm13, %v1787_v8 }
 0x264   : > { %2278 = vst.msk [vmem:[%s3508_s14 + $0x88] sm:$0xff] %vm2260_vm15, %v2187_v54 }
 0x265   : > { %2277 = vst.msk [vmem:[%s3508_s14 + $0x80] sm:$0xff] %vm2260_vm15, %v2182_v55  ;;  %v1628_v61 = vpop.permute.xlu1 %1627 }
 0x266   : > { %1695 = vst.msk [vmem:[#allocation3 + $0xe8] sm:$0xff] %vm1665_vm12, %v1628_v61  ;;  %v1020_v23 = vpop.permute.xlu0 %1019 }
 0x267   : > { %1101 = vst.msk [vmem:[#allocation3 + $0x78] sm:$0xff] %vm1085_vm9, %v1020_v23 }
 0x269   : > { %v1819_v9 = vpop.permute.xlu1 %1818 }
 0x26a   : > { %1887 = vst.msk [vmem:[#allocation3 + $0xe0] sm:$0xff] %vm1858_vm13, %v1819_v9  ;;  %v1211_v22 = vpop.permute.xlu0 %1210  ;;  %v1903_v0 = vld [vmem:[#allocation3 + $0x60] sm:$0xff] }
 0x26b   : > { %1293 = vst.msk [vmem:[#allocation3 + $0x70] sm:$0xff] %vm1278_vm10, %v1211_v22  ;;  %2457 = vmatprep.mubr.msk.f32.mxu0 %vm1934_vm14, %v1903_v0 }
 0x26d   : > { %v1052_v24 = vpop.permute.xlu1 %1051 }
 0x26e   : > { %1117 = vst.msk [vmem:[#allocation3 + $0xf8] sm:$0xff] %vm1085_vm9, %v1052_v24  ;;  %v1789_v14 = vpop.permute.xlu0 %1788 }
 0x26f   : > { %1872 = vst.msk [vmem:[#allocation3 + $0x68] sm:$0xff] %vm1858_vm13, %v1789_v14 }
 0x271   : > { %v1243_v25 = vpop.permute.xlu1 %1242  ;;  %v1919_v62 = vld [vmem:[#allocation3 + $0xe0] sm:$0xff] }
 0x272   : > { %1309 = vst.msk [vmem:[#allocation3 + $0xf0] sm:$0xff] %vm1278_vm10, %v1243_v25  ;;  %2481 = vmatprep.mubr.msk.f32.mxu1 %vm1934_vm14, %v1919_v62  ;;  %v1213_v2 = vpop.permute.xlu0 %1212 }
 0x273   : > { %1294 = vst.msk [vmem:[#allocation3 + $0x78] sm:$0xff] %vm1278_vm10, %v1213_v2 }
 0x275   : > { %v1821_v27 = vpop.permute.xlu1 %1820 }
 0x276   : > { %1888 = vst.msk [vmem:[#allocation3 + $0xe8] sm:$0xff] %vm1858_vm13, %v1821_v27  ;;  %v1405_v42 = vpop.permute.xlu0 %1404  ;;  %v1904_v21 = vld [vmem:[#allocation3 + $0x68] sm:$0xff] }
 0x277   : > { %1487 = vst.msk [vmem:[#allocation3 + $0x70] sm:$0xff] %vm1472_vm11, %v1405_v42  ;;  %2458 = vmatmul.mubr.msk.f32.gmra.mrb[12].mxu0 %vm1934_vm14, %v1904_v21 }
 0x279   : > { %v1245_v13 = vpop.permute.xlu1 %1244 }
 0x27a   : > { %1310 = vst.msk [vmem:[#allocation3 + $0xf8] sm:$0xff] %vm1278_vm10, %v1245_v13  ;;  %v1407_v34 = vpop.permute.xlu0 %1406 }
 0x27b   : > { %1488 = vst.msk [vmem:[#allocation3 + $0x78] sm:$0xff] %vm1472_vm11, %v1407_v34 }
 0x27d   : > { %v1437_v45 = vpop.permute.xlu1 %1436  ;;  %v1920_v56 = vld [vmem:[#allocation3 + $0xe8] sm:$0xff] }
 0x27e   : > { %1503 = vst.msk [vmem:[#allocation3 + $0xf0] sm:$0xff] %vm1472_vm11, %v1437_v45  ;;  %2482 = vmatmul.mubr.msk.f32.gmra.mrb[12].mxu1 %vm1934_vm14, %v1920_v56  ;;  %v1598_v29 = vpop.permute.xlu0 %1597 }
 0x27f   : > { %1680 = vst.msk [vmem:[#allocation3 + $0x70] sm:$0xff] %vm1665_vm12, %v1598_v29 }
 0x281   : > { %v1439_v57 = vpop.permute.xlu1 %1438 }
 0x282   : > { %1504 = vst.msk [vmem:[#allocation3 + $0xf8] sm:$0xff] %vm1472_vm11, %v1439_v57  ;;  %v1600_v37 = vpop.permute.xlu0 %1599  ;;  %v2444_v19 = vpop.f32.mrb[2].mxu0 }
 0x283   : > { %1681 = vst.msk [vmem:[#allocation3 + $0x78] sm:$0xff] %vm1665_vm12, %v1600_v37  ;;  %v2117_v38 = vadd.f32 %v2444_v19, %v3500_v15  ;;  %v2111_v58 = vpop.f32.mrb[3].mxu0 }
 0x284   : > { %v2112_v11 = vadd.f32 %v3500_v15, %v2111_v58 }
 0x285   : > { %v1630_v20 = vpop.permute.xlu1 %1629  ;;  %2264 = vst.msk [vmem:[%s3508_s14 + $0x18] sm:$0xff] %vm2260_vm15, %v2117_v38 }
 0x286   : > { %1696 = vst.msk [vmem:[#allocation3 + $0xf0] sm:$0xff] %vm1665_vm12, %v1630_v20  ;;  %v1791_v33 = vpop.permute.xlu0 %1790 }
 0x287   : > { %2263 = vst.msk [vmem:[%s3508_s14 + $0x10] sm:$0xff] %vm2260_vm15, %v2112_v11 }
 0x288   : > { %1873 = vst.msk [vmem:[#allocation3 + $0x70] sm:$0xff] %vm1858_vm13, %v1791_v33 }
 0x289   : > { %v2468_v41 = vpop.f32.mrb[2].mxu1  ;;  %v1632_v12 = vpop.permute.xlu1 %1631 }
 0x28a   : > { %v2197_v6 = vadd.f32 %v2468_v41, %v3500_v15  ;;  %1697 = vst.msk [vmem:[#allocation3 + $0xf8] sm:$0xff] %vm1665_vm12, %v1632_v12  ;;  %v2191_v51 = vpop.f32.mrb[3].mxu1  ;;  %v1793_v52 = vpop.permute.xlu0 %1792 }
 0x28b   : > { %v2192_v7 = vadd.f32 %v3500_v15, %v2191_v51  ;;  %1874 = vst.msk [vmem:[#allocation3 + $0x78] sm:$0xff] %vm1858_vm13, %v1793_v52 }
 0x28c   : > { %2280 = vst.msk [vmem:[%s3508_s14 + $0x98] sm:$0xff] %vm2260_vm15, %v2197_v6 }
 0x28d   : > { %2279 = vst.msk [vmem:[%s3508_s14 + $0x90] sm:$0xff] %vm2260_vm15, %v2192_v7  ;;  %v1823_v1 = vpop.permute.xlu1 %1822 }
 0x28e   : > { %1889 = vst.msk [vmem:[#allocation3 + $0xf0] sm:$0xff] %vm1858_vm13, %v1823_v1 }
 0x28f   : > { %v1905_v26 = vld [vmem:[#allocation3 + $0x70] sm:$0xff] }
 0x290   : > { %2460 = vmatprep.mubr.msk.f32.mxu0 %vm1934_vm14, %v1905_v26 }
 0x291   : > { %v1825_v44 = vpop.permute.xlu1 %1824 }
 0x292   : > { %1890 = vst.msk [vmem:[#allocation3 + $0xf8] sm:$0xff] %vm1858_vm13, %v1825_v44  ;;  %v1906_v4 = vld [vmem:[#allocation3 + $0x78] sm:$0xff] }
 0x293   : > { %2461 = vmatmul.mubr.msk.f32.gmra.mrb[14].mxu0 %vm1934_vm14, %v1906_v4 }
 0x295   : > { %v1921_v10 = vld [vmem:[#allocation3 + $0xf0] sm:$0xff] }
 0x296   : > { %2484 = vmatprep.mubr.msk.f32.mxu1 %vm1934_vm14, %v1921_v10 }
 0x299   : > { %v1922_v3 = vld [vmem:[#allocation3 + $0xf8] sm:$0xff] }
 0x29a   : > { %2485 = vmatmul.mubr.msk.f32.gmra.mrb[14].mxu1 %vm1934_vm14, %v1922_v3 }
 0x2aa   : > { %v2447_v46 = vpop.f32.mrb[4].mxu0 }
 0x2ab   : > { %v2127_v5 = vadd.f32 %v2447_v46, %v3500_v15  ;;  %v2121_v28 = vpop.f32.mrb[5].mxu0 }
 0x2ac   : > { %v2122_v30 = vadd.f32 %v3500_v15, %v2121_v28 }
 0x2ad   : > { %2266 = vst.msk [vmem:[%s3508_s14 + $0x28] sm:$0xff] %vm2260_vm15, %v2127_v5 }
 0x2ae   : > { %2265 = vst.msk [vmem:[%s3508_s14 + $0x20] sm:$0xff] %vm2260_vm15, %v2122_v30 }
 0x2b1   : > { %v2471_v36 = vpop.f32.mrb[4].mxu1 }
 0x2b2   : > { %v2207_v31 = vadd.f32 %v2471_v36, %v3500_v15  ;;  %v2201_v49 = vpop.f32.mrb[5].mxu1 }
 0x2b3   : > { %v2202_v59 = vadd.f32 %v3500_v15, %v2201_v49 }
 0x2b4   : > { %2282 = vst.msk [vmem:[%s3508_s14 + $0xa8] sm:$0xff] %vm2260_vm15, %v2207_v31 }
 0x2b5   : > { %2281 = vst.msk [vmem:[%s3508_s14 + $0xa0] sm:$0xff] %vm2260_vm15, %v2202_v59 }
 0x2d2   : > { %v2450_v39 = vpop.f32.mrb[6].mxu0 }
 0x2d3   : > { %v2137_v48 = vadd.f32 %v2450_v39, %v3500_v15  ;;  %v2131_v60 = vpop.f32.mrb[7].mxu0 }
 0x2d4   : > { %v2132_v47 = vadd.f32 %v3500_v15, %v2131_v60 }
 0x2d5   : > { %2268 = vst.msk [vmem:[%s3508_s14 + $0x38] sm:$0xff] %vm2260_vm15, %v2137_v48 }
 0x2d6   : > { %2267 = vst.msk [vmem:[%s3508_s14 + $0x30] sm:$0xff] %vm2260_vm15, %v2132_v47 }
 0x2d9   : > { %v2474_v40 = vpop.f32.mrb[6].mxu1 }
 0x2da   : > { %v2217_v53 = vadd.f32 %v2474_v40, %v3500_v15  ;;  %v2211_v16 = vpop.f32.mrb[7].mxu1 }
 0x2db   : > { %v2212_v17 = vadd.f32 %v3500_v15, %v2211_v16 }
 0x2dc   : > { %2284 = vst.msk [vmem:[%s3508_s14 + $0xb8] sm:$0xff] %vm2260_vm15, %v2217_v53 }
 0x2dd   : > { %2283 = vst.msk [vmem:[%s3508_s14 + $0xb0] sm:$0xff] %vm2260_vm15, %v2212_v17 }
 0x2fa   : > { %v2453_v50 = vpop.f32.mrb[8].mxu0 }
 0x2fb   : > { %v2147_v32 = vadd.f32 %v2453_v50, %v3500_v15  ;;  %v2141_v43 = vpop.f32.mrb[9].mxu0 }
 0x2fc   : > { %v2142_v63 = vadd.f32 %v3500_v15, %v2141_v43 }
 0x2fd   : > { %2270 = vst.msk [vmem:[%s3508_s14 + $0x48] sm:$0xff] %vm2260_vm15, %v2147_v32 }
 0x2fe   : > { %2269 = vst.msk [vmem:[%s3508_s14 + $0x40] sm:$0xff] %vm2260_vm15, %v2142_v63 }
 0x301   : > { %v2477_v18 = vpop.f32.mrb[8].mxu1 }
 0x302   : > { %v2227_v54 = vadd.f32 %v2477_v18, %v3500_v15  ;;  %v2221_v35 = vpop.f32.mrb[9].mxu1 }
 0x303   : > { %v2222_v55 = vadd.f32 %v3500_v15, %v2221_v35 }
 0x304   : > { %2286 = vst.msk [vmem:[%s3508_s14 + $0xc8] sm:$0xff] %vm2260_vm15, %v2227_v54 }
 0x305   : > { %2285 = vst.msk [vmem:[%s3508_s14 + $0xc0] sm:$0xff] %vm2260_vm15, %v2222_v55 }
 0x322   : > { %v2456_v8 = vpop.f32.mrb[10].mxu0 }
 0x323   : > { %v2157_v61 = vadd.f32 %v2456_v8, %v3500_v15  ;;  %v2151_v23 = vpop.f32.mrb[11].mxu0 }
 0x324   : > { %v2152_v9 = vadd.f32 %v3500_v15, %v2151_v23 }
 0x325   : > { %2272 = vst.msk [vmem:[%s3508_s14 + $0x58] sm:$0xff] %vm2260_vm15, %v2157_v61 }
 0x326   : > { %2271 = vst.msk [vmem:[%s3508_s14 + $0x50] sm:$0xff] %vm2260_vm15, %v2152_v9 }
 0x329   : > { %v2480_v22 = vpop.f32.mrb[10].mxu1 }
 0x32a   : > { %v2237_v0 = vadd.f32 %v2480_v22, %v3500_v15  ;;  %v2231_v24 = vpop.f32.mrb[11].mxu1 }
 0x32b   : > { %v2232_v14 = vadd.f32 %v3500_v15, %v2231_v24 }
 0x32c   : > { %2288 = vst.msk [vmem:[%s3508_s14 + $0xd8] sm:$0xff] %vm2260_vm15, %v2237_v0 }
 0x32d   : > { %2287 = vst.msk [vmem:[%s3508_s14 + $0xd0] sm:$0xff] %vm2260_vm15, %v2232_v14 }
 0x34a   : > { %v2459_v25 = vpop.f32.mrb[12].mxu0 }
 0x34b   : > { %v2167_v62 = vadd.f32 %v2459_v25, %v3500_v15  ;;  %v2161_v2 = vpop.f32.mrb[13].mxu0 }
 0x34c   : > { %v2162_v27 = vadd.f32 %v3500_v15, %v2161_v2 }
 0x34d   : > { %2274 = vst.msk [vmem:[%s3508_s14 + $0x68] sm:$0xff] %vm2260_vm15, %v2167_v62 }
 0x34e   : > { %2273 = vst.msk [vmem:[%s3508_s14 + $0x60] sm:$0xff] %vm2260_vm15, %v2162_v27 }
 0x351   : > { %v2483_v42 = vpop.f32.mrb[12].mxu1 }
 0x352   : > { %v2247_v21 = vadd.f32 %v2483_v42, %v3500_v15  ;;  %v2241_v13 = vpop.f32.mrb[13].mxu1 }
 0x353   : > { %v2242_v34 = vadd.f32 %v3500_v15, %v2241_v13 }
 0x354   : > { %2290 = vst.msk [vmem:[%s3508_s14 + $0xe8] sm:$0xff] %vm2260_vm15, %v2247_v21 }
 0x355   : > { %2289 = vst.msk [vmem:[%s3508_s14 + $0xe0] sm:$0xff] %vm2260_vm15, %v2242_v34 }
 0x366   : > { %v2462_v45 = vpop.f32.mrb[14].mxu0 }
 0x367   : > { %v2177_v56 = vadd.f32 %v2462_v45, %v3500_v15  ;;  %v2171_v29 = vpop.f32.mrb[15].mxu0 }
 0x368   : > { %v2172_v57 = vadd.f32 %v3500_v15, %v2171_v29 }
 0x369   : > { %2276 = vst.msk [vmem:[%s3508_s14 + $0x78] sm:$0xff] %vm2260_vm15, %v2177_v56 }
 0x36a   : > { %2275 = vst.msk [vmem:[%s3508_s14 + $0x70] sm:$0xff] %vm2260_vm15, %v2172_v57 }
 0x36d   : > { %v2486_v37 = vpop.f32.mrb[14].mxu1 }
 0x36e   : > { %v2257_v19 = vadd.f32 %v2486_v37, %v3500_v15  ;;  %v2251_v38 = vpop.f32.mrb[15].mxu1 }
 0x36f   : > { %v2252_v58 = vadd.f32 %v3500_v15, %v2251_v38 }
 0x370   : > { %2292 = vst.msk [vmem:[%s3508_s14 + $0xf8] sm:$0xff] %vm2260_vm15, %v2257_v19 }
 0x371   : > { %2291 = vst.msk [vmem:[%s3508_s14 + $0xf0] sm:$0xff] %vm2260_vm15, %v2252_v58 }
 0x372 PF: > { %s13_s12 = sadd.s32 1, %s2525_s12  }
 0x373   : > { %p10_p4 = scmp.ge.s32.totalorder %s13_s12, 4  }
 0x375   :  { %12 = sbr.rel (!%p10_p4) target bundleno = 1 (0x1), region = 65 }

// kernel: discriminator_forward.6
= control target key start
LH: loop header
LB: loop body
LE: loop exit
PB: predicated region body
PF: predicated region fallthrough
CT: control target
= control target key end

     0   :  { %s1985_s13 = smov 0   ;;  %s2556_s0 = inlined_call_operand.vmem [shape: f32[2,64,16], index: 0, kind: input, shape index: {}]   ;;  %s2557_s1 = inlined_call_operand.vmem [shape: f32[16,64], index: 1, kind: input, shape index: {}]   ;;  %s2558_s2 = inlined_call_operand.vmem [shape: f32[144,16], index: 2, kind: input, shape index: {}]   ;;  %s2559_s3 = inlined_call_operand.vmem [shape: f32[1,16], index: 3, kind: input, shape index: {}]   ;;  %s2560_s4 = inlined_call_operand.vmem [shape: f32[1,16], index: 4, kind: input, shape index: {}]   ;;  %s2561_s5 = inlined_call_operand.vmem [shape: f32[1,16], index: 5, kind: input, shape index: {}]   ;;  %s2562_s6 = inlined_call_operand.vmem [shape: f32[144,16], index: 6, kind: input, shape index: {}]   ;;  %s2563_s7 = inlined_call_operand.vmem [shape: f32[1,16], index: 7, kind: input, shape index: {}]   ;;  %s2564_s8 = inlined_call_operand.vmem [shape: f32[1,16], index: 8, kind: input, shape index: {}]   ;;  %s2565_s9 = inlined_call_operand.vmem [shape: f32[1,16], index: 9, kind: input, shape index: {}]   ;;  %s2566_s10 = inlined_call_operand.vmem [shape: f32[2,16,16], index: 10, kind: output, shape index: {}]  }
   0x1 LB: > { %s1707_s14 = sadd.s32 4294967295, %s1919_s13   ;;  %p1711_p0 = scmp.ge.s32.totalorder %s1919_s13, 1  ;;  %s1919_s13 = sphi %s1985_s13, %s20_s13  }
   0x2   : > { %p312_p1 = scmp.lt.s32.totalorder %s1919_s13, 3 }
   0x4   : > { %p313_p2 = pnand %p1711_p0, %p312_p1 }
   0x5   : > { %vm372_vm0 = vcmask (!%p313_p2), 130048   ;;  %vm497_vm1 = vcmask (!%p313_p2), 123904   ;;  %vm502_vm2 = vcmask (!%p313_p2), 122880   ;;  %v1921_v0 = vmov (!%p313_p2), 0.0   ;;  %p350_p3 = scmp.lt.s32.totalorder (!%p313_p2), %s1707_s14, 1  ;;  %s1922_s19 = smov (!%p313_p2), 16  }
   0x6   : > { %316 = sbr.rel (%p313_p2) target bundleno = 1236 (0x4d4), region = 60  ;;  %496 = vst.msk [vmem:[#allocation2] sm:$0xff] (!%p313_p2), %vm372_vm0, %v1921_v0  ;;  %500 = vst.msk [vmem:[#allocation2 + $0x90] sm:$0xff] (!%p313_p2), %vm372_vm0, %v1921_v0  ;;  %s1923_s20 = smov (!%p313_p2), 32   ;;  %vm588_vm11 = vcmask (!%p313_p2), 261248   ;;  %vm637_vm12 = vcmask (!%p313_p2), 392448  }
   0x7   : > { %498 = vst.msk [vmem:[#allocation2 + $0x8] sm:$0x3] (!%p313_p2), %vm497_vm1, %v1921_v0  ;;  %501 = vst.msk [vmem:[#allocation2 + $0x98] sm:$0x3] (!%p313_p2), %vm497_vm1, %v1921_v0  ;;  %s1925_s16 = smov (!%p313_p2), 48   ;;  %s1926_s24 = smov (!%p313_p2), 64  }
   0x8   : > { %504 = vst.msk [vmem:[#allocation2 + $0x10] sm:$0x1] (!%p313_p2), %vm502_vm2, %v1921_v0  ;;  %505 = vst.msk [vmem:[#allocation2 + $0x20] sm:$0x1] (!%p313_p2), %vm502_vm2, %v1921_v0  ;;  %s1927_s29 = smov (!%p313_p2), 80   ;;  %s1928_s17 = smov (!%p313_p2), 96  }
   0x9   : > { %506 = vst.msk [vmem:[#allocation2 + $0x30] sm:$0x1] (!%p313_p2), %vm502_vm2, %v1921_v0  ;;  %507 = vst.msk [vmem:[#allocation2 + $0x40] sm:$0x1] (!%p313_p2), %vm502_vm2, %v1921_v0  ;;  %s1929_s21 = smov (!%p313_p2), 112   ;;  %vm686_vm13 = vcmask (!%p313_p2), 523648  }
   0xa   : > { %508 = vst.msk [vmem:[#allocation2 + $0x50] sm:$0x1] (!%p313_p2), %vm502_vm2, %v1921_v0  ;;  %509 = vst.msk [vmem:[#allocation2 + $0x60] sm:$0x1] (!%p313_p2), %vm502_vm2, %v1921_v0  ;;  %vm735_vm14 = vcmask (!%p313_p2), 654848   ;;  %vm784_vm15 = vcmask (!%p313_p2), 786048  }
   0xb   : > { %510 = vst.msk [vmem:[#allocation2 + $0x70] sm:$0x1] (!%p313_p2), %vm502_vm2, %v1921_v0  ;;  %511 = vst.msk [vmem:[#allocation2 + $0x80] sm:$0x1] (!%p313_p2), %vm502_vm2, %v1921_v0  ;;  %vm834_vm1 = vcmask (!%p313_p2), 917248  }
   0xc   : > { %514 = vst.msk [vmem:[#allocation2 + $0x19] sm:$0x1] (!%p313_p2), %vm502_vm2, %v1921_v0  ;;  %515 = vst.msk [vmem:[#allocation2 + $0x29] sm:$0x1] (!%p313_p2), %vm502_vm2, %v1921_v0 }
   0xd   : > { %516 = vst.msk [vmem:[#allocation2 + $0x39] sm:$0x1] %vm502_vm2, %v1921_v0  ;;  %517 = vst.msk [vmem:[#allocation2 + $0x49] sm:$0x1] %vm502_vm2, %v1921_v0  ;;  %s2568_s14 = smov (!%p350_p3, %s1707_s14), 1 }
   0xe   : > { %518 = vst.msk [vmem:[#allocation2 + $0x59] sm:$0x1] %vm502_vm2, %v1921_v0  ;;  %519 = vst.msk [vmem:[#allocation2 + $0x69] sm:$0x1] %vm502_vm2, %v1921_v0  ;;  %s1738_s15 = sshll.u32 %s2568_s14, 6  ;;  %v548_v4 = vld [vmem:[#allocation2 + $0x1] sm:$0xff] }
   0xf   : > { %520 = vst.msk [vmem:[#allocation2 + $0x79] sm:$0x1] %vm502_vm2, %v1921_v0  ;;  %521 = vst.msk [vmem:[#allocation2 + $0x89] sm:$0x1] %vm502_vm2, %v1921_v0  ;;  %s2065_s18 = scalar_lea.vmem %s2556_s0, %s1738_s15  ;;  %564 = vrot.lane.b32.xlu0 %v548_v4, %s1922_s19 }
  0x10   : > { %1218 = vst.msk [vmem:[#allocation4 + $0x8] sm:$0x1] %vm502_vm2, %v1921_v0  ;;  %1219 = vst.msk [vmem:[#allocation4 + $0x10] sm:$0x1] %vm502_vm2, %v1921_v0  ;;  %v360_v1 = vld [vmem:[%s2065_s18] sm:$0xff]  ;;  %v361_v2 = vld [vmem:[%s2065_s18 + $0x8] sm:$0xff] }
  0x11   : > { %1220 = vst.msk [vmem:[#allocation4 + $0x18] sm:$0x1] %vm502_vm2, %v1921_v0  ;;  %1221 = vst.msk [vmem:[#allocation4 + $0x20] sm:$0x1] %vm502_vm2, %v1921_v0  ;;  %v362_v3 = vld [vmem:[%s2065_s18 + $0x10] sm:$0xff]  ;;  %v363_v5 = vld [vmem:[%s2065_s18 + $0x18] sm:$0xff] }
  0x12   : > { %1224 = vst.msk [vmem:[#allocation4 + $0xd] sm:$0x1] %vm502_vm2, %v1921_v0  ;;  %1225 = vst.msk [vmem:[#allocation4 + $0x15] sm:$0x1] %vm502_vm2, %v1921_v0  ;;  %v373_v6 = vsel %vm372_vm0, %v360_v1, 0.0  ;;  %v374_v7 = vsel %vm372_vm0, %v361_v2, 0.0 }
  0x13   : > { %1226 = vst.msk [vmem:[#allocation4 + $0x1d] sm:$0x1] %vm502_vm2, %v1921_v0  ;;  %1227 = vst.msk [vmem:[#allocation4 + $0x25] sm:$0x1] %vm502_vm2, %v1921_v0  ;;  %v376_v8 = vsel %vm372_vm0, %v362_v3, 0.0  ;;  %v364_v9 = vld [vmem:[%s2065_s18 + $0x20] sm:$0xff]  ;;  %v375_v10 = vadd.f32 %v374_v7, %v373_v6 }
  0x14   : > { %503 = vst.msk [vmem:[#allocation2] sm:$0x1] %vm502_vm2, %v1921_v0  ;;  %513 = vst.msk [vmem:[#allocation2 + $0x9] sm:$0x1] %vm502_vm2, %v1921_v0  ;;  %v378_v12 = vsel %vm372_vm0, %v363_v5, 0.0  ;;  %v365_v13 = vld [vmem:[%s2065_s18 + $0x28] sm:$0xff] }
  0x15   : > { %512 = vst.msk [vmem:[#allocation2 + $0x90] sm:$0x1] %vm502_vm2, %v1921_v0  ;;  %522 = vst.msk [vmem:[#allocation2 + $0x99] sm:$0x1] %vm502_vm2, %v1921_v0  ;;  %v377_v14 = vadd.f32 %v376_v8, %v375_v10  ;;  %v380_v15 = vsel %vm372_vm0, %v364_v9, 0.0  ;;  %v366_v16 = vld [vmem:[%s2065_s18 + $0x30] sm:$0xff] }
  0x16   : > { %v382_v18 = vsel %vm372_vm0, %v365_v13, 0.0  ;;  %v367_v19 = vld [vmem:[%s2065_s18 + $0x38] sm:$0xff]  ;;  %v384_v21 = vsel %vm372_vm0, %v366_v16, 0.0  ;;  %v925_v10 = vld [vmem:[%s2558_s2 + $0x8] sm:$0xff] }
  0x17   : > { %v379_v17 = vadd.f32 %v378_v12, %v377_v14  ;;  %v386_v23 = vsel %vm372_vm0, %v367_v19, 0.0  ;;  %v926_v14 = vld [vmem:[%s2558_s2 + $0x10] sm:$0xff] }
  0x19   : > { %v381_v20 = vadd.f32 %v380_v15, %v379_v17  ;;  %v927_v15 = vld [vmem:[%s2558_s2 + $0x18] sm:$0xff]  ;;  %v928_v17 = vld [vmem:[%s2558_s2 + $0x20] sm:$0xff] }
  0x1b   : > { %v597_v11 = vld [vmem:[#allocation2 + $0x2] sm:$0xff]  ;;  %v383_v22 = vadd.f32 %v382_v18, %v381_v20 }
  0x1c   : > { %613 = vrot.lane.b32.xlu0 %v597_v11, %s1923_s20  ;;  %v1924_v11 = vmov 0.0|0.0   ;;  %v929_v18 = vld [vmem:[%s2558_s2 + $0x28] sm:$0xff] }
  0x1d   : > { %v385_v24 = vadd.f32 %v384_v21, %v383_v22  ;;  %1798 = vmatprep.subr.bf16.mxu0 %v1924_v11  ;;  %v1716_v21 = vld [vmem:[%s2560_s4] ss:$0 sm:$0xff] }
  0x1f   : > { %v387_v25 = vadd.f32 %v386_v23, %v385_v24 }
  0x21   : > { %v388_v26 = vrot.slane %v387_v25, 4 }
  0x23   : > { %v389_v27 = vadd.f32 %v388_v26, %v387_v25  ;;  %v1717_v26 = vld [vmem:[%s2561_s5] ss:$0 sm:$0xff] }
  0x25   : > { %v390_v28 = vrot.slane %v389_v27, 2 }
  0x27   : > { %v391_v29 = vadd.f32 %v390_v28, %v389_v27 }
  0x29   : > { %v392_v30 = vrot.slane %v391_v29, 1 }
  0x2b   : > { %v393_v31 = vadd.f32 %v392_v30, %v391_v29 }
  0x2d   : > { %v395_v32 = vmul.f32 0.015625, %v393_v31 }
  0x2f   : > { %v396_v33 = vsub.f32 %v360_v1, %v395_v32  ;;  %v397_v34 = vsub.f32 %v361_v2, %v395_v32  ;;  %v398_v35 = vsub.f32 %v362_v3, %v395_v32  ;;  %v399_v36 = vsub.f32 %v363_v5, %v395_v32 }
  0x30   : > { %v400_v37 = vsub.f32 %v364_v9, %v395_v32  ;;  %v401_v38 = vsub.f32 %v365_v13, %v395_v32  ;;  %v402_v43 = vsub.f32 %v366_v16, %v395_v32  ;;  %v403_v49 = vsub.f32 %v367_v19, %v395_v32  ;;  %v924_v9 = vld [vmem:[%s2558_s2] sm:$0xff] }
  0x31   : > { %v404_v39 = vmul.f32 %v396_v33, %v396_v33  ;;  %v405_v40 = vmul.f32 %v397_v34, %v397_v34  ;;  %v406_v41 = vmul.f32 %v398_v35, %v398_v35  ;;  %v407_v42 = vmul.f32 %v399_v36, %v399_v36  ;;  %v532_v13 = vld [vmem:[#allocation2] sm:$0xff] }
  0x32   : > { %v408_v44 = vmul.f32 %v400_v37, %v400_v37  ;;  %v409_v50 = vmul.f32 %v401_v38, %v401_v38  ;;  %v410_v53 = vmul.f32 %v402_v43, %v402_v43  ;;  %v411_v56 = vmul.f32 %v403_v49, %v403_v49  ;;  %540 = vst.msk [vmem:[#allocation3] sm:$0xff] %vm372_vm0, %v532_v13  ;;  %v936_v13 = vld [vmem:[%s2558_s2 + $0x60] sm:$0xff] }
  0x33   : > { %v412_v45 = vsel %vm372_vm0, %v404_v39, 0.0  ;;  %v413_v46 = vsel %vm372_vm0, %v405_v40, 0.0  ;;  %v415_v47 = vsel %vm372_vm0, %v406_v41, 0.0  ;;  %v417_v51 = vsel %vm372_vm0, %v407_v42, 0.0 }
  0x34   : > { %v414_v48 = vadd.f32 %v413_v46, %v412_v45  ;;  %v419_v54 = vsel %vm372_vm0, %v408_v44, 0.0  ;;  %v421_v57 = vsel %vm372_vm0, %v409_v50, 0.0  ;;  %v423_v59 = vsel %vm372_vm0, %v410_v53, 0.0 }
  0x35   : > { %v425_v61 = vsel %vm372_vm0, %v411_v56, 0.0  ;;  %v1799_v12 = vpack.c.bf16 %v925_v10, %v924_v9  ;;  %v1802_v16 = vpack.c.bf16 %v927_v15, %v926_v14  ;;  %v1805_v19 = vpack.c.bf16 %v929_v18, %v928_v17 }
  0x36   : > { %v416_v52 = vadd.f32 %v415_v47, %v414_v48 }
  0x37   : > { %1800 = vmatpush1.bf16.msra.mxu0 %v1799_v12 }
  0x38   : > { %v418_v55 = vadd.f32 %v417_v51, %v416_v52  ;;  %1801 = vmatprep.subr.bf16.mxu0 %v1924_v11 }
  0x3a   : > { %v420_v58 = vadd.f32 %v419_v54, %v418_v55  ;;  %v930_v54 = vld [vmem:[%s2558_s2 + $0x30] sm:$0xff]  ;;  %v931_v55 = vld [vmem:[%s2558_s2 + $0x38] sm:$0xff] }
  0x3b   : > { %1803 = vmatpush1.bf16.msra.mxu0 %v1802_v16 }
  0x3c   : > { %v422_v60 = vadd.f32 %v421_v57, %v420_v58  ;;  %1804 = vmatprep.subr.bf16.mxu0 %v1924_v11 }
  0x3e   : > { %v424_v62 = vadd.f32 %v423_v59, %v422_v60 }
  0x3f   : > { %1806 = vmatpush1.bf16.msra.mxu0 %v1805_v19 }
  0x40   : > { %v426_v63 = vadd.f32 %v425_v61, %v424_v62  ;;  %1807 = vmatprep.subr.bf16.mxu0 %v1924_v11 }
  0x42   : > { %v427_v1 = vrot.slane %v426_v63, 4 }
  0x44   : > { %v428_v2 = vadd.f32 %v427_v1, %v426_v63  ;;  %v1808_v63 = vpack.c.bf16 %v931_v55, %v930_v54  ;;  %v932_v1 = vld [vmem:[%s2558_s2 + $0x40] sm:$0xff] }
  0x46   : > { %v429_v3 = vrot.slane %v428_v2, 2  ;;  %1809 = vmatpush1.bf16.msra.mxu0 %v1808_v63 }
  0x47   : > { %1810 = vmatprep.subr.bf16.mxu0 %v1924_v11 }
  0x48   : > { %v430_v4 = vadd.f32 %v429_v3, %v428_v2  ;;  %v933_v2 = vld [vmem:[%s2558_s2 + $0x48] sm:$0xff] }
  0x4a   : > { %v431_v5 = vrot.slane %v430_v4, 1 }
  0x4c   : > { %v432_v6 = vadd.f32 %v431_v5, %v430_v4  ;;  %v1811_v5 = vpack.c.bf16 %v933_v2, %v932_v1 }
  0x4e   : > { %v433_v7 = vmul.f32 0.015625, %v432_v6  ;;  %v934_v6 = vld [vmem:[%s2558_s2 + $0x50] sm:$0xff]  ;;  %1812 = vmatpush1.bf16.msra.mxu0 %v1811_v5 }
  0x4f   : > { %1813 = vmatprep.subr.bf16.mxu0 %v1924_v11 }
  0x50   : > { %v434_v8 = vadd.f32 1e-05, %v433_v7  ;;  %v935_v7 = vld [vmem:[%s2558_s2 + $0x58] sm:$0xff] }
  0x51   : > { %v1814_v17 = vpack.c.bf16 %v935_v7, %v934_v6 }
  0x52   : > { %1901 = vrsqrt.f32 %v434_v8 }
  0x53   : > { %1815 = vmatpush1.bf16.msra.mxu0 %v1814_v17 }
  0x54   : > { %1816 = vmatprep.subr.bf16.mxu0 %v1924_v11 }
  0x5c   : > { %v1902_v20 = vpop.eup %1901 }
  0x5d   : > { %v436_v22 = vmul.f32 %v1902_v20, %v396_v33  ;;  %v437_v23 = vmul.f32 %v1902_v20, %v397_v34  ;;  %v438_v24 = vmul.f32 %v1902_v20, %v398_v35  ;;  %v439_v25 = vmul.f32 %v1902_v20, %v399_v36 }
  0x5e   : > { %v440_v27 = vmul.f32 %v1902_v20, %v400_v37  ;;  %v441_v28 = vmul.f32 %v1902_v20, %v401_v38  ;;  %v442_v29 = vmul.f32 %v1902_v20, %v402_v43  ;;  %v443_v30 = vmul.f32 %v1902_v20, %v403_v49  ;;  %v937_v20 = vld [vmem:[%s2558_s2 + $0x68] sm:$0xff] }
  0x5f   : > { %v450_v31 = vmul.f32 %v1716_v21, %v436_v22  ;;  %v451_v32 = vmul.f32 %v1716_v21, %v437_v23  ;;  %v452_v39 = vmul.f32 %v1716_v21, %v438_v24  ;;  %v453_v40 = vmul.f32 %v1716_v21, %v439_v25 }
  0x60   : > { %v454_v41 = vmul.f32 %v1716_v21, %v440_v27  ;;  %v455_v33 = vmul.f32 %v1716_v21, %v441_v28  ;;  %v456_v34 = vmul.f32 %v1716_v21, %v442_v29  ;;  %v457_v35 = vmul.f32 %v1716_v21, %v443_v30  ;;  %v938_v29 = vld [vmem:[%s2558_s2 + $0x70] sm:$0xff]  ;;  %v939_v30 = vld [vmem:[%s2558_s2 + $0x78] sm:$0xff] }
  0x61   : > { %v464_v36 = vadd.f32 %v1717_v26, %v450_v31  ;;  %v465_v42 = vadd.f32 %v1717_v26, %v451_v32  ;;  %v466_v44 = vadd.f32 %v1717_v26, %v452_v39  ;;  %v467_v45 = vadd.f32 %v1717_v26, %v453_v40  ;;  %v940_v40 = vld [vmem:[%s2558_s2 + $0x80] sm:$0xff] }
  0x62   : > { %v468_v46 = vadd.f32 %v1717_v26, %v454_v41  ;;  %v469_v37 = vadd.f32 %v1717_v26, %v455_v33  ;;  %v470_v38 = vadd.f32 %v1717_v26, %v456_v34  ;;  %v471_v43 = vadd.f32 %v1717_v26, %v457_v35  ;;  %v941_v41 = vld [vmem:[%s2558_s2 + $0x88] sm:$0xff] }
  0x63   : > { %vm472_vm3 = vcmp.gt.f32.partialorder %v464_v36, 0.0  ;;  %v480_v47 = vmul.f32 0.2, %v464_v36  ;;  %vm473_vm4 = vcmp.gt.f32.partialorder %v465_v42, 0.0  ;;  %v481_v48 = vmul.f32 0.2, %v465_v42 }
  0x64   : > { %vm474_vm5 = vcmp.gt.f32.partialorder %v466_v44, 0.0  ;;  %v482_v49 = vmul.f32 0.2, %v466_v44  ;;  %vm475_vm6 = vcmp.gt.f32.partialorder %v467_v45, 0.0  ;;  %v483_v50 = vmul.f32 0.2, %v467_v45 }
  0x65   : > { %v488_v51 = vsel %vm472_vm3, %v464_v36, %v480_v47  ;;  %v489_v52 = vsel %vm473_vm4, %v465_v42, %v481_v48  ;;  %vm476_vm7 = vcmp.gt.f32.partialorder %v468_v46, 0.0  ;;  %v484_v53 = vmul.f32 0.2, %v468_v46  ;;  %v801_v47 = vld [vmem:[#allocation2 + $0x90] sm:$0xff] }
  0x66   : > { %524 = vst.msk [vmem:[#allocation2 + $0x11] sm:$0xff] %vm372_vm0, %v488_v51  ;;  %525 = vst.msk [vmem:[#allocation2 + $0x21] sm:$0xff] %vm372_vm0, %v489_v52  ;;  %v490_v56 = vsel %vm474_vm5, %v466_v44, %v482_v49  ;;  %v491_v57 = vsel %vm475_vm6, %v467_v45, %v483_v50  ;;  %vm477_vm8 = vcmp.gt.f32.partialorder %v469_v37, 0.0  ;;  %v485_v58 = vmul.f32 0.2, %v469_v37  ;;  %v850_v48 = vld [vmem:[#allocation2 + $0x91] sm:$0xff] }
  0x67   : > { %526 = vst.msk [vmem:[#allocation2 + $0x31] sm:$0xff] %vm372_vm0, %v490_v56  ;;  %527 = vst.msk [vmem:[#allocation2 + $0x41] sm:$0xff] %vm372_vm0, %v491_v57  ;;  %v492_v59 = vsel %vm476_vm7, %v468_v46, %v484_v53  ;;  %vm478_vm9 = vcmp.gt.f32.partialorder %v470_v38, 0.0  ;;  %v486_v60 = vmul.f32 0.2, %v470_v38  ;;  %vm479_vm10 = vcmp.gt.f32.partialorder %v471_v43, 0.0 }
  0x68   : > { %528 = vst.msk [vmem:[#allocation2 + $0x51] sm:$0xff] %vm372_vm0, %v492_v59  ;;  %v493_v61 = vsel %vm477_vm8, %v469_v37, %v485_v58  ;;  %v487_v62 = vmul.f32 0.2, %v471_v43  ;;  %v1817_v27 = vpack.c.bf16 %v937_v20, %v936_v13  ;;  %v1820_v39 = vpack.c.bf16 %v939_v30, %v938_v29 }
  0x69   : > { %529 = vst.msk [vmem:[#allocation2 + $0x61] sm:$0xff] %vm372_vm0, %v493_v61  ;;  %v494_v3 = vsel %vm478_vm9, %v470_v38, %v486_v60  ;;  %v1823_v33 = vpack.c.bf16 %v941_v41, %v940_v40  ;;  %v899_v38 = vld [vmem:[#allocation2 + $0x92] sm:$0xff]  ;;  %vm883_vm3 = vcmask 1048448   ;;  %vm1078_vm4 = vcmask 523264  }
  0x6a   : > { %530 = vst.msk [vmem:[#allocation2 + $0x71] sm:$0xff] %vm372_vm0, %v494_v3  ;;  %v495_v4 = vsel %vm479_vm10, %v471_v43, %v487_v62  ;;  %1818 = vmatpush1.bf16.msra.mxu0 %v1817_v27  ;;  %907 = vst.msk [vmem:[#allocation3 + $0x78] sm:$0xff] %vm372_vm0, %v899_v38  ;;  %vm1213_vm5 = vcmask 128000   ;;  %vm1233_vm6 = vcmask 130052   ;;  %vm1230_vm7 = vcmask 125952  }
  0x6b   : > { %531 = vst.msk [vmem:[#allocation2 + $0x81] sm:$0xff] %vm372_vm0, %v495_v4  ;;  %1819 = vmatprep.subr.bf16.mxu0 %v1924_v11  ;;  %vm1286_vm8 = vcmask 388352  }
  0x6c   : > { %1216 = vst.msk [vmem:[#allocation4 + $0x28] sm:$0x3f] %vm1213_vm5, %v1921_v0  ;;  %1214 = vst.msk [vmem:[#allocation4] sm:$0x3f] %vm1213_vm5, %v1921_v0  ;;  %vm1378_vm5 = vcmask 786052  }
  0x6d   : > { %v646_v8 = vld [vmem:[#allocation2 + $0x10] sm:$0xff]  ;;  %v647_v10 = vld [vmem:[#allocation2 + $0x20] sm:$0xff]  ;;  %1228 = vst.msk [vmem:[#allocation4 + $0x2d] sm:$0x1] %vm502_vm2, %v1921_v0  ;;  %1222 = vst.msk [vmem:[#allocation4 + $0x28] sm:$0x1] %vm502_vm2, %v1921_v0 }
  0x6e   : > { %v549_v9 = vld [vmem:[#allocation2 + $0x11] sm:$0xff]  ;;  %662 = vrot.lane.b32.xlu1 %v646_v8, %s1925_s16  ;;  %v2151_v12 = vld [vmem:[#allocation2 + $0x22] sm:$0xff]  ;;  %541 = vst.msk [vmem:[#allocation3 + $0x10] sm:$0xff] %vm372_vm0, %v646_v8  ;;  %542 = vst.msk [vmem:[#allocation3 + $0x20] sm:$0xff] %vm372_vm0, %v647_v10  ;;  %1821 = vmatpush1.bf16.msra.mxu0 %v1820_v39 }
  0x6f   : > { %566 = vrot.lane.b32.xlu0 %v549_v9, %s1922_s19  ;;  %v598_v14 = vld [vmem:[#allocation2 + $0x12] sm:$0xff]  ;;  %900 = vst.msk [vmem:[#allocation3 + $0x8] sm:$0xff] %vm372_vm0, %v2151_v12  ;;  %v2164_v18 = vld [vmem:[#allocation2 + $0x40] sm:$0xff]  ;;  %1822 = vmatprep.subr.bf16.mxu0 %v1924_v11 }
  0x70   : > { %v2157_v15 = vld [vmem:[#allocation2 + $0x30] sm:$0xff]  ;;  %v2166_v19 = vld [vmem:[#allocation2 + $0x42] sm:$0xff]  ;;  %544 = vst.msk [vmem:[#allocation3 + $0x40] sm:$0xff] %vm372_vm0, %v2164_v18 }
  0x71   : > { %v2159_v16 = vld [vmem:[#allocation2 + $0x32] sm:$0xff]  ;;  %543 = vst.msk [vmem:[#allocation3 + $0x30] sm:$0xff] %vm372_vm0, %v2157_v15  ;;  %902 = vst.msk [vmem:[#allocation3 + $0x28] sm:$0xff] %vm372_vm0, %v2166_v19  ;;  %v2186_v23 = vld [vmem:[#allocation2 + $0x60] sm:$0xff] }
  0x72   : > { %901 = vst.msk [vmem:[#allocation3 + $0x18] sm:$0xff] %vm372_vm0, %v2159_v16  ;;  %v2176_v21 = vld [vmem:[#allocation2 + $0x50] sm:$0xff]  ;;  %711 = vrot.lane.b32.xlu1 %v549_v9, %s1926_s24  ;;  %v2188_v24 = vld [vmem:[#allocation2 + $0x62] sm:$0xff]  ;;  %546 = vst.msk [vmem:[#allocation3 + $0x60] sm:$0xff] %vm372_vm0, %v2186_v23  ;;  %1824 = vmatpush1.bf16.msra.mxu0 %v1823_v33 }
  0x73   : > { %v2178_v22 = vld [vmem:[#allocation2 + $0x52] sm:$0xff]  ;;  %615 = vrot.lane.b32.xlu0 %v598_v14, %s1923_s20  ;;  %545 = vst.msk [vmem:[#allocation3 + $0x50] sm:$0xff] %vm372_vm0, %v2176_v21  ;;  %904 = vst.msk [vmem:[#allocation3 + $0x48] sm:$0xff] %vm372_vm0, %v2188_v24  ;;  %v2202_v28 = vld [vmem:[#allocation2 + $0x82] sm:$0xff] }
  0x74   : > { %903 = vst.msk [vmem:[#allocation3 + $0x38] sm:$0xff] %vm372_vm0, %v2178_v22  ;;  %v2194_v25 = vld [vmem:[#allocation2 + $0x70] sm:$0xff]  ;;  %906 = vst.msk [vmem:[#allocation3 + $0x68] sm:$0xff] %vm372_vm0, %v2202_v28  ;;  %v696_v32 = vld [vmem:[#allocation2 + $0x21] sm:$0xff] }
  0x75   : > { %v2196_v26 = vld [vmem:[#allocation2 + $0x72] sm:$0xff]  ;;  %547 = vst.msk [vmem:[#allocation3 + $0x70] sm:$0xff] %vm372_vm0, %v2194_v25  ;;  %v698_v42 = vld [vmem:[#allocation2 + $0x41] sm:$0xff] }
  0x76   : > { %905 = vst.msk [vmem:[#allocation3 + $0x58] sm:$0xff] %vm372_vm0, %v2196_v26  ;;  %760 = vrot.lane.b32.xlu1 %v598_v14, %s1927_s29  ;;  %v909_v31 = vld [vmem:[#allocation3 + $0x8] sm:$0xff]  ;;  %v844_v34 = vld [vmem:[#allocation2 + $0x31] sm:$0xff]  ;;  %v800_v37 = vld [vmem:[#allocation2 + $0x80] sm:$0xff] }
  0x77   : > { %664 = vrot.lane.b32.xlu0 %v647_v10, %s1925_s16  ;;  %1719 = vmatprep.mubr.msk.f32.mxu0 %vm372_vm0, %v909_v31  ;;  %v846_v44 = vld [vmem:[#allocation2 + $0x51] sm:$0xff]  ;;  %v700_v45 = vld [vmem:[#allocation2 + $0x61] sm:$0xff]  ;;  %1217 = vst.msk [vmem:[#allocation4] sm:$0x1] %vm502_vm2, %v1921_v0  ;;  %1223 = vst.msk [vmem:[#allocation4 + $0x5] sm:$0x1] %vm502_vm2, %v1921_v0 }
  0x78   : > { %v848_v46 = vld [vmem:[#allocation2 + $0x71] sm:$0xff]  ;;  %v849_v43 = vld [vmem:[#allocation2 + $0x81] sm:$0xff]  ;;  %vm1258_vm2 = vcmask 257152  }
  0x79   : > { %v911_v61 = vld [vmem:[#allocation3 + $0x18] sm:$0xff]  ;;  %v913_v4 = vld [vmem:[#allocation3 + $0x28] sm:$0xff] }
  0x7a   : > { %810 = vrot.lane.b32.xlu1 %v647_v10, %s1928_s17 }
  0x7b   : > { %713 = vrot.lane.b32.xlu0 %v696_v32, %s1926_s24  ;;  %v915_v17 = vld [vmem:[#allocation3 + $0x38] sm:$0xff] }
  0x7d   : > { %v919_v41 = vld [vmem:[#allocation3 + $0x58] sm:$0xff] }
  0x7e   : > { %859 = vrot.lane.b32.xlu1 %v696_v32, %s1929_s21 }
  0x7f   : > { %762 = vrot.lane.b32.xlu0 %v2151_v12, %s1927_s29 }
  0x81   : > { %v565_v35 = vpop.permute.xlu0 %564 }
  0x82   : > { %568 = vrot.lane.b32.xlu1 %v696_v32, %s1922_s19  ;;  %589 = vst.msk [vmem:[#allocation3] sm:$0xff] %vm588_vm11, %v565_v35 }
  0x83   : > { %812 = vrot.lane.b32.xlu0 %v2157_v15, %s1928_s17 }
  0x86   : > { %617 = vrot.lane.b32.xlu1 %v2151_v12, %s1923_s20 }
  0x87   : > { %861 = vrot.lane.b32.xlu0 %v844_v34, %s1929_s21 }
  0x8a   : > { %666 = vrot.lane.b32.xlu1 %v2157_v15, %s1925_s16 }
  0x8b   : > { %570 = vrot.lane.b32.xlu0 %v844_v34, %s1922_s19 }
  0x8e   : > { %v614_v36 = vpop.permute.xlu0 %613  ;;  %715 = vrot.lane.b32.xlu1 %v844_v34, %s1926_s24 }
  0x8f   : > { %638 = vst.msk [vmem:[#allocation3] sm:$0xff] %vm637_vm12, %v614_v36  ;;  %619 = vrot.lane.b32.xlu0 %v2159_v16, %s1923_s20 }
  0x92   : > { %764 = vrot.lane.b32.xlu1 %v2159_v16, %s1927_s29 }
  0x93   : > { %668 = vrot.lane.b32.xlu0 %v2164_v18, %s1925_s16 }
  0x96   : > { %814 = vrot.lane.b32.xlu1 %v2164_v18, %s1928_s17 }
  0x97   : > { %717 = vrot.lane.b32.xlu0 %v698_v42, %s1926_s24 }
  0x9a   : > { %863 = vrot.lane.b32.xlu1 %v698_v42, %s1929_s21 }
  0x9b   : > { %766 = vrot.lane.b32.xlu0 %v2166_v19, %s1927_s29 }
  0x9e   : > { %572 = vrot.lane.b32.xlu1 %v698_v42, %s1922_s19 }
  0x9f   : > { %816 = vrot.lane.b32.xlu0 %v2176_v21, %s1928_s17 }
  0xa2   : > { %621 = vrot.lane.b32.xlu1 %v2166_v19, %s1923_s20 }
  0xa3   : > { %865 = vrot.lane.b32.xlu0 %v846_v44, %s1929_s21 }
  0xa6   : > { %670 = vrot.lane.b32.xlu1 %v2176_v21, %s1925_s16 }
  0xa7   : > { %574 = vrot.lane.b32.xlu0 %v846_v44, %s1922_s19 }
  0xaa   : > { %719 = vrot.lane.b32.xlu1 %v846_v44, %s1926_s24  ;;  %v921_v44 = vld [vmem:[#allocation3 + $0x68] sm:$0xff] }
  0xab   : > { %623 = vrot.lane.b32.xlu0 %v2178_v22, %s1923_s20 }
  0xae   : > { %768 = vrot.lane.b32.xlu1 %v2178_v22, %s1927_s29 }
  0xaf   : > { %672 = vrot.lane.b32.xlu0 %v2186_v23, %s1925_s16 }
  0xb2   : > { %818 = vrot.lane.b32.xlu1 %v2186_v23, %s1928_s17  ;;  %v917_v23 = vld [vmem:[#allocation3 + $0x48] sm:$0xff] }
  0xb3   : > { %721 = vrot.lane.b32.xlu0 %v700_v45, %s1926_s24 }
  0xb6   : > { %867 = vrot.lane.b32.xlu1 %v700_v45, %s1929_s21 }
  0xb7   : > { %770 = vrot.lane.b32.xlu0 %v2188_v24, %s1927_s29 }
  0xba   : > { %576 = vrot.lane.b32.xlu1 %v700_v45, %s1922_s19 }
  0xbb   : > { %820 = vrot.lane.b32.xlu0 %v2194_v25, %s1928_s17 }
  0xbe   : > { %625 = vrot.lane.b32.xlu1 %v2188_v24, %s1923_s20 }
  0xbf   : > { %869 = vrot.lane.b32.xlu0 %v848_v46, %s1929_s21 }
  0xc2   : > { %674 = vrot.lane.b32.xlu1 %v2194_v25, %s1925_s16 }
  0xc3   : > { %578 = vrot.lane.b32.xlu0 %v848_v46, %s1922_s19 }
  0xc6   : > { %723 = vrot.lane.b32.xlu1 %v848_v46, %s1926_s24 }
  0xc7   : > { %627 = vrot.lane.b32.xlu0 %v2196_v26, %s1923_s20 }
  0xca   : > { %772 = vrot.lane.b32.xlu1 %v2196_v26, %s1927_s29 }
  0xcb   : > { %676 = vrot.lane.b32.xlu0 %v800_v37, %s1925_s16 }
  0xce   : > { %822 = vrot.lane.b32.xlu1 %v800_v37, %s1928_s17 }
  0xcf   : > { %725 = vrot.lane.b32.xlu0 %v849_v43, %s1926_s24 }
  0xd2   : > { %871 = vrot.lane.b32.xlu1 %v849_v43, %s1929_s21 }
  0xd3   : > { %824 = vrot.lane.b32.xlu0 %v801_v47, %s1928_s17 }
  0xd6   : > { %774 = vrot.lane.b32.xlu1 %v2202_v28, %s1927_s29 }
  0xda   : > { %873 = vrot.lane.b32.xlu1 %v850_v48, %s1929_s21 }
  0xe0   : > { %v663_v49 = vpop.permute.xlu1 %662 }
  0xe1   : > { %v567_v50 = vpop.permute.xlu0 %566  ;;  %687 = vst.msk [vmem:[#allocation3] sm:$0xff] %vm686_vm13, %v663_v49 }
  0xe2   : > { %590 = vst.msk [vmem:[#allocation3 + $0x10] sm:$0xff] %vm588_vm11, %v567_v50 }
  0xe4   : > { %v712_v51 = vpop.permute.xlu1 %711 }
  0xe5   : > { %v616_v52 = vpop.permute.xlu0 %615  ;;  %736 = vst.msk [vmem:[#allocation3] sm:$0xff] %vm735_vm14, %v712_v51 }
  0xe6   : > { %639 = vst.msk [vmem:[#allocation3 + $0x10] sm:$0xff] %vm637_vm12, %v616_v52  ;;  %v923_v52 = vld [vmem:[#allocation3 + $0x78] sm:$0xff] }
  0xe8   : > { %v761_v53 = vpop.permute.xlu1 %760 }
  0xe9   : > { %v665_v54 = vpop.permute.xlu0 %664  ;;  %785 = vst.msk [vmem:[#allocation3] sm:$0xff] %vm784_vm15, %v761_v53 }
  0xea   : > { %688 = vst.msk [vmem:[#allocation3 + $0x10] sm:$0xff] %vm686_vm13, %v665_v54 }
  0xec   : > { %v811_v55 = vpop.permute.xlu1 %810 }
  0xed   : > { %v714_v56 = vpop.permute.xlu0 %713  ;;  %835 = vst.msk [vmem:[#allocation3] sm:$0xff] %vm834_vm1, %v811_v55 }
  0xee   : > { %737 = vst.msk [vmem:[#allocation3 + $0x10] sm:$0xff] %vm735_vm14, %v714_v56  ;;  %v368_v56 = vld [vmem:[%s2557_s1] sm:$0xff] }
  0xef   : > { %1776 = vmatprep.mubr.msk.f32.mxu1 %vm1078_vm4, %v368_v56 }
  0xf0   : > { %v860_v57 = vpop.permute.xlu1 %859 }
  0xf1   : > { %v763_v58 = vpop.permute.xlu0 %762  ;;  %884 = vst.msk [vmem:[#allocation3] sm:$0xff] %vm883_vm3, %v860_v57 }
  0xf2   : > { %786 = vst.msk [vmem:[#allocation3 + $0x10] sm:$0xff] %vm784_vm15, %v763_v58 }
  0xf4   : > { %v569_v59 = vpop.permute.xlu1 %568 }
  0xf5   : > { %v813_v60 = vpop.permute.xlu0 %812  ;;  %591 = vst.msk [vmem:[#allocation3 + $0x20] sm:$0xff] %vm588_vm11, %v569_v59  ;;  %v1718_v59 = vld [vmem:[%s2559_s3] ss:$0 sm:$0xff] }
  0xf6   : > { %836 = vst.msk [vmem:[#allocation3 + $0x10] sm:$0xff] %vm834_vm1, %v813_v60 }
  0xf8   : > { %v618_v62 = vpop.permute.xlu1 %617  ;;  %v908_v1 = vld [vmem:[#allocation3] sm:$0xff] }
  0xf9   : > { %v862_v63 = vpop.permute.xlu0 %861  ;;  %640 = vst.msk [vmem:[#allocation3 + $0x20] sm:$0xff] %vm637_vm12, %v618_v62  ;;  %1038 = vmatmul.mubr.f32.vlgmr.msra.gmra.mrb[0].mxu0 %v908_v1 }
  0xfa   : > { %885 = vst.msk [vmem:[#allocation3 + $0x10] sm:$0xff] %vm883_vm3, %v862_v63  ;;  %1720 = vmatprep.mubr.msk.f32.mxu0 %vm372_vm0, %v911_v61 }
  0xfc   : > { %v667_v2 = vpop.permute.xlu1 %666 }
  0xfd   : > { %v571_v3 = vpop.permute.xlu0 %570  ;;  %689 = vst.msk [vmem:[#allocation3 + $0x20] sm:$0xff] %vm686_vm13, %v667_v2 }
  0xfe   : > { %592 = vst.msk [vmem:[#allocation3 + $0x30] sm:$0xff] %vm588_vm11, %v571_v3 }
 0x100   : > { %v716_v5 = vpop.permute.xlu1 %715 }
 0x101   : > { %v620_v6 = vpop.permute.xlu0 %619  ;;  %v910_v7 = vld [vmem:[#allocation3 + $0x10] sm:$0xff]  ;;  %738 = vst.msk [vmem:[#allocation3 + $0x20] sm:$0xff] %vm735_vm14, %v716_v5 }
 0x102   : > { %641 = vst.msk [vmem:[#allocation3 + $0x30] sm:$0xff] %vm637_vm12, %v620_v6  ;;  %1043 = vmatmul.mubr.f32.gmra.mrb[2].mxu0 %v910_v7 }
 0x103   : > { %1721 = vmatprep.mubr.msk.f32.mxu0 %vm372_vm0, %v913_v4 }
 0x104   : > { %v765_v8 = vpop.permute.xlu1 %764 }
 0x105   : > { %v669_v9 = vpop.permute.xlu0 %668  ;;  %787 = vst.msk [vmem:[#allocation3 + $0x20] sm:$0xff] %vm784_vm15, %v765_v8 }
 0x106   : > { %690 = vst.msk [vmem:[#allocation3 + $0x30] sm:$0xff] %vm686_vm13, %v669_v9 }
 0x108   : > { %v815_v10 = vpop.permute.xlu1 %814 }
 0x109   : > { %v718_v12 = vpop.permute.xlu0 %717  ;;  %837 = vst.msk [vmem:[#allocation3 + $0x20] sm:$0xff] %vm834_vm1, %v815_v10 }
 0x10a   : > { %739 = vst.msk [vmem:[#allocation3 + $0x30] sm:$0xff] %vm735_vm14, %v718_v12 }
 0x10c   : > { %v864_v13 = vpop.permute.xlu1 %863 }
 0x10d   : > { %v767_v14 = vpop.permute.xlu0 %766  ;;  %886 = vst.msk [vmem:[#allocation3 + $0x20] sm:$0xff] %vm883_vm3, %v864_v13 }
 0x10e   : > { %788 = vst.msk [vmem:[#allocation3 + $0x30] sm:$0xff] %vm784_vm15, %v767_v14 }
 0x110   : > { %v573_v15 = vpop.permute.xlu1 %572 }
 0x111   : > { %v817_v16 = vpop.permute.xlu0 %816  ;;  %593 = vst.msk [vmem:[#allocation3 + $0x40] sm:$0xff] %vm588_vm11, %v573_v15 }
 0x112   : > { %838 = vst.msk [vmem:[#allocation3 + $0x30] sm:$0xff] %vm834_vm1, %v817_v16 }
 0x114   : > { %v622_v18 = vpop.permute.xlu1 %621  ;;  %v912_v20 = vld [vmem:[#allocation3 + $0x20] sm:$0xff] }
 0x115   : > { %v866_v19 = vpop.permute.xlu0 %865  ;;  %642 = vst.msk [vmem:[#allocation3 + $0x40] sm:$0xff] %vm637_vm12, %v622_v18  ;;  %1048 = vmatmul.mubr.f32.gmra.mrb[4].mxu0 %v912_v20 }
 0x116   : > { %887 = vst.msk [vmem:[#allocation3 + $0x30] sm:$0xff] %vm883_vm3, %v866_v19  ;;  %1722 = vmatprep.mubr.msk.f32.mxu0 %vm372_vm0, %v915_v17 }
 0x118   : > { %v671_v21 = vpop.permute.xlu1 %670 }
 0x119   : > { %v575_v22 = vpop.permute.xlu0 %574  ;;  %691 = vst.msk [vmem:[#allocation3 + $0x40] sm:$0xff] %vm686_vm13, %v671_v21 }
 0x11a   : > { %594 = vst.msk [vmem:[#allocation3 + $0x50] sm:$0xff] %vm588_vm11, %v575_v22 }
 0x11c   : > { %v720_v24 = vpop.permute.xlu1 %719 }
 0x11d   : > { %v624_v25 = vpop.permute.xlu0 %623  ;;  %v914_v26 = vld [vmem:[#allocation3 + $0x30] sm:$0xff]  ;;  %740 = vst.msk [vmem:[#allocation3 + $0x40] sm:$0xff] %vm735_vm14, %v720_v24  ;;  %v2374_v24 = vld [vmem:[%s2557_s1 + $0x8] sm:$0xff] }
 0x11e   : > { %643 = vst.msk [vmem:[#allocation3 + $0x50] sm:$0xff] %vm637_vm12, %v624_v25  ;;  %1053 = vmatmul.mubr.f32.gmra.mrb[6].mxu0 %v914_v26  ;;  %v1253_v25 = vld [vmem:[#allocation4 + $0x1] sm:$0xf] }
 0x11f   : > { %1723 = vmatprep.mubr.msk.f32.mxu0 %vm372_vm0, %v917_v23  ;;  %1255 = vrot.lane.b32.xlu0 %v1253_v25, %s1922_s19  ;;  %v1281_v26 = vld [vmem:[#allocation4 + $0x2] sm:$0xf] }
 0x120   : > { %v769_v27 = vpop.permute.xlu1 %768 }
 0x121   : > { %v673_v28 = vpop.permute.xlu0 %672  ;;  %789 = vst.msk [vmem:[#allocation3 + $0x40] sm:$0xff] %vm784_vm15, %v769_v27  ;;  %v1414_v27 = vld [vmem:[#allocation4 + $0x28] sm:$0xf] }
 0x122   : > { %692 = vst.msk [vmem:[#allocation3 + $0x50] sm:$0xff] %vm686_vm13, %v673_v28  ;;  %v1416_v28 = vrot.slane %v1414_v27, 4 }
 0x123   : > { %1283 = vrot.lane.b32.xlu0 %v1281_v26, %s1923_s20 }
 0x124   : > { %v819_v29 = vpop.permute.xlu1 %818  ;;  %1417 = vrot.lane.b32.xlu1 %v1416_v28, %s1928_s17 }
 0x125   : > { %v722_v30 = vpop.permute.xlu0 %721  ;;  %839 = vst.msk [vmem:[#allocation3 + $0x40] sm:$0xff] %vm834_vm1, %v819_v29  ;;  %v1458_v29 = vld [vmem:[#allocation4 + $0x2a] sm:$0xf] }
 0x126   : > { %741 = vst.msk [vmem:[#allocation3 + $0x50] sm:$0xff] %vm735_vm14, %v722_v30  ;;  %v1460_v30 = vrot.slane %v1458_v29, 4  ;;  %v1471_v29 = vld [vmem:[%s2562_s6 + $0x20] sm:$0xff] }
 0x128   : > { %v868_v31 = vpop.permute.xlu1 %867  ;;  %1462 = vst.msk [vmem:[#allocation5 + $0x18] sm:$0xf0] %vm1233_vm6, %v1460_v30  ;;  %v1472_v30 = vld [vmem:[%s2562_s6 + $0x28] sm:$0xff] }
 0x129   : > { %v771_v32 = vpop.permute.xlu0 %770  ;;  %888 = vst.msk [vmem:[#allocation3 + $0x40] sm:$0xff] %vm883_vm3, %v868_v31  ;;  %v1239_v31 = vld [vmem:[#allocation4] sm:$0xf] }
 0x12a   : > { %790 = vst.msk [vmem:[#allocation3 + $0x50] sm:$0xff] %vm784_vm15, %v771_v32 }
 0x12b   : > { %1240 = vst.msk [vmem:[#allocation5] sm:$0xf] %vm1230_vm7, %v1239_v31 }
 0x12c   : > { %v577_v39 = vpop.permute.xlu1 %576 }
 0x12d   : > { %v821_v40 = vpop.permute.xlu0 %820  ;;  %595 = vst.msk [vmem:[#allocation3 + $0x60] sm:$0xff] %vm588_vm11, %v577_v39 }
 0x12e   : > { %840 = vst.msk [vmem:[#allocation3 + $0x50] sm:$0xff] %vm834_vm1, %v821_v40 }
 0x130   : > { %v626_v33 = vpop.permute.xlu1 %625  ;;  %v916_v35 = vld [vmem:[#allocation3 + $0x40] sm:$0xff] }
 0x131   : > { %v870_v34 = vpop.permute.xlu0 %869  ;;  %644 = vst.msk [vmem:[#allocation3 + $0x60] sm:$0xff] %vm637_vm12, %v626_v33  ;;  %1058 = vmatmul.mubr.f32.gmra.mrb[8].mxu0 %v916_v35 }
 0x132   : > { %889 = vst.msk [vmem:[#allocation3 + $0x50] sm:$0xff] %vm883_vm3, %v870_v34  ;;  %1724 = vmatprep.mubr.msk.f32.mxu0 %vm372_vm0, %v919_v41 }
 0x134   : > { %v675_v36 = vpop.permute.xlu1 %674 }
 0x135   : > { %v579_v42 = vpop.permute.xlu0 %578  ;;  %693 = vst.msk [vmem:[#allocation3 + $0x60] sm:$0xff] %vm686_vm13, %v675_v36 }
 0x136   : > { %596 = vst.msk [vmem:[#allocation3 + $0x70] sm:$0xff] %vm588_vm11, %v579_v42  ;;  %vm1314_vm11 = vcmask 519552  }
 0x138   : > { %v724_v45 = vpop.permute.xlu1 %723 }
 0x139   : > { %v918_v46 = vld [vmem:[#allocation3 + $0x50] sm:$0xff]  ;;  %v628_v37 = vpop.permute.xlu0 %627  ;;  %742 = vst.msk [vmem:[#allocation3 + $0x60] sm:$0xff] %vm735_vm14, %v724_v45 }
 0x13a   : > { %1063 = vmatmul.mubr.f32.gmra.mrb[10].mxu0 %v918_v46  ;;  %645 = vst.msk [vmem:[#allocation3 + $0x70] sm:$0xff] %vm637_vm12, %v628_v37  ;;  %vm1266_vm12 = vcmask 261252  }
 0x13b   : > { %1725 = vmatprep.mubr.msk.f32.mxu0 %vm372_vm0, %v921_v44 }
 0x13c   : > { %v773_v38 = vpop.permute.xlu1 %772 }
 0x13d   : > { %v677_v43 = vpop.permute.xlu0 %676  ;;  %791 = vst.msk [vmem:[#allocation3 + $0x60] sm:$0xff] %vm784_vm15, %v773_v38 }
 0x13e   : > { %694 = vst.msk [vmem:[#allocation3 + $0x70] sm:$0xff] %vm686_vm13, %v677_v43  ;;  %vm1342_vm13 = vcmask 650752  }
 0x140   : > { %v823_v47 = vpop.permute.xlu1 %822 }
 0x141   : > { %v726_v48 = vpop.permute.xlu0 %725  ;;  %841 = vst.msk [vmem:[#allocation3 + $0x60] sm:$0xff] %vm834_vm1, %v823_v47 }
 0x142   : > { %743 = vst.msk [vmem:[#allocation3 + $0x70] sm:$0xff] %vm735_vm14, %v726_v48  ;;  %vm1294_vm14 = vcmask 392452  }
 0x144   : > { %v872_v49 = vpop.permute.xlu1 %871 }
 0x145   : > { %890 = vst.msk [vmem:[#allocation3 + $0x60] sm:$0xff] %vm883_vm3, %v872_v49  ;;  %v825_v50 = vpop.permute.xlu0 %824 }
 0x148   : > { %v775_v51 = vpop.permute.xlu1 %774 }
 0x149   : > { %792 = vst.msk [vmem:[#allocation3 + $0x70] sm:$0xff] %vm784_vm15, %v775_v51  ;;  %vm1322_vm15 = vcmask 523652  }
 0x14a   : > { %842 = vst.msk [vmem:[#allocation3 + $0x70] sm:$0xff] %vm834_vm1, %v825_v50  ;;  %vm1370_vm1 = vcmask 781952  }
 0x14c   : > { %v874_v53 = vpop.permute.xlu1 %873  ;;  %v920_v54 = vld [vmem:[#allocation3 + $0x60] sm:$0xff] }
 0x14d   : > { %891 = vst.msk [vmem:[#allocation3 + $0x70] sm:$0xff] %vm883_vm3, %v874_v53  ;;  %1068 = vmatmul.mubr.f32.gmra.mrb[12].mxu0 %v920_v54  ;;  %vm1350_vm3 = vcmask 654852  }
 0x14e   : > { %1726 = vmatprep.mubr.msk.f32.mxu0 %vm372_vm0, %v923_v52 }
 0x154   : > { %v922_v55 = vld [vmem:[#allocation3 + $0x70] sm:$0xff] }
 0x155   : > { %1073 = vmatmul.mubr.f32.gmra.mrb[14].mxu0 %v922_v55 }
 0x156   : > { %1795 = vmatprep.mubr.msk.f32.mxu0 %vm1078_vm4, %v368_v56 }
 0x1cc   : > { %v1039_v57 = vpop.f32.mrb[0].mxu0 }
 0x1cd   : > { %v1041_v58 = vpop.f32.mrb[1].mxu0  ;;  %v1040_v61 = vadd.f32 %v1718_v59, %v1039_v57 }
 0x1ce   : > { %v1256_v58 = vpop.permute.xlu0 %1255 }
 0x1cf   : > { %1259 = vst.msk [vmem:[#allocation5] sm:$0xf] %vm1258_vm2, %v1256_v58 }
 0x1d5   : > { %v1044_v60 = vpop.f32.mrb[2].mxu0 }
 0x1d6   : > { %v1045_v62 = vadd.f32 %v1718_v59, %v1044_v60  ;;  %v1046_v63 = vpop.f32.mrb[3].mxu0  ;;  %v1729_v60 = vld [vmem:[%s2564_s8] ss:$0 sm:$0xff] }
 0x1d8   : > { %v1825_v1 = vpack.c.bf16 %v1045_v62, %v1040_v61  ;;  %v1284_v61 = vpop.permute.xlu0 %1283 }
 0x1d9   : > { %1287 = vst.msk [vmem:[#allocation5] sm:$0xf] %vm1286_vm8, %v1284_v61  ;;  %v1907_v61 = vld [vmem:[%s2065_s18 + $0x10] sm:$0xff] }
 0x1da   : > { %1826 = vmatprep.subr.bf16.mxu1 %v1825_v1 }
 0x1db   : > { %1828 = vmatpush3.bf16.msra.mxu1 %v1825_v1  ;;  %v1730_v1 = vld [vmem:[%s2565_s9] ss:$0 sm:$0xff] }
 0x1e8   : > { %v1049_v2 = vpop.f32.mrb[4].mxu0 }
 0x1e9   : > { %v1051_v3 = vpop.f32.mrb[5].mxu0  ;;  %v1050_v5 = vadd.f32 %v1718_v59, %v1049_v2 }
 0x1f1   : > { %v1054_v4 = vpop.f32.mrb[6].mxu0 }
 0x1f2   : > { %v1055_v6 = vadd.f32 %v1718_v59, %v1054_v4  ;;  %v1056_v7 = vpop.f32.mrb[7].mxu0 }
 0x1f4   : > { %v1829_v8 = vpack.c.bf16 %v1055_v6, %v1050_v5 }
 0x1f6   : > { %1830 = vmatprep.subr.bf16.mxu1 %v1829_v8 }
 0x1f7   : > { %1832 = vmatpush3.bf16.msra.mxu1 %v1829_v8 }
 0x204   : > { %v1059_v9 = vpop.f32.mrb[8].mxu0 }
 0x205   : > { %v1061_v10 = vpop.f32.mrb[9].mxu0  ;;  %v1060_v13 = vadd.f32 %v1718_v59, %v1059_v9 }
 0x206   : > { %v1467_v10 = vld [vmem:[%s2562_s6] sm:$0xff] }
 0x20d   : > { %v1064_v12 = vpop.f32.mrb[10].mxu0 }
 0x20e   : > { %v1065_v14 = vadd.f32 %v1718_v59, %v1064_v12  ;;  %v1066_v15 = vpop.f32.mrb[11].mxu0  ;;  %v1468_v12 = vld [vmem:[%s2562_s6 + $0x8] sm:$0xff] }
 0x210   : > { %v1833_v16 = vpack.c.bf16 %v1065_v14, %v1060_v13 }
 0x212   : > { %1834 = vmatprep.subr.bf16.mxu1 %v1833_v16 }
 0x213   : > { %1836 = vmatpush3.bf16.msra.mxu1 %v1833_v16  ;;  %v1842_v16 = vpack.c.bf16 %v1468_v12, %v1467_v10  ;;  %v1910_v10 = vld [vmem:[%s2065_s18 + $0x28] sm:$0xff] }
 0x220   : > { %v1069_v17 = vpop.f32.mrb[12].mxu0 }
 0x221   : > { %v1071_v18 = vpop.f32.mrb[13].mxu0  ;;  %v1070_v20 = vadd.f32 %v1718_v59, %v1069_v17 }
 0x228   : > { %v1074_v19 = vpop.f32.mrb[14].mxu0 }
 0x229   : > { %v1075_v21 = vadd.f32 %v1718_v59, %v1074_v19  ;;  %v1076_v22 = vpop.f32.mrb[15].mxu0 }
 0x22a   : > { %v1469_v22 = vld [vmem:[%s2562_s6 + $0x10] sm:$0xff] }
 0x22b   : > { %v1837_v23 = vpack.c.bf16 %v1075_v21, %v1070_v20 }
 0x22d   : > { %1838 = vmatprep.subr.bf16.mxu1 %v1837_v23 }
 0x22e   : > { %1840 = vmatpush3.bf16.msra.mxu1 %v1837_v23  ;;  %v1470_v23 = vld [vmem:[%s2562_s6 + $0x18] sm:$0xff] }
 0x22f   : > { %1841 = vmatprep.subr.bf16.mxu1 %v1924_v11  ;;  %v1845_v26 = vpack.c.bf16 %v1470_v23, %v1469_v22 }
 0x231   : > { %1777 = vmatmul.mubr.msk.f32.vlgmr.msra.gmra.mrb[0].mxu1 %vm1078_vm4, %v2374_v24 }
 0x232   : > { %1843 = vmatpush1.bf16.msra.mxu1 %v1842_v16 }
 0x233   : > { %1844 = vmatprep.subr.bf16.mxu1 %v1924_v11 }
 0x236   : > { %1846 = vmatpush1.bf16.msra.mxu1 %v1845_v26 }
 0x237   : > { %1847 = vmatprep.subr.bf16.mxu1 %v1924_v11 }
 0x304   : > { %v1778_v0 = vpop.f32.mrb[0].mxu1 }
 0x305   : > { %v1163_v32 = vsel %vm372_vm0, %v1778_v0, 0.0  ;;  %v1151_v39 = vpop.f32.mrb[1].mxu1 }
 0x306   : > { %v1162_v40 = vsel %vm372_vm0, %v1151_v39, 0.0 }
 0x307   : > { %v1164_v41 = vadd.f32 %v1163_v32, %v1162_v40 }
 0x309   : > { %v1165_v33 = vrot.slane %v1164_v41, 4 }
 0x30b   : > { %v1166_v34 = vadd.f32 %v1165_v33, %v1164_v41  ;;  %v1473_v33 = vld [vmem:[%s2562_s6 + $0x30] sm:$0xff] }
 0x30d   : > { %v1167_v35 = vrot.slane %v1166_v34, 2 }
 0x30f   : > { %v1168_v36 = vadd.f32 %v1167_v35, %v1166_v34 }
 0x311   : > { %v1169_v42 = vrot.slane %v1168_v36, 1 }
 0x313   : > { %v1170_v44 = vadd.f32 %v1169_v42, %v1168_v36  ;;  %v1474_v36 = vld [vmem:[%s2562_s6 + $0x38] sm:$0xff] }
 0x315   : > { %v1172_v45 = vmul.f32 0.0625, %v1170_v44 }
 0x317   : > { %v1173_v46 = vsub.f32 %v1151_v39, %v1172_v45  ;;  %v1174_v37 = vsub.f32 %v1778_v0, %v1172_v45  ;;  %v1848_v0 = vpack.c.bf16 %v1472_v30, %v1471_v29 }
 0x319   : > { %v1175_v38 = vmul.f32 %v1173_v46, %v1173_v46  ;;  %v1176_v43 = vmul.f32 %v1174_v37, %v1174_v37  ;;  %1849 = vmatpush1.bf16.msra.mxu1 %v1848_v0 }
 0x31a   : > { %1850 = vmatprep.subr.bf16.mxu1 %v1924_v11 }
 0x31b   : > { %v1177_v47 = vsel %vm372_vm0, %v1175_v38, 0.0  ;;  %v1178_v48 = vsel %vm372_vm0, %v1176_v43, 0.0  ;;  %v1905_v43 = vld [vmem:[%s2065_s18] sm:$0xff] }
 0x31c   : > { %v1179_v49 = vadd.f32 %v1178_v48, %v1177_v47  ;;  %v1906_v47 = vld [vmem:[%s2065_s18 + $0x8] sm:$0xff] }
 0x31d   : > { %v1868_v48 = vpack.c.bf16 %v1906_v47, %v1905_v43 }
 0x31e   : > { %v1180_v50 = vrot.slane %v1179_v49, 4 }
 0x31f   : > { %1869 = vmatprep.subr.bf16.mxu0 %v1868_v48 }
 0x320   : > { %v1181_v51 = vadd.f32 %v1180_v50, %v1179_v49  ;;  %v1475_v49 = vld [vmem:[%s2562_s6 + $0x40] sm:$0xff]  ;;  %v1476_v50 = vld [vmem:[%s2562_s6 + $0x48] sm:$0xff]  ;;  %1871 = vmatpush3.bf16.msra.mxu0 %v1868_v48 }
 0x322   : > { %v1182_v52 = vrot.slane %v1181_v51, 2 }
 0x324   : > { %v1183_v53 = vadd.f32 %v1182_v52, %v1181_v51  ;;  %v1854_v51 = vpack.c.bf16 %v1476_v50, %v1475_v49 }
 0x326   : > { %v1184_v54 = vrot.slane %v1183_v53, 1 }
 0x328   : > { %v1185_v55 = vadd.f32 %v1184_v54, %v1183_v53 }
 0x32a   : > { %v1186_v56 = vmul.f32 0.0625, %v1185_v55  ;;  %v1477_v55 = vld [vmem:[%s2562_s6 + $0x50] sm:$0xff] }
 0x32c   : > { %v1187_v57 = vadd.f32 1e-05, %v1186_v56  ;;  %v1478_v56 = vld [vmem:[%s2562_s6 + $0x58] sm:$0xff] }
 0x32e   : > { %1903 = vrsqrt.f32 %v1187_v57  ;;  %v1857_v57 = vpack.c.bf16 %v1478_v56, %v1477_v55 }
 0x338   : > { %v1904_v59 = vpop.eup %1903 }
 0x339   : > { %v1189_v62 = vmul.f32 %v1904_v59, %v1173_v46  ;;  %v1190_v63 = vmul.f32 %v1904_v59, %v1174_v37  ;;  %v1851_v46 = vpack.c.bf16 %v1474_v36, %v1473_v33 }
 0x33b   : > { %v1197_v2 = vmul.f32 %v1729_v60, %v1189_v62  ;;  %v1198_v3 = vmul.f32 %v1729_v60, %v1190_v63  ;;  %1852 = vmatpush1.bf16.msra.mxu1 %v1851_v46  ;;  %v1908_v62 = vld [vmem:[%s2065_s18 + $0x18] sm:$0xff] }
 0x33c   : > { %1853 = vmatprep.subr.bf16.mxu1 %v1924_v11  ;;  %v1872_v63 = vpack.c.bf16 %v1908_v62, %v1907_v61 }
 0x33d   : > { %v1205_v4 = vadd.f32 %v1730_v1, %v1197_v2  ;;  %v1206_v5 = vadd.f32 %v1730_v1, %v1198_v3  ;;  %v1479_v1 = vld [vmem:[%s2562_s6 + $0x60] sm:$0xff]  ;;  %v1480_v2 = vld [vmem:[%s2562_s6 + $0x68] sm:$0xff] }
 0x33e   : > { %v1860_v3 = vpack.c.bf16 %v1480_v2, %v1479_v1  ;;  %1873 = vmatprep.subr.bf16.mxu0 %v1872_v63  ;;  %v1731_v2 = vld [vmem:[%s2563_s7] ss:$0 sm:$0xff] }
 0x33f   : > { %vm1207_vm9 = vcmp.gt.f32.partialorder %v1205_v4, 0.0  ;;  %vm1208_vm10 = vcmp.gt.f32.partialorder %v1206_v5, 0.0  ;;  %v1209_v6 = vmul.f32 0.2, %v1205_v4  ;;  %v1210_v7 = vmul.f32 0.2, %v1206_v5  ;;  %1855 = vmatpush1.bf16.msra.mxu1 %v1854_v51  ;;  %1875 = vmatpush3.bf16.msra.mxu0 %v1872_v63 }
 0x340   : > { %1856 = vmatprep.subr.bf16.mxu1 %v1924_v11 }
 0x341   : > { %v1211_v8 = vsel %vm1207_vm9, %v1205_v4, %v1209_v6  ;;  %v1212_v9 = vsel %vm1208_vm10, %v1206_v5, %v1210_v7  ;;  %v1481_v7 = vld [vmem:[%s2562_s6 + $0x70] sm:$0xff] }
 0x342   : > { %1231 = vst.msk [vmem:[#allocation4 + $0x9] sm:$0xf] %vm1230_vm7, %v1211_v8  ;;  %1236 = vst.msk [vmem:[#allocation4 + $0x19] sm:$0xf] %vm1230_vm7, %v1212_v9 }
 0x343   : > { %1234 = vst.msk [vmem:[#allocation4 + $0xd] sm:$0xf0] %vm1233_vm6, %v1211_v8  ;;  %1238 = vst.msk [vmem:[#allocation4 + $0x1d] sm:$0xf0] %vm1233_vm6, %v1212_v9  ;;  %1858 = vmatpush1.bf16.msra.mxu1 %v1857_v57  ;;  %v1482_v8 = vld [vmem:[%s2562_s6 + $0x78] sm:$0xff]  ;;  %v1909_v9 = vld [vmem:[%s2065_s18 + $0x20] sm:$0xff] }
 0x344   : > { %1859 = vmatprep.subr.bf16.mxu1 %v1924_v11  ;;  %v1876_v12 = vpack.c.bf16 %v1910_v10, %v1909_v9 }
 0x346   : > { %1877 = vmatprep.subr.bf16.mxu0 %v1876_v12 }
 0x347   : > { %1861 = vmatpush1.bf16.msra.mxu1 %v1860_v3  ;;  %1879 = vmatpush3.bf16.msra.mxu0 %v1876_v12 }
 0x348   : > { %1862 = vmatprep.subr.bf16.mxu1 %v1924_v11 }
 0x349   : > { %v1451_v14 = vld [vmem:[#allocation4 + $0x1a] sm:$0xf]  ;;  %v1309_v18 = vld [vmem:[#allocation4 + $0x8] sm:$0xf] }
 0x34a   : > { %v1449_v13 = vld [vmem:[#allocation4 + $0x12] sm:$0xf]  ;;  %v1456_v15 = vld [vmem:[#allocation4 + $0x22] sm:$0xf]  ;;  %v1453_v17 = vrot.slane %v1451_v14, 4  ;;  %1311 = vrot.lane.b32.xlu0 %v1309_v18, %s1925_s16  ;;  %v1484_v18 = vld [vmem:[%s2562_s6 + $0x88] sm:$0xff] }
 0x34b   : > { %1450 = vst.msk [vmem:[#allocation5 + $0x8] sm:$0xf] %vm1230_vm7, %v1449_v13  ;;  %1457 = vst.msk [vmem:[#allocation5 + $0x18] sm:$0xf] %vm1230_vm7, %v1456_v15  ;;  %v1260_v19 = vld [vmem:[#allocation4 + $0x9] sm:$0xf]  ;;  %v1863_v13 = vpack.c.bf16 %v1482_v8, %v1481_v7 }
 0x34c   : > { %v1262_v20 = vrot.slane %v1260_v19, 4  ;;  %1455 = vst.msk [vmem:[#allocation5 + $0x8] sm:$0xf0] %vm1233_vm6, %v1453_v17  ;;  %v1288_v21 = vld [vmem:[#allocation4 + $0xa] sm:$0xf]  ;;  %v1483_v17 = vld [vmem:[%s2562_s6 + $0x80] sm:$0xff] }
 0x34d   : > { %v1337_v25 = vld [vmem:[#allocation4 + $0x9] sm:$0xf]  ;;  %v1290_v27 = vrot.slane %v1288_v21, 4  ;;  %v1316_v28 = vld [vmem:[#allocation4 + $0x10] sm:$0xf]  ;;  %1864 = vmatpush1.bf16.msra.mxu1 %v1863_v13  ;;  %v1866_v22 = vpack.c.bf16 %v1484_v18, %v1483_v17 }
 0x34e   : > { %1263 = vrot.lane.b32.xlu1 %v1262_v20, %s1922_s19  ;;  %1339 = vrot.lane.b32.xlu0 %v1337_v25, %s1926_s24  ;;  %v1268_v31 = vld [vmem:[#allocation4 + $0x11] sm:$0xf]  ;;  %v1318_v39 = vrot.slane %v1316_v28, 4  ;;  %v1365_v41 = vld [vmem:[#allocation4 + $0xa] sm:$0xf]  ;;  %v1912_v20 = vld [vmem:[%s2065_s18 + $0x38] sm:$0xff] }
 0x34f   : > { %v1344_v40 = vld [vmem:[#allocation4 + $0x11] sm:$0xf]  ;;  %v1241_v34 = vld [vmem:[#allocation4 + $0x8] sm:$0xf]  ;;  %v1248_v45 = vld [vmem:[#allocation4 + $0x18] sm:$0xf]  ;;  %1865 = vmatprep.subr.bf16.mxu1 %v1924_v11 }
 0x350   : > { %v1246_v35 = vld [vmem:[#allocation4 + $0x10] sm:$0xf]  ;;  %v1346_v42 = vrot.slane %v1344_v40, 4  ;;  %v1243_v44 = vrot.slane %v1241_v34, 4  ;;  %v1274_v37 = vld [vmem:[#allocation4 + $0x19] sm:$0xf]  ;;  %v2514_v40 = vpop.permute.xlu1 %1417 }
 0x351   : > { %1247 = vst.msk [vmem:[#allocation5 + $0x10] sm:$0xf] %vm1230_vm7, %v1246_v35  ;;  %v1250_v38 = vrot.slane %v1248_v45, 4  ;;  %v1296_v52 = vld [vmem:[#allocation4 + $0x12] sm:$0xf]  ;;  %v1276_v53 = vrot.slane %v1274_v37, 4  ;;  %1867 = vmatpush1.bf16.msra.mxu1 %v1866_v22 }
 0x352   : > { %1291 = vrot.lane.b32.xlu1 %v1290_v27, %s1923_s20  ;;  %1270 = vrot.lane.b32.xlu0 %v1268_v31, %s1922_s19  ;;  %1245 = vst.msk [vmem:[#allocation5] sm:$0xf0] %vm1233_vm6, %v1243_v44  ;;  %v1372_v54 = vld [vmem:[#allocation4 + $0x12] sm:$0xf]  ;;  %v1302_v60 = vld [vmem:[#allocation4 + $0x1a] sm:$0xf] }
 0x353   : > { %v1464_v32 = vld [vmem:[#allocation5 + $0x8] sm:$0xff]  ;;  %1252 = vst.msk [vmem:[#allocation5 + $0x10] sm:$0xf0] %vm1233_vm6, %v1250_v38  ;;  %v1393_v58 = vld [vmem:[#allocation4 + $0x10] sm:$0xf]  ;;  %v1374_v59 = vrot.slane %v1372_v54, 4 }
 0x354   : > { %1732 = vmatprep.mubr.msk.f32.mxu1 %vm372_vm0, %v1464_v32  ;;  %v1324_v4 = vld [vmem:[#allocation4 + $0x18] sm:$0xf]  ;;  %v1304_v5 = vrot.slane %v1302_v60, 4  ;;  %v1421_v14 = vld [vmem:[#allocation4 + $0x11] sm:$0xf]  ;;  %vm1426_vm6 = vcmask 1044352  }
 0x355   : > { %v1400_v6 = vld [vmem:[#allocation4 + $0x18] sm:$0xf]  ;;  %v1330_v16 = vld [vmem:[#allocation4 + $0x20] sm:$0xf]  ;;  %v1911_v19 = vld [vmem:[%s2065_s18 + $0x30] sm:$0xff]  ;;  %vm1406_vm7 = vcmask 917252  }
 0x356   : > { %1319 = vrot.lane.b32.xlu1 %v1318_v39, %s1925_s16  ;;  %1367 = vrot.lane.b32.xlu0 %v1365_v41, %s1927_s29  ;;  %v1402_v15 = vrot.slane %v1400_v6, 4  ;;  %v1880_v21 = vpack.c.bf16 %v1912_v20, %v1911_v19  ;;  %v1352_v23 = vld [vmem:[#allocation4 + $0x19] sm:$0xf]  ;;  %v1332_v25 = vrot.slane %v1330_v16, 4  ;;  %v1358_v29 = vld [vmem:[#allocation4 + $0x21] sm:$0xf] }
 0x357   : > { %v1428_v26 = vld [vmem:[#allocation4 + $0x19] sm:$0xf]  ;;  %v1408_v11 = vld [vmem:[#allocation4 + $0x20] sm:$0xf]  ;;  %v1360_v30 = vrot.slane %v1358_v29, 4  ;;  %v1466_v60 = vld [vmem:[#allocation5 + $0x18] sm:$0xff] }
 0x358   : > { %1881 = vmatprep.subr.bf16.mxu0 %v1880_v21  ;;  %v1380_v27 = vld [vmem:[#allocation4 + $0x1a] sm:$0xf]  ;;  %v1430_v28 = vrot.slane %v1428_v26, 4  ;;  %v1386_v31 = vld [vmem:[#allocation4 + $0x22] sm:$0xf] }
 0x359   : > { %1883 = vmatpush3.bf16.msra.mxu0 %v1880_v21  ;;  %v1436_v0 = vld [vmem:[#allocation4 + $0x21] sm:$0xf]  ;;  %v1442_v32 = vld [vmem:[#allocation4 + $0x29] sm:$0xf]  ;;  %v1388_v39 = vrot.slane %v1386_v31, 4 }
 0x35a   : > { %1347 = vrot.lane.b32.xlu1 %v1346_v42, %s1926_s24  ;;  %1298 = vrot.lane.b32.xlu0 %v1296_v52, %s1923_s20 }
 0x35c   : > { %1796 = vmatmul.mubr.msk.f32.vlgmr.msra.gmra.mrb[16].mxu0 %vm1078_vm4, %v2374_v24  ;;  %v1444_v24 = vrot.slane %v1442_v32, 4  ;;  %vm1398_vm4 = vcmask 913152  }
 0x35e   : > { %1277 = vrot.lane.b32.xlu1 %v1276_v53, %s1922_s19  ;;  %1395 = vrot.lane.b32.xlu0 %v1393_v58, %s1928_s17 }
 0x362   : > { %1375 = vrot.lane.b32.xlu1 %v1374_v59, %s1927_s29  ;;  %1326 = vrot.lane.b32.xlu0 %v1324_v4, %s1925_s16 }
 0x366   : > { %1305 = vrot.lane.b32.xlu1 %v1304_v5, %s1923_s20  ;;  %1423 = vrot.lane.b32.xlu0 %v1421_v14, %s1929_s21 }
 0x36a   : > { %1403 = vrot.lane.b32.xlu1 %v1402_v15, %s1928_s17  ;;  %1354 = vrot.lane.b32.xlu0 %v1352_v23, %s1926_s24 }
 0x36e   : > { %1333 = vrot.lane.b32.xlu1 %v1332_v25, %s1925_s16  ;;  %1382 = vrot.lane.b32.xlu0 %v1380_v27, %s1927_s29  ;;  %s1739_s16 = sshll.u32 %s2568_s14, 4 }
 0x372   : > { %1431 = vrot.lane.b32.xlu1 %v1430_v28, %s1929_s21  ;;  %1410 = vrot.lane.b32.xlu0 %v1408_v11, %s1928_s17  ;;  %s359_s17 = scalar_lea.vmem %s2566_s10, %s1739_s16 }
 0x376   : > { %1361 = vrot.lane.b32.xlu1 %v1360_v30, %s1926_s24  ;;  %1438 = vrot.lane.b32.xlu0 %v1436_v0, %s1929_s21 }
 0x37a   : > { %1389 = vrot.lane.b32.xlu1 %v1388_v39, %s1927_s29 }
 0x37e   : > { %1445 = vrot.lane.b32.xlu1 %v1444_v24, %s1929_s21 }
 0x3bc   : > { %v1312_v41 = vpop.permute.xlu0 %1311 }
 0x3bd   : > { %1315 = vst.msk [vmem:[#allocation5] sm:$0xf] %vm1314_vm11, %v1312_v41 }
 0x3c0   : > { %v1264_v33 = vpop.permute.xlu1 %1263  ;;  %v1340_v34 = vpop.permute.xlu0 %1339 }
 0x3c1   : > { %1267 = vst.msk [vmem:[#allocation5] sm:$0xf0] %vm1266_vm12, %v1264_v33 }
 0x3c2   : > { %1343 = vst.msk [vmem:[#allocation5] sm:$0xf] %vm1342_vm13, %v1340_v34 }
 0x3c4   : > { %v1292_v35 = vpop.permute.xlu1 %1291  ;;  %v1271_v36 = vpop.permute.xlu0 %1270 }
 0x3c5   : > { %1295 = vst.msk [vmem:[#allocation5] sm:$0xf0] %vm1294_vm14, %v1292_v35 }
 0x3c6   : > { %1273 = vst.msk [vmem:[#allocation5 + $0x10] sm:$0xf] %vm1258_vm2, %v1271_v36  ;;  %vm1434_vm2 = vcmask 1048452  }
 0x3c8   : > { %v1320_v42 = vpop.permute.xlu1 %1319  ;;  %v1368_v44 = vpop.permute.xlu0 %1367 }
 0x3c9   : > { %1323 = vst.msk [vmem:[#allocation5] sm:$0xf0] %vm1322_vm15, %v1320_v42 }
 0x3ca   : > { %1371 = vst.msk [vmem:[#allocation5] sm:$0xf] %vm1370_vm1, %v1368_v44 }
 0x3cc   : > { %v1348_v45 = vpop.permute.xlu1 %1347  ;;  %v1299_v46 = vpop.permute.xlu0 %1298 }
 0x3cd   : > { %1351 = vst.msk [vmem:[#allocation5] sm:$0xf0] %vm1350_vm3, %v1348_v45 }
 0x3ce   : > { %1301 = vst.msk [vmem:[#allocation5 + $0x10] sm:$0xf] %vm1286_vm8, %v1299_v46 }
 0x3d0   : > { %v1278_v37 = vpop.permute.xlu1 %1277  ;;  %v1396_v38 = vpop.permute.xlu0 %1395 }
 0x3d1   : > { %1280 = vst.msk [vmem:[#allocation5 + $0x10] sm:$0xf0] %vm1266_vm12, %v1278_v37 }
 0x3d2   : > { %1399 = vst.msk [vmem:[#allocation5] sm:$0xf] %vm1398_vm4, %v1396_v38 }
 0x3d4   : > { %v1376_v43 = vpop.permute.xlu1 %1375  ;;  %v1327_v47 = vpop.permute.xlu0 %1326 }
 0x3d5   : > { %1379 = vst.msk [vmem:[#allocation5] sm:$0xf0] %vm1378_vm5, %v1376_v43 }
 0x3d6   : > { %1329 = vst.msk [vmem:[#allocation5 + $0x10] sm:$0xf] %vm1314_vm11, %v1327_v47 }
 0x3d8   : > { %v1306_v48 = vpop.permute.xlu1 %1305  ;;  %v1424_v49 = vpop.permute.xlu0 %1423 }
 0x3d9   : > { %1308 = vst.msk [vmem:[#allocation5 + $0x10] sm:$0xf0] %vm1294_vm14, %v1306_v48 }
 0x3da   : > { %1427 = vst.msk [vmem:[#allocation5] sm:$0xf] %vm1426_vm6, %v1424_v49 }
 0x3dc   : > { %v1404_v50 = vpop.permute.xlu1 %1403  ;;  %v1355_v51 = vpop.permute.xlu0 %1354 }
 0x3dd   : > { %1407 = vst.msk [vmem:[#allocation5] sm:$0xf0] %vm1406_vm7, %v1404_v50 }
 0x3de   : > { %1357 = vst.msk [vmem:[#allocation5 + $0x10] sm:$0xf] %vm1342_vm13, %v1355_v51 }
 0x3e0   : > { %v1334_v52 = vpop.permute.xlu1 %1333  ;;  %v1383_v53 = vpop.permute.xlu0 %1382 }
 0x3e1   : > { %1336 = vst.msk [vmem:[#allocation5 + $0x10] sm:$0xf0] %vm1322_vm15, %v1334_v52 }
 0x3e2   : > { %1385 = vst.msk [vmem:[#allocation5 + $0x10] sm:$0xf] %vm1370_vm1, %v1383_v53 }
 0x3e4   : > { %v1432_v54 = vpop.permute.xlu1 %1431  ;;  %v1411_v55 = vpop.permute.xlu0 %1410 }
 0x3e5   : > { %1435 = vst.msk [vmem:[#allocation5] sm:$0xf0] %vm1434_vm2, %v1432_v54 }
 0x3e6   : > { %1413 = vst.msk [vmem:[#allocation5 + $0x10] sm:$0xf] %vm1398_vm4, %v1411_v55 }
 0x3e8   : > { %v1362_v56 = vpop.permute.xlu1 %1361  ;;  %v1439_v57 = vpop.permute.xlu0 %1438 }
 0x3e9   : > { %1364 = vst.msk [vmem:[#allocation5 + $0x10] sm:$0xf0] %vm1350_vm3, %v1362_v56 }
 0x3ea   : > { %1441 = vst.msk [vmem:[#allocation5 + $0x10] sm:$0xf] %vm1426_vm6, %v1439_v57 }
 0x3ec   : > { %v1390_v58 = vpop.permute.xlu1 %1389  ;;  %v1463_v59 = vld [vmem:[#allocation5] sm:$0xff] }
 0x3ed   : > { %1392 = vst.msk [vmem:[#allocation5 + $0x10] sm:$0xf0] %vm1378_vm5, %v1390_v58  ;;  %1563 = vmatmul.mubr.f32.vlgmr.msra.gmra.mrb[2].mxu1 %v1463_v59 }
 0x3ee   : > { %1420 = vst.msk [vmem:[#allocation5 + $0x10] sm:$0xf0] %vm1406_vm7, %v2514_v40  ;;  %1733 = vmatprep.mubr.msk.f32.mxu1 %vm372_vm0, %v1466_v60 }
 0x3f0   : > { %v1446_v61 = vpop.permute.xlu1 %1445 }
 0x3f1   : > { %1448 = vst.msk [vmem:[#allocation5 + $0x10] sm:$0xf0] %vm1434_vm2, %v1446_v61 }
 0x3f8   : > { %v1465_v62 = vld [vmem:[#allocation5 + $0x10] sm:$0xff] }
 0x3f9   : > { %1568 = vmatmul.mubr.f32.gmra.mrb[4].mxu1 %v1465_v62 }
 0x42f   : > { %v1797_v63 = vpop.f32.mrb[16].mxu0 }
 0x430   : > { %v1639_v1 = vpop.f32.mrb[17].mxu0 }
 0x4c0   : > { %v1564_v3 = vpop.f32.mrb[2].mxu1 }
 0x4c1   : > { %v1565_v4 = vadd.f32 %v1731_v2, %v1564_v3  ;;  %v1566_v5 = vpop.f32.mrb[3].mxu1 }
 0x4c3   : > { %v1640_v6 = vadd.f32 %v1639_v1, %v1565_v4 }
 0x4c5   : > { %v1648_v7 = vmul.f32 0.70710677, %v1640_v6 }
 0x4c7   : > { %1650 = vst.msk [vmem:[%s359_s17] sm:$0xff] %vm372_vm0, %v1648_v7 }
 0x4cc   : > { %v1569_v8 = vpop.f32.mrb[4].mxu1 }
 0x4cd   : > { %v1570_v9 = vadd.f32 %v1731_v2, %v1569_v8  ;;  %v1571_v10 = vpop.f32.mrb[5].mxu1 }
 0x4cf   : > { %v1645_v12 = vadd.f32 %v1797_v63, %v1570_v9 }
 0x4d1   : > { %v1649_v13 = vmul.f32 0.70710677, %v1645_v12 }
 0x4d3   : > { %1651 = vst.msk [vmem:[%s359_s17 + $0x8] sm:$0xff] %vm372_vm0, %v1649_v13 }
 0x4d4 PF: > { %s20_s13 = sadd.s32 1, %s1919_s13  }
 0x4d5   : > { %p17_p4 = scmp.ge.s32.totalorder %s20_s13, 4  }
 0x4d7   :  { %19 = sbr.rel (!%p17_p4) target bundleno = 1 (0x1), region = 98 }

// kernel: discriminator_forward.5
= control target key start
LH: loop header
LB: loop body
LE: loop exit
PB: predicated region body
PF: predicated region fallthrough
CT: control target
= control target key end

     0   :  { %s4642_s17 = smov 0   ;;  %s6652_s0 = inlined_call_operand.vmem [shape: f32[2,256,8], index: 0, kind: input, shape index: {}]   ;;  %s6653_s1 = inlined_call_operand.vmem [shape: f32[64,256], index: 1, kind: input, shape index: {}]   ;;  %s6654_s2 = inlined_call_operand.vmem [shape: f32[72,8], index: 2, kind: input, shape index: {}]   ;;  %s6655_s3 = inlined_call_operand.vmem [shape: f32[1,8], index: 3, kind: input, shape index: {}]   ;;  %s6656_s4 = inlined_call_operand.vmem [shape: f32[1,8], index: 4, kind: input, shape index: {}]   ;;  %s6657_s5 = inlined_call_operand.vmem [shape: f32[1,8], index: 5, kind: input, shape index: {}]   ;;  %s6658_s6 = inlined_call_operand.vmem [shape: f32[72,16], index: 6, kind: input, shape index: {}]   ;;  %s6659_s7 = inlined_call_operand.vmem [shape: f32[1,16], index: 7, kind: input, shape index: {}]   ;;  %s6660_s8 = inlined_call_operand.vmem [shape: f32[1,8], index: 8, kind: input, shape index: {}]   ;;  %s6661_s9 = inlined_call_operand.vmem [shape: f32[1,8], index: 9, kind: input, shape index: {}]   ;;  %s6662_s10 = inlined_call_operand.vmem [shape: f32[8,16], index: 10, kind: input, shape index: {}]   ;;  %s6663_s11 = inlined_call_operand.vmem [shape: f32[2,64,16], index: 11, kind: output, shape index: {}]  }
   0x1 LB: > { %s4031_s18 = sadd.s32 4294967295, %s4571_s17   ;;  %p4035_p0 = scmp.ge.s32.totalorder %s4571_s17, 1  ;;  %s4571_s17 = sphi %s4642_s17, %s21_s17  }
   0x2   : > { %p337_p1 = scmp.lt.s32.totalorder %s4571_s17, 3 }
   0x4   : > { %p338_p2 = pnand %p4035_p0, %p337_p1 }
   0x5   : > { %vm543_vm0 = vcmask (!%p338_p2), 64512   ;;  %vm963_vm1 = vcmask (!%p338_p2), 57344   ;;  %vm957_vm2 = vcmask (!%p338_p2), 58368   ;;  %v4573_v0 = vmov (!%p338_p2), 0.0   ;;  %p377_p3 = scmp.lt.s32.totalorder (!%p338_p2), %s4031_s18, 1  ;;  %s4574_s23 = smov (!%p338_p2), 16  }
   0x6   : > { %341 = sbr.rel (%p338_p2) target bundleno = 1838 (0x72e), region = 64  ;;  %955 = vst.msk [vmem:[#allocation2] sm:$0xff] (!%p338_p2), %vm543_vm0, %v4573_v0  ;;  %956 = vst.msk [vmem:[#allocation2 + $0x8] sm:$0xff] (!%p338_p2), %vm543_vm0, %v4573_v0  ;;  %s4575_s24 = smov (!%p338_p2), 8   ;;  %vm1257_vm3 = vcmask (!%p338_p2), 130112   ;;  %vm1450_vm4 = vcmask (!%p338_p2), 195712  }
   0x7   : > { %960 = vst.msk [vmem:[#allocation2 + $0x198] sm:$0xff] (!%p338_p2), %vm543_vm0, %v4573_v0  ;;  %961 = vst.msk [vmem:[#allocation2 + $0x1a0] sm:$0xff] (!%p338_p2), %vm543_vm0, %v4573_v0  ;;  %s4576_s29 = smov (!%p338_p2), 24   ;;  %s4577_s30 = smov (!%p338_p2), 32  }
   0x8   : > { %965 = vst.msk [vmem:[#allocation2 + $0x18] sm:$0x1] (!%p338_p2), %vm963_vm1, %v4573_v0  ;;  %966 = vst.msk [vmem:[#allocation2 + $0x30] sm:$0x1] (!%p338_p2), %vm963_vm1, %v4573_v0  ;;  %s6664_s12 = smov (!%p338_p2), 40   ;;  %s4580_s15 = smov (!%p338_p2), 56  }
   0x9   : > { %967 = vst.msk [vmem:[#allocation2 + $0x48] sm:$0x1] (!%p338_p2), %vm963_vm1, %v4573_v0  ;;  %968 = vst.msk [vmem:[#allocation2 + $0x60] sm:$0x1] (!%p338_p2), %vm963_vm1, %v4573_v0  ;;  %s4581_s26 = smov (!%p338_p2), 64   ;;  %s6668_s27 = smov (!%p338_p2), 40  }
   0xa   : > { %969 = vst.msk [vmem:[#allocation2 + $0x78] sm:$0x1] (!%p338_p2), %vm963_vm1, %v4573_v0  ;;  %970 = vst.msk [vmem:[#allocation2 + $0x90] sm:$0x1] (!%p338_p2), %vm963_vm1, %v4573_v0 }
   0xb   : > { %971 = vst.msk [vmem:[#allocation2 + $0xa8] sm:$0x1] (!%p338_p2), %vm963_vm1, %v4573_v0  ;;  %972 = vst.msk [vmem:[#allocation2 + $0xc0] sm:$0x1] (!%p338_p2), %vm963_vm1, %v4573_v0 }
   0xc   : > { %973 = vst.msk [vmem:[#allocation2 + $0xd8] sm:$0x1] (!%p338_p2), %vm963_vm1, %v4573_v0  ;;  %974 = vst.msk [vmem:[#allocation2 + $0xf0] sm:$0x1] (!%p338_p2), %vm963_vm1, %v4573_v0 }
   0xd   : > { %975 = vst.msk [vmem:[#allocation2 + $0x108] sm:$0x1] %vm963_vm1, %v4573_v0  ;;  %976 = vst.msk [vmem:[#allocation2 + $0x120] sm:$0x1] %vm963_vm1, %v4573_v0  ;;  %s6686_s18 = smov (!%p377_p3, %s4031_s18), 1  ;;  %v1290_v4 = vld [vmem:[#allocation2 + $0x2] sm:$0xff] }
   0xe   : > { %977 = vst.msk [vmem:[#allocation2 + $0x138] sm:$0x1] %vm963_vm1, %v4573_v0  ;;  %978 = vst.msk [vmem:[#allocation2 + $0x150] sm:$0x1] %vm963_vm1, %v4573_v0  ;;  %s4096_s19 = sshll.u32 %s6686_s18, 8  ;;  %v1097_v5 = vld [vmem:[#allocation2 + $0x1] sm:$0xff]  ;;  %1354 = vrot.lane.b32.xlu1 %v1290_v4, %s4574_s23 }
   0xf   : > { %979 = vst.msk [vmem:[#allocation2 + $0x168] sm:$0x1] %vm963_vm1, %v4573_v0  ;;  %980 = vst.msk [vmem:[#allocation2 + $0x180] sm:$0x1] %vm963_vm1, %v4573_v0  ;;  %s4792_s22 = scalar_lea.vmem %s6652_s0, %s4096_s19  ;;  %1161 = vrot.lane.b32.xlu0 %v1097_v5, %s4575_s24  ;;  %s4579_s19 = smov 48  }
  0x10   : > { %983 = vst.msk [vmem:[#allocation2 + $0x29] sm:$0x1] %vm963_vm1, %v4573_v0  ;;  %984 = vst.msk [vmem:[#allocation2 + $0x41] sm:$0x1] %vm963_vm1, %v4573_v0  ;;  %v4795_v1 = vld [vmem:[%s4792_s22] sm:$0xff]  ;;  %v4798_v2 = vld [vmem:[%s4792_s22 + $0x8] sm:$0xff] }
  0x11   : > { %985 = vst.msk [vmem:[#allocation2 + $0x59] sm:$0x1] %vm963_vm1, %v4573_v0  ;;  %986 = vst.msk [vmem:[#allocation2 + $0x71] sm:$0x1] %vm963_vm1, %v4573_v0  ;;  %v4801_v3 = vld [vmem:[%s4792_s22 + $0x10] sm:$0xff]  ;;  %v544_v6 = vsel %vm543_vm0, %v4795_v1, 0.0 }
  0x12   : > { %987 = vst.msk [vmem:[#allocation2 + $0x89] sm:$0x1] %vm963_vm1, %v4573_v0  ;;  %988 = vst.msk [vmem:[#allocation2 + $0xa1] sm:$0x1] %vm963_vm1, %v4573_v0  ;;  %v545_v7 = vsel %vm543_vm0, %v4798_v2, 0.0  ;;  %v547_v8 = vsel %vm543_vm0, %v4801_v3, 0.0 }
  0x13   : > { %989 = vst.msk [vmem:[#allocation2 + $0xb9] sm:$0x1] %vm963_vm1, %v4573_v0  ;;  %990 = vst.msk [vmem:[#allocation2 + $0xd1] sm:$0x1] %vm963_vm1, %v4573_v0  ;;  %v4812_v9 = vld [vmem:[%s4792_s22 + $0x18] sm:$0xff]  ;;  %v4815_v10 = vld [vmem:[%s4792_s22 + $0x20] sm:$0xff]  ;;  %v546_v11 = vadd.f32 %v545_v7, %v544_v6 }
  0x14   : > { %991 = vst.msk [vmem:[#allocation2 + $0xe9] sm:$0x1] %vm963_vm1, %v4573_v0  ;;  %992 = vst.msk [vmem:[#allocation2 + $0x101] sm:$0x1] %vm963_vm1, %v4573_v0  ;;  %v549_v14 = vsel %vm543_vm0, %v4812_v9, 0.0  ;;  %v4820_v15 = vld [vmem:[%s4792_s22 + $0x28] sm:$0xff] }
  0x15   : > { %993 = vst.msk [vmem:[#allocation2 + $0x119] sm:$0x1] %vm963_vm1, %v4573_v0  ;;  %994 = vst.msk [vmem:[#allocation2 + $0x131] sm:$0x1] %vm963_vm1, %v4573_v0  ;;  %v548_v16 = vadd.f32 %v547_v8, %v546_v11  ;;  %v551_v17 = vsel %vm543_vm0, %v4815_v10, 0.0  ;;  %v4827_v18 = vld [vmem:[%s4792_s22 + $0x30] sm:$0xff] }
  0x16   : > { %995 = vst.msk [vmem:[#allocation2 + $0x149] sm:$0x1] %vm963_vm1, %v4573_v0  ;;  %996 = vst.msk [vmem:[#allocation2 + $0x161] sm:$0x1] %vm963_vm1, %v4573_v0  ;;  %v553_v20 = vsel %vm543_vm0, %v4820_v15, 0.0  ;;  %v4832_v21 = vld [vmem:[%s4792_s22 + $0x38] sm:$0xff] }
  0x17   : > { %997 = vst.msk [vmem:[#allocation2 + $0x179] sm:$0x1] %vm963_vm1, %v4573_v0  ;;  %998 = vst.msk [vmem:[#allocation2 + $0x191] sm:$0x1] %vm963_vm1, %v4573_v0  ;;  %v550_v19 = vadd.f32 %v549_v14, %v548_v16  ;;  %v555_v23 = vsel %vm543_vm0, %v4827_v18, 0.0  ;;  %v4837_v24 = vld [vmem:[%s4792_s22 + $0x40] sm:$0xff] }
  0x18   : > { %3242 = vst.msk [vmem:[#allocation4] sm:$0xff] %vm543_vm0, %v4573_v0  ;;  %3245 = vst.msk [vmem:[#allocation4 + $0x90] sm:$0xff] %vm543_vm0, %v4573_v0  ;;  %v557_v26 = vsel %vm543_vm0, %v4832_v21, 0.0  ;;  %v4842_v27 = vld [vmem:[%s4792_s22 + $0x48] sm:$0xff]  ;;  %v559_v29 = vsel %vm543_vm0, %v4837_v24, 0.0  ;;  %v4847_v30 = vld [vmem:[%s4792_s22 + $0x50] sm:$0xff] }
  0x19   : > { %3248 = vst.msk [vmem:[#allocation4 + $0x10] sm:$0x1] %vm963_vm1, %v4573_v0  ;;  %3249 = vst.msk [vmem:[#allocation4 + $0x20] sm:$0x1] %vm963_vm1, %v4573_v0  ;;  %v552_v22 = vadd.f32 %v551_v17, %v550_v19  ;;  %v561_v32 = vsel %vm543_vm0, %v4842_v27, 0.0  ;;  %v4852_v33 = vld [vmem:[%s4792_s22 + $0x58] sm:$0xff] }
  0x1a   : > { %3250 = vst.msk [vmem:[#allocation4 + $0x30] sm:$0x1] %vm963_vm1, %v4573_v0  ;;  %3251 = vst.msk [vmem:[#allocation4 + $0x40] sm:$0x1] %vm963_vm1, %v4573_v0  ;;  %v563_v35 = vsel %vm543_vm0, %v4847_v30, 0.0  ;;  %v4857_v36 = vld [vmem:[%s4792_s22 + $0x60] sm:$0xff] }
  0x1b   : > { %3252 = vst.msk [vmem:[#allocation4 + $0x50] sm:$0x1] %vm963_vm1, %v4573_v0  ;;  %3253 = vst.msk [vmem:[#allocation4 + $0x60] sm:$0x1] %vm963_vm1, %v4573_v0  ;;  %v554_v25 = vadd.f32 %v553_v20, %v552_v22  ;;  %v565_v38 = vsel %vm543_vm0, %v4852_v33, 0.0  ;;  %v4862_v39 = vld [vmem:[%s4792_s22 + $0x68] sm:$0xff] }
  0x1c   : > { %3254 = vst.msk [vmem:[#allocation4 + $0x70] sm:$0x1] %vm963_vm1, %v4573_v0  ;;  %3255 = vst.msk [vmem:[#allocation4 + $0x80] sm:$0x1] %vm963_vm1, %v4573_v0  ;;  %v567_v41 = vsel %vm543_vm0, %v4857_v36, 0.0  ;;  %v4867_v42 = vld [vmem:[%s4792_s22 + $0x70] sm:$0xff] }
  0x1d   : > { %3258 = vst.msk [vmem:[#allocation4 + $0x19] sm:$0x1] %vm963_vm1, %v4573_v0  ;;  %3259 = vst.msk [vmem:[#allocation4 + $0x29] sm:$0x1] %vm963_vm1, %v4573_v0  ;;  %v556_v28 = vadd.f32 %v555_v23, %v554_v25  ;;  %v569_v44 = vsel %vm543_vm0, %v4862_v39, 0.0  ;;  %v4872_v45 = vld [vmem:[%s4792_s22 + $0x78] sm:$0xff] }
  0x1e   : > { %3260 = vst.msk [vmem:[#allocation4 + $0x39] sm:$0x1] %vm963_vm1, %v4573_v0  ;;  %3261 = vst.msk [vmem:[#allocation4 + $0x49] sm:$0x1] %vm963_vm1, %v4573_v0  ;;  %v571_v47 = vsel %vm543_vm0, %v4867_v42, 0.0  ;;  %v4877_v48 = vld [vmem:[%s4792_s22 + $0x80] sm:$0xff] }
  0x1f   : > { %3262 = vst.msk [vmem:[#allocation4 + $0x59] sm:$0x1] %vm963_vm1, %v4573_v0  ;;  %3263 = vst.msk [vmem:[#allocation4 + $0x69] sm:$0x1] %vm963_vm1, %v4573_v0  ;;  %v558_v31 = vadd.f32 %v557_v26, %v556_v28  ;;  %v573_v50 = vsel %vm543_vm0, %v4872_v45, 0.0  ;;  %v4882_v51 = vld [vmem:[%s4792_s22 + $0x88] sm:$0xff] }
  0x20   : > { %3264 = vst.msk [vmem:[#allocation4 + $0x79] sm:$0x1] %vm963_vm1, %v4573_v0  ;;  %3265 = vst.msk [vmem:[#allocation4 + $0x89] sm:$0x1] %vm963_vm1, %v4573_v0  ;;  %v575_v53 = vsel %vm543_vm0, %v4877_v48, 0.0  ;;  %v4887_v54 = vld [vmem:[%s4792_s22 + $0x90] sm:$0xff] }
  0x21   : > { %958 = vst.msk [vmem:[#allocation2 + $0x10] sm:$0x3] %vm957_vm2, %v4573_v0  ;;  %962 = vst.msk [vmem:[#allocation2 + $0x1a8] sm:$0x3] %vm957_vm2, %v4573_v0  ;;  %v560_v34 = vadd.f32 %v559_v29, %v558_v31  ;;  %v577_v56 = vsel %vm543_vm0, %v4882_v51, 0.0  ;;  %v4892_v57 = vld [vmem:[%s4792_s22 + $0x98] sm:$0xff] }
  0x22   : > { %3243 = vst.msk [vmem:[#allocation4 + $0x8] sm:$0x3] %vm957_vm2, %v4573_v0  ;;  %3246 = vst.msk [vmem:[#allocation4 + $0x98] sm:$0x3] %vm957_vm2, %v4573_v0  ;;  %v579_v59 = vsel %vm543_vm0, %v4887_v54, 0.0  ;;  %v4897_v60 = vld [vmem:[%s4792_s22 + $0xa0] sm:$0xff] }
  0x23   : > { %964 = vst.msk [vmem:[#allocation2] sm:$0x1] %vm963_vm1, %v4573_v0  ;;  %981 = vst.msk [vmem:[#allocation2 + $0x198] sm:$0x1] %vm963_vm1, %v4573_v0  ;;  %v562_v37 = vadd.f32 %v561_v32, %v560_v34  ;;  %v581_v62 = vsel %vm543_vm0, %v4892_v57, 0.0  ;;  %v4902_v63 = vld [vmem:[%s4792_s22 + $0xa8] sm:$0xff] }
  0x24   : > { %3247 = vst.msk [vmem:[#allocation4] sm:$0x1] %vm963_vm1, %v4573_v0  ;;  %3256 = vst.msk [vmem:[#allocation4 + $0x90] sm:$0x1] %vm963_vm1, %v4573_v0  ;;  %v583_v4 = vsel %vm543_vm0, %v4897_v60, 0.0  ;;  %v4907_v5 = vld [vmem:[%s4792_s22 + $0xb0] sm:$0xff] }
  0x25   : > { %982 = vst.msk [vmem:[#allocation2 + $0x11] sm:$0x1] %vm963_vm1, %v4573_v0  ;;  %999 = vst.msk [vmem:[#allocation2 + $0x1a9] sm:$0x1] %vm963_vm1, %v4573_v0  ;;  %v564_v40 = vadd.f32 %v563_v35, %v562_v37  ;;  %v585_v7 = vsel %vm543_vm0, %v4902_v63, 0.0  ;;  %v4912_v8 = vld [vmem:[%s4792_s22 + $0xb8] sm:$0xff] }
  0x26   : > { %3257 = vst.msk [vmem:[#allocation4 + $0x9] sm:$0x1] %vm963_vm1, %v4573_v0  ;;  %3266 = vst.msk [vmem:[#allocation4 + $0x99] sm:$0x1] %vm963_vm1, %v4573_v0  ;;  %v589_v16 = vsel %vm543_vm0, %v4912_v8, 0.0  ;;  %v4922_v17 = vld [vmem:[%s4792_s22 + $0xc8] sm:$0xff] }
  0x27   : > { %v566_v43 = vadd.f32 %v565_v38, %v564_v40  ;;  %v4927_v22 = vld [vmem:[%s4792_s22 + $0xd0] sm:$0xff]  ;;  %v593_v25 = vsel %vm543_vm0, %v4922_v17, 0.0  ;;  %v4932_v26 = vld [vmem:[%s4792_s22 + $0xd8] sm:$0xff]  ;;  %v4937_v31 = vld [vmem:[%s4792_s22 + $0xe0] sm:$0xff] }
  0x28   : > { %v1098_v13 = vld [vmem:[#allocation2 + $0x9] sm:$0xff]  ;;  %v595_v29 = vsel %vm543_vm0, %v4927_v22, 0.0  ;;  %v597_v34 = vsel %vm543_vm0, %v4932_v26, 0.0  ;;  %v599_v38 = vsel %vm543_vm0, %v4937_v31, 0.0 }
  0x29   : > { %1163 = vrot.lane.b32.xlu0 %v1098_v13, %s4575_s24  ;;  %v568_v46 = vadd.f32 %v567_v41, %v566_v43  ;;  %v4917_v13 = vld [vmem:[%s4792_s22 + $0xc0] sm:$0xff]  ;;  %v4942_v35 = vld [vmem:[%s4792_s22 + $0xe8] sm:$0xff]  ;;  %v4947_v40 = vld [vmem:[%s4792_s22 + $0xf0] sm:$0xff] }
  0x2a   : > { %v591_v20 = vsel %vm543_vm0, %v4917_v13, 0.0  ;;  %v601_v43 = vsel %vm543_vm0, %v4942_v35, 0.0 }
  0x2b   : > { %v570_v49 = vadd.f32 %v569_v44, %v568_v46  ;;  %v4952_v44 = vld [vmem:[%s4792_s22 + $0xf8] sm:$0xff] }
  0x2c   : > { %v1291_v12 = vld [vmem:[#allocation2 + $0xa] sm:$0xff] }
  0x2d   : > { %1356 = vrot.lane.b32.xlu1 %v1291_v12, %s4574_s23  ;;  %v572_v52 = vadd.f32 %v571_v47, %v570_v49  ;;  %v587_v12 = vsel %vm543_vm0, %v4907_v5, 0.0  ;;  %v603_v47 = vsel %vm543_vm0, %v4947_v40, 0.0 }
  0x2f   : > { %v574_v55 = vadd.f32 %v573_v50, %v572_v52  ;;  %v605_v50 = vsel %vm543_vm0, %v4952_v44, 0.0 }
  0x31   : > { %v576_v58 = vadd.f32 %v575_v53, %v574_v55 }
  0x33   : > { %v578_v61 = vadd.f32 %v577_v56, %v576_v58 }
  0x35   : > { %v580_v0 = vadd.f32 %v579_v59, %v578_v61 }
  0x37   : > { %v582_v6 = vadd.f32 %v581_v62, %v580_v0 }
  0x39   : > { %v584_v11 = vadd.f32 %v583_v4, %v582_v6 }
  0x3b   : > { %v586_v14 = vadd.f32 %v585_v7, %v584_v11 }
  0x3d   : > { %v588_v19 = vadd.f32 %v587_v12, %v586_v14 }
  0x3f   : > { %v590_v23 = vadd.f32 %v589_v16, %v588_v19 }
  0x41   : > { %v592_v28 = vadd.f32 %v591_v20, %v590_v23 }
  0x43   : > { %v594_v32 = vadd.f32 %v593_v25, %v592_v28 }
  0x45   : > { %v596_v37 = vadd.f32 %v595_v29, %v594_v32 }
  0x47   : > { %v598_v41 = vadd.f32 %v597_v34, %v596_v37 }
  0x49   : > { %v600_v46 = vadd.f32 %v599_v38, %v598_v41 }
  0x4b   : > { %v602_v49 = vadd.f32 %v601_v43, %v600_v46 }
  0x4d   : > { %v604_v52 = vadd.f32 %v603_v47, %v602_v49 }
  0x4f   : > { %v606_v53 = vadd.f32 %v605_v50, %v604_v52 }
  0x51   : > { %v607_v55 = vrot.slane %v606_v53, 4 }
  0x53   : > { %v608_v56 = vadd.f32 %v607_v55, %v606_v53 }
  0x55   : > { %v609_v58 = vrot.slane %v608_v56, 2 }
  0x57   : > { %v610_v59 = vadd.f32 %v609_v58, %v608_v56 }
  0x59   : > { %v611_v61 = vrot.slane %v610_v59, 1 }
  0x5b   : > { %v612_v62 = vadd.f32 %v611_v61, %v610_v59 }
  0x5d   : > { %v4958_v0 = vmul.f32 0.00390625, %v612_v62 }
  0x5f   : > { %v4962_v4 = vsub.f32 %v4795_v1, %v4958_v0  ;;  %v4966_v6 = vsub.f32 %v4798_v2, %v4958_v0  ;;  %v4970_v7 = vsub.f32 %v4801_v3, %v4958_v0  ;;  %v4974_v11 = vsub.f32 %v4812_v9, %v4958_v0 }
  0x60   : > { %v4978_v12 = vsub.f32 %v4815_v10, %v4958_v0  ;;  %v4988_v3 = vsub.f32 %v4820_v15, %v4958_v0  ;;  %v4994_v10 = vsub.f32 %v4827_v18, %v4958_v0  ;;  %v5003_v15 = vsub.f32 %v4832_v21, %v4958_v0 }
  0x61   : > { %v647_v1 = vmul.f32 %v4962_v4, %v4962_v4  ;;  %v648_v14 = vmul.f32 %v4966_v6, %v4966_v6  ;;  %v649_v2 = vmul.f32 %v4970_v7, %v4970_v7  ;;  %v650_v9 = vmul.f32 %v4974_v11, %v4974_v11 }
  0x62   : > { %v651_v16 = vmul.f32 %v4978_v12, %v4978_v12  ;;  %v652_v28 = vmul.f32 %v4988_v3, %v4988_v3  ;;  %v5010_v32 = vsub.f32 %v4837_v24, %v4958_v0  ;;  %v653_v34 = vmul.f32 %v4994_v10, %v4994_v10 }
  0x63   : > { %v679_v19 = vsel %vm543_vm0, %v647_v1, 0.0  ;;  %v680_v20 = vsel %vm543_vm0, %v648_v14, 0.0  ;;  %v682_v23 = vsel %vm543_vm0, %v649_v2, 0.0  ;;  %v684_v18 = vsel %vm543_vm0, %v650_v9, 0.0 }
  0x64   : > { %v681_v25 = vadd.f32 %v680_v20, %v679_v19  ;;  %v686_v37 = vsel %vm543_vm0, %v651_v16, 0.0  ;;  %v5017_v21 = vsub.f32 %v4842_v27, %v4958_v0  ;;  %v654_v41 = vmul.f32 %v5003_v15, %v5003_v15 }
  0x65   : > { %v688_v43 = vsel %vm543_vm0, %v652_v28, 0.0  ;;  %v5024_v24 = vsub.f32 %v4847_v30, %v4958_v0  ;;  %v655_v47 = vmul.f32 %v5010_v32, %v5010_v32  ;;  %v690_v49 = vsel %vm543_vm0, %v653_v34, 0.0 }
  0x66   : > { %v683_v29 = vadd.f32 %v682_v23, %v681_v25  ;;  %v5031_v27 = vsub.f32 %v4852_v33, %v4958_v0  ;;  %v656_v52 = vmul.f32 %v5017_v21, %v5017_v21  ;;  %v692_v53 = vsel %vm543_vm0, %v654_v41, 0.0 }
  0x67   : > { %v5038_v30 = vsub.f32 %v4857_v36, %v4958_v0  ;;  %v657_v56 = vmul.f32 %v5024_v24, %v5024_v24  ;;  %v694_v58 = vsel %vm543_vm0, %v655_v47, 0.0  ;;  %v5045_v33 = vsub.f32 %v4862_v39, %v4958_v0 }
  0x68   : > { %v685_v38 = vadd.f32 %v684_v18, %v683_v29  ;;  %v658_v61 = vmul.f32 %v5031_v27, %v5031_v27  ;;  %v696_v62 = vsel %vm543_vm0, %v656_v52, 0.0  ;;  %v5052_v36 = vsub.f32 %v4867_v42, %v4958_v0 }
  0x69   : > { %v659_v14 = vmul.f32 %v5038_v30, %v5038_v30  ;;  %v698_v2 = vsel %vm543_vm0, %v657_v56, 0.0  ;;  %v5059_v39 = vsub.f32 %v4872_v45, %v4958_v0  ;;  %v660_v16 = vmul.f32 %v5045_v33, %v5045_v33 }
  0x6a   : > { %v687_v46 = vadd.f32 %v686_v37, %v685_v38  ;;  %v700_v19 = vsel %vm543_vm0, %v658_v61, 0.0  ;;  %v5066_v42 = vsub.f32 %v4877_v48, %v4958_v0  ;;  %v661_v23 = vmul.f32 %v5052_v36, %v5052_v36 }
  0x6b   : > { %v702_v25 = vsel %vm543_vm0, %v659_v14, 0.0  ;;  %v5073_v45 = vsub.f32 %v4882_v51, %v4958_v0  ;;  %v662_v18 = vmul.f32 %v5059_v39, %v5059_v39  ;;  %v704_v29 = vsel %vm543_vm0, %v660_v16, 0.0 }
  0x6c   : > { %v689_v50 = vadd.f32 %v688_v43, %v687_v46  ;;  %v5080_v48 = vsub.f32 %v4887_v54, %v4958_v0  ;;  %v663_v37 = vmul.f32 %v5066_v42, %v5066_v42  ;;  %v706_v38 = vsel %vm543_vm0, %v661_v23, 0.0 }
  0x6d   : > { %v5087_v51 = vsub.f32 %v4892_v57, %v4958_v0  ;;  %v664_v43 = vmul.f32 %v5073_v45, %v5073_v45  ;;  %v708_v46 = vsel %vm543_vm0, %v662_v18, 0.0  ;;  %v5094_v54 = vsub.f32 %v4897_v60, %v4958_v0 }
  0x6e   : > { %v691_v55 = vadd.f32 %v690_v49, %v689_v50  ;;  %v665_v49 = vmul.f32 %v5080_v48, %v5080_v48  ;;  %v710_v50 = vsel %vm543_vm0, %v663_v37, 0.0  ;;  %v5101_v57 = vsub.f32 %v4902_v63, %v4958_v0 }
  0x6f   : > { %v5108_v60 = vsub.f32 %v4907_v5, %v4958_v0  ;;  %v5115_v63 = vsub.f32 %v4912_v8, %v4958_v0  ;;  %v5122_v5 = vsub.f32 %v4917_v13, %v4958_v0  ;;  %v5129_v8 = vsub.f32 %v4922_v17, %v4958_v0 }
  0x70   : > { %v693_v59 = vadd.f32 %v692_v53, %v691_v55  ;;  %v666_v53 = vmul.f32 %v5087_v51, %v5087_v51  ;;  %v712_v55 = vsel %vm543_vm0, %v664_v43, 0.0  ;;  %v5136_v13 = vsub.f32 %v4927_v22, %v4958_v0 }
  0x71   : > { %v5143_v17 = vsub.f32 %v4932_v26, %v4958_v0  ;;  %v5150_v22 = vsub.f32 %v4937_v31, %v4958_v0  ;;  %v5157_v26 = vsub.f32 %v4942_v35, %v4958_v0  ;;  %v5164_v31 = vsub.f32 %v4947_v40, %v4958_v0 }
  0x72   : > { %v695_v1 = vadd.f32 %v694_v58, %v693_v59  ;;  %v667_v58 = vmul.f32 %v5094_v54, %v5094_v54  ;;  %v714_v59 = vsel %vm543_vm0, %v665_v49, 0.0  ;;  %v5171_v35 = vsub.f32 %v4952_v44, %v4958_v0 }
  0x73   : > { %v677_v40 = vmul.f32 %v5164_v31, %v5164_v31 }
  0x74   : > { %v697_v9 = vadd.f32 %v696_v62, %v695_v1  ;;  %v668_v62 = vmul.f32 %v5101_v57, %v5101_v57  ;;  %v716_v1 = vsel %vm543_vm0, %v666_v53, 0.0 }
  0x75   : > { %v738_v44 = vsel %vm543_vm0, %v677_v40, 0.0 }
  0x76   : > { %v699_v20 = vadd.f32 %v698_v2, %v697_v9  ;;  %v669_v2 = vmul.f32 %v5108_v60, %v5108_v60  ;;  %v718_v9 = vsel %vm543_vm0, %v667_v58, 0.0 }
  0x78   : > { %v701_v28 = vadd.f32 %v700_v19, %v699_v20  ;;  %v670_v19 = vmul.f32 %v5115_v63, %v5115_v63  ;;  %v720_v20 = vsel %vm543_vm0, %v668_v62, 0.0  ;;  %v678_v62 = vmul.f32 %v5171_v35, %v5171_v35 }
  0x7a   : > { %v703_v34 = vadd.f32 %v702_v25, %v701_v28  ;;  %v671_v25 = vmul.f32 %v5122_v5, %v5122_v5  ;;  %v722_v28 = vsel %vm543_vm0, %v669_v2, 0.0  ;;  %v740_v2 = vsel %vm543_vm0, %v678_v62, 0.0 }
  0x7c   : > { %v705_v41 = vadd.f32 %v704_v29, %v703_v34  ;;  %v672_v29 = vmul.f32 %v5129_v8, %v5129_v8  ;;  %v724_v34 = vsel %vm543_vm0, %v670_v19, 0.0 }
  0x7e   : > { %v707_v47 = vadd.f32 %v706_v38, %v705_v41  ;;  %v673_v38 = vmul.f32 %v5136_v13, %v5136_v13  ;;  %v726_v41 = vsel %vm543_vm0, %v671_v25, 0.0 }
  0x80   : > { %v709_v52 = vadd.f32 %v708_v46, %v707_v47  ;;  %v674_v46 = vmul.f32 %v5143_v17, %v5143_v17  ;;  %v728_v47 = vsel %vm543_vm0, %v672_v29, 0.0 }
  0x82   : > { %v711_v56 = vadd.f32 %v710_v50, %v709_v52  ;;  %v675_v50 = vmul.f32 %v5150_v22, %v5150_v22  ;;  %v730_v52 = vsel %vm543_vm0, %v673_v38, 0.0  ;;  %v1162_v38 = vpop.permute.xlu0 %1161 }
  0x84   : > { %v713_v61 = vadd.f32 %v712_v55, %v711_v56  ;;  %v676_v55 = vmul.f32 %v5157_v26, %v5157_v26  ;;  %v732_v56 = vsel %vm543_vm0, %v674_v46, 0.0  ;;  %v1034_v46 = vld [vmem:[#allocation2 + $0x8] sm:$0xff] }
  0x85   : > { %1066 = vst.msk [vmem:[#allocation3 + $0x8] sm:$0xff] %vm543_vm0, %v1034_v46 }
  0x86   : > { %v715_v14 = vadd.f32 %v714_v59, %v713_v61  ;;  %v734_v59 = vsel %vm543_vm0, %v675_v50, 0.0  ;;  %v5193_v50 = vld [vmem:[%s6656_s4] ss:$0 sm:$0xff] }
  0x88   : > { %v717_v16 = vadd.f32 %v716_v1, %v715_v14  ;;  %v736_v1 = vsel %vm543_vm0, %v676_v55, 0.0 }
  0x8a   : > { %v719_v23 = vadd.f32 %v718_v9, %v717_v16 }
  0x8c   : > { %v721_v18 = vadd.f32 %v720_v20, %v719_v23 }
  0x8e   : > { %v723_v37 = vadd.f32 %v722_v28, %v721_v18 }
  0x90   : > { %v725_v43 = vadd.f32 %v724_v34, %v723_v37  ;;  %v1355_v37 = vpop.permute.xlu1 %1354 }
  0x92   : > { %v727_v49 = vadd.f32 %v726_v41, %v725_v43  ;;  %v1033_v41 = vld [vmem:[#allocation2] sm:$0xff] }
  0x93   : > { %1065 = vst.msk [vmem:[#allocation3] sm:$0xff] %vm543_vm0, %v1033_v41 }
  0x94   : > { %v729_v53 = vadd.f32 %v728_v47, %v727_v49  ;;  %1258 = vst.msk [vmem:[#allocation3] sm:$0xff] %vm1257_vm3, %v1162_v38 }
  0x95   : > { %1451 = vst.msk [vmem:[#allocation3] sm:$0xff] %vm1450_vm4, %v1355_v37 }
  0x96   : > { %v731_v58 = vadd.f32 %v730_v52, %v729_v53 }
  0x98   : > { %v733_v61 = vadd.f32 %v732_v56, %v731_v58  ;;  %v5208_v58 = vld [vmem:[%s6657_s5] ss:$0 sm:$0xff] }
  0x9a   : > { %v735_v14 = vadd.f32 %v734_v59, %v733_v61 }
  0x9b   : > { %v1164_v47 = vpop.permute.xlu0 %1163 }
  0x9c   : > { %v737_v0 = vadd.f32 %v736_v1, %v735_v14  ;;  %1259 = vst.msk [vmem:[#allocation3 + $0x8] sm:$0xff] %vm1257_vm3, %v1164_v47 }
  0x9e   : > { %v739_v9 = vadd.f32 %v738_v44, %v737_v0 }
  0x9f   : > { %v1357_v43 = vpop.permute.xlu1 %1356 }
  0xa0   : > { %v741_v16 = vadd.f32 %v740_v2, %v739_v9  ;;  %1452 = vst.msk [vmem:[#allocation3 + $0x8] sm:$0xff] %vm1450_vm4, %v1357_v43 }
  0xa2   : > { %v742_v19 = vrot.slane %v741_v16, 4 }
  0xa4   : > { %v743_v20 = vadd.f32 %v742_v19, %v741_v16 }
  0xa6   : > { %v744_v23 = vrot.slane %v743_v20, 2 }
  0xa8   : > { %v745_v25 = vadd.f32 %v744_v23, %v743_v20 }
  0xaa   : > { %v746_v28 = vrot.slane %v745_v25, 1 }
  0xac   : > { %v747_v18 = vadd.f32 %v746_v28, %v745_v25 }
  0xae   : > { %v748_v29 = vmul.f32 0.00390625, %v747_v18 }
  0xb0   : > { %v749_v34 = vadd.f32 1e-05, %v748_v29 }
  0xb2   : > { %4526 = vrsqrt.f32 %v749_v34 }
  0xbc   : > { %v5188_v49 = vpop.eup %4526 }
  0xbd   : > { %v751_v52 = vmul.f32 %v5188_v49, %v4962_v4  ;;  %v752_v53 = vmul.f32 %v5188_v49, %v4966_v6  ;;  %v753_v55 = vmul.f32 %v5188_v49, %v4970_v7  ;;  %v754_v56 = vmul.f32 %v5188_v49, %v4974_v11 }
  0xbe   : > { %v755_v40 = vmul.f32 %v5188_v49, %v4978_v12  ;;  %v756_v4 = vmul.f32 %v5188_v49, %v4988_v3  ;;  %v757_v6 = vmul.f32 %v5188_v49, %v4994_v10  ;;  %v758_v7 = vmul.f32 %v5188_v49, %v5003_v15 }
  0xbf   : > { %v789_v11 = vmul.f32 %v5193_v50, %v751_v52  ;;  %v790_v59 = vmul.f32 %v5193_v50, %v752_v53  ;;  %v791_v61 = vmul.f32 %v5193_v50, %v753_v55  ;;  %v792_v62 = vmul.f32 %v5193_v50, %v754_v56 }
  0xc0   : > { %v793_v1 = vmul.f32 %v5193_v50, %v755_v40  ;;  %v794_v12 = vmul.f32 %v5193_v50, %v756_v4  ;;  %v795_v3 = vmul.f32 %v5193_v50, %v757_v6  ;;  %v796_v14 = vmul.f32 %v5193_v50, %v758_v7 }
  0xc1   : > { %v827_v10 = vadd.f32 %v5208_v58, %v789_v11  ;;  %v828_v15 = vadd.f32 %v5208_v58, %v790_v59  ;;  %v829_v44 = vadd.f32 %v5208_v58, %v791_v61  ;;  %v830_v0 = vadd.f32 %v5208_v58, %v792_v62 }
  0xc2   : > { %v831_v2 = vadd.f32 %v5208_v58, %v793_v1  ;;  %v832_v9 = vadd.f32 %v5208_v58, %v794_v12  ;;  %v833_v16 = vadd.f32 %v5208_v58, %v795_v3  ;;  %v834_v19 = vadd.f32 %v5208_v58, %v796_v14 }
  0xc3   : > { %vm859_vm5 = vcmp.gt.f32.partialorder %v827_v10, 0.0  ;;  %vm860_vm6 = vcmp.gt.f32.partialorder %v828_v15, 0.0  ;;  %v891_v20 = vmul.f32 0.2, %v827_v10  ;;  %v892_v23 = vmul.f32 0.2, %v828_v15 }
  0xc4   : > { %vm861_vm7 = vcmp.gt.f32.partialorder %v829_v44, 0.0  ;;  %v893_v25 = vmul.f32 0.2, %v829_v44  ;;  %vm862_vm8 = vcmp.gt.f32.partialorder %v830_v0, 0.0  ;;  %v894_v28 = vmul.f32 0.2, %v830_v0 }
  0xc5   : > { %v923_v18 = vsel %vm859_vm5, %v827_v10, %v891_v20  ;;  %v924_v29 = vsel %vm860_vm6, %v828_v15, %v892_v23  ;;  %vm863_vm9 = vcmp.gt.f32.partialorder %v831_v2, 0.0  ;;  %v895_v34 = vmul.f32 0.2, %v831_v2 }
  0xc6   : > { %1001 = vst.msk [vmem:[#allocation2 + $0x19] sm:$0xff] %vm543_vm0, %v923_v18  ;;  %1002 = vst.msk [vmem:[#allocation2 + $0x21] sm:$0xff] %vm543_vm0, %v924_v29  ;;  %v925_v37 = vsel %vm861_vm7, %v829_v44, %v893_v25  ;;  %v926_v38 = vsel %vm862_vm8, %v830_v0, %v894_v28  ;;  %vm864_vm10 = vcmp.gt.f32.partialorder %v832_v9, 0.0  ;;  %v896_v41 = vmul.f32 0.2, %v832_v9 }
  0xc7   : > { %1003 = vst.msk [vmem:[#allocation2 + $0x31] sm:$0xff] %vm543_vm0, %v925_v37  ;;  %1004 = vst.msk [vmem:[#allocation2 + $0x39] sm:$0xff] %vm543_vm0, %v926_v38  ;;  %v927_v43 = vsel %vm863_vm9, %v831_v2, %v895_v34  ;;  %vm865_vm11 = vcmp.gt.f32.partialorder %v833_v16, 0.0  ;;  %v897_v46 = vmul.f32 0.2, %v833_v16  ;;  %vm866_vm12 = vcmp.gt.f32.partialorder %v834_v19, 0.0 }
  0xc8   : > { %1005 = vst.msk [vmem:[#allocation2 + $0x49] sm:$0xff] %vm543_vm0, %v927_v43  ;;  %v928_v47 = vsel %vm864_vm10, %v832_v9, %v896_v41  ;;  %v898_v52 = vmul.f32 0.2, %v834_v19  ;;  %v759_v53 = vmul.f32 %v5188_v49, %v5010_v32  ;;  %v760_v56 = vmul.f32 %v5188_v49, %v5017_v21  ;;  %v2674_v38 = vld [vmem:[%s6654_s2] sm:$0xff]  ;;  %v2675_v41 = vld [vmem:[%s6654_s2 + $0x8] sm:$0xff] }
  0xc9   : > { %1006 = vst.msk [vmem:[#allocation2 + $0x51] sm:$0xff] %vm543_vm0, %v928_v47  ;;  %v929_v55 = vsel %vm865_vm11, %v833_v16, %v897_v46  ;;  %v761_v61 = vmul.f32 %v5188_v49, %v5024_v24  ;;  %v762_v25 = vmul.f32 %v5188_v49, %v5031_v27  ;;  %v4419_v46 = vpack.c.bf16 %v2675_v41, %v2674_v38 }
  0xca   : > { %1007 = vst.msk [vmem:[#allocation2 + $0x61] sm:$0xff] %vm543_vm0, %v929_v55  ;;  %v930_v40 = vsel %vm866_vm12, %v834_v19, %v898_v52  ;;  %v797_v4 = vmul.f32 %v5193_v50, %v759_v53  ;;  %v798_v6 = vmul.f32 %v5193_v50, %v760_v56  ;;  %v2676_v52 = vld [vmem:[%s6654_s2 + $0x10] sm:$0xff]  ;;  %v2677_v53 = vld [vmem:[%s6654_s2 + $0x18] sm:$0xff]  ;;  %vm1643_vm10 = vcmask 261312  }
  0xcb   : > { %1008 = vst.msk [vmem:[#allocation2 + $0x69] sm:$0xff] %vm543_vm0, %v930_v40  ;;  %v799_v14 = vmul.f32 %v5193_v50, %v761_v61  ;;  %v800_v28 = vmul.f32 %v5193_v50, %v762_v25  ;;  %4420 = vmatprep.subr.bf16.mxu1 %v4419_v46  ;;  %v4423_v55 = vpack.c.bf16 %v2677_v53, %v2676_v52  ;;  %v2678_v40 = vld [vmem:[%s6654_s2 + $0x20] sm:$0xff]  ;;  %vm1836_vm11 = vcmask 326912  }
  0xcc   : > { %v835_v7 = vadd.f32 %v5208_v58, %v797_v4  ;;  %v836_v32 = vadd.f32 %v5208_v58, %v798_v6  ;;  %4422 = vmatpush3.bf16.msra.mxu1 %v4419_v46  ;;  %v2679_v4 = vld [vmem:[%s6654_s2 + $0x28] sm:$0xff]  ;;  %v766_v46 = vmul.f32 %v5188_v49, %v5059_v39  ;;  %vm2029_vm12 = vcmask 392512  }
  0xcd   : > { %v1484_v11 = vld [vmem:[#allocation2 + $0x20] sm:$0xff]  ;;  %v1483_v59 = vld [vmem:[#allocation2 + $0x18] sm:$0xff]  ;;  %v837_v0 = vadd.f32 %v5208_v58, %v799_v14  ;;  %v838_v34 = vadd.f32 %v5208_v58, %v800_v28  ;;  %4424 = vmatprep.subr.bf16.mxu1 %v4423_v55 }
  0xce   : > { %1549 = vrot.lane.b32.xlu1 %v1484_v11, %s4576_s29  ;;  %1547 = vrot.lane.b32.xlu0 %v1483_v59, %s4576_s29  ;;  %vm867_vm13 = vcmp.gt.f32.partialorder %v835_v7, 0.0  ;;  %v899_v21 = vmul.f32 0.2, %v835_v7  ;;  %1067 = vst.msk [vmem:[#allocation3 + $0x10] sm:$0xff] %vm543_vm0, %v1483_v59  ;;  %1068 = vst.msk [vmem:[#allocation3 + $0x18] sm:$0xff] %vm543_vm0, %v1484_v11  ;;  %v1676_v62 = vld [vmem:[#allocation2 + $0x19] sm:$0xff] }
  0xcf   : > { %v2063_v1 = vld [vmem:[#allocation2 + $0x30] sm:$0xff]  ;;  %v5256_v12 = vld [vmem:[#allocation2 + $0x38] sm:$0xff]  ;;  %vm868_vm14 = vcmp.gt.f32.partialorder %v836_v32, 0.0  ;;  %v900_v3 = vmul.f32 0.2, %v836_v32  ;;  %v5262_v10 = vld [vmem:[#allocation2 + $0x48] sm:$0xff] }
  0xd0   : > { %v931_v24 = vsel %vm867_vm13, %v835_v7, %v899_v21  ;;  %1069 = vst.msk [vmem:[#allocation3 + $0x20] sm:$0xff] %vm543_vm0, %v2063_v1  ;;  %1070 = vst.msk [vmem:[#allocation3 + $0x28] sm:$0xff] %vm543_vm0, %v5256_v12  ;;  %v5264_v15 = vld [vmem:[#allocation2 + $0x50] sm:$0xff]  ;;  %v1677_v2 = vld [vmem:[#allocation2 + $0x21] sm:$0xff]  ;;  %v901_v20 = vmul.f32 0.2, %v837_v0  ;;  %4426 = vmatpush3.bf16.msra.mxu1 %v4423_v55  ;;  %v4427_v7 = vpack.c.bf16 %v2679_v4, %v2678_v40 }
  0xd1   : > { %1009 = vst.msk [vmem:[#allocation2 + $0x79] sm:$0xff] %vm543_vm0, %v931_v24  ;;  %v932_v44 = vsel %vm868_vm14, %v836_v32, %v900_v3  ;;  %1071 = vst.msk [vmem:[#allocation3 + $0x30] sm:$0xff] %vm543_vm0, %v5262_v10  ;;  %v1869_v9 = vld [vmem:[#allocation2 + $0x1a] sm:$0xff]  ;;  %vm869_vm15 = vcmp.gt.f32.partialorder %v837_v0, 0.0  ;;  %v1870_v27 = vld [vmem:[#allocation2 + $0x22] sm:$0xff]  ;;  %vm870_vm1 = vcmp.gt.f32.partialorder %v838_v34, 0.0 }
  0xd2   : > { %1740 = vrot.lane.b32.xlu0 %v1676_v62, %s4577_s30  ;;  %1165 = vrot.lane.b32.xlu1 %v1676_v62, %s4575_s24  ;;  %1010 = vst.msk [vmem:[#allocation2 + $0x81] sm:$0xff] %vm543_vm0, %v932_v44  ;;  %1072 = vst.msk [vmem:[#allocation3 + $0x38] sm:$0xff] %vm543_vm0, %v5264_v15  ;;  %v5275_v16 = vld [vmem:[#allocation2 + $0x60] sm:$0xff]  ;;  %v5277_v19 = vld [vmem:[#allocation2 + $0x68] sm:$0xff]  ;;  %v933_v23 = vsel %vm869_vm15, %v837_v0, %v901_v20  ;;  %v902_v37 = vmul.f32 0.2, %v838_v34  ;;  %v763_v62 = vmul.f32 %v5188_v49, %v5038_v30 }
  0xd3   : > { %1073 = vst.msk [vmem:[#allocation3 + $0x40] sm:$0xff] %vm543_vm0, %v5275_v16  ;;  %1074 = vst.msk [vmem:[#allocation3 + $0x48] sm:$0xff] %vm543_vm0, %v5277_v19  ;;  %v2256_v56 = vld [vmem:[#allocation2 + $0x31] sm:$0xff]  ;;  %4428 = vmatprep.subr.bf16.mxu1 %v4427_v7  ;;  %v2257_v61 = vld [vmem:[#allocation2 + $0x39] sm:$0xff]  ;;  %v764_v44 = vmul.f32 %v5188_v49, %v5045_v33  ;;  %vm2223_vm13 = vcmask 458112   ;;  %vm2416_vm15 = vcmask 523712  }
  0xd4   : > { %1011 = vst.msk [vmem:[#allocation2 + $0x91] sm:$0xff] %vm543_vm0, %v933_v23  ;;  %v934_v47 = vsel %vm870_vm1, %v838_v34, %v902_v37  ;;  %4430 = vmatpush3.bf16.msra.mxu1 %v4427_v7  ;;  %v2680_v11 = vld [vmem:[%s6654_s2 + $0x30] sm:$0xff]  ;;  %v2681_v59 = vld [vmem:[%s6654_s2 + $0x38] sm:$0xff]  ;;  %v2260_v39 = vld [vmem:[#allocation2 + $0x61] sm:$0xff] }
  0xd5   : > { %1012 = vst.msk [vmem:[#allocation2 + $0x99] sm:$0xff] %vm543_vm0, %v934_v47  ;;  %v4431_v32 = vpack.c.bf16 %v2681_v59, %v2680_v11  ;;  %v2449_v21 = vld [vmem:[#allocation2 + $0x32] sm:$0xff]  ;;  %v2450_v30 = vld [vmem:[#allocation2 + $0x3a] sm:$0xff]  ;;  %v802_v0 = vmul.f32 %v5193_v50, %v764_v44  ;;  %v2258_v33 = vld [vmem:[#allocation2 + $0x49] sm:$0xff] }
  0xd6   : > { %1742 = vrot.lane.b32.xlu0 %v1677_v2, %s4577_s30  ;;  %1933 = vrot.lane.b32.xlu1 %v1869_v9, %s6664_s12  ;;  %v2259_v28 = vld [vmem:[#allocation2 + $0x51] sm:$0xff]  ;;  %v2261_v40 = vld [vmem:[#allocation2 + $0x69] sm:$0xff] }
  0xd7   : > { %4432 = vmatprep.subr.bf16.mxu1 %v4431_v32  ;;  %v2451_v34 = vld [vmem:[#allocation2 + $0x4a] sm:$0xff]  ;;  %v2453_v4 = vld [vmem:[#allocation2 + $0x62] sm:$0xff] }
  0xd8   : > { %v5289_v18 = vld [vmem:[#allocation2 + $0x78] sm:$0xff]  ;;  %4434 = vmatpush3.bf16.msra.mxu1 %v4431_v32 }
  0xd9   : > { %v5291_v29 = vld [vmem:[#allocation2 + $0x80] sm:$0xff]  ;;  %1075 = vst.msk [vmem:[#allocation3 + $0x50] sm:$0xff] %vm543_vm0, %v5289_v18 }
  0xda   : > { %1167 = vrot.lane.b32.xlu0 %v1677_v2, %s4575_s24  ;;  %1358 = vrot.lane.b32.xlu1 %v1869_v9, %s4574_s23  ;;  %1076 = vst.msk [vmem:[#allocation3 + $0x58] sm:$0xff] %vm543_vm0, %v5291_v29  ;;  %v840_v2 = vadd.f32 %v5208_v58, %v802_v0 }
  0xdb   : > { %v5306_v43 = vld [vmem:[#allocation2 + $0x90] sm:$0xff] }
  0xdc   : > { %1077 = vst.msk [vmem:[#allocation3 + $0x60] sm:$0xff] %vm543_vm0, %v5306_v43  ;;  %v5327_v6 = vld [vmem:[#allocation2 + $0x98] sm:$0xff]  ;;  %v904_v9 = vmul.f32 0.2, %v840_v2  ;;  %vm872_vm5 = vcmp.gt.f32.partialorder %v840_v2, 0.0 }
  0xdd   : > { %1078 = vst.msk [vmem:[#allocation3 + $0x68] sm:$0xff] %vm543_vm0, %v5327_v6 }
  0xde   : > { %1935 = vrot.lane.b32.xlu0 %v1870_v27, %s6664_s12  ;;  %2127 = vrot.lane.b32.xlu1 %v2063_v1, %s4579_s19  ;;  %v936_v23 = vsel %vm872_vm5, %v840_v2, %v904_v9  ;;  %v2263_v2 = vld [vmem:[#allocation2 + $0x81] sm:$0xff]  ;;  %vm6666_vm5 = vcmask 588800  }
  0xdf   : > { %1014 = vst.msk [vmem:[#allocation2 + $0xb1] sm:$0xff] %vm543_vm0, %v936_v23  ;;  %v2455_v9 = vld [vmem:[#allocation2 + $0x7a] sm:$0xff] }
  0xe2   : > { %1360 = vrot.lane.b32.xlu0 %v1870_v27, %s4574_s23  ;;  %1551 = vrot.lane.b32.xlu1 %v2063_v1, %s4576_s29  ;;  %v2682_v1 = vld [vmem:[%s6654_s2 + $0x40] sm:$0xff] }
  0xe3   : > { %4293 = vmatprep.subr.mxu1 %v2682_v1 }
  0xe4   : > { %4294 = vmatpush3.msra.mxu1 %v2682_v1 }
  0xe6   : > { %2129 = vrot.lane.b32.xlu0 %v5256_v12, %s4579_s19  ;;  %2320 = vrot.lane.b32.xlu1 %v2256_v56, %s4580_s15 }
  0xea   : > { %1553 = vrot.lane.b32.xlu0 %v5256_v12, %s4576_s29  ;;  %1744 = vrot.lane.b32.xlu1 %v2256_v56, %s4577_s30  ;;  %v801_v12 = vmul.f32 %v5193_v50, %v763_v62 }
  0xec   : > { %v839_v3 = vadd.f32 %v5208_v58, %v801_v12 }
  0xee   : > { %2322 = vrot.lane.b32.xlu0 %v2257_v61, %s4580_s15  ;;  %2513 = vrot.lane.b32.xlu1 %v2449_v21, %s4581_s26  ;;  %v903_v14 = vmul.f32 0.2, %v839_v3  ;;  %vm871_vm2 = vcmp.gt.f32.partialorder %v839_v3, 0.0 }
  0xf0   : > { %v935_v24 = vsel %vm871_vm2, %v839_v3, %v903_v14  ;;  %vm6667_vm2 = vcmask 589312  }
  0xf1   : > { %1013 = vst.msk [vmem:[#allocation2 + $0xa9] sm:$0xff] %vm543_vm0, %v935_v24 }
  0xf2   : > { %1169 = vrot.lane.b32.xlu0 %v2256_v56, %s4575_s24  ;;  %1746 = vrot.lane.b32.xlu1 %v2257_v61, %s4577_s30 }
  0xf6   : > { %1937 = vrot.lane.b32.xlu0 %v2449_v21, %s6664_s12  ;;  %2515 = vrot.lane.b32.xlu1 %v2450_v30, %s4581_s26 }
  0xf8   : > { %v5363_v20 = vld [vmem:[#allocation2 + $0xa8] sm:$0xff]  ;;  %v5374_v25 = vld [vmem:[#allocation2 + $0xb0] sm:$0xff] }
  0xf9   : > { %1079 = vst.msk [vmem:[#allocation3 + $0x70] sm:$0xff] %vm543_vm0, %v5363_v20  ;;  %1080 = vst.msk [vmem:[#allocation3 + $0x78] sm:$0xff] %vm543_vm0, %v5374_v25 }
  0xfa   : > { %1171 = vrot.lane.b32.xlu0 %v2257_v61, %s4575_s24  ;;  %1362 = vrot.lane.b32.xlu1 %v2449_v21, %s4574_s23  ;;  %v768_v61 = vmul.f32 %v5188_v49, %v5073_v45 }
  0xfe   : > { %1939 = vrot.lane.b32.xlu0 %v2450_v30, %s6664_s12  ;;  %2131 = vrot.lane.b32.xlu1 %v5262_v10, %s4579_s19 }
 0x102   : > { %1364 = vrot.lane.b32.xlu0 %v2450_v30, %s4574_s23  ;;  %1555 = vrot.lane.b32.xlu1 %v5262_v10, %s4576_s29  ;;  %v765_v10 = vmul.f32 %v5188_v49, %v5052_v36  ;;  %v804_v36 = vmul.f32 %v5193_v50, %v766_v46  ;;  %v2262_v30 = vld [vmem:[#allocation2 + $0x79] sm:$0xff]  ;;  %v770_v46 = vmul.f32 %v5188_v49, %v5087_v51 }
 0x104   : > { %v803_v27 = vmul.f32 %v5193_v50, %v765_v10  ;;  %v842_v47 = vadd.f32 %v5208_v58, %v804_v36  ;;  %v808_v36 = vmul.f32 %v5193_v50, %v770_v46 }
 0x106   : > { %2133 = vrot.lane.b32.xlu0 %v5264_v15, %s4579_s19  ;;  %2324 = vrot.lane.b32.xlu1 %v2258_v33, %s4580_s15  ;;  %v841_v37 = vadd.f32 %v5208_v58, %v803_v27  ;;  %v906_v52 = vmul.f32 0.2, %v842_v47  ;;  %vm874_vm7 = vcmp.gt.f32.partialorder %v842_v47, 0.0 }
 0x108   : > { %v905_v38 = vmul.f32 0.2, %v841_v37  ;;  %vm873_vm6 = vcmp.gt.f32.partialorder %v841_v37, 0.0  ;;  %v938_v55 = vsel %vm874_vm7, %v842_v47, %v906_v52 }
 0x109   : > { %1016 = vst.msk [vmem:[#allocation2 + $0xc9] sm:$0xff] %vm543_vm0, %v938_v55  ;;  %v846_v55 = vadd.f32 %v5208_v58, %v808_v36  ;;  %v2266_v36 = vld [vmem:[#allocation2 + $0xa9] sm:$0xff] }
 0x10a   : > { %1557 = vrot.lane.b32.xlu0 %v5264_v15, %s4576_s29  ;;  %1748 = vrot.lane.b32.xlu1 %v2258_v33, %s4577_s30  ;;  %v2452_v15 = vld [vmem:[#allocation2 + $0x52] sm:$0xff]  ;;  %v937_v41 = vsel %vm873_vm6, %v841_v37, %v905_v38 }
 0x10b   : > { %1015 = vst.msk [vmem:[#allocation2 + $0xc1] sm:$0xff] %vm543_vm0, %v937_v41  ;;  %v910_v51 = vmul.f32 0.2, %v846_v55  ;;  %vm878_vm1 = vcmp.gt.f32.partialorder %v846_v55, 0.0 }
 0x10e   : > { %2326 = vrot.lane.b32.xlu0 %v2259_v28, %s4580_s15  ;;  %2517 = vrot.lane.b32.xlu1 %v2451_v34, %s4581_s26 }
 0x112   : > { %1173 = vrot.lane.b32.xlu0 %v2258_v33, %s4575_s24  ;;  %1750 = vrot.lane.b32.xlu1 %v2259_v28, %s4577_s30  ;;  %v5401_v53 = vld [vmem:[#allocation2 + $0xc0] sm:$0xff]  ;;  %v5412_v56 = vld [vmem:[#allocation2 + $0xc8] sm:$0xff] }
 0x113   : > { %1081 = vst.msk [vmem:[#allocation3 + $0x80] sm:$0xff] %vm543_vm0, %v5401_v53  ;;  %1082 = vst.msk [vmem:[#allocation3 + $0x88] sm:$0xff] %vm543_vm0, %v5412_v56 }
 0x116   : > { %1941 = vrot.lane.b32.xlu0 %v2451_v34, %s6664_s12  ;;  %2519 = vrot.lane.b32.xlu1 %v2452_v15, %s4581_s26 }
 0x11a   : > { %1175 = vrot.lane.b32.xlu0 %v2259_v28, %s4575_s24  ;;  %1366 = vrot.lane.b32.xlu1 %v2451_v34, %s4574_s23  ;;  %v769_v28 = vmul.f32 %v5188_v49, %v5080_v48  ;;  %v2456_v48 = vld [vmem:[#allocation2 + $0x82] sm:$0xff] }
 0x11e   : > { %1943 = vrot.lane.b32.xlu0 %v2452_v15, %s6664_s12  ;;  %2135 = vrot.lane.b32.xlu1 %v5275_v16, %s4579_s19 }
 0x122   : > { %1368 = vrot.lane.b32.xlu0 %v2452_v15, %s4574_s23  ;;  %1559 = vrot.lane.b32.xlu1 %v5275_v16, %s4576_s29  ;;  %v767_v16 = vmul.f32 %v5188_v49, %v5066_v42  ;;  %v806_v42 = vmul.f32 %v5193_v50, %v768_v61 }
 0x124   : > { %v805_v7 = vmul.f32 %v5193_v50, %v767_v16  ;;  %v844_v21 = vadd.f32 %v5208_v58, %v806_v42  ;;  %v942_v16 = vsel %vm878_vm1, %v846_v55, %v910_v51 }
 0x125   : > { %1020 = vst.msk [vmem:[#allocation2 + $0xf9] sm:$0xff] %vm543_vm0, %v942_v16  ;;  %v2459_v16 = vld [vmem:[#allocation2 + $0xaa] sm:$0xff] }
 0x126   : > { %2137 = vrot.lane.b32.xlu0 %v5277_v19, %s4579_s19  ;;  %2328 = vrot.lane.b32.xlu1 %v2260_v39, %s4580_s15  ;;  %v843_v11 = vadd.f32 %v5208_v58, %v805_v7  ;;  %v908_v62 = vmul.f32 0.2, %v844_v21  ;;  %vm876_vm9 = vcmp.gt.f32.partialorder %v844_v21, 0.0 }
 0x128   : > { %v907_v59 = vmul.f32 0.2, %v843_v11  ;;  %vm875_vm8 = vcmp.gt.f32.partialorder %v843_v11, 0.0  ;;  %v940_v12 = vsel %vm876_vm9, %v844_v21, %v908_v62  ;;  %v2265_v62 = vld [vmem:[#allocation2 + $0x99] sm:$0xff] }
 0x129   : > { %1018 = vst.msk [vmem:[#allocation2 + $0xe1] sm:$0xff] %vm543_vm0, %v940_v12  ;;  %v2457_v12 = vld [vmem:[#allocation2 + $0x92] sm:$0xff] }
 0x12a   : > { %1561 = vrot.lane.b32.xlu0 %v5277_v19, %s4576_s29  ;;  %1752 = vrot.lane.b32.xlu1 %v2260_v39, %s4577_s30  ;;  %v2454_v19 = vld [vmem:[#allocation2 + $0x6a] sm:$0xff]  ;;  %v939_v32 = vsel %vm875_vm8, %v843_v11, %v907_v59 }
 0x12b   : > { %1017 = vst.msk [vmem:[#allocation2 + $0xd9] sm:$0xff] %vm543_vm0, %v939_v32 }
 0x12e   : > { %2330 = vrot.lane.b32.xlu0 %v2261_v40, %s4580_s15  ;;  %2521 = vrot.lane.b32.xlu1 %v2453_v4, %s4581_s26 }
 0x132   : > { %1177 = vrot.lane.b32.xlu0 %v2260_v39, %s4575_s24  ;;  %1754 = vrot.lane.b32.xlu1 %v2261_v40, %s4577_s30  ;;  %v5439_v1 = vld [vmem:[#allocation2 + $0xd8] sm:$0xff]  ;;  %v5454_v44 = vld [vmem:[#allocation2 + $0xe0] sm:$0xff] }
 0x133   : > { %1083 = vst.msk [vmem:[#allocation3 + $0x90] sm:$0xff] %vm543_vm0, %v5439_v1  ;;  %1084 = vst.msk [vmem:[#allocation3 + $0x98] sm:$0xff] %vm543_vm0, %v5454_v44 }
 0x136   : > { %1945 = vrot.lane.b32.xlu0 %v2453_v4, %s6664_s12  ;;  %2523 = vrot.lane.b32.xlu1 %v2454_v19, %s4581_s26 }
 0x13a   : > { %1179 = vrot.lane.b32.xlu0 %v2261_v40, %s4575_s24  ;;  %1370 = vrot.lane.b32.xlu1 %v2453_v4, %s4574_s23 }
 0x13e   : > { %1947 = vrot.lane.b32.xlu0 %v2454_v19, %s6664_s12  ;;  %2139 = vrot.lane.b32.xlu1 %v5289_v18, %s4579_s19 }
 0x140   : > { %v1550_v45 = vpop.permute.xlu1 %1549  ;;  %v1548_v3 = vpop.permute.xlu0 %1547 }
 0x141   : > { %1645 = vst.msk [vmem:[#allocation3 + $0x8] sm:$0xff] %vm1643_vm10, %v1550_v45  ;;  %1644 = vst.msk [vmem:[#allocation3] sm:$0xff] %vm1643_vm10, %v1548_v3 }
 0x142   : > { %1372 = vrot.lane.b32.xlu0 %v2454_v19, %s4574_s23  ;;  %1563 = vrot.lane.b32.xlu1 %v5289_v18, %s4576_s29  ;;  %v2264_v19 = vld [vmem:[#allocation2 + $0x91] sm:$0xff] }
 0x144   : > { %v1741_v14 = vpop.permute.xlu0 %1740  ;;  %v1166_v24 = vpop.permute.xlu1 %1165 }
 0x145   : > { %1837 = vst.msk [vmem:[#allocation3] sm:$0xff] %vm1836_vm11, %v1741_v14 }
 0x146   : > { %1260 = vst.msk [vmem:[#allocation3 + $0x10] sm:$0xff] %vm1257_vm3, %v1166_v24  ;;  %2141 = vrot.lane.b32.xlu0 %v5291_v29, %s4579_s19  ;;  %2332 = vrot.lane.b32.xlu1 %v2262_v30, %s4580_s15 }
 0x148   : > { %v1743_v18 = vpop.permute.xlu0 %1742  ;;  %v1934_v0 = vpop.permute.xlu1 %1933 }
 0x149   : > { %1838 = vst.msk [vmem:[#allocation3 + $0x8] sm:$0xff] %vm1836_vm11, %v1743_v18 }
 0x14a   : > { %2030 = vst.msk [vmem:[#allocation3] sm:$0xff] %vm2029_vm12, %v1934_v0  ;;  %1565 = vrot.lane.b32.xlu0 %v5291_v29, %s4576_s29  ;;  %1756 = vrot.lane.b32.xlu1 %v2262_v30, %s4577_s30  ;;  %v807_v29 = vmul.f32 %v5193_v50, %v769_v28  ;;  %v772_v28 = vmul.f32 %v5188_v49, %v5101_v57 }
 0x14c   : > { %v1168_v23 = vpop.permute.xlu0 %1167  ;;  %v1359_v33 = vpop.permute.xlu1 %1358  ;;  %v845_v27 = vadd.f32 %v5208_v58, %v807_v29  ;;  %v810_v29 = vmul.f32 %v5193_v50, %v772_v28 }
 0x14d   : > { %1261 = vst.msk [vmem:[#allocation3 + $0x18] sm:$0xff] %vm1257_vm3, %v1168_v23 }
 0x14e   : > { %1453 = vst.msk [vmem:[#allocation3 + $0x10] sm:$0xff] %vm1450_vm4, %v1359_v33  ;;  %2334 = vrot.lane.b32.xlu0 %v2263_v2, %s4580_s15  ;;  %2525 = vrot.lane.b32.xlu1 %v2455_v9, %s4581_s26  ;;  %v909_v37 = vmul.f32 0.2, %v845_v27  ;;  %vm877_vm14 = vcmp.gt.f32.partialorder %v845_v27, 0.0 }
 0x150   : > { %v1936_v34 = vpop.permute.xlu0 %1935  ;;  %v2128_v10 = vpop.permute.xlu1 %2127  ;;  %v941_v41 = vsel %vm877_vm14, %v845_v27, %v909_v37  ;;  %v848_v27 = vadd.f32 %v5208_v58, %v810_v29 }
 0x151   : > { %2031 = vst.msk [vmem:[#allocation3 + $0x8] sm:$0xff] %vm2029_vm12, %v1936_v34 }
 0x152   : > { %2224 = vst.msk [vmem:[#allocation3] sm:$0xff] %vm2223_vm13, %v2128_v10  ;;  %1181 = vrot.lane.b32.xlu0 %v2262_v30, %s4575_s24  ;;  %1758 = vrot.lane.b32.xlu1 %v2263_v2, %s4577_s30  ;;  %v771_v30 = vmul.f32 %v5188_v49, %v5094_v54  ;;  %v2458_v54 = vld [vmem:[#allocation2 + $0x9a] sm:$0xff]  ;;  %v912_v57 = vmul.f32 0.2, %v848_v27  ;;  %vm880_vm7 = vcmp.gt.f32.partialorder %v848_v27, 0.0 }
 0x153   : > { %1019 = vst.msk [vmem:[#allocation2 + $0xf1] sm:$0xff] %vm543_vm0, %v941_v41 }
 0x154   : > { %v1361_v15 = vpop.permute.xlu0 %1360  ;;  %v1552_v38 = vpop.permute.xlu1 %1551  ;;  %v809_v14 = vmul.f32 %v5193_v50, %v771_v30 }
 0x155   : > { %1454 = vst.msk [vmem:[#allocation3 + $0x18] sm:$0xff] %vm1450_vm4, %v1361_v15 }
 0x156   : > { %1646 = vst.msk [vmem:[#allocation3 + $0x10] sm:$0xff] %vm1643_vm10, %v1552_v38  ;;  %1949 = vrot.lane.b32.xlu0 %v2455_v9, %s6664_s12  ;;  %2527 = vrot.lane.b32.xlu1 %v2456_v48, %s4581_s26  ;;  %v847_v0 = vadd.f32 %v5208_v58, %v809_v14  ;;  %v944_v38 = vsel %vm880_vm7, %v848_v27, %v912_v57  ;;  %v2461_v27 = vld [vmem:[#allocation2 + $0xc2] sm:$0xff] }
 0x157   : > { %1022 = vst.msk [vmem:[#allocation2 + $0x111] sm:$0xff] %vm543_vm0, %v944_v38 }
 0x158   : > { %v2130_v47 = vpop.permute.xlu0 %2129  ;;  %v2321_v52 = vpop.permute.xlu1 %2320  ;;  %vm879_vm6 = vcmp.gt.f32.partialorder %v847_v0, 0.0 }
 0x159   : > { %2225 = vst.msk [vmem:[#allocation3 + $0x8] sm:$0xff] %vm2223_vm13, %v2130_v47 }
 0x15a   : > { %2417 = vst.msk [vmem:[#allocation3] sm:$0xff] %vm2416_vm15, %v2321_v52  ;;  %1183 = vrot.lane.b32.xlu0 %v2263_v2, %s4575_s24  ;;  %1374 = vrot.lane.b32.xlu1 %v2455_v9, %s4574_s23  ;;  %v5493_v4 = vld [vmem:[#allocation2 + $0xf0] sm:$0xff]  ;;  %v5508_v61 = vld [vmem:[#allocation2 + $0xf8] sm:$0xff]  ;;  %v911_v2 = vmul.f32 0.2, %v847_v0 }
 0x15b   : > { %1085 = vst.msk [vmem:[#allocation3 + $0xa0] sm:$0xff] %vm543_vm0, %v5493_v4  ;;  %1086 = vst.msk [vmem:[#allocation3 + $0xa8] sm:$0xff] %vm543_vm0, %v5508_v61 }
 0x15c   : > { %v1554_v39 = vpop.permute.xlu0 %1553  ;;  %v1745_v40 = vpop.permute.xlu1 %1744  ;;  %v943_v33 = vsel %vm879_vm6, %v847_v0, %v911_v2 }
 0x15d   : > { %1647 = vst.msk [vmem:[#allocation3 + $0x18] sm:$0xff] %vm1643_vm10, %v1554_v39 }
 0x15e   : > { %1839 = vst.msk [vmem:[#allocation3 + $0x10] sm:$0xff] %vm1836_vm11, %v1745_v40  ;;  %1951 = vrot.lane.b32.xlu0 %v2456_v48, %s6664_s12  ;;  %2143 = vrot.lane.b32.xlu1 %v5306_v43, %s4579_s19  ;;  %v2267_v40 = vld [vmem:[#allocation2 + $0xb1] sm:$0xff] }
 0x15f   : > { %1021 = vst.msk [vmem:[#allocation2 + $0x109] sm:$0xff] %vm543_vm0, %v943_v33 }
 0x160   : > { %v2323_v7 = vpop.permute.xlu0 %2322  ;;  %v2514_v11 = vpop.permute.xlu1 %2513 }
 0x161   : > { %2418 = vst.msk [vmem:[#allocation3 + $0x8] sm:$0xff] %vm2416_vm15, %v2323_v7 }
 0x162   : > { %2610 = vst.msk [vmem:[#allocation3] sm:$0xff] %vm6667_vm2, %v2514_v11  ;;  %1376 = vrot.lane.b32.xlu0 %v2456_v48, %s4574_s23  ;;  %1567 = vrot.lane.b32.xlu1 %v5306_v43, %s4576_s29 }
 0x164   : > { %v1170_v59 = vpop.permute.xlu0 %1169  ;;  %v1747_v32 = vpop.permute.xlu1 %1746 }
 0x165   : > { %1262 = vst.msk [vmem:[#allocation3 + $0x20] sm:$0xff] %vm1257_vm3, %v1170_v59 }
 0x166   : > { %1840 = vst.msk [vmem:[#allocation3 + $0x18] sm:$0xff] %vm1836_vm11, %v1747_v32  ;;  %2145 = vrot.lane.b32.xlu0 %v5327_v6, %s4579_s19  ;;  %2336 = vrot.lane.b32.xlu1 %v2264_v19, %s4580_s15  ;;  %v5549_v15 = vld [vmem:[#allocation2 + $0x108] sm:$0xff]  ;;  %v5564_v55 = vld [vmem:[#allocation2 + $0x110] sm:$0xff] }
 0x167   : > { %1087 = vst.msk [vmem:[#allocation3 + $0xb0] sm:$0xff] %vm543_vm0, %v5549_v15  ;;  %1088 = vst.msk [vmem:[#allocation3 + $0xb8] sm:$0xff] %vm543_vm0, %v5564_v55 }
 0x168   : > { %v1938_v42 = vpop.permute.xlu0 %1937  ;;  %v2516_v43 = vpop.permute.xlu1 %2515 }
 0x169   : > { %v2642_v21 = vld [vmem:[#allocation3] sm:$0xff]  ;;  %2032 = vst.msk [vmem:[#allocation3 + $0x10] sm:$0xff] %vm2029_vm12, %v1938_v42 }
 0x16a   : > { %2611 = vst.msk [vmem:[#allocation3 + $0x8] sm:$0xff] %vm6667_vm2, %v2516_v43  ;;  %4295 = vmatprep.mubr.msk.f32.mxu1 %vm6666_vm5, %v2642_v21  ;;  %1569 = vrot.lane.b32.xlu0 %v5327_v6, %s4576_s29 }
 0x16b   : > { %1760 = vrot.lane.b32.xlu1 %v2264_v19, %s4577_s30 }
 0x16c   : > { %v1172_v45 = vpop.permute.xlu0 %1171  ;;  %v1363_v3 = vpop.permute.xlu1 %1362 }
 0x16d   : > { %1263 = vst.msk [vmem:[#allocation3 + $0x28] sm:$0xff] %vm1257_vm3, %v1172_v45 }
 0x16e   : > { %1455 = vst.msk [vmem:[#allocation3 + $0x20] sm:$0xff] %vm1450_vm4, %v1363_v3  ;;  %2338 = vrot.lane.b32.xlu0 %v2265_v62, %s4580_s15  ;;  %v774_v3 = vmul.f32 %v5188_v49, %v5115_v63 }
 0x16f   : > { %2529 = vrot.lane.b32.xlu1 %v2457_v12, %s4581_s26 }
 0x170   : > { %v1940_v6 = vpop.permute.xlu0 %1939  ;;  %v2132_v24 = vpop.permute.xlu1 %2131  ;;  %v812_v30 = vmul.f32 %v5193_v50, %v774_v3 }
 0x171   : > { %v2643_v18 = vld [vmem:[#allocation3 + $0x8] sm:$0xff]  ;;  %2033 = vst.msk [vmem:[#allocation3 + $0x18] sm:$0xff] %vm2029_vm12, %v1940_v6 }
 0x172   : > { %2226 = vst.msk [vmem:[#allocation3 + $0x10] sm:$0xff] %vm2223_vm13, %v2132_v24  ;;  %4296 = vmatmul.mubr.msk.f32.vlgmr.msra.gmra.mrb[0].mxu1 %vm6666_vm5, %v2643_v18  ;;  %1185 = vrot.lane.b32.xlu0 %v2264_v19, %s4575_s24  ;;  %v773_v19 = vmul.f32 %v5188_v49, %v5108_v60  ;;  %v2460_v60 = vld [vmem:[#allocation2 + $0xb2] sm:$0xff]  ;;  %v850_v24 = vadd.f32 %v5208_v58, %v812_v30 }
 0x173   : > { %1762 = vrot.lane.b32.xlu1 %v2265_v62, %s4577_s30 }
 0x174   : > { %v1365_v9 = vpop.permute.xlu0 %1364  ;;  %v1556_v23 = vpop.permute.xlu1 %1555  ;;  %v811_v59 = vmul.f32 %v5193_v50, %v773_v19  ;;  %v914_v63 = vmul.f32 0.2, %v850_v24  ;;  %vm882_vm9 = vcmp.gt.f32.partialorder %v850_v24, 0.0 }
 0x175   : > { %1456 = vst.msk [vmem:[#allocation3 + $0x28] sm:$0xff] %vm1450_vm4, %v1365_v9  ;;  %v2268_v9 = vld [vmem:[#allocation2 + $0xc1] sm:$0xff] }
 0x176   : > { %1648 = vst.msk [vmem:[#allocation3 + $0x20] sm:$0xff] %vm1643_vm10, %v1556_v23  ;;  %1953 = vrot.lane.b32.xlu0 %v2457_v12, %s6664_s12  ;;  %v849_v43 = vadd.f32 %v5208_v58, %v811_v59 }
 0x177   : > { %2531 = vrot.lane.b32.xlu1 %v2458_v54, %s4581_s26 }
 0x178   : > { %v2134_v34 = vpop.permute.xlu0 %2133  ;;  %v2325_v10 = vpop.permute.xlu1 %2324  ;;  %v913_v21 = vmul.f32 0.2, %v849_v43  ;;  %vm881_vm8 = vcmp.gt.f32.partialorder %v849_v43, 0.0 }
 0x179   : > { %2227 = vst.msk [vmem:[#allocation3 + $0x18] sm:$0xff] %vm2223_vm13, %v2134_v34 }
 0x17a   : > { %2419 = vst.msk [vmem:[#allocation3 + $0x10] sm:$0xff] %vm2416_vm15, %v2325_v10  ;;  %1187 = vrot.lane.b32.xlu0 %v2265_v62, %s4575_s24  ;;  %v945_v45 = vsel %vm881_vm8, %v849_v43, %v913_v21  ;;  %v2269_v10 = vld [vmem:[#allocation2 + $0xc9] sm:$0xff] }
 0x17b   : > { %1378 = vrot.lane.b32.xlu1 %v2457_v12, %s4574_s23  ;;  %1023 = vst.msk [vmem:[#allocation2 + $0x121] sm:$0xff] %vm543_vm0, %v945_v45 }
 0x17c   : > { %v1558_v48 = vpop.permute.xlu0 %1557  ;;  %v1749_v37 = vpop.permute.xlu1 %1748 }
 0x17d   : > { %1649 = vst.msk [vmem:[#allocation3 + $0x28] sm:$0xff] %vm1643_vm10, %v1558_v48 }
 0x17e   : > { %1841 = vst.msk [vmem:[#allocation3 + $0x20] sm:$0xff] %vm1836_vm11, %v1749_v37  ;;  %1955 = vrot.lane.b32.xlu0 %v2458_v54, %s6664_s12  ;;  %v775_v37 = vmul.f32 %v5188_v49, %v5122_v5  ;;  %v5651_v5 = vld [vmem:[%s6657_s5] ss:$0 sm:$0xff] }
 0x17f   : > { %2147 = vrot.lane.b32.xlu1 %v5363_v20, %s4579_s19 }
 0x180   : > { %v2327_v41 = vpop.permute.xlu0 %2326  ;;  %v2518_v46 = vpop.permute.xlu1 %2517 }
 0x181   : > { %2420 = vst.msk [vmem:[#allocation3 + $0x18] sm:$0xff] %vm2416_vm15, %v2327_v41 }
 0x182   : > { %2612 = vst.msk [vmem:[#allocation3 + $0x10] sm:$0xff] %vm6667_vm2, %v2518_v46  ;;  %1380 = vrot.lane.b32.xlu0 %v2458_v54, %s4574_s23  ;;  %v5605_v50 = vld [vmem:[#allocation2 + $0x120] sm:$0xff]  ;;  %v946_v54 = vsel %vm882_vm9, %v850_v24, %v914_v63 }
 0x183   : > { %1571 = vrot.lane.b32.xlu1 %v5363_v20, %s4576_s29  ;;  %1024 = vst.msk [vmem:[#allocation2 + $0x129] sm:$0xff] %vm543_vm0, %v946_v54  ;;  %1089 = vst.msk [vmem:[#allocation3 + $0xc0] sm:$0xff] %vm543_vm0, %v5605_v50  ;;  %v2463_v24 = vld [vmem:[#allocation2 + $0xda] sm:$0xff] }
 0x184   : > { %v1174_v47 = vpop.permute.xlu0 %1173  ;;  %v1751_v52 = vpop.permute.xlu1 %1750 }
 0x185   : > { %1264 = vst.msk [vmem:[#allocation3 + $0x30] sm:$0xff] %vm1257_vm3, %v1174_v47 }
 0x186   : > { %1842 = vst.msk [vmem:[#allocation3 + $0x28] sm:$0xff] %vm1836_vm11, %v1751_v52  ;;  %2149 = vrot.lane.b32.xlu0 %v5374_v25, %s4579_s19  ;;  %v2462_v52 = vld [vmem:[#allocation2 + $0xca] sm:$0xff] }
 0x187   : > { %2340 = vrot.lane.b32.xlu1 %v2266_v36, %s4580_s15 }
 0x188   : > { %v1942_v51 = vpop.permute.xlu0 %1941  ;;  %v2520_v39 = vpop.permute.xlu1 %2519 }
 0x189   : > { %v2644_v20 = vld [vmem:[#allocation3 + $0x10] sm:$0xff]  ;;  %2034 = vst.msk [vmem:[#allocation3 + $0x20] sm:$0xff] %vm2029_vm12, %v1942_v51 }
 0x18a   : > { %2613 = vst.msk [vmem:[#allocation3 + $0x18] sm:$0xff] %vm6667_vm2, %v2520_v39  ;;  %4298 = vmatprep.mubr.msk.f32.mxu1 %vm6666_vm5, %v2644_v20  ;;  %1573 = vrot.lane.b32.xlu0 %v5374_v25, %s4576_s29  ;;  %v5620_v28 = vld [vmem:[#allocation2 + $0x128] sm:$0xff] }
 0x18b   : > { %1764 = vrot.lane.b32.xlu1 %v2266_v36, %s4577_s30  ;;  %1090 = vst.msk [vmem:[#allocation3 + $0xc8] sm:$0xff] %vm543_vm0, %v5620_v28 }
 0x18c   : > { %v1176_v7 = vpop.permute.xlu0 %1175  ;;  %v1367_v11 = vpop.permute.xlu1 %1366 }
 0x18d   : > { %1265 = vst.msk [vmem:[#allocation3 + $0x38] sm:$0xff] %vm1257_vm3, %v1176_v7 }
 0x18e   : > { %1457 = vst.msk [vmem:[#allocation3 + $0x30] sm:$0xff] %vm1450_vm4, %v1367_v11  ;;  %2342 = vrot.lane.b32.xlu0 %v2267_v40, %s4580_s15 }
 0x18f   : > { %2533 = vrot.lane.b32.xlu1 %v2459_v16, %s4581_s26 }
 0x190   : > { %v1944_v25 = vpop.permute.xlu0 %1943  ;;  %v2136_v32 = vpop.permute.xlu1 %2135 }
 0x191   : > { %v2645_v42 = vld [vmem:[#allocation3 + $0x18] sm:$0xff]  ;;  %2035 = vst.msk [vmem:[#allocation3 + $0x28] sm:$0xff] %vm2029_vm12, %v1944_v25 }
 0x192   : > { %2228 = vst.msk [vmem:[#allocation3 + $0x20] sm:$0xff] %vm2223_vm13, %v2136_v32  ;;  %4299 = vmatmul.mubr.msk.f32.gmra.mrb[2].mxu1 %vm6666_vm5, %v2645_v42  ;;  %1189 = vrot.lane.b32.xlu0 %v2266_v36, %s4575_s24 }
 0x193   : > { %1766 = vrot.lane.b32.xlu1 %v2267_v40, %s4577_s30 }
 0x194   : > { %v1369_v62 = vpop.permute.xlu0 %1368  ;;  %v1560_v12 = vpop.permute.xlu1 %1559 }
 0x195   : > { %1458 = vst.msk [vmem:[#allocation3 + $0x38] sm:$0xff] %vm1450_vm4, %v1369_v62  ;;  %v2270_v62 = vld [vmem:[#allocation2 + $0xd9] sm:$0xff] }
 0x196   : > { %1650 = vst.msk [vmem:[#allocation3 + $0x30] sm:$0xff] %vm1643_vm10, %v1560_v12  ;;  %1957 = vrot.lane.b32.xlu0 %v2459_v16, %s6664_s12 }
 0x197   : > { %2535 = vrot.lane.b32.xlu1 %v2460_v60, %s4581_s26 }
 0x198   : > { %v2138_v14 = vpop.permute.xlu0 %2137  ;;  %v2329_v6 = vpop.permute.xlu1 %2328 }
 0x199   : > { %2229 = vst.msk [vmem:[#allocation3 + $0x28] sm:$0xff] %vm2223_vm13, %v2138_v14 }
 0x19a   : > { %2421 = vst.msk [vmem:[#allocation3 + $0x20] sm:$0xff] %vm2416_vm15, %v2329_v6  ;;  %1191 = vrot.lane.b32.xlu0 %v2267_v40, %s4575_s24  ;;  %v2271_v6 = vld [vmem:[#allocation2 + $0xe1] sm:$0xff] }
 0x19b   : > { %1382 = vrot.lane.b32.xlu1 %v2459_v16, %s4574_s23  ;;  %v776_v16 = vmul.f32 %v5188_v49, %v5129_v8 }
 0x19c   : > { %v1562_v18 = vpop.permute.xlu0 %1561  ;;  %v1753_v0 = vpop.permute.xlu1 %1752 }
 0x19d   : > { %1651 = vst.msk [vmem:[#allocation3 + $0x38] sm:$0xff] %vm1643_vm10, %v1562_v18 }
 0x19e   : > { %1843 = vst.msk [vmem:[#allocation3 + $0x30] sm:$0xff] %vm1836_vm11, %v1753_v0  ;;  %1959 = vrot.lane.b32.xlu0 %v2460_v60, %s6664_s12  ;;  %v777_v0 = vmul.f32 %v5188_v49, %v5136_v13 }
 0x19f   : > { %2151 = vrot.lane.b32.xlu1 %v5401_v53, %s4579_s19 }
 0x1a0   : > { %v2331_v58 = vpop.permute.xlu0 %2330  ;;  %v2522_v2 = vpop.permute.xlu1 %2521 }
 0x1a1   : > { %2422 = vst.msk [vmem:[#allocation3 + $0x28] sm:$0xff] %vm2416_vm15, %v2331_v58 }
 0x1a2   : > { %2614 = vst.msk [vmem:[#allocation3 + $0x20] sm:$0xff] %vm6667_vm2, %v2522_v2  ;;  %1384 = vrot.lane.b32.xlu0 %v2460_v60, %s4574_s23 }
 0x1a3   : > { %1575 = vrot.lane.b32.xlu1 %v5401_v53, %s4576_s29 }
 0x1a4   : > { %v1178_v23 = vpop.permute.xlu0 %1177  ;;  %v1755_v33 = vpop.permute.xlu1 %1754 }
 0x1a5   : > { %1266 = vst.msk [vmem:[#allocation3 + $0x40] sm:$0xff] %vm1257_vm3, %v1178_v23  ;;  %v2464_v23 = vld [vmem:[#allocation2 + $0xe2] sm:$0xff] }
 0x1a6   : > { %1844 = vst.msk [vmem:[#allocation3 + $0x38] sm:$0xff] %vm1836_vm11, %v1755_v33  ;;  %2153 = vrot.lane.b32.xlu0 %v5412_v56, %s4579_s19 }
 0x1a7   : > { %2344 = vrot.lane.b32.xlu1 %v2268_v9, %s4580_s15 }
 0x1a8   : > { %v1946_v29 = vpop.permute.xlu0 %1945  ;;  %v2524_v34 = vpop.permute.xlu1 %2523 }
 0x1a9   : > { %v2646_v53 = vld [vmem:[#allocation3 + $0x20] sm:$0xff]  ;;  %2036 = vst.msk [vmem:[#allocation3 + $0x30] sm:$0xff] %vm2029_vm12, %v1946_v29 }
 0x1aa   : > { %2615 = vst.msk [vmem:[#allocation3 + $0x28] sm:$0xff] %vm6667_vm2, %v2524_v34  ;;  %4301 = vmatprep.mubr.msk.f32.mxu1 %vm6666_vm5, %v2646_v53  ;;  %1577 = vrot.lane.b32.xlu0 %v5412_v56, %s4576_s29  ;;  %v5642_v56 = vld [vmem:[%s6656_s4] ss:$0 sm:$0xff]  ;;  %v778_v53 = vmul.f32 %v5188_v49, %v5143_v17 }
 0x1ab   : > { %1768 = vrot.lane.b32.xlu1 %v2268_v9, %s4577_s30  ;;  %v813_v38 = vmul.f32 %v5642_v56, %v775_v37  ;;  %v814_v19 = vmul.f32 %v5642_v56, %v776_v16  ;;  %v815_v2 = vmul.f32 %v5642_v56, %v777_v0 }
 0x1ac   : > { %v1180_v57 = vpop.permute.xlu0 %1179  ;;  %v1371_v48 = vpop.permute.xlu1 %1370 }
 0x1ad   : > { %1267 = vst.msk [vmem:[#allocation3 + $0x48] sm:$0xff] %vm1257_vm3, %v1180_v57  ;;  %v851_v47 = vadd.f32 %v5651_v5, %v813_v38  ;;  %v852_v59 = vadd.f32 %v5651_v5, %v814_v19  ;;  %v816_v57 = vmul.f32 %v5642_v56, %v778_v53  ;;  %v2467_v53 = vld [vmem:[#allocation2 + $0x10a] sm:$0xff] }
 0x1ae   : > { %1459 = vst.msk [vmem:[#allocation3 + $0x40] sm:$0xff] %vm1450_vm4, %v1371_v48  ;;  %2346 = vrot.lane.b32.xlu0 %v2269_v10, %s4580_s15 }
 0x1af   : > { %2537 = vrot.lane.b32.xlu1 %v2461_v27, %s4581_s26  ;;  %v915_v51 = vmul.f32 0.2, %v851_v47  ;;  %vm883_vm14 = vcmp.gt.f32.partialorder %v851_v47, 0.0  ;;  %v916_v42 = vmul.f32 0.2, %v852_v59  ;;  %vm884_vm1 = vcmp.gt.f32.partialorder %v852_v59, 0.0 }
 0x1b0   : > { %v1948_v41 = vpop.permute.xlu0 %1947  ;;  %v2140_v46 = vpop.permute.xlu1 %2139  ;;  %v854_v48 = vadd.f32 %v5651_v5, %v816_v57  ;;  %v781_v57 = vmul.f32 %v5188_v49, %v5164_v31 }
 0x1b1   : > { %v2647_v36 = vld [vmem:[#allocation3 + $0x28] sm:$0xff]  ;;  %2037 = vst.msk [vmem:[#allocation3 + $0x38] sm:$0xff] %vm2029_vm12, %v1948_v41  ;;  %v947_v40 = vsel %vm883_vm14, %v851_v47, %v915_v51  ;;  %v948_v43 = vsel %vm884_vm1, %v852_v59, %v916_v42 }
 0x1b2   : > { %2230 = vst.msk [vmem:[#allocation3 + $0x30] sm:$0xff] %vm2223_vm13, %v2140_v46  ;;  %4302 = vmatmul.mubr.msk.f32.gmra.mrb[4].mxu1 %vm6666_vm5, %v2647_v36  ;;  %1193 = vrot.lane.b32.xlu0 %v2268_v9, %s4575_s24  ;;  %v853_v9 = vadd.f32 %v5651_v5, %v815_v2  ;;  %v918_v41 = vmul.f32 0.2, %v854_v48  ;;  %vm886_vm7 = vcmp.gt.f32.partialorder %v854_v48, 0.0  ;;  %v2274_v2 = vld [vmem:[#allocation2 + $0x109] sm:$0xff] }
 0x1b3   : > { %1770 = vrot.lane.b32.xlu1 %v2269_v10, %s4577_s30  ;;  %1025 = vst.msk [vmem:[#allocation2 + $0x139] sm:$0xff] %vm543_vm0, %v947_v40  ;;  %1026 = vst.msk [vmem:[#allocation2 + $0x141] sm:$0xff] %vm543_vm0, %v948_v43 }
 0x1b4   : > { %v1373_v39 = vpop.permute.xlu0 %1372  ;;  %v1564_v20 = vpop.permute.xlu1 %1563  ;;  %v917_v29 = vmul.f32 0.2, %v853_v9  ;;  %vm885_vm6 = vcmp.gt.f32.partialorder %v853_v9, 0.0  ;;  %v950_v46 = vsel %vm886_vm7, %v854_v48, %v918_v41  ;;  %v2468_v41 = vld [vmem:[#allocation2 + $0x112] sm:$0xff] }
 0x1b5   : > { %1460 = vst.msk [vmem:[#allocation3 + $0x48] sm:$0xff] %vm1450_vm4, %v1373_v39 }
 0x1b6   : > { %1652 = vst.msk [vmem:[#allocation3 + $0x40] sm:$0xff] %vm1643_vm10, %v1564_v20  ;;  %1961 = vrot.lane.b32.xlu0 %v2461_v27, %s6664_s12  ;;  %v949_v34 = vsel %vm885_vm6, %v853_v9, %v917_v29 }
 0x1b7   : > { %2539 = vrot.lane.b32.xlu1 %v2462_v52, %s4581_s26  ;;  %1027 = vst.msk [vmem:[#allocation2 + $0x151] sm:$0xff] %vm543_vm0, %v949_v34  ;;  %1028 = vst.msk [vmem:[#allocation2 + $0x159] sm:$0xff] %vm543_vm0, %v950_v46  ;;  %v2275_v34 = vld [vmem:[#allocation2 + $0x111] sm:$0xff] }
 0x1b8   : > { %v2142_v7 = vpop.permute.xlu0 %2141  ;;  %v2333_v11 = vpop.permute.xlu1 %2332 }
 0x1b9   : > { %2231 = vst.msk [vmem:[#allocation3 + $0x38] sm:$0xff] %vm2223_vm13, %v2142_v7  ;;  %v2273_v7 = vld [vmem:[#allocation2 + $0xf9] sm:$0xff] }
 0x1ba   : > { %2423 = vst.msk [vmem:[#allocation3 + $0x30] sm:$0xff] %vm2416_vm15, %v2333_v11  ;;  %1195 = vrot.lane.b32.xlu0 %v2269_v10, %s4575_s24  ;;  %v5671_v8 = vld [vmem:[#allocation2 + $0x138] sm:$0xff]  ;;  %v5689_v3 = vld [vmem:[#allocation2 + $0x140] sm:$0xff] }
 0x1bb   : > { %1386 = vrot.lane.b32.xlu1 %v2461_v27, %s4574_s23  ;;  %1091 = vst.msk [vmem:[#allocation3 + $0xd0] sm:$0xff] %vm543_vm0, %v5671_v8  ;;  %1092 = vst.msk [vmem:[#allocation3 + $0xd8] sm:$0xff] %vm543_vm0, %v5689_v3  ;;  %v2465_v11 = vld [vmem:[#allocation2 + $0xf2] sm:$0xff] }
 0x1bc   : > { %v1566_v25 = vpop.permute.xlu0 %1565  ;;  %v1757_v32 = vpop.permute.xlu1 %1756 }
 0x1bd   : > { %1653 = vst.msk [vmem:[#allocation3 + $0x48] sm:$0xff] %vm1643_vm10, %v1566_v25  ;;  %v779_v25 = vmul.f32 %v5188_v49, %v5150_v22 }
 0x1be   : > { %1845 = vst.msk [vmem:[#allocation3 + $0x40] sm:$0xff] %vm1836_vm11, %v1757_v32  ;;  %1963 = vrot.lane.b32.xlu0 %v2462_v52, %s6664_s12  ;;  %v5730_v17 = vld [vmem:[#allocation2 + $0x150] sm:$0xff]  ;;  %v5745_v20 = vld [vmem:[#allocation2 + $0x158] sm:$0xff] }
 0x1bf   : > { %2155 = vrot.lane.b32.xlu1 %v5439_v1, %s4579_s19  ;;  %1093 = vst.msk [vmem:[#allocation3 + $0xe0] sm:$0xff] %vm543_vm0, %v5730_v17  ;;  %1094 = vst.msk [vmem:[#allocation3 + $0xe8] sm:$0xff] %vm543_vm0, %v5745_v20  ;;  %v817_v43 = vmul.f32 %v5642_v56, %v779_v25 }
 0x1c0   : > { %v2335_v60 = vpop.permute.xlu0 %2334  ;;  %v2526_v21 = vpop.permute.xlu1 %2525 }
 0x1c1   : > { %2424 = vst.msk [vmem:[#allocation3 + $0x38] sm:$0xff] %vm2416_vm15, %v2335_v60  ;;  %v855_v60 = vadd.f32 %v5651_v5, %v817_v43  ;;  %v2469_v43 = vld [vmem:[#allocation2 + $0x122] sm:$0xff] }
 0x1c2   : > { %2616 = vst.msk [vmem:[#allocation3 + $0x30] sm:$0xff] %vm6667_vm2, %v2526_v21  ;;  %1388 = vrot.lane.b32.xlu0 %v2462_v52, %s4574_s23  ;;  %v2272_v52 = vld [vmem:[#allocation2 + $0xf1] sm:$0xff]  ;;  %v2466_v21 = vld [vmem:[#allocation2 + $0xfa] sm:$0xff] }
 0x1c3   : > { %1579 = vrot.lane.b32.xlu1 %v5439_v1, %s4576_s29  ;;  %vm887_vm8 = vcmp.gt.f32.partialorder %v855_v60, 0.0 }
 0x1c4   : > { %v1182_v12 = vpop.permute.xlu0 %1181  ;;  %v1759_v45 = vpop.permute.xlu1 %1758 }
 0x1c5   : > { %1268 = vst.msk [vmem:[#allocation3 + $0x50] sm:$0xff] %vm1257_vm3, %v1182_v12  ;;  %v919_v12 = vmul.f32 0.2, %v855_v60 }
 0x1c6   : > { %1846 = vst.msk [vmem:[#allocation3 + $0x48] sm:$0xff] %vm1836_vm11, %v1759_v45  ;;  %2157 = vrot.lane.b32.xlu0 %v5454_v44, %s4579_s19 }
 0x1c7   : > { %2348 = vrot.lane.b32.xlu1 %v2270_v62, %s4580_s15  ;;  %v951_v45 = vsel %vm887_vm8, %v855_v60, %v919_v12 }
 0x1c8   : > { %v1950_v30 = vpop.permute.xlu0 %1949  ;;  %v2528_v14 = vpop.permute.xlu1 %2527  ;;  %1029 = vst.msk [vmem:[#allocation2 + $0x169] sm:$0xff] %vm543_vm0, %v951_v45 }
 0x1c9   : > { %v2648_v1 = vld [vmem:[#allocation3 + $0x30] sm:$0xff]  ;;  %2038 = vst.msk [vmem:[#allocation3 + $0x40] sm:$0xff] %vm2029_vm12, %v1950_v30  ;;  %v780_v30 = vmul.f32 %v5188_v49, %v5157_v26 }
 0x1ca   : > { %2617 = vst.msk [vmem:[#allocation3 + $0x38] sm:$0xff] %vm6667_vm2, %v2528_v14  ;;  %4304 = vmatprep.mubr.msk.f32.mxu1 %vm6666_vm5, %v2648_v1  ;;  %1581 = vrot.lane.b32.xlu0 %v5454_v44, %s4576_s29 }
 0x1cb   : > { %1772 = vrot.lane.b32.xlu1 %v2270_v62, %s4577_s30 }
 0x1cc   : > { %v1184_v63 = vpop.permute.xlu0 %1183  ;;  %v1375_v18 = vpop.permute.xlu1 %1374 }
 0x1cd   : > { %1269 = vst.msk [vmem:[#allocation3 + $0x58] sm:$0xff] %vm1257_vm3, %v1184_v63 }
 0x1ce   : > { %1461 = vst.msk [vmem:[#allocation3 + $0x50] sm:$0xff] %vm1450_vm4, %v1375_v18  ;;  %2350 = vrot.lane.b32.xlu0 %v2271_v6, %s4580_s15 }
 0x1cf   : > { %2541 = vrot.lane.b32.xlu1 %v2463_v24, %s4581_s26  ;;  %v5786_v26 = vld [vmem:[#allocation2 + $0x168] sm:$0xff] }
 0x1d0   : > { %v1952_v54 = vpop.permute.xlu0 %1951  ;;  %v2144_v58 = vpop.permute.xlu1 %2143  ;;  %1095 = vst.msk [vmem:[#allocation3 + $0xf0] sm:$0xff] %vm543_vm0, %v5786_v26 }
 0x1d1   : > { %v2649_v44 = vld [vmem:[#allocation3 + $0x38] sm:$0xff]  ;;  %2039 = vst.msk [vmem:[#allocation3 + $0x48] sm:$0xff] %vm2029_vm12, %v1952_v54 }
 0x1d2   : > { %2232 = vst.msk [vmem:[#allocation3 + $0x40] sm:$0xff] %vm2223_vm13, %v2144_v58  ;;  %4305 = vmatmul.mubr.msk.f32.gmra.mrb[6].mxu1 %vm6666_vm5, %v2649_v44  ;;  %1197 = vrot.lane.b32.xlu0 %v2270_v62, %s4575_s24 }
 0x1d3   : > { %1774 = vrot.lane.b32.xlu1 %v2271_v6, %s4577_s30 }
 0x1d4   : > { %v1377_v33 = vpop.permute.xlu0 %1376  ;;  %v1568_v13 = vpop.permute.xlu1 %1567 }
 0x1d5   : > { %1462 = vst.msk [vmem:[#allocation3 + $0x58] sm:$0xff] %vm1450_vm4, %v1377_v33 }
 0x1d6   : > { %1654 = vst.msk [vmem:[#allocation3 + $0x50] sm:$0xff] %vm1643_vm10, %v1568_v13  ;;  %1965 = vrot.lane.b32.xlu0 %v2463_v24, %s6664_s12 }
 0x1d7   : > { %2543 = vrot.lane.b32.xlu1 %v2464_v23, %s4581_s26 }
 0x1d8   : > { %v2146_v10 = vpop.permute.xlu0 %2145  ;;  %v2337_v27 = vpop.permute.xlu1 %2336 }
 0x1d9   : > { %2233 = vst.msk [vmem:[#allocation3 + $0x48] sm:$0xff] %vm2223_vm13, %v2146_v10 }
 0x1da   : > { %2425 = vst.msk [vmem:[#allocation3 + $0x40] sm:$0xff] %vm2416_vm15, %v2337_v27  ;;  %1199 = vrot.lane.b32.xlu0 %v2271_v6, %s4575_s24  ;;  %v818_v6 = vmul.f32 %v5642_v56, %v780_v30 }
 0x1db   : > { %1390 = vrot.lane.b32.xlu1 %v2463_v24, %s4574_s23 }
 0x1dc   : > { %v1570_v37 = vpop.permute.xlu0 %1569  ;;  %v856_v24 = vadd.f32 %v5651_v5, %v818_v6 }
 0x1dd   : > { %v1761_v38 = vpop.permute.xlu1 %1760  ;;  %1655 = vst.msk [vmem:[#allocation3 + $0x58] sm:$0xff] %vm1643_vm10, %v1570_v37 }
 0x1de   : > { %1847 = vst.msk [vmem:[#allocation3 + $0x50] sm:$0xff] %vm1836_vm11, %v1761_v38  ;;  %1967 = vrot.lane.b32.xlu0 %v2464_v23, %s6664_s12  ;;  %v920_v0 = vmul.f32 0.2, %v856_v24  ;;  %vm888_vm9 = vcmp.gt.f32.partialorder %v856_v24, 0.0  ;;  %v819_v38 = vmul.f32 %v5642_v56, %v781_v57 }
 0x1df   : > { %2159 = vrot.lane.b32.xlu1 %v5493_v4, %s4579_s19 }
 0x1e0   : > { %v2339_v36 = vpop.permute.xlu0 %2338  ;;  %v952_v54 = vsel %vm888_vm9, %v856_v24, %v920_v0  ;;  %v857_v46 = vadd.f32 %v5651_v5, %v819_v38  ;;  %v5889_v0 = vld [vmem:[%s6655_s3] ss:$0 sm:$0xff]  ;;  %v2472_v38 = vld [vmem:[#allocation2 + $0x142] sm:$0xff] }
 0x1e1   : > { %v2530_v47 = vpop.permute.xlu1 %2529  ;;  %2426 = vst.msk [vmem:[#allocation3 + $0x48] sm:$0xff] %vm2416_vm15, %v2339_v36 }
 0x1e2   : > { %2618 = vst.msk [vmem:[#allocation3 + $0x40] sm:$0xff] %vm6667_vm2, %v2530_v47  ;;  %1392 = vrot.lane.b32.xlu0 %v2464_v23, %s4574_s23  ;;  %v921_v47 = vmul.f32 0.2, %v857_v46  ;;  %vm889_vm14 = vcmp.gt.f32.partialorder %v857_v46, 0.0 }
 0x1e3   : > { %1583 = vrot.lane.b32.xlu1 %v5493_v4, %s4576_s29  ;;  %1030 = vst.msk [vmem:[#allocation2 + $0x171] sm:$0xff] %vm543_vm0, %v952_v54  ;;  %v2278_v54 = vld [vmem:[#allocation2 + $0x139] sm:$0xff] }
 0x1e4   : > { %v1186_v51 = vpop.permute.xlu0 %1185 }
 0x1e5   : > { %v1763_v39 = vpop.permute.xlu1 %1762  ;;  %1270 = vst.msk [vmem:[#allocation3 + $0x60] sm:$0xff] %vm1257_vm3, %v1186_v51  ;;  %v953_v51 = vsel %vm889_vm14, %v857_v46, %v921_v47 }
 0x1e6   : > { %1848 = vst.msk [vmem:[#allocation3 + $0x58] sm:$0xff] %vm1836_vm11, %v1763_v39  ;;  %2161 = vrot.lane.b32.xlu0 %v5508_v61, %s4579_s19 }
 0x1e7   : > { %2352 = vrot.lane.b32.xlu1 %v2272_v52, %s4580_s15  ;;  %1031 = vst.msk [vmem:[#allocation2 + $0x181] sm:$0xff] %vm543_vm0, %v953_v51 }
 0x1e8   : > { %v1954_v40 = vpop.permute.xlu0 %1953 }
 0x1e9   : > { %v2532_v16 = vpop.permute.xlu1 %2531  ;;  %v2650_v4 = vld [vmem:[#allocation3 + $0x40] sm:$0xff]  ;;  %2040 = vst.msk [vmem:[#allocation3 + $0x50] sm:$0xff] %vm2029_vm12, %v1954_v40 }
 0x1ea   : > { %2619 = vst.msk [vmem:[#allocation3 + $0x48] sm:$0xff] %vm6667_vm2, %v2532_v16  ;;  %4307 = vmatprep.mubr.msk.f32.mxu1 %vm6666_vm5, %v2650_v4  ;;  %1585 = vrot.lane.b32.xlu0 %v5508_v61, %s4576_s29  ;;  %v5801_v33 = vld [vmem:[#allocation2 + $0x170] sm:$0xff] }
 0x1eb   : > { %1776 = vrot.lane.b32.xlu1 %v2272_v52, %s4577_s30  ;;  %1096 = vst.msk [vmem:[#allocation3 + $0xf8] sm:$0xff] %vm543_vm0, %v5801_v33 }
 0x1ec   : > { %v1188_v19 = vpop.permute.xlu0 %1187 }
 0x1ed   : > { %v1379_v59 = vpop.permute.xlu1 %1378  ;;  %1271 = vst.msk [vmem:[#allocation3 + $0x68] sm:$0xff] %vm1257_vm3, %v1188_v19 }
 0x1ee   : > { %1463 = vst.msk [vmem:[#allocation3 + $0x60] sm:$0xff] %vm1450_vm4, %v1379_v59  ;;  %2354 = vrot.lane.b32.xlu0 %v2273_v7, %s4580_s15 }
 0x1ef   : > { %2545 = vrot.lane.b32.xlu1 %v2465_v11, %s4581_s26 }
 0x1f0   : > { %v1956_v32 = vpop.permute.xlu0 %1955 }
 0x1f1   : > { %v2148_v42 = vpop.permute.xlu1 %2147  ;;  %v2651_v61 = vld [vmem:[#allocation3 + $0x48] sm:$0xff]  ;;  %2041 = vst.msk [vmem:[#allocation3 + $0x58] sm:$0xff] %vm2029_vm12, %v1956_v32 }
 0x1f2   : > { %2234 = vst.msk [vmem:[#allocation3 + $0x50] sm:$0xff] %vm2223_vm13, %v2148_v42  ;;  %4308 = vmatmul.mubr.msk.f32.gmra.mrb[8].mxu1 %vm6666_vm5, %v2651_v61  ;;  %1201 = vrot.lane.b32.xlu0 %v2272_v52, %s4575_s24  ;;  %v782_v52 = vmul.f32 %v5188_v49, %v5171_v35 }
 0x1f3   : > { %1778 = vrot.lane.b32.xlu1 %v2273_v7, %s4577_s30 }
 0x1f4   : > { %v1381_v62 = vpop.permute.xlu0 %1380  ;;  %v820_v16 = vmul.f32 %v5642_v56, %v782_v52 }
 0x1f5   : > { %v1572_v22 = vpop.permute.xlu1 %1571  ;;  %1464 = vst.msk [vmem:[#allocation3 + $0x68] sm:$0xff] %vm1450_vm4, %v1381_v62 }
 0x1f6   : > { %1656 = vst.msk [vmem:[#allocation3 + $0x60] sm:$0xff] %vm1643_vm10, %v1572_v22  ;;  %1969 = vrot.lane.b32.xlu0 %v2465_v11, %s6664_s12  ;;  %v858_v4 = vadd.f32 %v5651_v5, %v820_v16  ;;  %v2276_v5 = vld [vmem:[#allocation2 + $0x121] sm:$0xff]  ;;  %v2280_v16 = vld [vmem:[#allocation2 + $0x151] sm:$0xff] }
 0x1f7   : > { %2547 = vrot.lane.b32.xlu1 %v2466_v21, %s4581_s26 }
 0x1f8   : > { %v2150_v14 = vpop.permute.xlu0 %2149  ;;  %v922_v35 = vmul.f32 0.2, %v858_v4  ;;  %vm890_vm1 = vcmp.gt.f32.partialorder %v858_v4, 0.0 }
 0x1f9   : > { %v2341_v1 = vpop.permute.xlu1 %2340  ;;  %2235 = vst.msk [vmem:[#allocation3 + $0x58] sm:$0xff] %vm2223_vm13, %v2150_v14 }
 0x1fa   : > { %2427 = vst.msk [vmem:[#allocation3 + $0x50] sm:$0xff] %vm2416_vm15, %v2341_v1  ;;  %1203 = vrot.lane.b32.xlu0 %v2273_v7, %s4575_s24  ;;  %v954_v49 = vsel %vm890_vm1, %v858_v4, %v922_v35 }
 0x1fb   : > { %1394 = vrot.lane.b32.xlu1 %v2465_v11, %s4574_s23  ;;  %1032 = vst.msk [vmem:[#allocation2 + $0x189] sm:$0xff] %vm543_vm0, %v954_v49 }
 0x1fc   : > { %v1574_v63 = vpop.permute.xlu0 %1573 }
 0x1fd   : > { %v1765_v18 = vpop.permute.xlu1 %1764  ;;  %1657 = vst.msk [vmem:[#allocation3 + $0x68] sm:$0xff] %vm1643_vm10, %v1574_v63 }
 0x1fe   : > { %1849 = vst.msk [vmem:[#allocation3 + $0x60] sm:$0xff] %vm1836_vm11, %v1765_v18  ;;  %1971 = vrot.lane.b32.xlu0 %v2466_v21, %s6664_s12 }
 0x1ff   : > { %2163 = vrot.lane.b32.xlu1 %v5549_v15, %s4579_s19 }
 0x200   : > { %v2343_v58 = vpop.permute.xlu0 %2342 }
 0x201   : > { %v2534_v44 = vpop.permute.xlu1 %2533  ;;  %2428 = vst.msk [vmem:[#allocation3 + $0x58] sm:$0xff] %vm2416_vm15, %v2343_v58 }
 0x202   : > { %2620 = vst.msk [vmem:[#allocation3 + $0x50] sm:$0xff] %vm6667_vm2, %v2534_v44  ;;  %1396 = vrot.lane.b32.xlu0 %v2466_v21, %s4574_s23 }
 0x203   : > { %1587 = vrot.lane.b32.xlu1 %v5549_v15, %s4576_s29 }
 0x204   : > { %v1190_v9 = vpop.permute.xlu0 %1189 }
 0x205   : > { %v1767_v23 = vpop.permute.xlu1 %1766  ;;  %1272 = vst.msk [vmem:[#allocation3 + $0x70] sm:$0xff] %vm1257_vm3, %v1190_v9 }
 0x206   : > { %1850 = vst.msk [vmem:[#allocation3 + $0x68] sm:$0xff] %vm1836_vm11, %v1767_v23  ;;  %2165 = vrot.lane.b32.xlu0 %v5564_v55, %s4579_s19 }
 0x207   : > { %2356 = vrot.lane.b32.xlu1 %v2274_v2, %s4580_s15 }
 0x208   : > { %v1958_v13 = vpop.permute.xlu0 %1957 }
 0x209   : > { %v2536_v29 = vpop.permute.xlu1 %2535  ;;  %v2652_v15 = vld [vmem:[#allocation3 + $0x50] sm:$0xff]  ;;  %2042 = vst.msk [vmem:[#allocation3 + $0x60] sm:$0xff] %vm2029_vm12, %v1958_v13 }
 0x20a   : > { %2621 = vst.msk [vmem:[#allocation3 + $0x58] sm:$0xff] %vm6667_vm2, %v2536_v29  ;;  %4310 = vmatprep.mubr.msk.f32.mxu1 %vm6666_vm5, %v2652_v15  ;;  %1589 = vrot.lane.b32.xlu0 %v5564_v55, %s4576_s29 }
 0x20b   : > { %1780 = vrot.lane.b32.xlu1 %v2274_v2, %s4577_s30 }
 0x20c   : > { %v1192_v10 = vpop.permute.xlu0 %1191 }
 0x20d   : > { %v1383_v27 = vpop.permute.xlu1 %1382  ;;  %1273 = vst.msk [vmem:[#allocation3 + $0x78] sm:$0xff] %vm1257_vm3, %v1192_v10  ;;  %v2471_v10 = vld [vmem:[#allocation2 + $0x13a] sm:$0xff] }
 0x20e   : > { %1465 = vst.msk [vmem:[#allocation3 + $0x70] sm:$0xff] %vm1450_vm4, %v1383_v27  ;;  %2358 = vrot.lane.b32.xlu0 %v2275_v34, %s4580_s15 }
 0x20f   : > { %2549 = vrot.lane.b32.xlu1 %v2467_v53, %s4581_s26 }
 0x210   : > { %v1960_v48 = vpop.permute.xlu0 %1959 }
 0x211   : > { %v2152_v37 = vpop.permute.xlu1 %2151  ;;  %v2653_v55 = vld [vmem:[#allocation3 + $0x58] sm:$0xff]  ;;  %2043 = vst.msk [vmem:[#allocation3 + $0x68] sm:$0xff] %vm2029_vm12, %v1960_v48 }
 0x212   : > { %2236 = vst.msk [vmem:[#allocation3 + $0x60] sm:$0xff] %vm2223_vm13, %v2152_v37  ;;  %4311 = vmatmul.mubr.msk.f32.gmra.mrb[10].mxu1 %vm6666_vm5, %v2653_v55  ;;  %1205 = vrot.lane.b32.xlu0 %v2274_v2, %s4575_s24 }
 0x213   : > { %1782 = vrot.lane.b32.xlu1 %v2275_v34, %s4577_s30 }
 0x214   : > { %v1385_v36 = vpop.permute.xlu0 %1384 }
 0x215   : > { %v1576_v31 = vpop.permute.xlu1 %1575  ;;  %1466 = vst.msk [vmem:[#allocation3 + $0x78] sm:$0xff] %vm1450_vm4, %v1385_v36 }
 0x216   : > { %1658 = vst.msk [vmem:[#allocation3 + $0x70] sm:$0xff] %vm1643_vm10, %v1576_v31  ;;  %1973 = vrot.lane.b32.xlu0 %v2467_v53, %s6664_s12 }
 0x217   : > { %2551 = vrot.lane.b32.xlu1 %v2468_v41, %s4581_s26 }
 0x218   : > { %v2154_v39 = vpop.permute.xlu0 %2153 }
 0x219   : > { %v2345_v40 = vpop.permute.xlu1 %2344  ;;  %2237 = vst.msk [vmem:[#allocation3 + $0x68] sm:$0xff] %vm2223_vm13, %v2154_v39 }
 0x21a   : > { %2429 = vst.msk [vmem:[#allocation3 + $0x60] sm:$0xff] %vm2416_vm15, %v2345_v40  ;;  %1207 = vrot.lane.b32.xlu0 %v2275_v34, %s4575_s24 }
 0x21b   : > { %1398 = vrot.lane.b32.xlu1 %v2467_v53, %s4574_s23  ;;  %v2279_v53 = vld [vmem:[#allocation2 + $0x141] sm:$0xff] }
 0x21c   : > { %v1578_v7 = vpop.permute.xlu0 %1577 }
 0x21d   : > { %v1769_v11 = vpop.permute.xlu1 %1768  ;;  %1659 = vst.msk [vmem:[#allocation3 + $0x78] sm:$0xff] %vm1643_vm10, %v1578_v7 }
 0x21e   : > { %1851 = vst.msk [vmem:[#allocation3 + $0x70] sm:$0xff] %vm1836_vm11, %v1769_v11  ;;  %1975 = vrot.lane.b32.xlu0 %v2468_v41, %s6664_s12 }
 0x21f   : > { %2167 = vrot.lane.b32.xlu1 %v5605_v50, %s4579_s19 }
 0x220   : > { %v2347_v56 = vpop.permute.xlu0 %2346 }
 0x221   : > { %v2538_v19 = vpop.permute.xlu1 %2537  ;;  %2430 = vst.msk [vmem:[#allocation3 + $0x68] sm:$0xff] %vm2416_vm15, %v2347_v56 }
 0x222   : > { %2622 = vst.msk [vmem:[#allocation3 + $0x60] sm:$0xff] %vm6667_vm2, %v2538_v19  ;;  %1400 = vrot.lane.b32.xlu0 %v2468_v41, %s4574_s23 }
 0x223   : > { %1591 = vrot.lane.b32.xlu1 %v5605_v50, %s4576_s29  ;;  %v2277_v50 = vld [vmem:[#allocation2 + $0x129] sm:$0xff] }
 0x224   : > { %v1194_v59 = vpop.permute.xlu0 %1193 }
 0x225   : > { %v1771_v25 = vpop.permute.xlu1 %1770  ;;  %1274 = vst.msk [vmem:[#allocation3 + $0x80] sm:$0xff] %vm1257_vm3, %v1194_v59 }
 0x226   : > { %1852 = vst.msk [vmem:[#allocation3 + $0x78] sm:$0xff] %vm1836_vm11, %v1771_v25  ;;  %2169 = vrot.lane.b32.xlu0 %v5620_v28, %s4579_s19  ;;  %v2473_v25 = vld [vmem:[#allocation2 + $0x152] sm:$0xff] }
 0x227   : > { %2360 = vrot.lane.b32.xlu1 %v2276_v5, %s4580_s15 }
 0x228   : > { %v1962_v32 = vpop.permute.xlu0 %1961 }
 0x229   : > { %v2540_v42 = vpop.permute.xlu1 %2539  ;;  %v2654_v61 = vld [vmem:[#allocation3 + $0x60] sm:$0xff]  ;;  %2044 = vst.msk [vmem:[#allocation3 + $0x70] sm:$0xff] %vm2029_vm12, %v1962_v32 }
 0x22a   : > { %2623 = vst.msk [vmem:[#allocation3 + $0x68] sm:$0xff] %vm6667_vm2, %v2540_v42  ;;  %4313 = vmatprep.mubr.msk.f32.mxu1 %vm6666_vm5, %v2654_v61  ;;  %1593 = vrot.lane.b32.xlu0 %v5620_v28, %s4576_s29  ;;  %v2470_v28 = vld [vmem:[#allocation2 + $0x12a] sm:$0xff] }
 0x22b   : > { %1784 = vrot.lane.b32.xlu1 %v2276_v5, %s4577_s30 }
 0x22c   : > { %v1196_v60 = vpop.permute.xlu0 %1195 }
 0x22d   : > { %v1387_v21 = vpop.permute.xlu1 %1386  ;;  %1275 = vst.msk [vmem:[#allocation3 + $0x88] sm:$0xff] %vm1257_vm3, %v1196_v60 }
 0x22e   : > { %1467 = vst.msk [vmem:[#allocation3 + $0x80] sm:$0xff] %vm1450_vm4, %v1387_v21  ;;  %2362 = vrot.lane.b32.xlu0 %v2277_v50, %s4580_s15 }
 0x22f   : > { %2553 = vrot.lane.b32.xlu1 %v2469_v43, %s4581_s26 }
 0x230   : > { %v1964_v62 = vpop.permute.xlu0 %1963 }
 0x231   : > { %v2156_v22 = vpop.permute.xlu1 %2155  ;;  %v2655_v12 = vld [vmem:[#allocation3 + $0x68] sm:$0xff]  ;;  %2045 = vst.msk [vmem:[#allocation3 + $0x78] sm:$0xff] %vm2029_vm12, %v1964_v62 }
 0x232   : > { %2238 = vst.msk [vmem:[#allocation3 + $0x70] sm:$0xff] %vm2223_vm13, %v2156_v22  ;;  %4314 = vmatmul.mubr.msk.f32.gmra.mrb[12].mxu1 %vm6666_vm5, %v2655_v12  ;;  %1209 = vrot.lane.b32.xlu0 %v2276_v5, %s4575_s24  ;;  %v2281_v5 = vld [vmem:[#allocation2 + $0x159] sm:$0xff] }
 0x233   : > { %1786 = vrot.lane.b32.xlu1 %v2277_v50, %s4577_s30 }
 0x234   : > { %v1389_v45 = vpop.permute.xlu0 %1388 }
 0x235   : > { %v1580_v30 = vpop.permute.xlu1 %1579  ;;  %1468 = vst.msk [vmem:[#allocation3 + $0x88] sm:$0xff] %vm1450_vm4, %v1389_v45 }
 0x236   : > { %1660 = vst.msk [vmem:[#allocation3 + $0x80] sm:$0xff] %vm1643_vm10, %v1580_v30  ;;  %1977 = vrot.lane.b32.xlu0 %v2469_v43, %s6664_s12 }
 0x237   : > { %2555 = vrot.lane.b32.xlu1 %v2470_v28, %s4581_s26 }
 0x238   : > { %v2158_v14 = vpop.permute.xlu0 %2157 }
 0x239   : > { %v2349_v1 = vpop.permute.xlu1 %2348  ;;  %2239 = vst.msk [vmem:[#allocation3 + $0x78] sm:$0xff] %vm2223_vm13, %v2158_v14 }
 0x23a   : > { %2431 = vst.msk [vmem:[#allocation3 + $0x70] sm:$0xff] %vm2416_vm15, %v2349_v1  ;;  %1211 = vrot.lane.b32.xlu0 %v2277_v50, %s4575_s24  ;;  %v2282_v1 = vld [vmem:[#allocation2 + $0x169] sm:$0xff] }
 0x23b   : > { %1402 = vrot.lane.b32.xlu1 %v2469_v43, %s4574_s23  ;;  %v2474_v43 = vld [vmem:[#allocation2 + $0x15a] sm:$0xff] }
 0x23c   : > { %v1582_v6 = vpop.permute.xlu0 %1581 }
 0x23d   : > { %v1773_v24 = vpop.permute.xlu1 %1772  ;;  %1661 = vst.msk [vmem:[#allocation3 + $0x88] sm:$0xff] %vm1643_vm10, %v1582_v6 }
 0x23e   : > { %1853 = vst.msk [vmem:[#allocation3 + $0x80] sm:$0xff] %vm1836_vm11, %v1773_v24  ;;  %1979 = vrot.lane.b32.xlu0 %v2470_v28, %s6664_s12 }
 0x23f   : > { %2171 = vrot.lane.b32.xlu1 %v5671_v8, %s4579_s19 }
 0x240   : > { %v2351_v63 = vpop.permute.xlu0 %2350 }
 0x241   : > { %v2542_v18 = vpop.permute.xlu1 %2541  ;;  %2432 = vst.msk [vmem:[#allocation3 + $0x78] sm:$0xff] %vm2416_vm15, %v2351_v63 }
 0x242   : > { %2624 = vst.msk [vmem:[#allocation3 + $0x70] sm:$0xff] %vm6667_vm2, %v2542_v18  ;;  %1404 = vrot.lane.b32.xlu0 %v2470_v28, %s4574_s23 }
 0x243   : > { %1595 = vrot.lane.b32.xlu1 %v5671_v8, %s4576_s29 }
 0x244   : > { %v1198_v58 = vpop.permute.xlu0 %1197 }
 0x245   : > { %v4297_v44 = vpop.f32.mrb[0].mxu1  ;;  %1276 = vst.msk [vmem:[#allocation3 + $0x90] sm:$0xff] %vm1257_vm3, %v1198_v58  ;;  %v1775_v9 = vpop.permute.xlu1 %1774 }
 0x246   : > { %v5893_v2 = vadd.f32 %v4297_v44, %v5889_v0  ;;  %v2853_v23 = vpop.f32.mrb[1].mxu1  ;;  %1854 = vst.msk [vmem:[#allocation3 + $0x88] sm:$0xff] %vm1836_vm11, %v1775_v9  ;;  %2173 = vrot.lane.b32.xlu0 %v5689_v3, %s4579_s19  ;;  %v2283_v9 = vld [vmem:[#allocation2 + $0x171] sm:$0xff] }
 0x247   : > { %v5897_v13 = vadd.f32 %v5889_v0, %v2853_v23  ;;  %2364 = vrot.lane.b32.xlu1 %v2278_v54, %s4580_s15 }
 0x248   : > { %v1966_v29 = vpop.permute.xlu0 %1965 }
 0x249   : > { %v4437_v8 = vpack.c.bf16 %v5893_v2, %v5897_v13  ;;  %v2656_v15 = vld [vmem:[#allocation3 + $0x70] sm:$0xff]  ;;  %2046 = vst.msk [vmem:[#allocation3 + $0x80] sm:$0xff] %vm2029_vm12, %v1966_v29  ;;  %v2544_v34 = vpop.permute.xlu1 %2543  ;;  %v2475_v29 = vld [vmem:[#allocation2 + $0x16a] sm:$0xff] }
 0x24a   : > { %4316 = vmatprep.mubr.msk.f32.mxu1 %vm6666_vm5, %v2656_v15  ;;  %2625 = vst.msk [vmem:[#allocation3 + $0x78] sm:$0xff] %vm6667_vm2, %v2544_v34  ;;  %1597 = vrot.lane.b32.xlu0 %v5689_v3, %s4576_s29  ;;  %v6231_v2 = vld [vmem:[%s6653_s1 + $0x10] sm:$0xff]  ;;  %v6236_v13 = vld [vmem:[%s6653_s1 + $0x28] sm:$0xff] }
 0x24b   : > { %1788 = vrot.lane.b32.xlu1 %v2278_v54, %s4577_s30 }
 0x24c   : > { %v1200_v27 = vpop.permute.xlu0 %1199 }
 0x24d   : > { %1277 = vst.msk [vmem:[#allocation3 + $0x98] sm:$0xff] %vm1257_vm3, %v1200_v27  ;;  %v1391_v57 = vpop.permute.xlu1 %1390  ;;  %v2476_v27 = vld [vmem:[#allocation2 + $0x172] sm:$0xff] }
 0x24e   : > { %1469 = vst.msk [vmem:[#allocation3 + $0x90] sm:$0xff] %vm1450_vm4, %v1391_v57  ;;  %2366 = vrot.lane.b32.xlu0 %v2279_v53, %s4580_s15 }
 0x24f   : > { %2557 = vrot.lane.b32.xlu1 %v2471_v10, %s4581_s26 }
 0x250   : > { %v1968_v48 = vpop.permute.xlu0 %1967 }
 0x251   : > { %2047 = vst.msk [vmem:[#allocation3 + $0x88] sm:$0xff] %vm2029_vm12, %v1968_v48  ;;  %v2160_v37 = vpop.permute.xlu1 %2159  ;;  %v2657_v55 = vld [vmem:[#allocation3 + $0x78] sm:$0xff] }
 0x252   : > { %2240 = vst.msk [vmem:[#allocation3 + $0x80] sm:$0xff] %vm2223_vm13, %v2160_v37  ;;  %4317 = vmatmul.mubr.msk.f32.gmra.mrb[14].mxu1 %vm6666_vm5, %v2657_v55  ;;  %1213 = vrot.lane.b32.xlu0 %v2278_v54, %s4575_s24 }
 0x253   : > { %1790 = vrot.lane.b32.xlu1 %v2279_v53, %s4577_s30 }
 0x254   : > { %v1393_v3 = vpop.permute.xlu0 %1392 }
 0x255   : > { %1470 = vst.msk [vmem:[#allocation3 + $0x98] sm:$0xff] %vm1450_vm4, %v1393_v3  ;;  %v1584_v41 = vpop.permute.xlu1 %1583  ;;  %v2091_v3 = vld [vmem:[#allocation2 + $0x180] sm:$0xff] }
 0x256   : > { %1662 = vst.msk [vmem:[#allocation3 + $0x90] sm:$0xff] %vm1643_vm10, %v1584_v41  ;;  %1981 = vrot.lane.b32.xlu0 %v2471_v10, %s6664_s12 }
 0x257   : > { %2559 = vrot.lane.b32.xlu1 %v2472_v38, %s4581_s26 }
 0x258   : > { %v2162_v46 = vpop.permute.xlu0 %2161 }
 0x259   : > { %2241 = vst.msk [vmem:[#allocation3 + $0x88] sm:$0xff] %vm2223_vm13, %v2162_v46  ;;  %v2353_v36 = vpop.permute.xlu1 %2352 }
 0x25a   : > { %2433 = vst.msk [vmem:[#allocation3 + $0x80] sm:$0xff] %vm2416_vm15, %v2353_v36  ;;  %1215 = vrot.lane.b32.xlu0 %v2279_v53, %s4575_s24  ;;  %v2092_v36 = vld [vmem:[#allocation2 + $0x188] sm:$0xff] }
 0x25b   : > { %1406 = vrot.lane.b32.xlu1 %v2471_v10, %s4574_s23 }
 0x25c   : > { %v1586_v31 = vpop.permute.xlu0 %1585 }
 0x25d   : > { %1663 = vst.msk [vmem:[#allocation3 + $0x98] sm:$0xff] %vm1643_vm10, %v1586_v31  ;;  %v1777_v47 = vpop.permute.xlu1 %1776 }
 0x25e   : > { %1855 = vst.msk [vmem:[#allocation3 + $0x90] sm:$0xff] %vm1836_vm11, %v1777_v47  ;;  %1983 = vrot.lane.b32.xlu0 %v2472_v38, %s6664_s12 }
 0x25f   : > { %2175 = vrot.lane.b32.xlu1 %v5730_v17, %s4579_s19 }
 0x260   : > { %v2355_v52 = vpop.permute.xlu0 %2354 }
 0x261   : > { %2434 = vst.msk [vmem:[#allocation3 + $0x88] sm:$0xff] %vm2416_vm15, %v2355_v52  ;;  %v2546_v51 = vpop.permute.xlu1 %2545  ;;  %v2284_v52 = vld [vmem:[#allocation2 + $0x181] sm:$0xff] }
 0x262   : > { %2626 = vst.msk [vmem:[#allocation3 + $0x80] sm:$0xff] %vm6667_vm2, %v2546_v51  ;;  %1408 = vrot.lane.b32.xlu0 %v2472_v38, %s4574_s23 }
 0x263   : > { %1599 = vrot.lane.b32.xlu1 %v5730_v17, %s4576_s29 }
 0x264   : > { %v1202_v39 = vpop.permute.xlu0 %1201 }
 0x265   : > { %v4300_v40 = vpop.f32.mrb[2].mxu1  ;;  %1278 = vst.msk [vmem:[#allocation3 + $0xa0] sm:$0xff] %vm1257_vm3, %v1202_v39  ;;  %v1779_v4 = vpop.permute.xlu1 %1778 }
 0x266   : > { %v5939_v7 = vadd.f32 %v4300_v40, %v5889_v0  ;;  %v2863_v11 = vpop.f32.mrb[3].mxu1  ;;  %1856 = vst.msk [vmem:[#allocation3 + $0x98] sm:$0xff] %vm1836_vm11, %v1779_v4  ;;  %2177 = vrot.lane.b32.xlu0 %v5745_v20, %s4579_s19 }
 0x267   : > { %v5943_v35 = vadd.f32 %v5889_v0, %v2863_v11  ;;  %2368 = vrot.lane.b32.xlu1 %v2280_v16, %s4580_s15 }
 0x268   : > { %v1970_v49 = vpop.permute.xlu0 %1969 }
 0x269   : > { %v4441_v17 = vpack.c.bf16 %v5939_v7, %v5943_v35  ;;  %2048 = vst.msk [vmem:[#allocation3 + $0x90] sm:$0xff] %vm2029_vm12, %v1970_v49  ;;  %v2548_v56 = vpop.permute.xlu1 %2547  ;;  %v2658_v19 = vld [vmem:[#allocation3 + $0x80] sm:$0xff]  ;;  %v6250_v35 = vld [vmem:[%s6653_s1 + $0x38] sm:$0xff] }
 0x26a   : > { %2627 = vst.msk [vmem:[#allocation3 + $0x88] sm:$0xff] %vm6667_vm2, %v2548_v56  ;;  %1601 = vrot.lane.b32.xlu0 %v5745_v20, %s4576_s29  ;;  %4319 = vmatprep.mubr.msk.f32.mxu1 %vm6666_vm5, %v2658_v19  ;;  %v4532_v19 = vld [vmem:[%s4792_s22 + $0x80] sm:$0xff] }
 0x26b   : > { %1792 = vrot.lane.b32.xlu1 %v2280_v16, %s4577_s30 }
 0x26c   : > { %v1204_v59 = vpop.permute.xlu0 %1203 }
 0x26d   : > { %1279 = vst.msk [vmem:[#allocation3 + $0xa8] sm:$0xff] %vm1257_vm3, %v1204_v59  ;;  %v1395_v32 = vpop.permute.xlu1 %1394 }
 0x26e   : > { %1471 = vst.msk [vmem:[#allocation3 + $0xa0] sm:$0xff] %vm1450_vm4, %v1395_v32  ;;  %2370 = vrot.lane.b32.xlu0 %v2281_v5, %s4580_s15  ;;  %v4535_v32 = vld [vmem:[%s4792_s22 + $0x8] sm:$0xff] }
 0x26f   : > { %2561 = vrot.lane.b32.xlu1 %v2473_v25, %s4581_s26 }
 0x270   : > { %v1972_v42 = vpop.permute.xlu0 %1971 }
 0x271   : > { %2049 = vst.msk [vmem:[#allocation3 + $0x98] sm:$0xff] %vm2029_vm12, %v1972_v42  ;;  %v2164_v20 = vpop.permute.xlu1 %2163  ;;  %v2659_v61 = vld [vmem:[#allocation3 + $0x88] sm:$0xff] }
 0x272   : > { %2242 = vst.msk [vmem:[#allocation3 + $0x90] sm:$0xff] %vm2223_vm13, %v2164_v20  ;;  %4320 = vmatmul.mubr.msk.f32.gmra.mrb[16].mxu1 %vm6666_vm5, %v2659_v61  ;;  %1217 = vrot.lane.b32.xlu0 %v2280_v16, %s4575_s24  ;;  %v2285_v20 = vld [vmem:[#allocation2 + $0x189] sm:$0xff] }
 0x273   : > { %1794 = vrot.lane.b32.xlu1 %v2281_v5, %s4577_s30 }
 0x274   : > { %v1397_v50 = vpop.permute.xlu0 %1396 }
 0x275   : > { %1472 = vst.msk [vmem:[#allocation3 + $0xa8] sm:$0xff] %vm1450_vm4, %v1397_v50  ;;  %v1588_v60 = vpop.permute.xlu1 %1587  ;;  %v2477_v50 = vld [vmem:[#allocation2 + $0x182] sm:$0xff] }
 0x276   : > { %1664 = vst.msk [vmem:[#allocation3 + $0xa0] sm:$0xff] %vm1643_vm10, %v1588_v60  ;;  %1985 = vrot.lane.b32.xlu0 %v2473_v25, %s6664_s12  ;;  %v4536_v60 = vld [vmem:[%s4792_s22 + $0x90] sm:$0xff] }
 0x277   : > { %2563 = vrot.lane.b32.xlu1 %v2474_v43, %s4581_s26 }
 0x278   : > { %v2166_v21 = vpop.permute.xlu0 %2165 }
 0x279   : > { %2243 = vst.msk [vmem:[#allocation3 + $0x98] sm:$0xff] %vm2223_vm13, %v2166_v21  ;;  %v2357_v62 = vpop.permute.xlu1 %2356  ;;  %v4537_v21 = vld [vmem:[%s4792_s22 + $0x98] sm:$0xff] }
 0x27a   : > { %2435 = vst.msk [vmem:[#allocation3 + $0x90] sm:$0xff] %vm2416_vm15, %v2357_v62  ;;  %1219 = vrot.lane.b32.xlu0 %v2281_v5, %s4575_s24  ;;  %v4533_v5 = vld [vmem:[%s4792_s22 + $0x88] sm:$0xff]  ;;  %v4391_v62 = vpack.c.bf16 %v4537_v21, %v4536_v60 }
 0x27b   : > { %1410 = vrot.lane.b32.xlu1 %v2473_v25, %s4574_s23  ;;  %v4387_v59 = vpack.c.bf16 %v4533_v5, %v4532_v19  ;;  %v4534_v25 = vld [vmem:[%s4792_s22] sm:$0xff]  ;;  %v4554_v19 = vld [vmem:[%s4792_s22 + $0x50] sm:$0xff]  ;;  %v4555_v5 = vld [vmem:[%s4792_s22 + $0x58] sm:$0xff] }
 0x27c   : > { %v1590_v22 = vpop.permute.xlu0 %1589  ;;  %v4389_v42 = vpack.c.bf16 %v4535_v32, %v4534_v25  ;;  %v4556_v25 = vld [vmem:[%s4792_s22 + $0xe0] sm:$0xff]  ;;  %v4557_v32 = vld [vmem:[%s4792_s22 + $0xe8] sm:$0xff] }
 0x27d   : > { %1665 = vst.msk [vmem:[#allocation3 + $0xa8] sm:$0xff] %vm1643_vm10, %v1590_v22  ;;  %v1781_v12 = vpop.permute.xlu1 %1780  ;;  %4388 = vmatprep.subr.bf16.mxu0 %v4387_v59  ;;  %v4538_v22 = vld [vmem:[%s4792_s22 + $0x10] sm:$0xff]  ;;  %v4409_v59 = vpack.c.bf16 %v4555_v5, %v4554_v19  ;;  %v4559_v60 = vld [vmem:[%s4792_s22 + $0x68] sm:$0xff] }
 0x27e   : > { %1857 = vst.msk [vmem:[#allocation3 + $0xa0] sm:$0xff] %vm1836_vm11, %v1781_v12  ;;  %1987 = vrot.lane.b32.xlu0 %v2474_v43, %s6664_s12  ;;  %4390 = vmatpush3.bf16.msra.mxu0 %v4389_v42  ;;  %v4539_v12 = vld [vmem:[%s4792_s22 + $0x18] sm:$0xff]  ;;  %v4411_v42 = vpack.c.bf16 %v4557_v32, %v4556_v25 }
 0x27f   : > { %2179 = vrot.lane.b32.xlu1 %v5786_v26, %s4579_s19  ;;  %4392 = vmatprep.subr.bf16.mxu0 %v4391_v62 }
 0x280   : > { %v2359_v28 = vpop.permute.xlu0 %2358 }
 0x281   : > { %2436 = vst.msk [vmem:[#allocation3 + $0x98] sm:$0xff] %vm2416_vm15, %v2359_v28  ;;  %v2550_v45 = vpop.permute.xlu1 %2549  ;;  %v4393_v28 = vpack.c.bf16 %v4539_v12, %v4538_v22 }
 0x282   : > { %2628 = vst.msk [vmem:[#allocation3 + $0x90] sm:$0xff] %vm6667_vm2, %v2550_v45  ;;  %1412 = vrot.lane.b32.xlu0 %v2474_v43, %s4574_s23 }
 0x283   : > { %1603 = vrot.lane.b32.xlu1 %v5786_v26, %s4576_s29  ;;  %4394 = vmatpush3.bf16.msra.mxu0 %v4393_v28 }
 0x284   : > { %v1206_v30 = vpop.permute.xlu0 %1205 }
 0x285   : > { %v4303_v14 = vpop.f32.mrb[4].mxu1  ;;  %1280 = vst.msk [vmem:[#allocation3 + $0xb0] sm:$0xff] %vm1257_vm3, %v1206_v30  ;;  %v1783_v6 = vpop.permute.xlu1 %1782 }
 0x286   : > { %v5985_v24 = vadd.f32 %v4303_v14, %v5889_v0  ;;  %v2873_v63 = vpop.f32.mrb[5].mxu1  ;;  %1858 = vst.msk [vmem:[#allocation3 + $0xa8] sm:$0xff] %vm1836_vm11, %v1783_v6  ;;  %2181 = vrot.lane.b32.xlu0 %v5801_v33, %s4579_s19  ;;  %v4541_v6 = vld [vmem:[%s4792_s22 + $0xa8] sm:$0xff] }
 0x287   : > { %v5989_v18 = vadd.f32 %v5889_v0, %v2873_v63  ;;  %2372 = vrot.lane.b32.xlu1 %v2282_v1, %s4580_s15 }
 0x288   : > { %v1974_v54 = vpop.permute.xlu0 %1973 }
 0x289   : > { %v4445_v26 = vpack.c.bf16 %v5985_v24, %v5989_v18  ;;  %2050 = vst.msk [vmem:[#allocation3 + $0xa0] sm:$0xff] %vm2029_vm12, %v1974_v54  ;;  %v2552_v58 = vpop.permute.xlu1 %2551  ;;  %v2660_v44 = vld [vmem:[#allocation3 + $0x90] sm:$0xff]  ;;  %v434_v24 = vld [vmem:[%s6653_s1 + $0x78] sm:$0xff]  ;;  %v433_v18 = vld [vmem:[%s6653_s1 + $0x70] sm:$0xff] }
 0x28a   : > { %2629 = vst.msk [vmem:[#allocation3 + $0x98] sm:$0xff] %vm6667_vm2, %v2552_v58  ;;  %1605 = vrot.lane.b32.xlu0 %v5801_v33, %s4576_s29  ;;  %4322 = vmatprep.mubr.msk.f32.mxu1 %vm6666_vm5, %v2660_v44  ;;  %v4542_v54 = vld [vmem:[%s4792_s22 + $0x20] sm:$0xff]  ;;  %v4543_v58 = vld [vmem:[%s4792_s22 + $0x28] sm:$0xff] }
 0x28b   : > { %1796 = vrot.lane.b32.xlu1 %v2282_v1, %s4577_s30  ;;  %v4397_v44 = vpack.c.bf16 %v4543_v58, %v4542_v54  ;;  %v4562_v54 = vld [vmem:[%s4792_s22 + $0x70] sm:$0xff]  ;;  %v4563_v58 = vld [vmem:[%s4792_s22 + $0x78] sm:$0xff] }
 0x28c   : > { %v1208_v23 = vpop.permute.xlu0 %1207 }
 0x28d   : > { %1281 = vst.msk [vmem:[#allocation3 + $0xb8] sm:$0xff] %vm1257_vm3, %v1208_v23  ;;  %v1399_v15 = vpop.permute.xlu1 %1398 }
 0x28e   : > { %1473 = vst.msk [vmem:[#allocation3 + $0xb0] sm:$0xff] %vm1450_vm4, %v1399_v15  ;;  %2374 = vrot.lane.b32.xlu0 %v2283_v9, %s4580_s15  ;;  %v4544_v15 = vld [vmem:[%s4792_s22 + $0xb0] sm:$0xff] }
 0x28f   : > { %2565 = vrot.lane.b32.xlu1 %v2475_v29, %s4581_s26 }
 0x290   : > { %v1976_v34 = vpop.permute.xlu0 %1975 }
 0x291   : > { %2051 = vst.msk [vmem:[#allocation3 + $0xa8] sm:$0xff] %vm2029_vm12, %v1976_v34  ;;  %v2168_v33 = vpop.permute.xlu1 %2167  ;;  %v2661_v53 = vld [vmem:[#allocation3 + $0x98] sm:$0xff]  ;;  %v4545_v34 = vld [vmem:[%s4792_s22 + $0xb8] sm:$0xff] }
 0x292   : > { %2244 = vst.msk [vmem:[#allocation3 + $0xa0] sm:$0xff] %vm2223_vm13, %v2168_v33  ;;  %4323 = vmatmul.mubr.msk.f32.gmra.mrb[18].mxu1 %vm6666_vm5, %v2661_v53  ;;  %1221 = vrot.lane.b32.xlu0 %v2282_v1, %s4575_s24  ;;  %v4540_v1 = vld [vmem:[%s4792_s22 + $0xa0] sm:$0xff]  ;;  %v4399_v33 = vpack.c.bf16 %v4545_v34, %v4544_v15  ;;  %v4546_v53 = vld [vmem:[%s4792_s22 + $0x30] sm:$0xff]  ;;  %v6115_v34 = vld [vmem:[%s6653_s1 + $0x8] sm:$0xff] }
 0x293   : > { %1798 = vrot.lane.b32.xlu1 %v2283_v9, %s4577_s30  ;;  %v4395_v63 = vpack.c.bf16 %v4541_v6, %v4540_v1  ;;  %v4561_v1 = vld [vmem:[%s4792_s22 + $0xf8] sm:$0xff]  ;;  %499 = vmatprep.mubr.f32.mxu0 %v6115_v34 }
 0x294   : > { %v1401_v10 = vpop.permute.xlu0 %1400 }
 0x295   : > { %1474 = vst.msk [vmem:[#allocation3 + $0xb8] sm:$0xff] %vm1450_vm4, %v1401_v10  ;;  %v1592_v57 = vpop.permute.xlu1 %1591  ;;  %4396 = vmatprep.subr.bf16.mxu0 %v4395_v63  ;;  %v4547_v10 = vld [vmem:[%s4792_s22 + $0x38] sm:$0xff] }
 0x296   : > { %1666 = vst.msk [vmem:[#allocation3 + $0xb0] sm:$0xff] %vm1643_vm10, %v1592_v57  ;;  %1989 = vrot.lane.b32.xlu0 %v2475_v29, %s6664_s12  ;;  %4398 = vmatpush3.bf16.msra.mxu0 %v4397_v44  ;;  %v4548_v57 = vld [vmem:[%s4792_s22 + $0xc0] sm:$0xff]  ;;  %v4417_v44 = vpack.c.bf16 %v4563_v58, %v4562_v54 }
 0x297   : > { %2567 = vrot.lane.b32.xlu1 %v2476_v27, %s4581_s26  ;;  %4400 = vmatprep.subr.bf16.mxu0 %v4399_v33  ;;  %v6123_v33 = vld [vmem:[%s6653_s1] sm:$0xff] }
 0x298   : > { %v2170_v48 = vpop.permute.xlu0 %2169 }
 0x299   : > { %2245 = vst.msk [vmem:[#allocation3 + $0xa8] sm:$0xff] %vm2223_vm13, %v2170_v48  ;;  %v2361_v37 = vpop.permute.xlu1 %2360  ;;  %v4549_v48 = vld [vmem:[%s4792_s22 + $0xc8] sm:$0xff] }
 0x29a   : > { %2437 = vst.msk [vmem:[#allocation3 + $0xa0] sm:$0xff] %vm2416_vm15, %v2361_v37  ;;  %1223 = vrot.lane.b32.xlu0 %v2283_v9, %s4575_s24  ;;  %v2478_v9 = vld [vmem:[#allocation2 + $0x18a] sm:$0xff]  ;;  %v4403_v37 = vpack.c.bf16 %v4549_v48, %v4548_v57 }
 0x29b   : > { %1414 = vrot.lane.b32.xlu1 %v2475_v29, %s4574_s23 }
 0x29c   : > { %v1594_v55 = vpop.permute.xlu0 %1593 }
 0x29d   : > { %1667 = vst.msk [vmem:[#allocation3 + $0xb8] sm:$0xff] %vm1643_vm10, %v1594_v55  ;;  %v1785_v38 = vpop.permute.xlu1 %1784  ;;  %v2093_v55 = vld [vmem:[#allocation2 + $0x198] sm:$0xff] }
 0x29e   : > { %1859 = vst.msk [vmem:[#allocation3 + $0xb0] sm:$0xff] %vm1836_vm11, %v1785_v38  ;;  %1991 = vrot.lane.b32.xlu0 %v2476_v27, %s6664_s12  ;;  %v2094_v38 = vld [vmem:[#allocation2 + $0x1a0] sm:$0xff] }
 0x29f   : > { %2183 = vrot.lane.b32.xlu1 %v2091_v3, %s4579_s19 }
 0x2a0   : > { %v2363_v41 = vpop.permute.xlu0 %2362 }
 0x2a1   : > { %2438 = vst.msk [vmem:[#allocation3 + $0xa8] sm:$0xff] %vm2416_vm15, %v2363_v41  ;;  %v2554_v46 = vpop.permute.xlu1 %2553  ;;  %v4550_v41 = vld [vmem:[%s4792_s22 + $0x40] sm:$0xff] }
 0x2a2   : > { %2630 = vst.msk [vmem:[#allocation3 + $0xa0] sm:$0xff] %vm6667_vm2, %v2554_v46  ;;  %1416 = vrot.lane.b32.xlu0 %v2476_v27, %s4574_s23  ;;  %v4401_v27 = vpack.c.bf16 %v4547_v10, %v4546_v53  ;;  %v4551_v46 = vld [vmem:[%s4792_s22 + $0x48] sm:$0xff] }
 0x2a3   : > { %1607 = vrot.lane.b32.xlu1 %v2091_v3, %s4576_s29 }
 0x2a4   : > { %v1210_v31 = vpop.permute.xlu0 %1209  ;;  %4402 = vmatpush3.bf16.msra.mxu0 %v4401_v27 }
 0x2a5   : > { %v4306_v47 = vpop.f32.mrb[6].mxu1  ;;  %1282 = vst.msk [vmem:[#allocation3 + $0xc0] sm:$0xff] %vm1257_vm3, %v1210_v31  ;;  %v1787_v51 = vpop.permute.xlu1 %1786  ;;  %4404 = vmatprep.subr.bf16.mxu0 %v4403_v37 }
 0x2a6   : > { %v6029_v39 = vadd.f32 %v4306_v47, %v5889_v0  ;;  %v2883_v40 = vpop.f32.mrb[7].mxu1  ;;  %1860 = vst.msk [vmem:[#allocation3 + $0xb8] sm:$0xff] %vm1836_vm11, %v1787_v51  ;;  %2185 = vrot.lane.b32.xlu0 %v2092_v36, %s4579_s19  ;;  %v2286_v47 = vld [vmem:[#allocation2 + $0x199] sm:$0xff]  ;;  %v2287_v51 = vld [vmem:[#allocation2 + $0x1a1] sm:$0xff] }
 0x2a7   : > { %v6033_v16 = vadd.f32 %v5889_v0, %v2883_v40  ;;  %2376 = vrot.lane.b32.xlu1 %v2284_v52, %s4580_s15 }
 0x2a8   : > { %v1978_v11 = vpop.permute.xlu0 %1977 }
 0x2a9   : > { %v4449_v4 = vpack.c.bf16 %v6029_v39, %v6033_v16  ;;  %2052 = vst.msk [vmem:[#allocation3 + $0xb0] sm:$0xff] %vm2029_vm12, %v1978_v11  ;;  %v2556_v49 = vpop.permute.xlu1 %2555  ;;  %v2662_v56 = vld [vmem:[#allocation3 + $0xa0] sm:$0xff]  ;;  %v4564_v39 = vld [vmem:[%s6655_s3] ss:$0 sm:$0xff] }
 0x2aa   : > { %2631 = vst.msk [vmem:[#allocation3 + $0xa8] sm:$0xff] %vm6667_vm2, %v2556_v49  ;;  %1609 = vrot.lane.b32.xlu0 %v2092_v36, %s4576_s29  ;;  %4325 = vmatprep.mubr.msk.f32.mxu1 %vm6666_vm5, %v2662_v56  ;;  %v4405_v36 = vpack.c.bf16 %v4551_v46, %v4550_v41  ;;  %v4552_v11 = vld [vmem:[%s4792_s22 + $0xd0] sm:$0xff]  ;;  %v4553_v49 = vld [vmem:[%s4792_s22 + $0xd8] sm:$0xff] }
 0x2ab   : > { %1800 = vrot.lane.b32.xlu1 %v2284_v52, %s4577_s30  ;;  %v4407_v56 = vpack.c.bf16 %v4553_v49, %v4552_v11 }
 0x2ac   : > { %v1212_v61 = vpop.permute.xlu0 %1211  ;;  %4406 = vmatpush3.bf16.msra.mxu0 %v4405_v36 }
 0x2ad   : > { %1283 = vst.msk [vmem:[#allocation3 + $0xc8] sm:$0xff] %vm1257_vm3, %v1212_v61  ;;  %v1403_v43 = vpop.permute.xlu1 %1402  ;;  %4408 = vmatprep.subr.bf16.mxu0 %v4407_v56 }
 0x2ae   : > { %1475 = vst.msk [vmem:[#allocation3 + $0xc0] sm:$0xff] %vm1450_vm4, %v1403_v43  ;;  %2378 = vrot.lane.b32.xlu0 %v2285_v20, %s4580_s15  ;;  %v4558_v43 = vld [vmem:[%s4792_s22 + $0x60] sm:$0xff] }
 0x2af   : > { %2569 = vrot.lane.b32.xlu1 %v2477_v50, %s4581_s26  ;;  %v4413_v21 = vpack.c.bf16 %v4559_v60, %v4558_v43 }
 0x2b0   : > { %v1980_v45 = vpop.permute.xlu0 %1979  ;;  %4410 = vmatpush3.bf16.msra.mxu0 %v4409_v59 }
 0x2b1   : > { %2053 = vst.msk [vmem:[#allocation3 + $0xb8] sm:$0xff] %vm2029_vm12, %v1980_v45  ;;  %v2172_v30 = vpop.permute.xlu1 %2171  ;;  %v2663_v14 = vld [vmem:[#allocation3 + $0xa8] sm:$0xff]  ;;  %4412 = vmatprep.subr.bf16.mxu0 %v4411_v42 }
 0x2b2   : > { %2246 = vst.msk [vmem:[#allocation3 + $0xb0] sm:$0xff] %vm2223_vm13, %v2172_v30  ;;  %4326 = vmatmul.mubr.msk.f32.gmra.mrb[20].mxu1 %vm6666_vm5, %v2663_v14  ;;  %1802 = vrot.lane.b32.xlu0 %v2285_v20, %s4577_s30  ;;  %v2479_v20 = vld [vmem:[#allocation2 + $0x19a] sm:$0xff]  ;;  %v4560_v14 = vld [vmem:[%s4792_s22 + $0xf0] sm:$0xff] }
 0x2b3   : > { %1993 = vrot.lane.b32.xlu1 %v2477_v50, %s6664_s12  ;;  %v2480_v50 = vld [vmem:[#allocation2 + $0x1a2] sm:$0xff]  ;;  %v4415_v6 = vpack.c.bf16 %v4561_v1, %v4560_v14 }
 0x2b4   : > { %v1405_v23 = vpop.permute.xlu0 %1404  ;;  %4414 = vmatpush3.bf16.msra.mxu0 %v4413_v21 }
 0x2b5   : > { %1476 = vst.msk [vmem:[#allocation3 + $0xc8] sm:$0xff] %vm1450_vm4, %v1405_v23  ;;  %v1596_v29 = vpop.permute.xlu1 %1595  ;;  %4416 = vmatprep.subr.bf16.mxu0 %v4415_v6 }
 0x2b6   : > { %1668 = vst.msk [vmem:[#allocation3 + $0xc0] sm:$0xff] %vm1643_vm10, %v1596_v29  ;;  %2571 = vrot.lane.b32.xlu0 %v2478_v9, %s4581_s26 }
 0x2b7   : > { %1995 = vrot.lane.b32.xlu1 %v2478_v9, %s6664_s12 }
 0x2b8   : > { %v2174_v3 = vpop.permute.xlu0 %2173  ;;  %4418 = vmatpush3.bf16.msra.mxu0 %v4417_v44 }
 0x2b9   : > { %2247 = vst.msk [vmem:[#allocation3 + $0xb8] sm:$0xff] %vm2223_vm13, %v2174_v3  ;;  %v2365_v31 = vpop.permute.xlu1 %2364 }
 0x2ba   : > { %2439 = vst.msk [vmem:[#allocation3 + $0xb0] sm:$0xff] %vm2416_vm15, %v2365_v31  ;;  %2187 = vrot.lane.b32.xlu0 %v2093_v55, %s4579_s19 }
 0x2bb   : > { %2189 = vrot.lane.b32.xlu1 %v2094_v38, %s4579_s19  ;;  %500 = vmatmul.mubr.f32.vlgmr.msra.gmra.mrb[0].mxu0 %v6123_v33 }
 0x2bc   : > { %v1598_v52 = vpop.permute.xlu0 %1597 }
 0x2bd   : > { %1669 = vst.msk [vmem:[#allocation3 + $0xc8] sm:$0xff] %vm1643_vm10, %v1598_v52  ;;  %v1789_v40 = vpop.permute.xlu1 %1788 }
 0x2be   : > { %1861 = vst.msk [vmem:[#allocation3 + $0xc0] sm:$0xff] %vm1836_vm11, %v1789_v40  ;;  %2380 = vrot.lane.b32.xlu0 %v2286_v47, %s4580_s15 }
 0x2bf   : > { %2382 = vrot.lane.b32.xlu1 %v2287_v51, %s4580_s15 }
 0x2c0   : > { %v2367_v61 = vpop.permute.xlu0 %2366 }
 0x2c1   : > { %2440 = vst.msk [vmem:[#allocation3 + $0xb8] sm:$0xff] %vm2416_vm15, %v2367_v61  ;;  %v2558_v62 = vpop.permute.xlu1 %2557 }
 0x2c2   : > { %2632 = vst.msk [vmem:[#allocation3 + $0xb0] sm:$0xff] %vm6667_vm2, %v2558_v62  ;;  %2573 = vrot.lane.b32.xlu0 %v2479_v20, %s4581_s26 }
 0x2c3   : > { %2575 = vrot.lane.b32.xlu1 %v2480_v50, %s4581_s26 }
 0x2c4   : > { %v1214_v22 = vpop.permute.xlu0 %1213 }
 0x2c5   : > { %v4309_v12 = vpop.f32.mrb[8].mxu1  ;;  %1284 = vst.msk [vmem:[#allocation3 + $0xd0] sm:$0xff] %vm1257_vm3, %v1214_v22  ;;  %v1791_v28 = vpop.permute.xlu1 %1790 }
 0x2c6   : > { %v6099_v45 = vadd.f32 %v4309_v12, %v5889_v0  ;;  %v2893_v30 = vpop.f32.mrb[9].mxu1  ;;  %1862 = vst.msk [vmem:[#allocation3 + $0xc8] sm:$0xff] %vm1836_vm11, %v1791_v28 }
 0x2c7   : > { %v6105_v63 = vadd.f32 %v5889_v0, %v2893_v30 }
 0x2c8   : > { %v1982_v23 = vpop.permute.xlu0 %1981 }
 0x2c9   : > { %v4453_v9 = vpack.c.bf16 %v6099_v45, %v6105_v63  ;;  %2054 = vst.msk [vmem:[#allocation3 + $0xc0] sm:$0xff] %vm2029_vm12, %v1982_v23  ;;  %v2560_v29 = vpop.permute.xlu1 %2559  ;;  %v2664_v15 = vld [vmem:[#allocation3 + $0xb0] sm:$0xff] }
 0x2ca   : > { %2633 = vst.msk [vmem:[#allocation3 + $0xb8] sm:$0xff] %vm6667_vm2, %v2560_v29  ;;  %4328 = vmatprep.mubr.msk.f32.mxu1 %vm6666_vm5, %v2664_v15 }
 0x2cc   : > { %v1216_v53 = vpop.permute.xlu0 %1215 }
 0x2cd   : > { %1285 = vst.msk [vmem:[#allocation3 + $0xd8] sm:$0xff] %vm1257_vm3, %v1216_v53  ;;  %v1407_v10 = vpop.permute.xlu1 %1406 }
 0x2ce   : > { %1477 = vst.msk [vmem:[#allocation3 + $0xd0] sm:$0xff] %vm1450_vm4, %v1407_v10 }
 0x2d0   : > { %v1984_v27 = vpop.permute.xlu0 %1983 }
 0x2d1   : > { %2055 = vst.msk [vmem:[#allocation3 + $0xc8] sm:$0xff] %vm2029_vm12, %v1984_v27  ;;  %v2176_v57 = vpop.permute.xlu1 %2175  ;;  %v2665_v48 = vld [vmem:[#allocation3 + $0xb8] sm:$0xff] }
 0x2d2   : > { %2248 = vst.msk [vmem:[#allocation3 + $0xc0] sm:$0xff] %vm2223_vm13, %v2176_v57  ;;  %4329 = vmatmul.mubr.msk.f32.gmra.mrb[22].mxu1 %vm6666_vm5, %v2665_v48 }
 0x2d4   : > { %v1409_v37 = vpop.permute.xlu0 %1408 }
 0x2d5   : > { %1478 = vst.msk [vmem:[#allocation3 + $0xd8] sm:$0xff] %vm1450_vm4, %v1409_v37  ;;  %v1600_v55 = vpop.permute.xlu1 %1599 }
 0x2d6   : > { %1670 = vst.msk [vmem:[#allocation3 + $0xd0] sm:$0xff] %vm1643_vm10, %v1600_v55 }
 0x2d8   : > { %v2178_v3 = vpop.permute.xlu0 %2177 }
 0x2d9   : > { %2249 = vst.msk [vmem:[#allocation3 + $0xc8] sm:$0xff] %vm2223_vm13, %v2178_v3  ;;  %v2369_v38 = vpop.permute.xlu1 %2368 }
 0x2da   : > { %2441 = vst.msk [vmem:[#allocation3 + $0xc0] sm:$0xff] %vm2416_vm15, %v2369_v38 }
 0x2dc   : > { %v1602_v41 = vpop.permute.xlu0 %1601 }
 0x2dd   : > { %1671 = vst.msk [vmem:[#allocation3 + $0xd8] sm:$0xff] %vm1643_vm10, %v1602_v41  ;;  %v1793_v46 = vpop.permute.xlu1 %1792 }
 0x2de   : > { %1863 = vst.msk [vmem:[#allocation3 + $0xd0] sm:$0xff] %vm1836_vm11, %v1793_v46 }
 0x2e0   : > { %v2371_v36 = vpop.permute.xlu0 %2370 }
 0x2e1   : > { %2442 = vst.msk [vmem:[#allocation3 + $0xc8] sm:$0xff] %vm2416_vm15, %v2371_v36  ;;  %v2562_v31 = vpop.permute.xlu1 %2561 }
 0x2e2   : > { %2634 = vst.msk [vmem:[#allocation3 + $0xc0] sm:$0xff] %vm6667_vm2, %v2562_v31 }
 0x2e4   : > { %v1218_v47 = vpop.permute.xlu0 %1217 }
 0x2e5   : > { %v4312_v52 = vpop.f32.mrb[10].mxu1  ;;  %1286 = vst.msk [vmem:[#allocation3 + $0xe0] sm:$0xff] %vm1257_vm3, %v1218_v47  ;;  %v1795_v51 = vpop.permute.xlu1 %1794 }
 0x2e6   : > { %v6141_v40 = vadd.f32 %v4312_v52, %v5889_v0  ;;  %v2903_v11 = vpop.f32.mrb[11].mxu1  ;;  %1864 = vst.msk [vmem:[#allocation3 + $0xd8] sm:$0xff] %vm1836_vm11, %v1795_v51 }
 0x2e7   : > { %v6145_v49 = vadd.f32 %v5889_v0, %v2903_v11 }
 0x2e8   : > { %v1986_v19 = vpop.permute.xlu0 %1985 }
 0x2e9   : > { %v4457_v56 = vpack.c.bf16 %v6141_v40, %v6145_v49  ;;  %2056 = vst.msk [vmem:[#allocation3 + $0xd0] sm:$0xff] %vm2029_vm12, %v1986_v19  ;;  %v2564_v5 = vpop.permute.xlu1 %2563  ;;  %v2666_v59 = vld [vmem:[#allocation3 + $0xc0] sm:$0xff] }
 0x2ea   : > { %2635 = vst.msk [vmem:[#allocation3 + $0xc8] sm:$0xff] %vm6667_vm2, %v2564_v5  ;;  %4331 = vmatprep.mubr.msk.f32.mxu1 %vm6666_vm5, %v2666_v59 }
 0x2ec   : > { %v1220_v25 = vpop.permute.xlu0 %1219 }
 0x2ed   : > { %1287 = vst.msk [vmem:[#allocation3 + $0xe8] sm:$0xff] %vm1257_vm3, %v1220_v25  ;;  %v1411_v32 = vpop.permute.xlu1 %1410 }
 0x2ee   : > { %1479 = vst.msk [vmem:[#allocation3 + $0xe0] sm:$0xff] %vm1450_vm4, %v1411_v32 }
 0x2f0   : > { %v1988_v42 = vpop.permute.xlu0 %1987 }
 0x2f1   : > { %2057 = vst.msk [vmem:[#allocation3 + $0xd8] sm:$0xff] %vm2029_vm12, %v1988_v42  ;;  %v2180_v20 = vpop.permute.xlu1 %2179  ;;  %v2667_v61 = vld [vmem:[#allocation3 + $0xc8] sm:$0xff] }
 0x2f2   : > { %2250 = vst.msk [vmem:[#allocation3 + $0xd0] sm:$0xff] %vm2223_vm13, %v2180_v20  ;;  %4332 = vmatmul.mubr.msk.f32.gmra.mrb[24].mxu1 %vm6666_vm5, %v2667_v61 }
 0x2f4   : > { %v1413_v50 = vpop.permute.xlu0 %1412 }
 0x2f5   : > { %1480 = vst.msk [vmem:[#allocation3 + $0xe8] sm:$0xff] %vm1450_vm4, %v1413_v50  ;;  %v1604_v43 = vpop.permute.xlu1 %1603 }
 0x2f6   : > { %1672 = vst.msk [vmem:[#allocation3 + $0xe0] sm:$0xff] %vm1643_vm10, %v1604_v43 }
 0x2f8   : > { %v2182_v60 = vpop.permute.xlu0 %2181 }
 0x2f9   : > { %2251 = vst.msk [vmem:[#allocation3 + $0xd8] sm:$0xff] %vm2223_vm13, %v2182_v60  ;;  %v2373_v21 = vpop.permute.xlu1 %2372 }
 0x2fa   : > { %2443 = vst.msk [vmem:[#allocation3 + $0xd0] sm:$0xff] %vm2416_vm15, %v2373_v21 }
 0x2fc   : > { %v1606_v62 = vpop.permute.xlu0 %1605 }
 0x2fd   : > { %1673 = vst.msk [vmem:[#allocation3 + $0xe8] sm:$0xff] %vm1643_vm10, %v1606_v62  ;;  %v1797_v22 = vpop.permute.xlu1 %1796 }
 0x2fe   : > { %1865 = vst.msk [vmem:[#allocation3 + $0xe0] sm:$0xff] %vm1836_vm11, %v1797_v22 }
 0x300   : > { %v2375_v12 = vpop.permute.xlu0 %2374 }
 0x301   : > { %2444 = vst.msk [vmem:[#allocation3 + $0xd8] sm:$0xff] %vm2416_vm15, %v2375_v12  ;;  %v2566_v28 = vpop.permute.xlu1 %2565 }
 0x302   : > { %2636 = vst.msk [vmem:[#allocation3 + $0xd0] sm:$0xff] %vm6667_vm2, %v2566_v28 }
 0x304   : > { %v1222_v30 = vpop.permute.xlu0 %1221 }
 0x305   : > { %v4315_v14 = vpop.f32.mrb[12].mxu1  ;;  %1288 = vst.msk [vmem:[#allocation3 + $0xf0] sm:$0xff] %vm1257_vm3, %v1222_v30  ;;  %v1799_v1 = vpop.permute.xlu1 %1798 }
 0x306   : > { %v6167_v6 = vadd.f32 %v4315_v14, %v5889_v0  ;;  %v2913_v54 = vpop.f32.mrb[13].mxu1  ;;  %1866 = vst.msk [vmem:[#allocation3 + $0xe8] sm:$0xff] %vm1836_vm11, %v1799_v1 }
 0x307   : > { %v6171_v58 = vadd.f32 %v5889_v0, %v2913_v54 }
 0x308   : > { %v1990_v23 = vpop.permute.xlu0 %1989 }
 0x309   : > { %v4461_v44 = vpack.c.bf16 %v6167_v6, %v6171_v58  ;;  %2058 = vst.msk [vmem:[#allocation3 + $0xe0] sm:$0xff] %vm2029_vm12, %v1990_v23  ;;  %v2568_v29 = vpop.permute.xlu1 %2567  ;;  %v2668_v15 = vld [vmem:[#allocation3 + $0xd0] sm:$0xff] }
 0x30a   : > { %2637 = vst.msk [vmem:[#allocation3 + $0xd8] sm:$0xff] %vm6667_vm2, %v2568_v29  ;;  %4334 = vmatprep.mubr.msk.f32.mxu1 %vm6666_vm5, %v2668_v15 }
 0x30c   : > { %v1224_v53 = vpop.permute.xlu0 %1223 }
 0x30d   : > { %1289 = vst.msk [vmem:[#allocation3 + $0xf8] sm:$0xff] %vm1257_vm3, %v1224_v53  ;;  %v1415_v10 = vpop.permute.xlu1 %1414 }
 0x30e   : > { %1481 = vst.msk [vmem:[#allocation3 + $0xf0] sm:$0xff] %vm1450_vm4, %v1415_v10 }
 0x310   : > { %v1992_v27 = vpop.permute.xlu0 %1991 }
 0x311   : > { %2059 = vst.msk [vmem:[#allocation3 + $0xe8] sm:$0xff] %vm2029_vm12, %v1992_v27  ;;  %v2184_v57 = vpop.permute.xlu1 %2183  ;;  %v2669_v48 = vld [vmem:[#allocation3 + $0xd8] sm:$0xff]  ;;  %v6226_v27 = vld [vmem:[%s6653_s1 + $0x18] sm:$0xff] }
 0x312   : > { %2252 = vst.msk [vmem:[#allocation3 + $0xe0] sm:$0xff] %vm2223_vm13, %v2184_v57  ;;  %4335 = vmatmul.mubr.msk.f32.gmra.mrb[26].mxu1 %vm6666_vm5, %v2669_v48  ;;  %504 = vmatprep.mubr.f32.mxu0 %v6226_v27  ;;  %v6257_v48 = vld [vmem:[%s6653_s1 + $0x30] sm:$0xff] }
 0x313   : > { %505 = vmatmul.mubr.f32.gmra.mrb[2].mxu0 %v6231_v2 }
 0x314   : > { %v1417_v37 = vpop.permute.xlu0 %1416  ;;  %509 = vmatprep.mubr.f32.mxu0 %v6236_v13 }
 0x315   : > { %1482 = vst.msk [vmem:[#allocation3 + $0xf8] sm:$0xff] %vm1450_vm4, %v1417_v37  ;;  %v1608_v55 = vpop.permute.xlu1 %1607 }
 0x316   : > { %1674 = vst.msk [vmem:[#allocation3 + $0xf0] sm:$0xff] %vm1643_vm10, %v1608_v55  ;;  %v6264_v55 = vld [vmem:[%s6653_s1 + $0x48] sm:$0xff] }
 0x318   : > { %v2186_v3 = vpop.permute.xlu0 %2185 }
 0x319   : > { %2253 = vst.msk [vmem:[#allocation3 + $0xe8] sm:$0xff] %vm2223_vm13, %v2186_v3  ;;  %v2377_v38 = vpop.permute.xlu1 %2376 }
 0x31a   : > { %2445 = vst.msk [vmem:[#allocation3 + $0xe0] sm:$0xff] %vm2416_vm15, %v2377_v38  ;;  %v6270_v38 = vld [vmem:[%s6653_s1 + $0x40] sm:$0xff] }
 0x31c   : > { %v1610_v41 = vpop.permute.xlu0 %1609 }
 0x31d   : > { %1675 = vst.msk [vmem:[#allocation3 + $0xf8] sm:$0xff] %vm1643_vm10, %v1610_v41  ;;  %v1801_v46 = vpop.permute.xlu1 %1800  ;;  %v430_v41 = vld [vmem:[%s6653_s1 + $0x58] sm:$0xff] }
 0x31e   : > { %1867 = vst.msk [vmem:[#allocation3 + $0xf0] sm:$0xff] %vm1836_vm11, %v1801_v46  ;;  %v429_v46 = vld [vmem:[%s6653_s1 + $0x50] sm:$0xff] }
 0x320   : > { %v2379_v36 = vpop.permute.xlu0 %2378 }
 0x321   : > { %2446 = vst.msk [vmem:[#allocation3 + $0xe8] sm:$0xff] %vm2416_vm15, %v2379_v36  ;;  %v2570_v31 = vpop.permute.xlu1 %2569  ;;  %v432_v36 = vld [vmem:[%s6653_s1 + $0x68] sm:$0xff] }
 0x322   : > { %2638 = vst.msk [vmem:[#allocation3 + $0xe0] sm:$0xff] %vm6667_vm2, %v2570_v31  ;;  %v431_v31 = vld [vmem:[%s6653_s1 + $0x60] sm:$0xff] }
 0x324   : > { %v1803_v47 = vpop.permute.xlu0 %1802 }
 0x325   : > { %1868 = vst.msk [vmem:[#allocation3 + $0xf8] sm:$0xff] %vm1836_vm11, %v1803_v47  ;;  %v4318_v52 = vpop.f32.mrb[14].mxu1  ;;  %v1994_v51 = vpop.permute.xlu1 %1993 }
 0x326   : > { %v6193_v11 = vadd.f32 %v4318_v52, %v5889_v0  ;;  %2060 = vst.msk [vmem:[#allocation3 + $0xf0] sm:$0xff] %vm2029_vm12, %v1994_v51  ;;  %v2923_v19 = vpop.f32.mrb[15].mxu1 }
 0x327   : > { %v6197_v5 = vadd.f32 %v5889_v0, %v2923_v19 }
 0x328   : > { %v2572_v59 = vpop.permute.xlu0 %2571 }
 0x329   : > { %v4465_v25 = vpack.c.bf16 %v6193_v11, %v6197_v5  ;;  %2639 = vst.msk [vmem:[#allocation3 + $0xe8] sm:$0xff] %vm6667_vm2, %v2572_v59  ;;  %v1996_v32 = vpop.permute.xlu1 %1995  ;;  %v2670_v42 = vld [vmem:[#allocation3 + $0xe0] sm:$0xff] }
 0x32a   : > { %2061 = vst.msk [vmem:[#allocation3 + $0xf8] sm:$0xff] %vm2029_vm12, %v1996_v32  ;;  %4337 = vmatprep.mubr.msk.f32.mxu1 %vm6666_vm5, %v2670_v42 }
 0x32c   : > { %v2188_v20 = vpop.permute.xlu0 %2187 }
 0x32d   : > { %2254 = vst.msk [vmem:[#allocation3 + $0xf0] sm:$0xff] %vm2223_vm13, %v2188_v20  ;;  %v2190_v61 = vpop.permute.xlu1 %2189 }
 0x32e   : > { %2255 = vst.msk [vmem:[#allocation3 + $0xf8] sm:$0xff] %vm2223_vm13, %v2190_v61 }
 0x330   : > { %v2381_v50 = vpop.permute.xlu0 %2380  ;;  %v2671_v43 = vld [vmem:[#allocation3 + $0xe8] sm:$0xff] }
 0x331   : > { %2447 = vst.msk [vmem:[#allocation3 + $0xf0] sm:$0xff] %vm2416_vm15, %v2381_v50  ;;  %v2383_v60 = vpop.permute.xlu1 %2382  ;;  %4338 = vmatmul.mubr.msk.f32.gmra.mrb[28].mxu1 %vm6666_vm5, %v2671_v43 }
 0x332   : > { %2448 = vst.msk [vmem:[#allocation3 + $0xf8] sm:$0xff] %vm2416_vm15, %v2383_v60 }
 0x334   : > { %v2574_v21 = vpop.permute.xlu0 %2573 }
 0x335   : > { %2640 = vst.msk [vmem:[#allocation3 + $0xf0] sm:$0xff] %vm6667_vm2, %v2574_v21  ;;  %v2576_v62 = vpop.permute.xlu1 %2575 }
 0x336   : > { %2641 = vst.msk [vmem:[#allocation3 + $0xf8] sm:$0xff] %vm6667_vm2, %v2576_v62 }
 0x33c   : > { %v2672_v22 = vld [vmem:[#allocation3 + $0xf0] sm:$0xff] }
 0x33d   : > { %4340 = vmatprep.mubr.msk.f32.mxu1 %vm6666_vm5, %v2672_v22  ;;  %v2673_v12 = vld [vmem:[#allocation3 + $0xf8] sm:$0xff] }
 0x33e   : > { %4341 = vmatmul.mubr.msk.f32.gmra.mrb[30].mxu1 %vm6666_vm5, %v2673_v12 }
 0x345   : > { %v4321_v28 = vpop.f32.mrb[16].mxu1 }
 0x346   : > { %v2939_v30 = vadd.f32 %v4321_v28, %v5889_v0  ;;  %v2933_v14 = vpop.f32.mrb[17].mxu1 }
 0x347   : > { %v2934_v1 = vadd.f32 %v5889_v0, %v2933_v14 }
 0x349   : > { %v4435_v54 = vpack.c.bf16 %v2939_v30, %v2934_v1 }
 0x34b   : > { %4436 = vmatprep.subr.bf16.mxu0 %v4435_v54 }
 0x34c   : > { %4438 = vmatpush3.bf16.msra.mxu0 %v4437_v8  ;;  %v6244_v8 = vld [vmem:[%s6653_s1 + $0x20] sm:$0xff] }
 0x34d   : > { %510 = vmatmul.mubr.f32.gmra.mrb[4].mxu0 %v6244_v8 }
 0x34e   : > { %514 = vmatprep.mubr.f32.mxu0 %v6250_v35 }
 0x351   : > { %515 = vmatmul.mubr.f32.gmra.mrb[6].mxu0 %v6257_v48 }
 0x352   : > { %519 = vmatprep.mubr.f32.mxu0 %v6264_v55 }
 0x355   : > { %520 = vmatmul.mubr.f32.gmra.mrb[8].mxu0 %v6270_v38 }
 0x356   : > { %524 = vmatprep.mubr.f32.mxu0 %v430_v41 }
 0x359   : > { %525 = vmatmul.mubr.f32.gmra.mrb[10].mxu0 %v429_v46 }
 0x35a   : > { %529 = vmatprep.mubr.f32.mxu0 %v432_v36 }
 0x35d   : > { %530 = vmatmul.mubr.f32.gmra.mrb[12].mxu0 %v431_v31 }
 0x35e   : > { %534 = vmatprep.mubr.f32.mxu0 %v434_v24 }
 0x361   : > { %535 = vmatmul.mubr.f32.gmra.mrb[14].mxu0 %v433_v18 }
 0x362   : > { %3076 = vmatprep.mubr.f32.mxu0 %v6115_v34 }
 0x365   : > { %v4324_v23 = vpop.f32.mrb[18].mxu1 }
 0x366   : > { %v2949_v29 = vadd.f32 %v4324_v23, %v5889_v0  ;;  %v2943_v15 = vpop.f32.mrb[19].mxu1 }
 0x367   : > { %v2944_v53 = vadd.f32 %v5889_v0, %v2943_v15 }
 0x369   : > { %v4439_v10 = vpack.c.bf16 %v2949_v29, %v2944_v53 }
 0x36b   : > { %4440 = vmatprep.subr.bf16.mxu0 %v4439_v10 }
 0x36c   : > { %4442 = vmatpush3.bf16.msra.mxu0 %v4441_v17 }
 0x385   : > { %v4327_v7 = vpop.f32.mrb[20].mxu1 }
 0x386   : > { %v2959_v17 = vadd.f32 %v4327_v7, %v5889_v0  ;;  %v2953_v57 = vpop.f32.mrb[21].mxu1 }
 0x387   : > { %v2954_v37 = vadd.f32 %v5889_v0, %v2953_v57  ;;  %v3588_v57 = vld [vmem:[#allocation4 + $0x91] sm:$0xff] }
 0x389   : > { %v4443_v3 = vpack.c.bf16 %v2959_v17, %v2954_v37  ;;  %v3292_v17 = vld [vmem:[#allocation4 + $0x1] sm:$0xff]  ;;  %v3636_v37 = vld [vmem:[#allocation4 + $0x92] sm:$0xff] }
 0x38a   : > { %3308 = vrot.lane.b32.xlu0 %v3292_v17, %s4575_s24 }
 0x38b   : > { %4444 = vmatprep.subr.bf16.mxu0 %v4443_v3 }
 0x38c   : > { %4446 = vmatpush3.bf16.msra.mxu0 %v4445_v26 }
 0x38e   : > { %v4130_v59 = vpop.f32.mrb[0].mxu0 }
 0x38f   : > { %v4131_v32 = vpop.f32.mrb[1].mxu0 }
 0x390   : > { %v6300_v42 = vadd.f32 %v4131_v32, %v4130_v59 }
 0x3a5   : > { %v4330_v26 = vpop.f32.mrb[22].mxu1 }
 0x3a6   : > { %v2969_v47 = vadd.f32 %v4330_v26, %v5889_v0  ;;  %v2963_v52 = vpop.f32.mrb[23].mxu1 }
 0x3a7   : > { %v2964_v51 = vadd.f32 %v5889_v0, %v2963_v52 }
 0x3a9   : > { %v4447_v19 = vpack.c.bf16 %v2969_v47, %v2964_v51 }
 0x3ab   : > { %4448 = vmatprep.subr.bf16.mxu0 %v4447_v19 }
 0x3ac   : > { %4450 = vmatpush3.bf16.msra.mxu0 %v4449_v4 }
 0x3c5   : > { %v4333_v20 = vpop.f32.mrb[24].mxu1 }
 0x3c6   : > { %v2979_v61 = vadd.f32 %v4333_v20, %v5889_v0  ;;  %v2973_v34 = vpop.f32.mrb[25].mxu1 }
 0x3c7   : > { %v2974_v50 = vadd.f32 %v5889_v0, %v2973_v34 }
 0x3c9   : > { %v4451_v43 = vpack.c.bf16 %v2979_v61, %v2974_v50 }
 0x3cb   : > { %4452 = vmatprep.subr.bf16.mxu0 %v4451_v43 }
 0x3cc   : > { %4454 = vmatpush3.bf16.msra.mxu0 %v4453_v9 }
 0x3e5   : > { %v4336_v60 = vpop.f32.mrb[26].mxu1 }
 0x3e6   : > { %v2989_v16 = vadd.f32 %v4564_v39, %v4336_v60  ;;  %v2983_v4 = vpop.f32.mrb[27].mxu1 }
 0x3e7   : > { %v2984_v21 = vadd.f32 %v4564_v39, %v2983_v4 }
 0x3e9   : > { %v4455_v62 = vpack.c.bf16 %v2989_v16, %v2984_v21 }
 0x3eb   : > { %4456 = vmatprep.subr.bf16.mxu0 %v4455_v62 }
 0x3ec   : > { %4458 = vmatpush3.bf16.msra.mxu0 %v4457_v56 }
 0x404   : > { %v4339_v0 = vpop.f32.mrb[28].mxu1 }
 0x405   : > { %v2999_v22 = vadd.f32 %v4564_v39, %v4339_v0  ;;  %v2993_v12 = vpop.f32.mrb[29].mxu1 }
 0x406   : > { %v2994_v28 = vadd.f32 %v4564_v39, %v2993_v12 }
 0x408   : > { %v4459_v45 = vpack.c.bf16 %v2999_v22, %v2994_v28 }
 0x40a   : > { %4460 = vmatprep.subr.bf16.mxu0 %v4459_v45 }
 0x40b   : > { %4462 = vmatpush3.bf16.msra.mxu0 %v4461_v44 }
 0x411   : > { %v4342_v63 = vpop.f32.mrb[30].mxu1 }
 0x412   : > { %v3009_v9 = vadd.f32 %v4564_v39, %v4342_v63  ;;  %v3003_v30 = vpop.f32.mrb[31].mxu1 }
 0x413   : > { %v3004_v14 = vadd.f32 %v4564_v39, %v3003_v30 }
 0x415   : > { %v4463_v1 = vpack.c.bf16 %v3009_v9, %v3004_v14 }
 0x417   : > { %4464 = vmatprep.subr.bf16.mxu0 %v4463_v1 }
 0x418   : > { %4466 = vmatpush3.bf16.msra.mxu0 %v4465_v25 }
 0x41b   : > { %3077 = vmatmul.mubr.f32.vlgmr.msra.gmra.mrb[16].mxu0 %v6123_v33  ;;  %v4133_v33 = vpop.f32.mrb[2].mxu0 }
 0x41c   : > { %3081 = vmatprep.mubr.f32.mxu0 %v6226_v27  ;;  %v4134_v40 = vpop.f32.mrb[3].mxu0 }
 0x41d   : > { %v6328_v49 = vadd.f32 %v4134_v40, %v4133_v33 }
 0x41f   : > { %3082 = vmatmul.mubr.f32.gmra.mrb[18].mxu0 %v6231_v2 }
 0x420   : > { %3086 = vmatprep.mubr.f32.mxu0 %v6236_v13  ;;  %v4136_v56 = vpop.f32.mrb[4].mxu0 }
 0x421   : > { %v4137_v6 = vpop.f32.mrb[5].mxu0 }
 0x422   : > { %v6330_v58 = vadd.f32 %v4137_v6, %v4136_v56 }
 0x423   : > { %3087 = vmatmul.mubr.f32.gmra.mrb[20].mxu0 %v6244_v8 }
 0x424   : > { %3091 = vmatprep.mubr.f32.mxu0 %v6250_v35  ;;  %v4139_v44 = vpop.f32.mrb[6].mxu0  ;;  %v3540_v35 = vld [vmem:[#allocation4 + $0x90] sm:$0xff] }
 0x425   : > { %v4140_v11 = vpop.f32.mrb[7].mxu0  ;;  %3563 = vrot.lane.b32.xlu1 %v3540_v35, %s4579_s19 }
 0x426   : > { %v6332_v5 = vadd.f32 %v4140_v11, %v4139_v44 }
 0x427   : > { %3092 = vmatmul.mubr.f32.gmra.mrb[22].mxu0 %v6257_v48  ;;  %v3340_v48 = vld [vmem:[#allocation4 + $0x2] sm:$0xff] }
 0x428   : > { %3096 = vmatprep.mubr.f32.mxu0 %v6264_v55  ;;  %v4142_v25 = vpop.f32.mrb[8].mxu0  ;;  %3356 = vrot.lane.b32.xlu0 %v3340_v48, %s4574_s23 }
 0x429   : > { %v4143_v54 = vpop.f32.mrb[9].mxu0  ;;  %3611 = vrot.lane.b32.xlu1 %v3588_v57, %s4580_s15 }
 0x42a   : > { %v6334_v23 = vadd.f32 %v4143_v54, %v4142_v25 }
 0x42b   : > { %3097 = vmatmul.mubr.f32.gmra.mrb[24].mxu0 %v6270_v38 }
 0x42c   : > { %3101 = vmatprep.mubr.f32.mxu0 %v430_v41  ;;  %v4145_v29 = vpop.f32.mrb[10].mxu0 }
 0x42d   : > { %v4146_v15 = vpop.f32.mrb[11].mxu0  ;;  %3659 = vrot.lane.b32.xlu1 %v3636_v37, %s4581_s26 }
 0x42e   : > { %v6336_v53 = vadd.f32 %v4146_v15, %v4145_v29 }
 0x42f   : > { %3102 = vmatmul.mubr.f32.gmra.mrb[26].mxu0 %v429_v46 }
 0x430   : > { %3106 = vmatprep.mubr.f32.mxu0 %v432_v36  ;;  %v4148_v10 = vpop.f32.mrb[12].mxu0 }
 0x431   : > { %v4149_v27 = vpop.f32.mrb[13].mxu0 }
 0x432   : > { %v6338_v2 = vadd.f32 %v4149_v27, %v4148_v10 }
 0x433   : > { %3107 = vmatmul.mubr.f32.gmra.mrb[28].mxu0 %v431_v31 }
 0x434   : > { %3111 = vmatprep.mubr.f32.mxu0 %v434_v24  ;;  %v4151_v13 = vpop.f32.mrb[14].mxu0 }
 0x435   : > { %v4152_v8 = vpop.f32.mrb[15].mxu0 }
 0x436   : > { %v6340_v7 = vadd.f32 %v4152_v8, %v4151_v13 }
 0x437   : > { %3112 = vmatmul.mubr.f32.gmra.mrb[30].mxu0 %v433_v18 }
 0x4ee   : > { %v4227_v55 = vpop.f32.mrb[16].mxu0 }
 0x4ef   : > { %v4228_v3 = vpop.f32.mrb[17].mxu0 }
 0x4f0   : > { %v4229_v38 = vadd.f32 %v4228_v3, %v4227_v55 }
 0x4f2   : > { %v4230_v41 = vpop.f32.mrb[18].mxu0  ;;  %v3119_v31 = vsel %vm543_vm0, %v4229_v38, 0.0 }
 0x4f3   : > { %v4231_v46 = vpop.f32.mrb[19].mxu0 }
 0x4f4   : > { %v4232_v36 = vadd.f32 %v4231_v46, %v4230_v41 }
 0x4f6   : > { %v3120_v24 = vsel %vm543_vm0, %v4232_v36, 0.0  ;;  %v4233_v18 = vpop.f32.mrb[20].mxu0 }
 0x4f7   : > { %v3121_v26 = vadd.f32 %v3120_v24, %v3119_v31  ;;  %v4234_v47 = vpop.f32.mrb[21].mxu0 }
 0x4f8   : > { %v4235_v52 = vadd.f32 %v4234_v47, %v4233_v18 }
 0x4fa   : > { %v3122_v51 = vsel %vm543_vm0, %v4235_v52, 0.0  ;;  %v4236_v19 = vpop.f32.mrb[22].mxu0 }
 0x4fb   : > { %v3123_v59 = vadd.f32 %v3122_v51, %v3121_v26  ;;  %v4237_v32 = vpop.f32.mrb[23].mxu0 }
 0x4fc   : > { %v4238_v20 = vadd.f32 %v4237_v32, %v4236_v19 }
 0x4fe   : > { %v3124_v61 = vsel %vm543_vm0, %v4238_v20, 0.0  ;;  %v4239_v34 = vpop.f32.mrb[24].mxu0 }
 0x4ff   : > { %v3125_v50 = vadd.f32 %v3124_v61, %v3123_v59  ;;  %v4240_v43 = vpop.f32.mrb[25].mxu0 }
 0x500   : > { %v4241_v60 = vadd.f32 %v4240_v43, %v4239_v34 }
 0x502   : > { %v3126_v39 = vsel %vm543_vm0, %v4241_v60, 0.0  ;;  %v4242_v16 = vpop.f32.mrb[26].mxu0 }
 0x503   : > { %v3127_v4 = vadd.f32 %v3126_v39, %v3125_v50  ;;  %v4243_v21 = vpop.f32.mrb[27].mxu0 }
 0x504   : > { %v4244_v62 = vadd.f32 %v4243_v21, %v4242_v16 }
 0x506   : > { %v3128_v0 = vsel %vm543_vm0, %v4244_v62, 0.0  ;;  %v4245_v22 = vpop.f32.mrb[28].mxu0 }
 0x507   : > { %v3129_v12 = vadd.f32 %v3128_v0, %v3127_v4  ;;  %v4246_v28 = vpop.f32.mrb[29].mxu0 }
 0x508   : > { %v4247_v45 = vadd.f32 %v4246_v28, %v4245_v22 }
 0x50a   : > { %v3130_v63 = vsel %vm543_vm0, %v4247_v45, 0.0  ;;  %v4248_v9 = vpop.f32.mrb[30].mxu0 }
 0x50b   : > { %v3131_v30 = vadd.f32 %v3130_v63, %v3129_v12  ;;  %v4249_v14 = vpop.f32.mrb[31].mxu0  ;;  %v3276_v12 = vld [vmem:[#allocation4] sm:$0xff]  ;;  %v3309_v63 = vpop.permute.xlu0 %3308 }
 0x50c   : > { %v4250_v1 = vadd.f32 %v4249_v14, %v4248_v9  ;;  %3284 = vst.msk [vmem:[#allocation5] sm:$0xff] %vm543_vm0, %v3276_v12 }
 0x50d   : > { %3332 = vst.msk [vmem:[#allocation5] sm:$0xff] %vm1257_vm3, %v3309_v63 }
 0x50e   : > { %v3132_v33 = vsel %vm543_vm0, %v4250_v1, 0.0 }
 0x50f   : > { %v3133_v40 = vadd.f32 %v3132_v33, %v3131_v30  ;;  %v4076_v33 = vld [vmem:[%s6661_s9] ss:$0 sm:$0xff] }
 0x511   : > { %v3134_v56 = vrot.slane %v3133_v40, 4 }
 0x513   : > { %v3135_v6 = vadd.f32 %v3134_v56, %v3133_v40 }
 0x515   : > { %v3136_v44 = vrot.slane %v3135_v6, 2 }
 0x517   : > { %v3137_v11 = vadd.f32 %v3136_v44, %v3135_v6 }
 0x519   : > { %v3138_v25 = vrot.slane %v3137_v11, 1 }
 0x51b   : > { %v3139_v54 = vadd.f32 %v3138_v25, %v3137_v11 }
 0x51d   : > { %v3141_v29 = vmul.f32 0.015625, %v3139_v54 }
 0x51f   : > { %v3142_v15 = vsub.f32 %v4229_v38, %v3141_v29  ;;  %v3143_v10 = vsub.f32 %v4232_v36, %v3141_v29  ;;  %v3144_v27 = vsub.f32 %v4235_v52, %v3141_v29  ;;  %v3145_v13 = vsub.f32 %v4238_v20, %v3141_v29 }
 0x520   : > { %v3146_v8 = vsub.f32 %v4241_v60, %v3141_v29  ;;  %v3147_v35 = vsub.f32 %v4244_v62, %v3141_v29  ;;  %v3148_v17 = vsub.f32 %v4247_v45, %v3141_v29  ;;  %v3149_v57 = vsub.f32 %v4250_v1, %v3141_v29  ;;  %v4075_v45 = vld [vmem:[%s6660_s8] ss:$0 sm:$0xff] }
 0x521   : > { %v3150_v48 = vmul.f32 %v3142_v15, %v3142_v15  ;;  %v3151_v37 = vmul.f32 %v3143_v10, %v3143_v10  ;;  %v3152_v55 = vmul.f32 %v3144_v27, %v3144_v27  ;;  %v3153_v3 = vmul.f32 %v3145_v13, %v3145_v13 }
 0x522   : > { %v3154_v24 = vmul.f32 %v3146_v8, %v3146_v8  ;;  %v3155_v36 = vmul.f32 %v3147_v35, %v3147_v35  ;;  %v3156_v52 = vmul.f32 %v3148_v17, %v3148_v17  ;;  %v3157_v59 = vmul.f32 %v3149_v57, %v3149_v57 }
 0x523   : > { %v3158_v41 = vsel %vm543_vm0, %v3150_v48, 0.0  ;;  %v3159_v46 = vsel %vm543_vm0, %v3151_v37, 0.0  ;;  %v3161_v18 = vsel %vm543_vm0, %v3152_v55, 0.0  ;;  %v3163_v26 = vsel %vm543_vm0, %v3153_v3, 0.0 }
 0x524   : > { %v3160_v31 = vadd.f32 %v3159_v46, %v3158_v41  ;;  %v3165_v51 = vsel %vm543_vm0, %v3154_v24, 0.0  ;;  %v3167_v32 = vsel %vm543_vm0, %v3155_v36, 0.0  ;;  %v3169_v61 = vsel %vm543_vm0, %v3156_v52, 0.0 }
 0x525   : > { %v3171_v50 = vsel %vm543_vm0, %v3157_v59, 0.0 }
 0x526   : > { %v3162_v38 = vadd.f32 %v3161_v18, %v3160_v31 }
 0x528   : > { %v3164_v47 = vadd.f32 %v3163_v26, %v3162_v38 }
 0x52a   : > { %v3166_v19 = vadd.f32 %v3165_v51, %v3164_v47 }
 0x52c   : > { %v3168_v20 = vadd.f32 %v3167_v32, %v3166_v19 }
 0x52e   : > { %v3170_v34 = vadd.f32 %v3169_v61, %v3168_v20 }
 0x530   : > { %v3172_v43 = vadd.f32 %v3171_v50, %v3170_v34 }
 0x532   : > { %v3173_v60 = vrot.slane %v3172_v43, 4 }
 0x534   : > { %v3174_v39 = vadd.f32 %v3173_v60, %v3172_v43 }
 0x536   : > { %v3175_v16 = vrot.slane %v3174_v39, 2 }
 0x538   : > { %v3176_v4 = vadd.f32 %v3175_v16, %v3174_v39 }
 0x53a   : > { %v3177_v21 = vrot.slane %v3176_v4, 1 }
 0x53c   : > { %v3178_v62 = vadd.f32 %v3177_v21, %v3176_v4 }
 0x53e   : > { %v3179_v0 = vmul.f32 0.015625, %v3178_v62 }
 0x540   : > { %v3180_v22 = vadd.f32 1e-05, %v3179_v0 }
 0x542   : > { %4528 = vrsqrt.f32 %v3180_v22 }
 0x54c   : > { %v4529_v28 = vpop.eup %4528 }
 0x54d   : > { %v3182_v9 = vmul.f32 %v4529_v28, %v3142_v15  ;;  %v3183_v30 = vmul.f32 %v4529_v28, %v3143_v10  ;;  %v3184_v14 = vmul.f32 %v4529_v28, %v3144_v27  ;;  %v3185_v1 = vmul.f32 %v4529_v28, %v3145_v13  ;;  %v3357_v27 = vpop.permute.xlu0 %3356 }
 0x54e   : > { %v3186_v40 = vmul.f32 %v4529_v28, %v3146_v8  ;;  %v3187_v56 = vmul.f32 %v4529_v28, %v3147_v35  ;;  %v3188_v6 = vmul.f32 %v4529_v28, %v3148_v17  ;;  %v3189_v44 = vmul.f32 %v4529_v28, %v3149_v57  ;;  %3380 = vst.msk [vmem:[#allocation5] sm:$0xff] %vm1450_vm4, %v3357_v27 }
 0x54f   : > { %v3196_v11 = vmul.f32 %v4075_v45, %v3182_v9  ;;  %v3197_v25 = vmul.f32 %v4075_v45, %v3183_v30  ;;  %v3198_v54 = vmul.f32 %v4075_v45, %v3184_v14  ;;  %v3199_v29 = vmul.f32 %v4075_v45, %v3185_v1  ;;  %v3685_v9 = vld [vmem:[%s6658_s6] sm:$0xff]  ;;  %v3686_v30 = vld [vmem:[%s6658_s6 + $0x8] sm:$0xff] }
 0x550   : > { %v3200_v48 = vmul.f32 %v4075_v45, %v3186_v40  ;;  %v3201_v37 = vmul.f32 %v4075_v45, %v3187_v56  ;;  %v3202_v15 = vmul.f32 %v4075_v45, %v3188_v6  ;;  %v3203_v10 = vmul.f32 %v4075_v45, %v3189_v44  ;;  %v3688_v40 = vld [vmem:[%s6658_s6 + $0x18] sm:$0xff]  ;;  %v3689_v6 = vld [vmem:[%s6658_s6 + $0x20] sm:$0xff]  ;;  %v3690_v44 = vld [vmem:[%s6658_s6 + $0x28] sm:$0xff] }
 0x551   : > { %v3210_v13 = vadd.f32 %v4076_v33, %v3196_v11  ;;  %v3211_v55 = vadd.f32 %v4076_v33, %v3197_v25  ;;  %v3212_v3 = vadd.f32 %v4076_v33, %v3198_v54  ;;  %v3213_v41 = vadd.f32 %v4076_v33, %v3199_v29  ;;  %v3691_v54 = vld [vmem:[%s6658_s6 + $0x30] sm:$0xff]  ;;  %v3692_v29 = vld [vmem:[%s6658_s6 + $0x38] sm:$0xff] }
 0x552   : > { %v3214_v46 = vadd.f32 %v4076_v33, %v3200_v48  ;;  %v3215_v8 = vadd.f32 %v4076_v33, %v3201_v37  ;;  %v3216_v35 = vadd.f32 %v4076_v33, %v3202_v15  ;;  %v3217_v17 = vadd.f32 %v4076_v33, %v3203_v10  ;;  %v3687_v33 = vld [vmem:[%s6658_s6 + $0x10] sm:$0xff]  ;;  %v3693_v37 = vld [vmem:[%s6658_s6 + $0x40] sm:$0xff] }
 0x553   : > { %vm3218_vm6 = vcmp.gt.f32.partialorder %v3210_v13, 0.0  ;;  %vm3219_vm7 = vcmp.gt.f32.partialorder %v3211_v55, 0.0  ;;  %vm3220_vm8 = vcmp.gt.f32.partialorder %v3212_v3, 0.0  ;;  %vm3221_vm9 = vcmp.gt.f32.partialorder %v3213_v41, 0.0 }
 0x554   : > { %vm3222_vm14 = vcmp.gt.f32.partialorder %v3214_v46, 0.0  ;;  %vm3223_vm1 = vcmp.gt.f32.partialorder %v3215_v8, 0.0  ;;  %vm3224_vm5 = vcmp.gt.f32.partialorder %v3216_v35, 0.0  ;;  %vm3225_vm2 = vcmp.gt.f32.partialorder %v3217_v17, 0.0 }
 0x555   : > { %v3226_v57 = vmul.f32 0.2, %v3210_v13  ;;  %v3227_v31 = vmul.f32 0.2, %v3211_v55  ;;  %v3228_v24 = vmul.f32 0.2, %v3212_v3  ;;  %v4467_v14 = vpack.c.bf16 %v3686_v30, %v3685_v9 }
 0x556   : > { %v3229_v18 = vmul.f32 0.2, %v3213_v41  ;;  %v3230_v38 = vmul.f32 0.2, %v3214_v46  ;;  %v3231_v36 = vmul.f32 0.2, %v3215_v8  ;;  %v4471_v56 = vpack.c.bf16 %v3688_v40, %v3687_v33 }
 0x557   : > { %v3232_v26 = vmul.f32 0.2, %v3216_v35  ;;  %v3233_v47 = vmul.f32 0.2, %v3217_v17  ;;  %v3234_v52 = vsel %vm3218_vm6, %v3210_v13, %v3226_v57  ;;  %v3235_v51 = vsel %vm3219_vm7, %v3211_v55, %v3227_v31  ;;  %4483 = vmatprep.subr.bf16.mxu1 %v4467_v14  ;;  %4468 = vmatprep.subr.bf16.mxu0 %v4467_v14  ;;  %v6485_v55 = vld [vmem:[%s6662_s10] sm:$0xff] }
 0x558   : > { %v3236_v19 = vsel %vm3220_vm8, %v3212_v3, %v3228_v24  ;;  %v3237_v59 = vsel %vm3221_vm9, %v3213_v41, %v3229_v18  ;;  %v3238_v32 = vsel %vm3222_vm14, %v3214_v46, %v3230_v38  ;;  %v3239_v20 = vsel %vm3223_vm1, %v3215_v8, %v3231_v36  ;;  %3268 = vst.msk [vmem:[#allocation4 + $0x11] sm:$0xff] %vm543_vm0, %v3234_v52 }
 0x559   : > { %3269 = vst.msk [vmem:[#allocation4 + $0x21] sm:$0xff] %vm543_vm0, %v3235_v51  ;;  %v3240_v61 = vsel %vm3224_vm5, %v3216_v35, %v3232_v26  ;;  %v3241_v34 = vsel %vm3225_vm2, %v3217_v17, %v3233_v47  ;;  %3270 = vst.msk [vmem:[#allocation4 + $0x31] sm:$0xff] %vm543_vm0, %v3236_v19  ;;  %4488 = vmatpush3.bf16.msra.mxu1 %v4467_v14  ;;  %4470 = vmatpush3.bf16.msra.mxu0 %v4467_v14  ;;  %v6514_v35 = vpop.permute.xlu1 %3563  ;;  %vm6669_vm2 = vcmask 589312   ;;  %vm6671_vm6 = vcmask 588800  }
 0x55a   : > { %3271 = vst.msk [vmem:[#allocation4 + $0x41] sm:$0xff] %vm543_vm0, %v3237_v59  ;;  %3272 = vst.msk [vmem:[#allocation4 + $0x51] sm:$0xff] %vm543_vm0, %v3238_v32  ;;  %4484 = vmatprep.subr.bf16.mxu1 %v4471_v56  ;;  %4472 = vmatprep.subr.bf16.mxu0 %v4471_v56  ;;  %v4475_v11 = vpack.c.bf16 %v3690_v44, %v3689_v6  ;;  %v4479_v48 = vpack.c.bf16 %v3692_v29, %v3691_v54 }
 0x55b   : > { %3273 = vst.msk [vmem:[#allocation4 + $0x61] sm:$0xff] %vm543_vm0, %v3239_v20  ;;  %3274 = vst.msk [vmem:[#allocation4 + $0x71] sm:$0xff] %vm543_vm0, %v3240_v61 }
 0x55c   : > { %3275 = vst.msk [vmem:[#allocation4 + $0x81] sm:$0xff] %vm543_vm0, %v3241_v34  ;;  %vm6670_vm5 = vmmov %vm6669_vm2 }
 0x55d   : > { %4489 = vmatpush3.bf16.msra.mxu1 %v4471_v56  ;;  %4474 = vmatpush3.bf16.msra.mxu0 %v4471_v56  ;;  %v6520_v17 = vpop.permute.xlu1 %3611  ;;  %vm6672_vm7 = vmmov %vm6669_vm2 }
 0x55e   : > { %4485 = vmatprep.subr.bf16.mxu1 %v4475_v11  ;;  %4476 = vmatprep.subr.bf16.mxu0 %v4475_v11  ;;  %vm6673_vm8 = vmmov %vm6671_vm6 }
 0x55f   : > { %v6409_v0 = vld [vmem:[#allocation4 + $0x10] sm:$0xff]  ;;  %vm6674_vm9 = vmmov %vm6669_vm2 }
 0x560   : > { %v6388_v50 = vld [vmem:[#allocation4 + $0x20] sm:$0xff]  ;;  %3285 = vst.msk [vmem:[#allocation5 + $0x8] sm:$0xff] %vm543_vm0, %v6409_v0  ;;  %v6418_v22 = vld [vmem:[#allocation4 + $0x30] sm:$0xff]  ;;  %vm6675_vm14 = vmmov %vm6671_vm6 }
 0x561   : > { %v6390_v43 = vld [vmem:[#allocation4 + $0x51] sm:$0xff]  ;;  %v6392_v60 = vld [vmem:[#allocation4 + $0x41] sm:$0xff]  ;;  %3286 = vst.msk [vmem:[#allocation5 + $0x10] sm:$0xff] %vm543_vm0, %v6388_v50  ;;  %3287 = vst.msk [vmem:[#allocation5 + $0x18] sm:$0xff] %vm543_vm0, %v6418_v22  ;;  %4490 = vmatpush3.bf16.msra.mxu1 %v4475_v11  ;;  %4478 = vmatpush3.bf16.msra.mxu0 %v4475_v11  ;;  %v3660_v57 = vpop.permute.xlu1 %3659 }
 0x562   : > { %3318 = vrot.lane.b32.xlu1 %v6390_v43, %s4575_s24  ;;  %3316 = vrot.lane.b32.xlu0 %v6392_v60, %s4575_s24  ;;  %v3393_v39 = vld [vmem:[#allocation4 + $0x60] sm:$0xff]  ;;  %v6400_v16 = vld [vmem:[#allocation4 + $0x50] sm:$0xff]  ;;  %vm6676_vm1 = vmmov %vm6671_vm6 }
 0x563   : > { %3289 = vst.msk [vmem:[#allocation5 + $0x28] sm:$0xff] %vm543_vm0, %v6400_v16  ;;  %3290 = vst.msk [vmem:[#allocation5 + $0x30] sm:$0xff] %vm543_vm0, %v3393_v39  ;;  %v3394_v4 = vld [vmem:[#allocation4 + $0x70] sm:$0xff]  ;;  %v6407_v62 = vld [vmem:[#allocation4 + $0x42] sm:$0xff]  ;;  %4486 = vmatprep.subr.bf16.mxu1 %v4479_v48  ;;  %4480 = vmatprep.subr.bf16.mxu0 %v4479_v48 }
 0x564   : > { %v6405_v21 = vld [vmem:[#allocation4 + $0x52] sm:$0xff]  ;;  %3291 = vst.msk [vmem:[#allocation5 + $0x38] sm:$0xff] %vm543_vm0, %v3394_v4  ;;  %v6420_v12 = vld [vmem:[#allocation4 + $0x40] sm:$0xff] }
 0x565   : > { %3288 = vst.msk [vmem:[#allocation5 + $0x20] sm:$0xff] %vm543_vm0, %v6420_v12  ;;  %v3298_v28 = vld [vmem:[#allocation4 + $0x61] sm:$0xff]  ;;  %v3299_v63 = vld [vmem:[#allocation4 + $0x71] sm:$0xff]  ;;  %4491 = vmatpush3.bf16.msra.mxu1 %v4479_v48  ;;  %4482 = vmatpush3.bf16.msra.mxu0 %v4479_v48 }
 0x566   : > { %3366 = vrot.lane.b32.xlu1 %v6405_v21, %s4574_s23  ;;  %3364 = vrot.lane.b32.xlu0 %v6407_v62, %s4574_s23  ;;  %v3346_v45 = vld [vmem:[#allocation4 + $0x62] sm:$0xff]  ;;  %v3347_v1 = vld [vmem:[#allocation4 + $0x72] sm:$0xff] }
 0x567   : > { %v3395_v25 = vld [vmem:[#allocation4 + $0x80] sm:$0xff]  ;;  %4487 = vmatprep.subr.mxu1 %v3693_v37  ;;  %4359 = vmatprep.subr.mxu0 %v3693_v37  ;;  %v3293_v27 = vld [vmem:[#allocation4 + $0x11] sm:$0xff] }
 0x568   : > { %v3443_v15 = vld [vmem:[#allocation4 + $0x81] sm:$0xff]  ;;  %v3341_v13 = vld [vmem:[#allocation4 + $0x12] sm:$0xff] }
 0x569   : > { %4492 = vmatpush3.msra.mxu1 %v3693_v37  ;;  %4360 = vmatpush3.msra.mxu0 %v3693_v37  ;;  %v3491_v10 = vld [vmem:[#allocation4 + $0x82] sm:$0xff]  ;;  %v3295_v46 = vld [vmem:[#allocation4 + $0x31] sm:$0xff] }
 0x56a   : > { %3414 = vrot.lane.b32.xlu1 %v3393_v39, %s4576_s29  ;;  %3412 = vrot.lane.b32.xlu0 %v6400_v16, %s4576_s29  ;;  %v3294_v3 = vld [vmem:[#allocation4 + $0x21] sm:$0xff]  ;;  %v3343_v8 = vld [vmem:[#allocation4 + $0x32] sm:$0xff] }
 0x56b   : > { %4373 = vmatprep.subr.mxu1 %v6485_v55  ;;  %v3342_v41 = vld [vmem:[#allocation4 + $0x22] sm:$0xff] }
 0x56e   : > { %3320 = vrot.lane.b32.xlu1 %v3298_v28, %s4575_s24  ;;  %3460 = vrot.lane.b32.xlu0 %v6390_v43, %s4577_s30 }
 0x572   : > { %3508 = vrot.lane.b32.xlu1 %v6405_v21, %s6668_s27  ;;  %3462 = vrot.lane.b32.xlu0 %v3298_v28, %s4577_s30 }
 0x576   : > { %3368 = vrot.lane.b32.xlu1 %v3346_v45, %s4574_s23  ;;  %3322 = vrot.lane.b32.xlu0 %v3299_v63, %s4575_s24 }
 0x57a   : > { %3557 = vrot.lane.b32.xlu1 %v3393_v39, %s4579_s19  ;;  %3510 = vrot.lane.b32.xlu0 %v3346_v45, %s6668_s27 }
 0x57e   : > { %3416 = vrot.lane.b32.xlu1 %v3394_v4, %s4576_s29  ;;  %3370 = vrot.lane.b32.xlu0 %v3347_v1, %s4574_s23 }
 0x582   : > { %3605 = vrot.lane.b32.xlu1 %v3298_v28, %s4580_s15  ;;  %3559 = vrot.lane.b32.xlu0 %v3394_v4, %s4579_s19 }
 0x586   : > { %3464 = vrot.lane.b32.xlu1 %v3299_v63, %s4577_s30  ;;  %3418 = vrot.lane.b32.xlu0 %v3395_v25, %s4576_s29 }
 0x58a   : > { %3653 = vrot.lane.b32.xlu1 %v3346_v45, %s4581_s26  ;;  %3607 = vrot.lane.b32.xlu0 %v3299_v63, %s4580_s15 }
 0x58e   : > { %3512 = vrot.lane.b32.xlu1 %v3347_v1, %s6668_s27  ;;  %3466 = vrot.lane.b32.xlu0 %v3443_v15, %s4577_s30 }
 0x592   : > { %3514 = vrot.lane.b32.xlu1 %v3491_v10, %s6668_s27  ;;  %3655 = vrot.lane.b32.xlu0 %v3347_v1, %s4581_s26 }
 0x596   : > { %3561 = vrot.lane.b32.xlu0 %v3395_v25, %s4579_s19  ;;  %3310 = vrot.lane.b32.xlu1 %v3293_v27, %s4575_s24 }
 0x59a   : > { %3609 = vrot.lane.b32.xlu0 %v3443_v15, %s4580_s15  ;;  %3358 = vrot.lane.b32.xlu1 %v3341_v13, %s4574_s23 }
 0x59e   : > { %3657 = vrot.lane.b32.xlu0 %v3491_v10, %s4581_s26  ;;  %3406 = vrot.lane.b32.xlu1 %v6388_v50, %s4576_s29 }
 0x5a2   : > { %3404 = vrot.lane.b32.xlu0 %v6409_v0, %s4576_s29  ;;  %3312 = vrot.lane.b32.xlu1 %v3294_v3, %s4575_s24 }
 0x5a6   : > { %3452 = vrot.lane.b32.xlu0 %v3293_v27, %s4577_s30  ;;  %3500 = vrot.lane.b32.xlu1 %v3341_v13, %s6668_s27 }
 0x5aa   : > { %3454 = vrot.lane.b32.xlu0 %v3294_v3, %s4577_s30  ;;  %3360 = vrot.lane.b32.xlu1 %v3342_v41, %s4574_s23 }
 0x5ae   : > { %3314 = vrot.lane.b32.xlu0 %v3295_v46, %s4575_s24  ;;  %3549 = vrot.lane.b32.xlu1 %v6388_v50, %s4579_s19 }
 0x5b2   : > { %3502 = vrot.lane.b32.xlu0 %v3342_v41, %s6668_s27  ;;  %3408 = vrot.lane.b32.xlu1 %v6418_v22, %s4576_s29 }
 0x5b6   : > { %3362 = vrot.lane.b32.xlu0 %v3343_v8, %s4574_s23  ;;  %3597 = vrot.lane.b32.xlu1 %v3294_v3, %s4580_s15 }
 0x5ba   : > { %3551 = vrot.lane.b32.xlu0 %v6418_v22, %s4579_s19  ;;  %3456 = vrot.lane.b32.xlu1 %v3295_v46, %s4577_s30 }
 0x5be   : > { %3410 = vrot.lane.b32.xlu0 %v6420_v12, %s4576_s29  ;;  %3645 = vrot.lane.b32.xlu1 %v3342_v41, %s4581_s26  ;;  %s4097_s29 = sshll.u32 %s6686_s18, 6 }
 0x5c2   : > { %3599 = vrot.lane.b32.xlu0 %v3295_v46, %s4580_s15  ;;  %3504 = vrot.lane.b32.xlu1 %v3343_v8, %s6668_s27 }
 0x5c6   : > { %3458 = vrot.lane.b32.xlu0 %v6392_v60, %s4577_s30  ;;  %3506 = vrot.lane.b32.xlu1 %v6407_v62, %s6668_s27 }
 0x5ca   : > { %3647 = vrot.lane.b32.xlu0 %v3343_v8, %s4581_s26  ;;  %3555 = vrot.lane.b32.xlu1 %v6400_v16, %s4579_s19 }
 0x5ce   : > { %3553 = vrot.lane.b32.xlu0 %v6420_v12, %s4579_s19  ;;  %3603 = vrot.lane.b32.xlu1 %v6390_v43, %s4580_s15 }
 0x5d2   : > { %3601 = vrot.lane.b32.xlu0 %v6392_v60, %s4580_s15  ;;  %3651 = vrot.lane.b32.xlu1 %v6405_v21, %s4581_s26  ;;  %s6631_s15 = scalar_lea.vmem %s6663_s11, %s4097_s29 }
 0x5d4   : > { %v3319_v31 = vpop.permute.xlu1 %3318  ;;  %v3317_v24 = vpop.permute.xlu0 %3316 }
 0x5d5   : > { %3337 = vst.msk [vmem:[#allocation5 + $0x28] sm:$0xff] %vm1257_vm3, %v3319_v31  ;;  %3336 = vst.msk [vmem:[#allocation5 + $0x20] sm:$0xff] %vm1257_vm3, %v3317_v24 }
 0x5d6   : > { %3649 = vrot.lane.b32.xlu0 %v6407_v62, %s4581_s26 }
 0x5d8   : > { %v3367_v18 = vpop.permute.xlu1 %3366  ;;  %v3365_v38 = vpop.permute.xlu0 %3364 }
 0x5d9   : > { %3385 = vst.msk [vmem:[#allocation5 + $0x28] sm:$0xff] %vm1450_vm4, %v3367_v18  ;;  %3384 = vst.msk [vmem:[#allocation5 + $0x20] sm:$0xff] %vm1450_vm4, %v3365_v38 }
 0x5dc   : > { %v3415_v36 = vpop.permute.xlu1 %3414  ;;  %v3413_v26 = vpop.permute.xlu0 %3412 }
 0x5dd   : > { %3433 = vst.msk [vmem:[#allocation5 + $0x28] sm:$0xff] %vm1643_vm10, %v3415_v36  ;;  %3432 = vst.msk [vmem:[#allocation5 + $0x20] sm:$0xff] %vm1643_vm10, %v3413_v26 }
 0x5e0   : > { %v3321_v47 = vpop.permute.xlu1 %3320  ;;  %v3461_v52 = vpop.permute.xlu0 %3460 }
 0x5e1   : > { %3338 = vst.msk [vmem:[#allocation5 + $0x30] sm:$0xff] %vm1257_vm3, %v3321_v47 }
 0x5e2   : > { %3480 = vst.msk [vmem:[#allocation5 + $0x20] sm:$0xff] %vm1836_vm11, %v3461_v52  ;;  %v4077_v52 = vld [vmem:[%s6659_s7] ss:$0 sm:$0xff] }
 0x5e4   : > { %v3509_v51 = vpop.permute.xlu1 %3508  ;;  %v3463_v19 = vpop.permute.xlu0 %3462 }
 0x5e5   : > { %3528 = vst.msk [vmem:[#allocation5 + $0x20] sm:$0xff] %vm2029_vm12, %v3509_v51 }
 0x5e6   : > { %3481 = vst.msk [vmem:[#allocation5 + $0x28] sm:$0xff] %vm1836_vm11, %v3463_v19 }
 0x5e8   : > { %v3369_v59 = vpop.permute.xlu1 %3368  ;;  %v3323_v32 = vpop.permute.xlu0 %3322 }
 0x5e9   : > { %3386 = vst.msk [vmem:[#allocation5 + $0x30] sm:$0xff] %vm1450_vm4, %v3369_v59 }
 0x5ea   : > { %3339 = vst.msk [vmem:[#allocation5 + $0x38] sm:$0xff] %vm1257_vm3, %v3323_v32 }
 0x5ec   : > { %v3558_v20 = vpop.permute.xlu1 %3557  ;;  %v3511_v61 = vpop.permute.xlu0 %3510 }
 0x5ed   : > { %3577 = vst.msk [vmem:[#allocation5 + $0x20] sm:$0xff] %vm2223_vm13, %v3558_v20 }
 0x5ee   : > { %3529 = vst.msk [vmem:[#allocation5 + $0x28] sm:$0xff] %vm2029_vm12, %v3511_v61 }
 0x5f0   : > { %v3417_v34 = vpop.permute.xlu1 %3416  ;;  %v3371_v50 = vpop.permute.xlu0 %3370 }
 0x5f1   : > { %3434 = vst.msk [vmem:[#allocation5 + $0x30] sm:$0xff] %vm1643_vm10, %v3417_v34 }
 0x5f2   : > { %3387 = vst.msk [vmem:[#allocation5 + $0x38] sm:$0xff] %vm1450_vm4, %v3371_v50 }
 0x5f4   : > { %v3606_v43 = vpop.permute.xlu1 %3605  ;;  %v3560_v60 = vpop.permute.xlu0 %3559 }
 0x5f5   : > { %3625 = vst.msk [vmem:[#allocation5 + $0x20] sm:$0xff] %vm2416_vm15, %v3606_v43 }
 0x5f6   : > { %3578 = vst.msk [vmem:[#allocation5 + $0x28] sm:$0xff] %vm2223_vm13, %v3560_v60 }
 0x5f8   : > { %v3465_v39 = vpop.permute.xlu1 %3464  ;;  %v3419_v16 = vpop.permute.xlu0 %3418 }
 0x5f9   : > { %3482 = vst.msk [vmem:[#allocation5 + $0x30] sm:$0xff] %vm1836_vm11, %v3465_v39 }
 0x5fa   : > { %3435 = vst.msk [vmem:[#allocation5 + $0x38] sm:$0xff] %vm1643_vm10, %v3419_v16 }
 0x5fc   : > { %v3654_v4 = vpop.permute.xlu1 %3653  ;;  %v3608_v21 = vpop.permute.xlu0 %3607 }
 0x5fd   : > { %3673 = vst.msk [vmem:[#allocation5 + $0x20] sm:$0xff] %vm6669_vm2, %v3654_v4 }
 0x5fe   : > { %3626 = vst.msk [vmem:[#allocation5 + $0x28] sm:$0xff] %vm2416_vm15, %v3608_v21 }
 0x600   : > { %v3513_v62 = vpop.permute.xlu1 %3512  ;;  %v3467_v0 = vpop.permute.xlu0 %3466 }
 0x601   : > { %3530 = vst.msk [vmem:[#allocation5 + $0x30] sm:$0xff] %vm2029_vm12, %v3513_v62 }
 0x602   : > { %3483 = vst.msk [vmem:[#allocation5 + $0x38] sm:$0xff] %vm1836_vm11, %v3467_v0 }
 0x604   : > { %v3515_v22 = vpop.permute.xlu1 %3514  ;;  %v3656_v12 = vpop.permute.xlu0 %3655  ;;  %v3681_v28 = vld [vmem:[#allocation5 + $0x20] sm:$0xff] }
 0x605   : > { %3531 = vst.msk [vmem:[#allocation5 + $0x38] sm:$0xff] %vm2029_vm12, %v3515_v22  ;;  %4367 = vmatprep.mubr.msk.f32.mxu1 %vm6671_vm6, %v3681_v28 }
 0x606   : > { %3674 = vst.msk [vmem:[#allocation5 + $0x28] sm:$0xff] %vm6670_vm5, %v3656_v12 }
 0x607   : > { %3580 = vst.msk [vmem:[#allocation5 + $0x38] sm:$0xff] %vm2223_vm13, %v6514_v35 }
 0x608   : > { %3628 = vst.msk [vmem:[#allocation5 + $0x38] sm:$0xff] %vm2416_vm15, %v6520_v17  ;;  %v3562_v45 = vpop.permute.xlu0 %3561  ;;  %v3311_v63 = vpop.permute.xlu1 %3310 }
 0x609   : > { %3676 = vst.msk [vmem:[#allocation5 + $0x38] sm:$0xff] %vm6672_vm7, %v3660_v57 }
 0x60a   : > { %3579 = vst.msk [vmem:[#allocation5 + $0x30] sm:$0xff] %vm2223_vm13, %v3562_v45 }
 0x60b   : > { %3333 = vst.msk [vmem:[#allocation5 + $0x8] sm:$0xff] %vm1257_vm3, %v3311_v63 }
 0x60c   : > { %v3610_v9 = vpop.permute.xlu0 %3609  ;;  %v3359_v30 = vpop.permute.xlu1 %3358 }
 0x60d   : > { %v3682_v14 = vld [vmem:[#allocation5 + $0x28] sm:$0xff]  ;;  %3627 = vst.msk [vmem:[#allocation5 + $0x30] sm:$0xff] %vm2416_vm15, %v3610_v9 }
 0x60e   : > { %3381 = vst.msk [vmem:[#allocation5 + $0x8] sm:$0xff] %vm1450_vm4, %v3359_v30  ;;  %4368 = vmatmul.mubr.msk.f32.vlgmr.msra.gmra.mrb[32].mxu1 %vm6673_vm8, %v3682_v14 }
 0x60f   : > { %4374 = vmatpush3.msra.mxu1 %v6485_v55 }
 0x610   : > { %v3658_v1 = vpop.permute.xlu0 %3657  ;;  %v3407_v33 = vpop.permute.xlu1 %3406  ;;  %v3684_v25 = vld [vmem:[#allocation5 + $0x38] sm:$0xff] }
 0x611   : > { %3675 = vst.msk [vmem:[#allocation5 + $0x30] sm:$0xff] %vm6674_vm9, %v3658_v1 }
 0x612   : > { %3429 = vst.msk [vmem:[#allocation5 + $0x8] sm:$0xff] %vm1643_vm10, %v3407_v33 }
 0x614   : > { %v3405_v40 = vpop.permute.xlu0 %3404  ;;  %v3313_v56 = vpop.permute.xlu1 %3312 }
 0x615   : > { %3428 = vst.msk [vmem:[#allocation5] sm:$0xff] %vm1643_vm10, %v3405_v40 }
 0x616   : > { %3334 = vst.msk [vmem:[#allocation5 + $0x10] sm:$0xff] %vm1257_vm3, %v3313_v56 }
 0x618   : > { %v3453_v6 = vpop.permute.xlu0 %3452  ;;  %v3501_v44 = vpop.permute.xlu1 %3500  ;;  %v3683_v11 = vld [vmem:[#allocation5 + $0x30] sm:$0xff] }
 0x619   : > { %3476 = vst.msk [vmem:[#allocation5] sm:$0xff] %vm1836_vm11, %v3453_v6  ;;  %4370 = vmatprep.mubr.msk.f32.mxu1 %vm6675_vm14, %v3683_v11 }
 0x61a   : > { %3524 = vst.msk [vmem:[#allocation5] sm:$0xff] %vm2029_vm12, %v3501_v44  ;;  %4371 = vmatmul.mubr.msk.f32.gmra.mrb[34].mxu1 %vm6676_vm1, %v3684_v25 }
 0x61b   : > { %4375 = vmatprep.mubr.msk.f32.mxu1 %vm543_vm0, %v6300_v42 }
 0x61c   : > { %v3455_v54 = vpop.permute.xlu0 %3454  ;;  %v3361_v29 = vpop.permute.xlu1 %3360 }
 0x61d   : > { %3477 = vst.msk [vmem:[#allocation5 + $0x8] sm:$0xff] %vm1836_vm11, %v3455_v54 }
 0x61e   : > { %3382 = vst.msk [vmem:[#allocation5 + $0x10] sm:$0xff] %vm1450_vm4, %v3361_v29  ;;  %4376 = vmatmul.mubr.msk.f32.vlgmr.msra.gmra.mrb[36].mxu1 %vm543_vm0, %v6328_v49 }
 0x61f   : > { %4378 = vmatprep.mubr.msk.f32.mxu1 %vm543_vm0, %v6330_v58 }
 0x620   : > { %v3315_v48 = vpop.permute.xlu0 %3314  ;;  %v3550_v37 = vpop.permute.xlu1 %3549 }
 0x621   : > { %3335 = vst.msk [vmem:[#allocation5 + $0x18] sm:$0xff] %vm1257_vm3, %v3315_v48  ;;  %vm6677_vm3 = vmmov %vm6669_vm2 }
 0x622   : > { %3573 = vst.msk [vmem:[#allocation5] sm:$0xff] %vm2223_vm13, %v3550_v37  ;;  %4379 = vmatmul.mubr.msk.f32.gmra.mrb[38].mxu1 %vm543_vm0, %v6332_v5 }
 0x623   : > { %4381 = vmatprep.mubr.msk.f32.mxu1 %vm543_vm0, %v6334_v23 }
 0x624   : > { %v3503_v42 = vpop.permute.xlu0 %3502  ;;  %v3409_v15 = vpop.permute.xlu1 %3408 }
 0x625   : > { %3525 = vst.msk [vmem:[#allocation5 + $0x8] sm:$0xff] %vm2029_vm12, %v3503_v42 }
 0x626   : > { %3430 = vst.msk [vmem:[#allocation5 + $0x10] sm:$0xff] %vm1643_vm10, %v3409_v15  ;;  %4382 = vmatmul.mubr.msk.f32.gmra.mrb[32].mxu1 %vm543_vm0, %v6336_v53 }
 0x627   : > { %4384 = vmatprep.mubr.msk.f32.mxu1 %vm543_vm0, %v6338_v2 }
 0x628   : > { %v3363_v49 = vpop.permute.xlu0 %3362  ;;  %v3598_v58 = vpop.permute.xlu1 %3597 }
 0x629   : > { %3383 = vst.msk [vmem:[#allocation5 + $0x18] sm:$0xff] %vm1450_vm4, %v3363_v49  ;;  %vm6679_vm4 = vmmov %vm6669_vm2 }
 0x62a   : > { %3621 = vst.msk [vmem:[#allocation5] sm:$0xff] %vm2416_vm15, %v3598_v58  ;;  %4385 = vmatmul.mubr.msk.f32.gmra.mrb[34].mxu1 %vm543_vm0, %v6340_v7  ;;  %vm6678_vm0 = vmmov %vm6676_vm1 }
 0x62c   : > { %v3552_v5 = vpop.permute.xlu0 %3551  ;;  %v3457_v23 = vpop.permute.xlu1 %3456 }
 0x62d   : > { %3574 = vst.msk [vmem:[#allocation5 + $0x8] sm:$0xff] %vm2223_vm13, %v3552_v5 }
 0x62e   : > { %3478 = vst.msk [vmem:[#allocation5 + $0x10] sm:$0xff] %vm1836_vm11, %v3457_v23 }
 0x630   : > { %v3411_v10 = vpop.permute.xlu0 %3410  ;;  %v3646_v53 = vpop.permute.xlu1 %3645 }
 0x631   : > { %3431 = vst.msk [vmem:[#allocation5 + $0x18] sm:$0xff] %vm1643_vm10, %v3411_v10  ;;  %vm6680_vm10 = vmmov %vm6669_vm2 }
 0x632   : > { %3669 = vst.msk [vmem:[#allocation5] sm:$0xff] %vm6677_vm3, %v3646_v53 }
 0x634   : > { %v3600_v2 = vpop.permute.xlu0 %3599  ;;  %v3505_v27 = vpop.permute.xlu1 %3504 }
 0x635   : > { %3622 = vst.msk [vmem:[#allocation5 + $0x8] sm:$0xff] %vm2416_vm15, %v3600_v2 }
 0x636   : > { %3526 = vst.msk [vmem:[#allocation5 + $0x10] sm:$0xff] %vm2029_vm12, %v3505_v27 }
 0x638   : > { %v3459_v13 = vpop.permute.xlu0 %3458  ;;  %v3507_v7 = vpop.permute.xlu1 %3506 }
 0x639   : > { %v3677_v55 = vld [vmem:[#allocation5] sm:$0xff]  ;;  %3479 = vst.msk [vmem:[#allocation5 + $0x18] sm:$0xff] %vm1836_vm11, %v3459_v13  ;;  %vm6681_vm11 = vmmov %vm6678_vm0 }
 0x63a   : > { %4361 = vmatprep.mubr.msk.f32.mxu0 %vm6678_vm0, %v3677_v55  ;;  %3527 = vst.msk [vmem:[#allocation5 + $0x18] sm:$0xff] %vm2029_vm12, %v3507_v7  ;;  %vm6682_vm12 = vmmov %vm6669_vm2 }
 0x63b   : > { %vm6683_vm2 = vmmov %vm6678_vm0 }
 0x63c   : > { %v3648_v3 = vpop.permute.xlu0 %3647  ;;  %v3556_v41 = vpop.permute.xlu1 %3555 }
 0x63d   : > { %3670 = vst.msk [vmem:[#allocation5 + $0x8] sm:$0xff] %vm6679_vm4, %v3648_v3 }
 0x63e   : > { %3576 = vst.msk [vmem:[#allocation5 + $0x18] sm:$0xff] %vm2223_vm13, %v3556_v41 }
 0x640   : > { %v3554_v46 = vpop.permute.xlu0 %3553  ;;  %v3604_v8 = vpop.permute.xlu1 %3603 }
 0x641   : > { %3575 = vst.msk [vmem:[#allocation5 + $0x10] sm:$0xff] %vm2223_vm13, %v3554_v46  ;;  %vm6684_vm13 = vmmov %vm6678_vm0 }
 0x642   : > { %3624 = vst.msk [vmem:[#allocation5 + $0x18] sm:$0xff] %vm2416_vm15, %v3604_v8 }
 0x644   : > { %v3602_v35 = vpop.permute.xlu0 %3601  ;;  %v3652_v17 = vpop.permute.xlu1 %3651  ;;  %v3678_v57 = vld [vmem:[#allocation5 + $0x8] sm:$0xff] }
 0x645   : > { %3623 = vst.msk [vmem:[#allocation5 + $0x10] sm:$0xff] %vm2416_vm15, %v3602_v35  ;;  %4362 = vmatmul.mubr.msk.f32.vlgmr.msra.gmra.mrb[32].mxu0 %vm6681_vm11, %v3678_v57  ;;  %vm3967_vm15 = vcmask 130048  }
 0x646   : > { %3672 = vst.msk [vmem:[#allocation5 + $0x18] sm:$0xff] %vm6680_vm10, %v3652_v17 }
 0x648   : > { %v3650_v31 = vpop.permute.xlu0 %3649 }
 0x649   : > { %3671 = vst.msk [vmem:[#allocation5 + $0x10] sm:$0xff] %vm6682_vm12, %v3650_v31 }
 0x64d   : > { %v3680_v18 = vld [vmem:[#allocation5 + $0x18] sm:$0xff] }
 0x650   : > { %v3679_v24 = vld [vmem:[#allocation5 + $0x10] sm:$0xff] }
 0x651   : > { %4364 = vmatprep.mubr.msk.f32.mxu0 %vm6683_vm2, %v3679_v24 }
 0x652   : > { %4365 = vmatmul.mubr.msk.f32.gmra.mrb[34].mxu0 %vm6684_vm13, %v3680_v18 }
 0x6f1   : > { %v4377_v38 = vpop.f32.mrb[36].mxu1 }
 0x6f2   : > { %v3920_v36 = vpop.f32.mrb[37].mxu1 }
 0x6f5   : > { %v4380_v26 = vpop.f32.mrb[38].mxu1 }
 0x6f6   : > { %v3930_v47 = vpop.f32.mrb[39].mxu1 }
 0x6f9   : > { %v4383_v51 = vpop.f32.mrb[32].mxu1 }
 0x6fa   : > { %v4501_v19 = vadd.f32 %v4383_v51, %v4077_v52  ;;  %v3940_v59 = vpop.f32.mrb[33].mxu1 }
 0x6fb   : > { %v4502_v32 = vadd.f32 %v4077_v52, %v3940_v59 }
 0x6fc   : > { %v3964_v20 = vmul.f32 0.70710677, %v4501_v19 }
 0x6fd   : > { %v3963_v61 = vmul.f32 0.70710677, %v4502_v32  ;;  %v4386_v34 = vpop.f32.mrb[34].mxu1 }
 0x6fe   : > { %3973 = vst.msk [vmem:[%s6631_s15 + $0x28] sm:$0xff] %vm3967_vm15, %v3964_v20  ;;  %v4503_v50 = vadd.f32 %v4386_v34, %v4077_v52  ;;  %v3950_v43 = vpop.f32.mrb[35].mxu1 }
 0x6ff   : > { %3972 = vst.msk [vmem:[%s6631_s15 + $0x20] sm:$0xff] %vm3967_vm15, %v3963_v61  ;;  %v4504_v60 = vadd.f32 %v4077_v52, %v3950_v43 }
 0x700   : > { %v3966_v39 = vmul.f32 0.70710677, %v4503_v50 }
 0x701   : > { %v3965_v16 = vmul.f32 0.70710677, %v4504_v60 }
 0x702   : > { %3975 = vst.msk [vmem:[%s6631_s15 + $0x38] sm:$0xff] %vm3967_vm15, %v3966_v39 }
 0x703   : > { %3974 = vst.msk [vmem:[%s6631_s15 + $0x30] sm:$0xff] %vm3967_vm15, %v3965_v16 }
 0x718   : > { %v4363_v4 = vpop.f32.mrb[32].mxu0 }
 0x719   : > { %v3797_v21 = vadd.f32 %v4363_v4, %v4077_v52  ;;  %v3791_v62 = vpop.f32.mrb[33].mxu0 }
 0x71a   : > { %v3792_v0 = vadd.f32 %v4077_v52, %v3791_v62 }
 0x71b   : > { %v3926_v22 = vadd.f32 %v4377_v38, %v3797_v21 }
 0x71c   : > { %v3921_v12 = vadd.f32 %v3920_v36, %v3792_v0 }
 0x71d   : > { %v3960_v28 = vmul.f32 0.70710677, %v3926_v22 }
 0x71e   : > { %v3959_v45 = vmul.f32 0.70710677, %v3921_v12 }
 0x71f   : > { %3969 = vst.msk [vmem:[%s6631_s15 + $0x8] sm:$0xff] %vm3967_vm15, %v3960_v28 }
 0x720   : > { %3968 = vst.msk [vmem:[%s6631_s15] sm:$0xff] %vm3967_vm15, %v3959_v45 }
 0x725   : > { %v4366_v63 = vpop.f32.mrb[34].mxu0 }
 0x726   : > { %v3807_v9 = vadd.f32 %v4366_v63, %v4077_v52  ;;  %v3801_v30 = vpop.f32.mrb[35].mxu0 }
 0x727   : > { %v3802_v14 = vadd.f32 %v4077_v52, %v3801_v30 }
 0x728   : > { %v3936_v1 = vadd.f32 %v4380_v26, %v3807_v9 }
 0x729   : > { %v3931_v33 = vadd.f32 %v3930_v47, %v3802_v14 }
 0x72a   : > { %v3962_v40 = vmul.f32 0.70710677, %v3936_v1 }
 0x72b   : > { %v3961_v56 = vmul.f32 0.70710677, %v3931_v33 }
 0x72c   : > { %3971 = vst.msk [vmem:[%s6631_s15 + $0x18] sm:$0xff] %vm3967_vm15, %v3962_v40 }
 0x72d   : > { %3970 = vst.msk [vmem:[%s6631_s15 + $0x10] sm:$0xff] %vm3967_vm15, %v3961_v56 }
 0x72e PF: > { %s21_s17 = sadd.s32 1, %s4571_s17  }
 0x72f   : > { %p18_p4 = scmp.ge.s32.totalorder %s21_s17, 4  }
 0x731   :  { %20 = sbr.rel (!%p18_p4) target bundleno = 1 (0x1), region = 100 }

</bundles_post_ra>
